<compile_context>
chip_gen: v6e
topology: v6e:2x2x1
jax: 0.10.0
libtpu: 0.0.40
codegen_flags: <defaults>
</compile_context>

<pallas_src>
import jax
import jax.numpy as jnp
from jax.experimental import pallas as pl
from jax.experimental.pallas import tpu as pltpu

# --- sizes from the PyTorch module -----------------------------------------
RES_OUT   = 1000          # res_out_size
RES_PAD   = 1024          # K-padded resnet feature width (128-lane aligned)
FC1       = 512           # fc1_out_size
FC2       = 512           # fc2_out_size
FC3       = 159           # fc3_out_size
FC3_PAD   = 256           # lane-aligned pad of fc3 output
DELTA     = 0.1
NUM_IEF   = 3
RING      = 5             # ring_size_same_sbj = ring_size - 1
TILE_M    = 16            # rows per grid step (bf16 sublane packing multiple)

N_LMK     = 68            # stand-in FLAME landmark count
LMK_DIM   = N_LMK * 3     # 204
LMK_PAD   = 256           # lane-aligned pad of landmark output

IMG_FEAT  = 3 * 16 * 16   # flattened NCHW image feature fed to resnet stand-in


# --- Pallas kernel: fused resnet stand-in + IEF loop + flame tail -----------
def ief_kernel(x_ref, wres_ref, bres_ref, w1a_ref, b1_ref, w1b_ref,
               w2_ref, b2_ref, w3_ref, b3_ref, wfl_ref, lmk_ref):
    # Hoist all weight / bias reads above the unrolled loop (one VMEM read each).
    wres = wres_ref[...]                       # [IMG_FEAT, RES_PAD]  bf16
    bres = bres_ref[...]                       # [1, RES_PAD]         f32
    w1a  = w1a_ref[...]                        # [RES_PAD, FC1]       bf16
    b1   = b1_ref[...]                         # [1, FC1]             f32
    w1b  = w1b_ref[...]                        # [FC3_PAD, FC1]       bf16
    w2   = w2_ref[...]                         # [FC1, FC2]           bf16
    b2   = b2_ref[...]                         # [1, FC2]             f32
    w3   = w3_ref[...]                         # [FC2, FC3_PAD]       bf16
    b3   = b3_ref[...]                         # [1, FC3_PAD]         f32
    wfl  = wfl_ref[...]                        # [FC3_PAD, LMK_PAD]   bf16

    # Fused resnet stand-in: feat = x_flat @ w_res + b_res.
    # TODO(synk): the real `resnet` backbone is an injected dependency; a flat
    # linear stand-in is used here.
    feat = jnp.dot(x_ref[...], wres,
                   preferred_element_type=jnp.float32) + bres   # [TILE_M, RES_PAD] f32

    # Loop-invariant fc1 contribution: feat @ W1[:res] + b1, computed once.
    h_feat = jnp.dot(feat.astype(jnp.bfloat16), w1a,
                     preferred_element_type=jnp.float32) + b1    # [TILE_M, FC1] f32

    def fc23(h):
        # fc2 -> relu -> fc3 (+bias).
        # TODO(synk): Dropout(p=0.2) is identity at inference; no RNG applied.
        h = jnp.maximum(
            jnp.dot(h.astype(jnp.bfloat16), w2,
                    preferred_element_type=jnp.float32) + b2, 0.0)
        return jnp.dot(h.astype(jnp.bfloat16), w3,
                       preferred_element_type=jnp.float32) + b3

    # i == 0: `out` starts at zero in the reference, so out @ W1[res:] is dead
    # and the reference sets out = outNew (no delta) on the first iteration.
    out = fc23(jnp.maximum(h_feat, 0.0))       # [TILE_M, FC3_PAD] f32

    for _ in range(NUM_IEF - 1):               # unrolled: iterations 1..2
        h = jnp.maximum(
            h_feat + jnp.dot(out.astype(jnp.bfloat16), w1b,
                             preferred_element_type=jnp.float32), 0.0)
        out = out + DELTA * fc23(h)            # out += delta * outNew

    # Fused flame stand-in: w_flame rows pre-permuted / zero-padded so that
    # landmarks == cat([shape, expr, pose]) @ w_flame == out @ wfl.
    # TODO(synk): the real `flame` model is an injected dependency; a linear
    # landmark regressor stand-in is used here (vertices output omitted).
    lmk_ref[...] = jnp.dot(out.astype(jnp.bfloat16), wfl,
                           preferred_element_type=jnp.float32)


def run_ief(x_pad, wres, bres, w1a, b1, w1b, w2, b2, w3, b3, wfl):
    m_pad, img_feat = x_pad.shape
    assert m_pad % TILE_M == 0
    n_tiles = m_pad // TILE_M

    # Weights: same block for every grid step -> VMEM-resident, DMA'd once.
    resident = lambda shape: pl.BlockSpec(shape, lambda i: (0,) * len(shape))
    row_tile = lambda shape: pl.BlockSpec(shape, lambda i: (i, 0))

    # Roofline numbers for XLA's scheduler (kernel is weight-DMA bound at
    # small M; batching across the grid axis amortizes the weight stream).
    flops = 2 * m_pad * (img_feat * RES_PAD + RES_PAD * FC1
                         + NUM_IEF * (FC1 * FC2 + FC2 * FC3_PAD)
                         + (NUM_IEF - 1) * FC3_PAD * FC1
                         + FC3_PAD * LMK_PAD)
    bytes_accessed = (2 * (img_feat * RES_PAD + RES_PAD * FC1 + FC3_PAD * FC1
                           + FC1 * FC2 + FC2 * FC3_PAD + FC3_PAD * LMK_PAD)
                      + 4 * (RES_PAD + FC1 + FC2 + FC3_PAD)
                      + 2 * m_pad * img_feat + 4 * m_pad * LMK_PAD)
    cost = pl.CostEstimate(flops=int(flops), transcendentals=0,
                           bytes_accessed=int(bytes_accessed))

    return pl.pallas_call(
        ief_kernel,
        out_shape=jax.ShapeDtypeStruct((m_pad, LMK_PAD), jnp.float32),
        grid=(n_tiles,),
        in_specs=[
            row_tile((TILE_M, img_feat)),        # x_flat  (bf16)
            resident((img_feat, RES_PAD)),       # w_res   (bf16, col-padded)
            resident((1, RES_PAD)),              # b_res   (f32,  padded)
            resident((RES_PAD, FC1)),            # w1a     (bf16, row-padded)
            resident((1, FC1)),                  # b1      (f32)
            resident((FC3_PAD, FC1)),            # w1b     (bf16, row-padded)
            resident((FC1, FC2)),                # w2      (bf16)
            resident((1, FC2)),                  # b2      (f32)
            resident((FC2, FC3_PAD)),            # w3      (bf16, col-padded)
            resident((1, FC3_PAD)),              # b3      (f32,  padded)
            resident((FC3_PAD, LMK_PAD)),        # wfl     (bf16, permuted/padded)
        ],
        out_specs=row_tile((TILE_M, LMK_PAD)),
        compiler_params=pltpu.CompilerParams(
            dimension_semantics=("parallel",)),   # v7x: shard row tiles across TCs
        cost_estimate=cost,
    )(x_pad, wres, bres, w1a, b1, w1b, w2, b2, w3, b3, wfl)


# --- parameter init (deterministic, synthetic) -------------------------------
def init_params(key, img_feat_dim):
    ks = jax.random.split(key, 8)
    s = 0.02
    return dict(
        # TODO(synk): stand-in for the external `resnet` backbone (flat linear).
        w_res=s * jax.random.normal(ks[0], (img_feat_dim, RES_OUT), jnp.float32),
        b_res=jnp.zeros((RES_OUT,), jnp.float32),
        # Regression MLP
        w1=s * jax.random.normal(ks[1], (RES_OUT + FC3, FC1), jnp.float32),
        b1=s * jax.random.normal(ks[2], (1, FC1), jnp.float32),
        w2=s * jax.random.normal(ks[3], (FC1, FC2), jnp.float32),
        b2=s * jax.random.normal(ks[4], (1, FC2), jnp.float32),
        w3=s * jax.random.normal(ks[5], (FC2, FC3), jnp.float32),
        b3=s * jax.random.normal(ks[6], (1, FC3), jnp.float32),
        # TODO(synk): stand-in for the external `flame` model (linear -> landmarks).
        w_flame=s * jax.random.normal(ks[7], (156, LMK_DIM), jnp.float32),
    )


def prepare_kernel_weights(params):
    """One-time weight prep: bf16 cast, K/N lane padding, flame-row permutation."""
    f32, bf16 = jnp.float32, jnp.bfloat16
    # resnet stand-in: pad output columns 1000 -> 1024, cast to bf16.
    w_res = (jnp.zeros((params["w_res"].shape[0], RES_PAD), f32)
             .at[:, :RES_OUT].set(params["w_res"]).astype(bf16))
    b_res = jnp.zeros((1, RES_PAD), f32).at[0, :RES_OUT].set(params["b_res"])
    # fc1 split for the concat-free formulation; pad w1a rows 1000 -> 1024,
    # w1b rows 159 -> 256.
    w1a = (jnp.zeros((RES_PAD, FC1), f32)
           .at[:RES_OUT].set(params["w1"][:RES_OUT]).astype(bf16))  # [1024, 512]
    w1b = (jnp.zeros((FC3_PAD, FC1), f32)
           .at[:FC3].set(params["w1"][RES_OUT:]).astype(bf16))      # [256, 512]
    # fc3: pad output columns 159 -> 256.
    w3 = (jnp.zeros((FC2, FC3_PAD), f32)
          .at[:, :FC3].set(params["w3"]).astype(bf16))              # [512, 256]
    b3 = jnp.zeros((1, FC3_PAD), f32).at[:, :FC3].set(params["b3"])
    # flame stand-in: permute rows into `out`-column order so the
    # cat([shape, expression, pose]) in the reference forward disappears.
    #   shape  = out[:, 59:159], expr = out[:, 9:59], pose = out[:, 3:9]
    wfl = jnp.zeros((FC3_PAD, LMK_PAD), f32)
    wfl = wfl.at[59:159, :LMK_DIM].set(params["w_flame"][0:100])    # shape
    wfl = wfl.at[9:59,  :LMK_DIM].set(params["w_flame"][100:150])   # expression
    wfl = wfl.at[3:9,   :LMK_DIM].set(params["w_flame"][150:156])   # pose
    return dict(
        w_res=w_res, b_res=b_res,
        w1a=w1a, b1=params["b1"].astype(f32), w1b=w1b,
        w2=params["w2"].astype(bf16), b2=params["b2"].astype(f32),
        w3=w3, b3=b3, wfl=wfl.astype(bf16),
    )


# --- full Ringnet forward ----------------------------------------------------
def ringnet_forward(x, kp):
    n = x.shape[0]                                  # == RING (5)
    # flatten NCHW image -> feature vector for the fused resnet stand-in
    x_flat = x.reshape(n, -1).astype(jnp.bfloat16)  # [n, IMG_FEAT]
    m_pad = ((n + TILE_M - 1) // TILE_M) * TILE_M   # pad rows to a full tile
    x_pad = (jnp.zeros((m_pad, x_flat.shape[1]), jnp.bfloat16)
             .at[:n].set(x_flat))

    lmk_full = run_ief(x_pad, kp["w_res"], kp["b_res"],
                       kp["w1a"], kp["b1"], kp["w1b"],
                       kp["w2"], kp["b2"], kp["w3"], kp["b3"], kp["wfl"])
    landmarks = lmk_full[:n, :LMK_DIM].reshape(n, N_LMK, 3)  # [5, 68, 3]
    return landmarks


if __name__ == "__main__":
    key = jax.random.PRNGKey(0)
    k_x, k_p = jax.random.split(key)

    # ring_size_same_sbj = 5 images, small NCHW shape: [5, 3, 16, 16]
    x = jax.random.normal(k_x, (RING, 3, 16, 16), jnp.float32)
    params = init_params(k_p, img_feat_dim=IMG_FEAT)
    kparams = prepare_kernel_weights(params)        # one-time weight prep

    landmarks = jax.jit(ringnet_forward)(x, kparams)
    landmarks = jax.block_until_ready(landmarks)

    assert landmarks.shape == (RING, N_LMK, 3)
    assert bool(jnp.all(jnp.isfinite(landmarks)))
    print("KERNEL_OK")
</pallas_src>

<mosaic_0001>
module attributes {stable_mosaic.version = 11 : i64} {
  func.func @ief_kernel(%arg0: i32, %arg1: memref<16x768xbf16, #tpu.memory_space<vmem>>, %arg2: memref<768x1024xbf16, #tpu.memory_space<vmem>>, %arg3: memref<1x1024xf32, #tpu.memory_space<vmem>>, %arg4: memref<1024x512xbf16, #tpu.memory_space<vmem>>, %arg5: memref<1x512xf32, #tpu.memory_space<vmem>>, %arg6: memref<256x512xbf16, #tpu.memory_space<vmem>>, %arg7: memref<512x512xbf16, #tpu.memory_space<vmem>>, %arg8: memref<1x512xf32, #tpu.memory_space<vmem>>, %arg9: memref<512x256xbf16, #tpu.memory_space<vmem>>, %arg10: memref<1x256xf32, #tpu.memory_space<vmem>>, %arg11: memref<256x256xbf16, #tpu.memory_space<vmem>>, %arg12: memref<16x256xf32, #tpu.memory_space<vmem>>) attributes {dimension_semantics = [#tpu.dimension_semantics<parallel>], iteration_bounds = array<i64: 1>, scalar_prefetch = 0 : i64, scratch_operands = 0 : i64, tpu.core_type = #tpu.core_type<tc>, window_params = [{transform_indices = @transform_0, window_bounds = array<i64: 16, 768>}, {pipeline_mode = #tpu.pipeline_mode<synchronous>, transform_indices = @transform_1, window_bounds = array<i64: 768, 1024>}, {pipeline_mode = #tpu.pipeline_mode<synchronous>, transform_indices = @transform_2, window_bounds = array<i64: 1, 1024>}, {pipeline_mode = #tpu.pipeline_mode<synchronous>, transform_indices = @transform_3, window_bounds = array<i64: 1024, 512>}, {pipeline_mode = #tpu.pipeline_mode<synchronous>, transform_indices = @transform_4, window_bounds = array<i64: 1, 512>}, {pipeline_mode = #tpu.pipeline_mode<synchronous>, transform_indices = @transform_5, window_bounds = array<i64: 256, 512>}, {pipeline_mode = #tpu.pipeline_mode<synchronous>, transform_indices = @transform_6, window_bounds = array<i64: 512, 512>}, {pipeline_mode = #tpu.pipeline_mode<synchronous>, transform_indices = @transform_7, window_bounds = array<i64: 1, 512>}, {pipeline_mode = #tpu.pipeline_mode<synchronous>, transform_indices = @transform_8, window_bounds = array<i64: 512, 256>}, {pipeline_mode = #tpu.pipeline_mode<synchronous>, transform_indices = @transform_9, window_bounds = array<i64: 1, 256>}, {pipeline_mode = #tpu.pipeline_mode<synchronous>, transform_indices = @transform_10, window_bounds = array<i64: 256, 256>}, {transform_indices = @transform_11, window_bounds = array<i64: 16, 256>}]} {
    %c0 = arith.constant 0 : index
    %c0_0 = arith.constant 0 : index
    %0 = vector.load %arg2[%c0, %c0_0] : memref<768x1024xbf16, #tpu.memory_space<vmem>>, vector<768x1024xbf16>
    %c0_1 = arith.constant 0 : index
    %c0_2 = arith.constant 0 : index
    %1 = vector.load %arg3[%c0_1, %c0_2] : memref<1x1024xf32, #tpu.memory_space<vmem>>, vector<1x1024xf32>
    %c0_3 = arith.constant 0 : index
    %c0_4 = arith.constant 0 : index
    %2 = vector.load %arg4[%c0_3, %c0_4] : memref<1024x512xbf16, #tpu.memory_space<vmem>>, vector<1024x512xbf16>
    %c0_5 = arith.constant 0 : index
    %c0_6 = arith.constant 0 : index
    %3 = vector.load %arg5[%c0_5, %c0_6] : memref<1x512xf32, #tpu.memory_space<vmem>>, vector<1x512xf32>
    %c0_7 = arith.constant 0 : index
    %c0_8 = arith.constant 0 : index
    %4 = vector.load %arg6[%c0_7, %c0_8] : memref<256x512xbf16, #tpu.memory_space<vmem>>, vector<256x512xbf16>
    %c0_9 = arith.constant 0 : index
    %c0_10 = arith.constant 0 : index
    %5 = vector.load %arg7[%c0_9, %c0_10] : memref<512x512xbf16, #tpu.memory_space<vmem>>, vector<512x512xbf16>
    %c0_11 = arith.constant 0 : index
    %c0_12 = arith.constant 0 : index
    %6 = vector.load %arg8[%c0_11, %c0_12] : memref<1x512xf32, #tpu.memory_space<vmem>>, vector<1x512xf32>
    %c0_13 = arith.constant 0 : index
    %c0_14 = arith.constant 0 : index
    %7 = vector.load %arg9[%c0_13, %c0_14] : memref<512x256xbf16, #tpu.memory_space<vmem>>, vector<512x256xbf16>
    %c0_15 = arith.constant 0 : index
    %c0_16 = arith.constant 0 : index
    %8 = vector.load %arg10[%c0_15, %c0_16] : memref<1x256xf32, #tpu.memory_space<vmem>>, vector<1x256xf32>
    %c0_17 = arith.constant 0 : index
    %c0_18 = arith.constant 0 : index
    %9 = vector.load %arg11[%c0_17, %c0_18] : memref<256x256xbf16, #tpu.memory_space<vmem>>, vector<256x256xbf16>
    %c0_19 = arith.constant 0 : index
    %c0_20 = arith.constant 0 : index
    %10 = vector.load %arg1[%c0_19, %c0_20] : memref<16x768xbf16, #tpu.memory_space<vmem>>, vector<16x768xbf16>
    %cst = arith.constant dense<0.000000e+00> : vector<16x1024xf32>
    %11 = tpu.matmul %10, %0, %cst {dimension_numbers = #tpu.dot_dimension_numbers<[1], [0], [0], [1], [0, 0, 1, 1], [], []>} : vector<16x768xbf16>, vector<768x1024xbf16>, vector<16x1024xf32> -> vector<16x1024xf32>
    %12 = vector.broadcast %1 : vector<1x1024xf32> to vector<16x1024xf32>
    %13 = arith.addf %11, %12 : vector<16x1024xf32>
    %14 = arith.truncf %13 : vector<16x1024xf32> to vector<16x1024xbf16>
    %cst_21 = arith.constant dense<0.000000e+00> : vector<16x512xf32>
    %15 = tpu.matmul %14, %2, %cst_21 {dimension_numbers = #tpu.dot_dimension_numbers<[1], [0], [0], [1], [0, 0, 1, 1], [], []>} : vector<16x1024xbf16>, vector<1024x512xbf16>, vector<16x512xf32> -> vector<16x512xf32>
    %16 = vector.broadcast %3 : vector<1x512xf32> to vector<16x512xf32>
    %17 = arith.addf %15, %16 : vector<16x512xf32>
    %cst_22 = arith.constant 0.000000e+00 : f32
    %18 = vector.broadcast %cst_22 : f32 to vector<16x512xf32>
    %19 = arith.maximumf %17, %18 : vector<16x512xf32>
    %20 = arith.truncf %19 : vector<16x512xf32> to vector<16x512xbf16>
    %cst_23 = arith.constant dense<0.000000e+00> : vector<16x512xf32>
    %21 = tpu.matmul %20, %5, %cst_23 {dimension_numbers = #tpu.dot_dimension_numbers<[1], [0], [0], [1], [0, 0, 1, 1], [], []>} : vector<16x512xbf16>, vector<512x512xbf16>, vector<16x512xf32> -> vector<16x512xf32>
    %22 = vector.broadcast %6 : vector<1x512xf32> to vector<16x512xf32>
    %23 = arith.addf %21, %22 : vector<16x512xf32>
    %cst_24 = arith.constant 0.000000e+00 : f32
    %24 = vector.broadcast %cst_24 : f32 to vector<16x512xf32>
    %25 = arith.maximumf %23, %24 : vector<16x512xf32>
    %26 = arith.truncf %25 : vector<16x512xf32> to vector<16x512xbf16>
    %cst_25 = arith.constant dense<0.000000e+00> : vector<16x256xf32>
    %27 = tpu.matmul %26, %7, %cst_25 {dimension_numbers = #tpu.dot_dimension_numbers<[1], [0], [0], [1], [0, 0, 1, 1], [], []>} : vector<16x512xbf16>, vector<512x256xbf16>, vector<16x256xf32> -> vector<16x256xf32>
    %28 = vector.broadcast %8 : vector<1x256xf32> to vector<16x256xf32>
    %29 = arith.addf %27, %28 : vector<16x256xf32>
    %30 = arith.truncf %29 : vector<16x256xf32> to vector<16x256xbf16>
    %cst_26 = arith.constant dense<0.000000e+00> : vector<16x512xf32>
    %31 = tpu.matmul %30, %4, %cst_26 {dimension_numbers = #tpu.dot_dimension_numbers<[1], [0], [0], [1], [0, 0, 1, 1], [], []>} : vector<16x256xbf16>, vector<256x512xbf16>, vector<16x512xf32> -> vector<16x512xf32>
    %32 = arith.addf %17, %31 : vector<16x512xf32>
    %cst_27 = arith.constant 0.000000e+00 : f32
    %33 = vector.broadcast %cst_27 : f32 to vector<16x512xf32>
    %34 = arith.maximumf %32, %33 : vector<16x512xf32>
    %35 = arith.truncf %34 : vector<16x512xf32> to vector<16x512xbf16>
    %cst_28 = arith.constant dense<0.000000e+00> : vector<16x512xf32>
    %36 = tpu.matmul %35, %5, %cst_28 {dimension_numbers = #tpu.dot_dimension_numbers<[1], [0], [0], [1], [0, 0, 1, 1], [], []>} : vector<16x512xbf16>, vector<512x512xbf16>, vector<16x512xf32> -> vector<16x512xf32>
    %37 = vector.broadcast %6 : vector<1x512xf32> to vector<16x512xf32>
    %38 = arith.addf %36, %37 : vector<16x512xf32>
    %cst_29 = arith.constant 0.000000e+00 : f32
    %39 = vector.broadcast %cst_29 : f32 to vector<16x512xf32>
    %40 = arith.maximumf %38, %39 : vector<16x512xf32>
    %41 = arith.truncf %40 : vector<16x512xf32> to vector<16x512xbf16>
    %cst_30 = arith.constant dense<0.000000e+00> : vector<16x256xf32>
    %42 = tpu.matmul %41, %7, %cst_30 {dimension_numbers = #tpu.dot_dimension_numbers<[1], [0], [0], [1], [0, 0, 1, 1], [], []>} : vector<16x512xbf16>, vector<512x256xbf16>, vector<16x256xf32> -> vector<16x256xf32>
    %43 = vector.broadcast %8 : vector<1x256xf32> to vector<16x256xf32>
    %44 = arith.addf %42, %43 : vector<16x256xf32>
    %cst_31 = arith.constant 1.000000e-01 : f32
    %45 = vector.broadcast %cst_31 : f32 to vector<16x256xf32>
    %46 = arith.mulf %45, %44 : vector<16x256xf32>
    %47 = arith.addf %29, %46 : vector<16x256xf32>
    %48 = arith.truncf %47 : vector<16x256xf32> to vector<16x256xbf16>
    %cst_32 = arith.constant dense<0.000000e+00> : vector<16x512xf32>
    %49 = tpu.matmul %48, %4, %cst_32 {dimension_numbers = #tpu.dot_dimension_numbers<[1], [0], [0], [1], [0, 0, 1, 1], [], []>} : vector<16x256xbf16>, vector<256x512xbf16>, vector<16x512xf32> -> vector<16x512xf32>
    %50 = arith.addf %17, %49 : vector<16x512xf32>
    %cst_33 = arith.constant 0.000000e+00 : f32
    %51 = vector.broadcast %cst_33 : f32 to vector<16x512xf32>
    %52 = arith.maximumf %50, %51 : vector<16x512xf32>
    %53 = arith.truncf %52 : vector<16x512xf32> to vector<16x512xbf16>
    %cst_34 = arith.constant dense<0.000000e+00> : vector<16x512xf32>
    %54 = tpu.matmul %53, %5, %cst_34 {dimension_numbers = #tpu.dot_dimension_numbers<[1], [0], [0], [1], [0, 0, 1, 1], [], []>} : vector<16x512xbf16>, vector<512x512xbf16>, vector<16x512xf32> -> vector<16x512xf32>
    %55 = vector.broadcast %6 : vector<1x512xf32> to vector<16x512xf32>
    %56 = arith.addf %54, %55 : vector<16x512xf32>
    %cst_35 = arith.constant 0.000000e+00 : f32
    %57 = vector.broadcast %cst_35 : f32 to vector<16x512xf32>
    %58 = arith.maximumf %56, %57 : vector<16x512xf32>
    %59 = arith.truncf %58 : vector<16x512xf32> to vector<16x512xbf16>
    %cst_36 = arith.constant dense<0.000000e+00> : vector<16x256xf32>
    %60 = tpu.matmul %59, %7, %cst_36 {dimension_numbers = #tpu.dot_dimension_numbers<[1], [0], [0], [1], [0, 0, 1, 1], [], []>} : vector<16x512xbf16>, vector<512x256xbf16>, vector<16x256xf32> -> vector<16x256xf32>
    %61 = vector.broadcast %8 : vector<1x256xf32> to vector<16x256xf32>
    %62 = arith.addf %60, %61 : vector<16x256xf32>
    %cst_37 = arith.constant 1.000000e-01 : f32
    %63 = vector.broadcast %cst_37 : f32 to vector<16x256xf32>
    %64 = arith.mulf %63, %62 : vector<16x256xf32>
    %65 = arith.addf %47, %64 : vector<16x256xf32>
    %66 = arith.truncf %65 : vector<16x256xf32> to vector<16x256xbf16>
    %cst_38 = arith.constant dense<0.000000e+00> : vector<16x256xf32>
    %67 = tpu.matmul %66, %9, %cst_38 {dimension_numbers = #tpu.dot_dimension_numbers<[1], [0], [0], [1], [0, 0, 1, 1], [], []>} : vector<16x256xbf16>, vector<256x256xbf16>, vector<16x256xf32> -> vector<16x256xf32>
    %c0_39 = arith.constant 0 : index
    %c0_40 = arith.constant 0 : index
    %68 = vector.load %arg12[%c0_39, %c0_40] : memref<16x256xf32, #tpu.memory_space<vmem>>, vector<16x256xf32>
    tpu.vector_store %arg12[%c0_39, %c0_40], %67 {strides = array<i32>} : memref<16x256xf32, #tpu.memory_space<vmem>>, vector<16x256xf32>,
    return
  }
  func.func @transform_0(%arg0: i32) -> (i32, i32) {
    %c0_i32 = arith.constant 0 : i32
    %c0_i32_0 = arith.constant 0 : i32
    return %arg0, %c0_i32 : i32, i32
  }
  func.func @transform_1(%arg0: i32) -> (i32, i32) {
    %c0_i32 = arith.constant 0 : i32
    %c0_i32_0 = arith.constant 0 : i32
    %c0_i32_1 = arith.constant 0 : i32
    return %c0_i32, %c0_i32_0 : i32, i32
  }
  func.func @transform_2(%arg0: i32) -> (i32, i32) {
    %c0_i32 = arith.constant 0 : i32
    %c0_i32_0 = arith.constant 0 : i32
    %c0_i32_1 = arith.constant 0 : i32
    return %c0_i32, %c0_i32_0 : i32, i32
  }
  func.func @transform_3(%arg0: i32) -> (i32, i32) {
    %c0_i32 = arith.constant 0 : i32
    %c0_i32_0 = arith.constant 0 : i32
    %c0_i32_1 = arith.constant 0 : i32
    return %c0_i32, %c0_i32_0 : i32, i32
  }
  func.func @transform_4(%arg0: i32) -> (i32, i32) {
    %c0_i32 = arith.constant 0 : i32
    %c0_i32_0 = arith.constant 0 : i32
    %c0_i32_1 = arith.constant 0 : i32
    return %c0_i32, %c0_i32_0 : i32, i32
  }
  func.func @transform_5(%arg0: i32) -> (i32, i32) {
    %c0_i32 = arith.constant 0 : i32
    %c0_i32_0 = arith.constant 0 : i32
    %c0_i32_1 = arith.constant 0 : i32
    return %c0_i32, %c0_i32_0 : i32, i32
  }
  func.func @transform_6(%arg0: i32) -> (i32, i32) {
    %c0_i32 = arith.constant 0 : i32
    %c0_i32_0 = arith.constant 0 : i32
    %c0_i32_1 = arith.constant 0 : i32
    return %c0_i32, %c0_i32_0 : i32, i32
  }
  func.func @transform_7(%arg0: i32) -> (i32, i32) {
    %c0_i32 = arith.constant 0 : i32
    %c0_i32_0 = arith.constant 0 : i32
    %c0_i32_1 = arith.constant 0 : i32
    return %c0_i32, %c0_i32_0 : i32, i32
  }
  func.func @transform_8(%arg0: i32) -> (i32, i32) {
    %c0_i32 = arith.constant 0 : i32
    %c0_i32_0 = arith.constant 0 : i32
    %c0_i32_1 = arith.constant 0 : i32
    return %c0_i32, %c0_i32_0 : i32, i32
  }
  func.func @transform_9(%arg0: i32) -> (i32, i32) {
    %c0_i32 = arith.constant 0 : i32
    %c0_i32_0 = arith.constant 0 : i32
    %c0_i32_1 = arith.constant 0 : i32
    return %c0_i32, %c0_i32_0 : i32, i32
  }
  func.func @transform_10(%arg0: i32) -> (i32, i32) {
    %c0_i32 = arith.constant 0 : i32
    %c0_i32_0 = arith.constant 0 : i32
    %c0_i32_1 = arith.constant 0 : i32
    return %c0_i32, %c0_i32_0 : i32, i32
  }
  func.func @transform_11(%arg0: i32) -> (i32, i32) {
    %c0_i32 = arith.constant 0 : i32
    %c0_i32_0 = arith.constant 0 : i32
    return %arg0, %c0_i32 : i32, i32
  }
}

</mosaic_0001>

<bundles_post_ra>
// kernel: ringnet_forward.1
= control target key start
LH: loop header
LB: loop body
LE: loop exit
PB: predicated region body
PF: predicated region fallthrough
CT: control target
= control target key end

     0   :  { %16 = vsyncpa [#allocation3], 0  ;;  %s11535_s0 = inlined_call_operand.vmem [shape: bf16[16,768], index: 0, kind: input, shape index: {}]   ;;  %s11536_s1 = inlined_call_operand.hbm [shape: bf16[768,1024], index: 1, kind: input, shape index: {}]   ;;  %s11537_s2 = inlined_call_operand.hbm [shape: f32[1,1024], index: 2, kind: input, shape index: {}]   ;;  %s11538_s3 = inlined_call_operand.hbm [shape: bf16[1024,512], index: 3, kind: input, shape index: {}]   ;;  %s11539_s4 = inlined_call_operand.hbm [shape: f32[1,512], index: 4, kind: input, shape index: {}]   ;;  %s11540_s5 = inlined_call_operand.hbm [shape: bf16[256,512], index: 5, kind: input, shape index: {}]   ;;  %s11541_s6 = inlined_call_operand.hbm [shape: bf16[512,512], index: 6, kind: input, shape index: {}]   ;;  %s11542_s7 = inlined_call_operand.hbm [shape: f32[1,512], index: 7, kind: input, shape index: {}]   ;;  %s11543_s8 = inlined_call_operand.hbm [shape: bf16[512,256], index: 8, kind: input, shape index: {}]   ;;  %s11544_s9 = inlined_call_operand.hbm [shape: f32[1,256], index: 9, kind: input, shape index: {}]   ;;  %s11545_s10 = inlined_call_operand.hbm [shape: bf16[256,256], index: 10, kind: input, shape index: {}]   ;;  %s11546_s11 = inlined_call_operand.vmem [shape: f32[16,256], index: 11, kind: output, shape index: {}]  }
   0x1   :  { %17 = vsyncpa [#allocation5], 0 }
   0x2   :  { %18 = vsyncpa [#allocation8], 0 }
   0x3   :  { %19 = vsyncpa [#allocation11], 0 }
   0x4   :  { %20 = vsyncpa [#allocation14], 0 }
   0x5   :  { %21 = vsyncpa [#allocation17], 0  ;;  %s10037_s17 = smov [#allocation4]   ;;  %s10038_s19 = smov [#allocation7]  }
   0x6   :  { %s42_s18 = sshll.u32 %s10037_s17, 4  ;;  %s64_s20 = sshll.u32 %s10038_s19, 4  ;;  %s43_s18 = int_to_ptr.vmem [resolvable:$true] %s42_s18  ;;  %s65_s20 = int_to_ptr.vmem [resolvable:$true] %s64_s20 }
   0x7   :  { %s9833_s21 = scalar_lea.vmem %s43_s18, 128  ;;  %p9838_p1 = scmp.lt.s32.totalorder %s43_s18, %s43_s18 }
   0x8   :  { %p9834_p0 = scmp.ne.s32.totalorder %s43_s18, %s9833_s21  ;;  %p9839_p2 = scmp.lt.s32.totalorder %s9833_s21, %s9833_s21 }
   0xa   :  { %p9840_p3 = por %p9839_p2, %p9838_p1 }
   0xc   :  { %p9841_p4 = pnand %p9840_p3, %p9834_p0 }
   0xe   :  { %9844 = shalt.err (!%p9841_p4)
}
   0xf   :  { %45 = dma.hbm_to_vmem [thread:$0]  %s11537_s2, 128, %s43_s18, [#allocation5]  }
  0x10   :  { %s9853_s24 = scalar_lea.vmem %s65_s20, 64  ;;  %p9858_p6 = scmp.lt.s32.totalorder %s65_s20, %s65_s20 }
  0x11   :  { %p9854_p5 = scmp.ne.s32.totalorder %s65_s20, %s9853_s24  ;;  %p9859_p7 = scmp.lt.s32.totalorder %s9853_s24, %s9853_s24 }
  0x13   :  { %p9860_p8 = por %p9859_p7, %p9858_p6 }
  0x15   :  { %p9861_p9 = pnand %p9860_p8, %p9854_p5 }
  0x17   :  { %9864 = shalt.err (!%p9861_p9)
}
  0x18   :  { %67 = dma.hbm_to_vmem [thread:$0]  %s11539_s4, 64, %s65_s20, [#allocation8]  }
  0x19   :  { %s10039_s27 = smov [#allocation10]   ;;  %s10040_s29 = smov [#allocation13]  }
  0x1a   :  { %s85_s28 = sshll.u32 %s10039_s27, 4  ;;  %s107_s30 = sshll.u32 %s10040_s29, 4  ;;  %s86_s28 = int_to_ptr.vmem [resolvable:$true] %s85_s28  ;;  %s108_s30 = int_to_ptr.vmem [resolvable:$true] %s107_s30 }
  0x1b   :  { %s9873_s12 = scalar_lea.vmem %s86_s28, 16384  ;;  %p9878_p11 = scmp.lt.s32.totalorder %s86_s28, %s86_s28 }
  0x1c   :  { %p9874_p10 = scmp.ne.s32.totalorder %s86_s28, %s9873_s12  ;;  %p9879_p12 = scmp.lt.s32.totalorder %s9873_s12, %s9873_s12 }
  0x1e   :  { %p9880_p13 = por %p9879_p12, %p9878_p11 }
  0x20   :  { %p9881_p0 = pnand %p9880_p13, %p9874_p10 }
  0x22   :  { %9884 = shalt.err (!%p9881_p0)
}
  0x23   :  { %s10041_s2 = smov 256   ;;  %s10042_s13 = smov 16  }
  0x24   :  { %91 = dma.hbm_to_vmem [thread:$0]  %s11541_s6, 16384, %s86_s28, [#allocation11], %s10041_s2, %s10041_s2, %s10042_s13  }
  0x25   :  { %s9893_s15 = scalar_lea.vmem %s108_s30, 8192  ;;  %p9898_p2 = scmp.lt.s32.totalorder %s108_s30, %s108_s30 }
  0x26   :  { %p9894_p1 = scmp.ne.s32.totalorder %s108_s30, %s9893_s15  ;;  %p9899_p3 = scmp.lt.s32.totalorder %s9893_s15, %s9893_s15 }
  0x28   :  { %p9900_p4 = por %p9899_p3, %p9898_p2 }
  0x2a   :  { %p9901_p5 = pnand %p9900_p4, %p9894_p1 }
  0x2c   :  { %9904 = shalt.err (!%p9901_p5)
}
  0x2d   :  { %s10043_s16 = smov 128   ;;  %s10044_s17 = smov 8  }
  0x2e   :  { %113 = dma.hbm_to_vmem [thread:$0]  %s11543_s8, 8192, %s108_s30, [#allocation14], %s10043_s16, %s10043_s16, %s10044_s17  }
  0x2f   :  { %s10045_s20 = smov [#allocation2]  }
  0x30   :  { %s29_s21 = sshll.u32 %s10045_s20, 4  ;;  %s30_s21 = int_to_ptr.vmem [resolvable:$true] %s29_s21 }
  0x31   :  { %s9913_s6 = scalar_lea.vmem %s30_s21, 49152  ;;  %p9918_p7 = scmp.lt.s32.totalorder %s30_s21, %s30_s21 }
  0x32   :  { %p9914_p6 = scmp.ne.s32.totalorder %s30_s21, %s9913_s6  ;;  %p9919_p8 = scmp.lt.s32.totalorder %s9913_s6, %s9913_s6 }
  0x34   :  { %p9920_p9 = por %p9919_p8, %p9918_p7 }
  0x36   :  { %p9921_p10 = pnand %p9920_p9, %p9914_p6 }
  0x38   :  { %9924 = shalt.err (!%p9921_p10)
}
  0x39   :  { %s10046_s22 = smov 512   ;;  %s10047_s23 = smov 32  }
  0x3a   :  { %35 = dma.hbm_to_vmem [thread:$0]  %s11536_s1, 49152, %s30_s21, [#allocation3], %s10046_s22, %s10046_s22, %s10047_s23  }
  0x3b   :  { %s10048_s26 = smov [#allocation6]   ;;  %s10049_s8 = smov [#allocation9]  }
  0x3c   :  { %s51_s27 = sshll.u32 %s10048_s26, 4  ;;  %s73_s28 = sshll.u32 %s10049_s8, 4  ;;  %s52_s27 = int_to_ptr.vmem [resolvable:$true] %s51_s27  ;;  %s74_s28 = int_to_ptr.vmem [resolvable:$true] %s73_s28 }
  0x3d   :  { %s9933_s29 = scalar_lea.vmem %s52_s27, 32768  ;;  %p9938_p12 = scmp.lt.s32.totalorder %s52_s27, %s52_s27 }
  0x3e   :  { %p9934_p11 = scmp.ne.s32.totalorder %s52_s27, %s9933_s29  ;;  %p9939_p13 = scmp.lt.s32.totalorder %s9933_s29, %s9933_s29 }
  0x40   :  { %p9940_p0 = por %p9939_p13, %p9938_p12 }
  0x42   :  { %p9941_p1 = pnand %p9940_p0, %p9934_p11 }
  0x44   :  { %9944 = shalt.err (!%p9941_p1)
}
  0x45   :  { %57 = dma.hbm_to_vmem [thread:$0]  %s11538_s3, 32768, %s52_s27, [#allocation5], %s10041_s2, %s10041_s2, %s10042_s13  }
  0x46   :  { %s9953_s1 = scalar_lea.vmem %s74_s28, 8192  ;;  %p9958_p3 = scmp.lt.s32.totalorder %s74_s28, %s74_s28 }
  0x47   :  { %p9954_p2 = scmp.ne.s32.totalorder %s74_s28, %s9953_s1  ;;  %p9959_p4 = scmp.lt.s32.totalorder %s9953_s1, %s9953_s1 }
  0x49   :  { %p9960_p5 = por %p9959_p4, %p9958_p3 }
  0x4b   :  { %p9961_p6 = pnand %p9960_p5, %p9954_p2 }
  0x4d   :  { %9964 = shalt.err (!%p9961_p6)
}
  0x4e   :  { %79 = dma.hbm_to_vmem [thread:$0]  %s11540_s5, 8192, %s74_s28, [#allocation8], %s10041_s2, %s10041_s2, %s10042_s13  }
  0x4f   :  { %s10050_s15 = smov [#allocation12]   ;;  %s10051_s19 = smov [#allocation15]  }
  0x50   :  { %s98_s18 = sshll.u32 %s10050_s15, 4  ;;  %s120_s3 = sshll.u32 %s10051_s19, 4  ;;  %s99_s18 = int_to_ptr.vmem [resolvable:$true] %s98_s18  ;;  %s121_s3 = int_to_ptr.vmem [resolvable:$true] %s120_s3 }
  0x51   :  { %s9973_s20 = scalar_lea.vmem %s99_s18, 64  ;;  %p9978_p8 = scmp.lt.s32.totalorder %s99_s18, %s99_s18 }
  0x52   :  { %p9974_p7 = scmp.ne.s32.totalorder %s99_s18, %s9973_s20  ;;  %p9979_p9 = scmp.lt.s32.totalorder %s9973_s20, %s9973_s20 }
  0x54   :  { %p9980_p10 = por %p9979_p9, %p9978_p8 }
  0x56   :  { %p9981_p11 = pnand %p9980_p10, %p9974_p7 }
  0x58   :  { %9984 = shalt.err (!%p9981_p11)
}
  0x59   :  { %101 = dma.hbm_to_vmem [thread:$0]  %s11542_s7, 64, %s99_s18, [#allocation11]  }
  0x5a   :  { %s9993_s22 = scalar_lea.vmem %s121_s3, 32  ;;  %p9998_p13 = scmp.lt.s32.totalorder %s121_s3, %s121_s3 }
  0x5b   :  { %p9994_p12 = scmp.ne.s32.totalorder %s121_s3, %s9993_s22  ;;  %p9999_p0 = scmp.lt.s32.totalorder %s9993_s22, %s9993_s22 }
  0x5d   :  { %p10000_p1 = por %p9999_p0, %p9998_p13 }
  0x5f   :  { %p10001_p2 = pnand %p10000_p1, %p9994_p12 }
  0x61   :  { %10004 = shalt.err (!%p10001_p2)
}
  0x62   :  { %123 = dma.hbm_to_vmem [thread:$0]  %s11544_s9, 32, %s121_s3, [#allocation14]  }
  0x63   :  { %s10052_s13 = smov [#allocation16]  }
  0x64   :  { %s129_s23 = sshll.u32 %s10052_s13, 4  ;;  %s130_s23 = int_to_ptr.vmem [resolvable:$true] %s129_s23 }
  0x65   :  { %s10013_s24 = scalar_lea.vmem %s130_s23, 4096  ;;  %p10018_p4 = scmp.lt.s32.totalorder %s130_s23, %s130_s23 }
  0x66   :  { %p10014_p3 = scmp.ne.s32.totalorder %s130_s23, %s10013_s24  ;;  %p10019_p5 = scmp.lt.s32.totalorder %s10013_s24, %s10013_s24 }
  0x68   :  { %p10020_p6 = por %p10019_p5, %p10018_p4 }
  0x6a   :  { %p10021_p7 = pnand %p10020_p6, %p10014_p3 }
  0x6c   :  { %10024 = shalt.err (!%p10021_p7)
}
  0x6d   :  { %135 = dma.hbm_to_vmem [thread:$0]  %s11545_s10, 4096, %s130_s23, [#allocation17], %s10043_s16, %s10043_s16, %s10044_s17  }
  0x6e   :  { %10025 = dma.done.wait [#allocation3], 49152  }
  0x6f   :  { %10026 = vsyncadd [#allocation3], 4294918144 }
  0x70   :  { %10027 = dma.done.wait [#allocation5], 32896  }
  0x71   :  { %10028 = vsyncadd [#allocation5], 4294934400 }
  0x72   :  { %10029 = dma.done.wait [#allocation8], 8256  }
  0x73   :  { %10030 = vsyncadd [#allocation8], 4294959040 }
  0x74   :  { %10031 = dma.done.wait [#allocation11], 16448  }
  0x75   :  { %10032 = vsyncadd [#allocation11], 4294950848 }
  0x76   :  { %10033 = dma.done.wait [#allocation14], 8224  }
  0x77   :  { %10034 = vsyncadd [#allocation14], 4294959072 }
  0x78   :  { %10035 = dma.done.wait [#allocation17], 4096  }
  0x79   :  { %10036 = vsyncadd [#allocation17], 4294963200  ;;  %v222_v0 = vld [vmem:[#allocation2 + $0x1c0] sm:$0xff] }
  0x7a   :  { %v226_v1 = vld [vmem:[#allocation2 + $0x1e0] sm:$0xff] }
  0x7b   :  { %v350_v2 = vld [vmem:[#allocation2 + $0x5c0] sm:$0xff]  ;;  %v7912_v3 = vcombine.high %v222_v0, %v226_v1  ;;  %v7911_v5 = vcombine.low %v222_v0, %v226_v1 }
  0x7c   :  { %v354_v4 = vld [vmem:[#allocation2 + $0x5e0] sm:$0xff] }
  0x7d   :  { %v214_v6 = vld [vmem:[#allocation2 + $0x180] sm:$0xff]  ;;  %v8040_v8 = vcombine.high %v350_v2, %v354_v4  ;;  %v8039_v9 = vcombine.low %v350_v2, %v354_v4  ;;  %3095 = vmatprep.subr.bf16.mxu0 %v7912_v3 }
  0x7e   :  { %v218_v7 = vld [vmem:[#allocation2 + $0x1a0] sm:$0xff]  ;;  %3096 = vmatpush1.bf16.msra.mxu0 %v7911_v5 }
  0x7f   :  { %v7904_v10 = vcombine.high %v214_v6, %v218_v7  ;;  %v342_v11 = vld [vmem:[#allocation2 + $0x580] sm:$0xff]  ;;  %3138 = vmatprep.subr.bf16.mxu1 %v8040_v8  ;;  %v7903_v18 = vcombine.low %v214_v6, %v218_v7 }
  0x80   :  { %v346_v12 = vld [vmem:[#allocation2 + $0x5a0] sm:$0xff]  ;;  %3139 = vmatpush1.bf16.msra.mxu1 %v8039_v9 }
  0x81   :  { %v206_v13 = vld [vmem:[#allocation2 + $0x140] sm:$0xff]  ;;  %v8032_v14 = vcombine.high %v342_v11, %v346_v12  ;;  %3097 = vmatprep.subr.bf16.mxu0 %v7904_v10  ;;  %v8031_v19 = vcombine.low %v342_v11, %v346_v12 }
  0x82   :  { %v210_v15 = vld [vmem:[#allocation2 + $0x160] sm:$0xff]  ;;  %3098 = vmatpush1.bf16.msra.mxu0 %v7903_v18 }
  0x83   :  { %v334_v16 = vld [vmem:[#allocation2 + $0x540] sm:$0xff]  ;;  %v7896_v20 = vcombine.high %v206_v13, %v210_v15  ;;  %3140 = vmatprep.subr.bf16.mxu1 %v8032_v14  ;;  %v7895_v26 = vcombine.low %v206_v13, %v210_v15 }
  0x84   :  { %v338_v17 = vld [vmem:[#allocation2 + $0x560] sm:$0xff]  ;;  %3141 = vmatpush1.bf16.msra.mxu1 %v8031_v19 }
  0x85   :  { %v8024_v21 = vcombine.high %v334_v16, %v338_v17  ;;  %v198_v22 = vld [vmem:[#allocation2 + $0x100] sm:$0xff]  ;;  %3099 = vmatprep.subr.bf16.mxu0 %v7896_v20  ;;  %v8023_v27 = vcombine.low %v334_v16, %v338_v17 }
  0x86   :  { %v202_v23 = vld [vmem:[#allocation2 + $0x120] sm:$0xff]  ;;  %3100 = vmatpush1.bf16.msra.mxu0 %v7895_v26 }
  0x87   :  { %v326_v24 = vld [vmem:[#allocation2 + $0x500] sm:$0xff]  ;;  %v7888_v28 = vcombine.high %v198_v22, %v202_v23  ;;  %3142 = vmatprep.subr.bf16.mxu1 %v8024_v21  ;;  %v7887_v34 = vcombine.low %v198_v22, %v202_v23 }
  0x88   :  { %v330_v25 = vld [vmem:[#allocation2 + $0x520] sm:$0xff]  ;;  %3143 = vmatpush1.bf16.msra.mxu1 %v8023_v27 }
  0x89   :  { %v8016_v29 = vcombine.high %v326_v24, %v330_v25  ;;  %v190_v30 = vld [vmem:[#allocation2 + $0xc0] sm:$0xff]  ;;  %3101 = vmatprep.subr.bf16.mxu0 %v7888_v28  ;;  %v8015_v35 = vcombine.low %v326_v24, %v330_v25 }
  0x8a   :  { %v194_v31 = vld [vmem:[#allocation2 + $0xe0] sm:$0xff]  ;;  %3102 = vmatpush1.bf16.msra.mxu0 %v7887_v34 }
  0x8b   :  { %v318_v32 = vld [vmem:[#allocation2 + $0x4c0] sm:$0xff]  ;;  %v7880_v36 = vcombine.high %v190_v30, %v194_v31  ;;  %3144 = vmatprep.subr.bf16.mxu1 %v8016_v29  ;;  %v7879_v42 = vcombine.low %v190_v30, %v194_v31 }
  0x8c   :  { %v322_v33 = vld [vmem:[#allocation2 + $0x4e0] sm:$0xff]  ;;  %3145 = vmatpush1.bf16.msra.mxu1 %v8015_v35 }
  0x8d   :  { %v8008_v37 = vcombine.high %v318_v32, %v322_v33  ;;  %v182_v38 = vld [vmem:[#allocation2 + $0x80] sm:$0xff]  ;;  %3103 = vmatprep.subr.bf16.mxu0 %v7880_v36  ;;  %v8007_v43 = vcombine.low %v318_v32, %v322_v33 }
  0x8e   :  { %v186_v39 = vld [vmem:[#allocation2 + $0xa0] sm:$0xff]  ;;  %3104 = vmatpush1.bf16.msra.mxu0 %v7879_v42 }
  0x8f   :  { %v310_v40 = vld [vmem:[#allocation2 + $0x480] sm:$0xff]  ;;  %v7872_v44 = vcombine.high %v182_v38, %v186_v39  ;;  %3146 = vmatprep.subr.bf16.mxu1 %v8008_v37  ;;  %v7871_v50 = vcombine.low %v182_v38, %v186_v39 }
  0x90   :  { %v314_v41 = vld [vmem:[#allocation2 + $0x4a0] sm:$0xff]  ;;  %3147 = vmatpush1.bf16.msra.mxu1 %v8007_v43 }
  0x91   :  { %v8000_v45 = vcombine.high %v310_v40, %v314_v41  ;;  %v174_v46 = vld [vmem:[#allocation2 + $0x40] sm:$0xff]  ;;  %3105 = vmatprep.subr.bf16.mxu0 %v7872_v44  ;;  %v7999_v52 = vcombine.low %v310_v40, %v314_v41 }
  0x92   :  { %v178_v47 = vld [vmem:[#allocation2 + $0x60] sm:$0xff]  ;;  %3106 = vmatpush1.bf16.msra.mxu0 %v7871_v50 }
  0x93   :  { %v302_v48 = vld [vmem:[#allocation2 + $0x440] sm:$0xff]  ;;  %v7864_v53 = vcombine.high %v174_v46, %v178_v47  ;;  %3148 = vmatprep.subr.bf16.mxu1 %v8000_v45  ;;  %v7863_v60 = vcombine.low %v174_v46, %v178_v47 }
  0x94   :  { %v306_v49 = vld [vmem:[#allocation2 + $0x460] sm:$0xff]  ;;  %3149 = vmatpush1.bf16.msra.mxu1 %v7999_v52 }
  0x95   :  { %v166_v51 = vld [vmem:[#allocation2] sm:$0xff]  ;;  %v7992_v55 = vcombine.high %v302_v48, %v306_v49  ;;  %3107 = vmatprep.subr.bf16.mxu0 %v7864_v53  ;;  %v7991_v61 = vcombine.low %v302_v48, %v306_v49 }
  0x96   :  { %v170_v54 = vld [vmem:[#allocation2 + $0x20] sm:$0xff]  ;;  %3108 = vmatpush1.bf16.msra.mxu0 %v7863_v60 }
  0x97   :  { %v10161_v56 = vld [vmem:[%s11535_s0 + $0x4] ss:$24 sps:$4 sm:$0xff]   ;;  %v7856_v62 = vcombine.high %v166_v51, %v170_v54  ;;  %3150 = vmatprep.subr.bf16.mxu1 %v7992_v55  ;;  %v7855_v4 = vcombine.low %v166_v51, %v170_v54 }
  0x98   :  { %v294_v57 = vld [vmem:[#allocation2 + $0x400] sm:$0xff]  ;;  %3127 = vmatprep.mubr.bf16.mxu0 %v10161_v56  ;;  %3151 = vmatpush1.bf16.msra.mxu1 %v7991_v61 }
  0x99   :  { %v298_v58 = vld [vmem:[#allocation2 + $0x420] sm:$0xff]  ;;  %3109 = vmatprep.subr.bf16.mxu0 %v7856_v62 }
  0x9a   :  { %v10166_v59 = vld [vmem:[%s11535_s0 + $0xc] ss:$24 sps:$4 sm:$0xff]   ;;  %v7984_v63 = vcombine.high %v294_v57, %v298_v58  ;;  %v7983_v5 = vcombine.low %v294_v57, %v298_v58  ;;  %3110 = vmatpush1.bf16.msra.mxu0 %v7855_v4 }
  0x9b   :  { %v286_v0 = vld [vmem:[#allocation2 + $0x3c0] sm:$0xff]  ;;  %3170 = vmatprep.mubr.bf16.mxu1 %v10166_v59  ;;  %v223_v4 = vld [vmem:[#allocation2 + $0x1c8] sm:$0xff] }
  0x9c   :  { %v290_v1 = vld [vmem:[#allocation2 + $0x3e0] sm:$0xff]  ;;  %3152 = vmatprep.subr.bf16.mxu1 %v7984_v63 }
  0x9d   :  { %v414_v2 = vld [vmem:[#allocation2 + $0x7c0] sm:$0xff]  ;;  %v7976_v6 = vcombine.high %v286_v0, %v290_v1  ;;  %v7975_v12 = vcombine.low %v286_v0, %v290_v1  ;;  %3153 = vmatpush1.bf16.msra.mxu1 %v7983_v5  ;;  %v227_v5 = vld [vmem:[#allocation2 + $0x1e8] sm:$0xff] }
  0x9e   :  { %v418_v3 = vld [vmem:[#allocation2 + $0x7e0] sm:$0xff] }
  0x9f   :  { %v8104_v7 = vcombine.high %v414_v2, %v418_v3  ;;  %v278_v8 = vld [vmem:[#allocation2 + $0x380] sm:$0xff]  ;;  %3111 = vmatprep.subr.bf16.mxu0 %v7976_v6  ;;  %v8103_v13 = vcombine.low %v414_v2, %v418_v3 }
  0xa0   :  { %v282_v9 = vld [vmem:[#allocation2 + $0x3a0] sm:$0xff]  ;;  %3112 = vmatpush2.bf16.msra.mxu0 %v7975_v12 }
  0xa1   :  { %v406_v10 = vld [vmem:[#allocation2 + $0x780] sm:$0xff]  ;;  %v7968_v14 = vcombine.high %v278_v8, %v282_v9  ;;  %3154 = vmatprep.subr.bf16.mxu1 %v8104_v7  ;;  %v7967_v20 = vcombine.low %v278_v8, %v282_v9  ;;  %v7914_v9 = vcombine.high %v223_v4, %v227_v5 }
  0xa2   :  { %v410_v11 = vld [vmem:[#allocation2 + $0x7a0] sm:$0xff]  ;;  %3155 = vmatpush2.bf16.msra.mxu1 %v8103_v13  ;;  %v215_v13 = vld [vmem:[#allocation2 + $0x188] sm:$0xff] }
  0xa3   :  { %v8096_v15 = vcombine.high %v406_v10, %v410_v11  ;;  %v270_v16 = vld [vmem:[#allocation2 + $0x340] sm:$0xff]  ;;  %3113 = vmatprep.subr.bf16.mxu0 %v7968_v14  ;;  %v8095_v21 = vcombine.low %v406_v10, %v410_v11  ;;  %v219_v14 = vld [vmem:[#allocation2 + $0x1a8] sm:$0xff] }
  0xa4   :  { %v274_v17 = vld [vmem:[#allocation2 + $0x360] sm:$0xff]  ;;  %3114 = vmatpush2.bf16.msra.mxu0 %v7967_v20 }
  0xa5   :  { %v398_v18 = vld [vmem:[#allocation2 + $0x740] sm:$0xff]  ;;  %v7960_v22 = vcombine.high %v270_v16, %v274_v17  ;;  %3156 = vmatprep.subr.bf16.mxu1 %v8096_v15  ;;  %v7959_v28 = vcombine.low %v270_v16, %v274_v17  ;;  %v7913_v17 = vcombine.low %v223_v4, %v227_v5 }
  0xa6   :  { %v402_v19 = vld [vmem:[#allocation2 + $0x760] sm:$0xff]  ;;  %3157 = vmatpush2.bf16.msra.mxu1 %v8095_v21 }
  0xa7   :  { %v8088_v23 = vcombine.high %v398_v18, %v402_v19  ;;  %v262_v24 = vld [vmem:[#allocation2 + $0x300] sm:$0xff]  ;;  %3115 = vmatprep.subr.bf16.mxu0 %v7960_v22  ;;  %v8087_v29 = vcombine.low %v398_v18, %v402_v19  ;;  %v7906_v19 = vcombine.high %v215_v13, %v219_v14  ;;  %v10181_v22 = vld [vmem:[%s11535_s0 + $0x14] ss:$24 sps:$4 sm:$0xff]  }
  0xa8   :  { %v266_v25 = vld [vmem:[#allocation2 + $0x320] sm:$0xff]  ;;  %3116 = vmatpush2.bf16.msra.mxu0 %v7959_v28 }
  0xa9   :  { %v390_v26 = vld [vmem:[#allocation2 + $0x700] sm:$0xff]  ;;  %v7952_v30 = vcombine.high %v262_v24, %v266_v25  ;;  %3158 = vmatprep.subr.bf16.mxu1 %v8088_v23  ;;  %v7951_v36 = vcombine.low %v262_v24, %v266_v25  ;;  %v207_v23 = vld [vmem:[#allocation2 + $0x148] sm:$0xff] }
  0xaa   :  { %v394_v27 = vld [vmem:[#allocation2 + $0x720] sm:$0xff]  ;;  %3159 = vmatpush2.bf16.msra.mxu1 %v8087_v29  ;;  %v211_v24 = vld [vmem:[#allocation2 + $0x168] sm:$0xff] }
  0xab   :  { %v8080_v31 = vcombine.high %v390_v26, %v394_v27  ;;  %v254_v32 = vld [vmem:[#allocation2 + $0x2c0] sm:$0xff]  ;;  %3117 = vmatprep.subr.bf16.mxu0 %v7952_v30  ;;  %v8079_v37 = vcombine.low %v390_v26, %v394_v27  ;;  %v7905_v26 = vcombine.low %v215_v13, %v219_v14  ;;  %v7898_v30 = vcombine.high %v207_v23, %v211_v24 }
  0xac   :  { %v258_v33 = vld [vmem:[#allocation2 + $0x2e0] sm:$0xff]  ;;  %3118 = vmatpush2.bf16.msra.mxu0 %v7951_v36 }
  0xad   :  { %v382_v34 = vld [vmem:[#allocation2 + $0x6c0] sm:$0xff]  ;;  %v7944_v38 = vcombine.high %v254_v32, %v258_v33  ;;  %3160 = vmatprep.subr.bf16.mxu1 %v8080_v31  ;;  %v7943_v44 = vcombine.low %v254_v32, %v258_v33  ;;  %v199_v31 = vld [vmem:[#allocation2 + $0x108] sm:$0xff] }
  0xae   :  { %v386_v35 = vld [vmem:[#allocation2 + $0x6e0] sm:$0xff]  ;;  %3161 = vmatpush2.bf16.msra.mxu1 %v8079_v37  ;;  %v203_v32 = vld [vmem:[#allocation2 + $0x128] sm:$0xff] }
  0xaf   :  { %v8072_v39 = vcombine.high %v382_v34, %v386_v35  ;;  %v246_v40 = vld [vmem:[#allocation2 + $0x280] sm:$0xff]  ;;  %3119 = vmatprep.subr.bf16.mxu0 %v7944_v38  ;;  %v8071_v45 = vcombine.low %v382_v34, %v386_v35  ;;  %v7897_v34 = vcombine.low %v207_v23, %v211_v24  ;;  %v191_v38 = vld [vmem:[#allocation2 + $0xc8] sm:$0xff] }
  0xb0   :  { %v250_v41 = vld [vmem:[#allocation2 + $0x2a0] sm:$0xff]  ;;  %3120 = vmatpush2.bf16.msra.mxu0 %v7943_v44 }
  0xb1   :  { %v374_v42 = vld [vmem:[#allocation2 + $0x680] sm:$0xff]  ;;  %v7936_v46 = vcombine.high %v246_v40, %v250_v41  ;;  %3162 = vmatprep.subr.bf16.mxu1 %v8072_v39  ;;  %v7935_v52 = vcombine.low %v246_v40, %v250_v41  ;;  %v7890_v39 = vcombine.high %v199_v31, %v203_v32  ;;  %v195_v40 = vld [vmem:[#allocation2 + $0xe8] sm:$0xff] }
  0xb2   :  { %v378_v43 = vld [vmem:[#allocation2 + $0x6a0] sm:$0xff]  ;;  %3163 = vmatpush2.bf16.msra.mxu1 %v8071_v45  ;;  %v183_v45 = vld [vmem:[#allocation2 + $0x88] sm:$0xff] }
  0xb3   :  { %v8064_v47 = vcombine.high %v374_v42, %v378_v43  ;;  %v238_v48 = vld [vmem:[#allocation2 + $0x240] sm:$0xff]  ;;  %3121 = vmatprep.subr.bf16.mxu0 %v7936_v46  ;;  %v8063_v53 = vcombine.low %v374_v42, %v378_v43  ;;  %v7889_v42 = vcombine.low %v199_v31, %v203_v32  ;;  %v7882_v46 = vcombine.high %v191_v38, %v195_v40 }
  0xb4   :  { %v242_v49 = vld [vmem:[#allocation2 + $0x260] sm:$0xff]  ;;  %3122 = vmatpush2.bf16.msra.mxu0 %v7935_v52 }
  0xb5   :  { %v366_v50 = vld [vmem:[#allocation2 + $0x640] sm:$0xff]  ;;  %v7928_v54 = vcombine.high %v238_v48, %v242_v49  ;;  %3164 = vmatprep.subr.bf16.mxu1 %v8064_v47  ;;  %v7927_v62 = vcombine.low %v238_v48, %v242_v49  ;;  %v187_v47 = vld [vmem:[#allocation2 + $0xa8] sm:$0xff]  ;;  %v7881_v49 = vcombine.low %v191_v38, %v195_v40 }
  0xb6   :  { %v370_v51 = vld [vmem:[#allocation2 + $0x660] sm:$0xff]  ;;  %3165 = vmatpush2.bf16.msra.mxu1 %v8063_v53  ;;  %v175_v53 = vld [vmem:[#allocation2 + $0x48] sm:$0xff] }
  0xb7   :  { %v8056_v55 = vcombine.high %v366_v50, %v370_v51  ;;  %v230_v57 = vld [vmem:[#allocation2 + $0x200] sm:$0xff]  ;;  %3123 = vmatprep.subr.bf16.mxu0 %v7928_v54  ;;  %v8055_v63 = vcombine.low %v366_v50, %v370_v51  ;;  %v7874_v54 = vcombine.high %v183_v45, %v187_v47 }
  0xb8   :  { %v234_v58 = vld [vmem:[#allocation2 + $0x220] sm:$0xff]  ;;  %3124 = vmatpush2.bf16.msra.mxu0 %v7927_v62 }
  0xb9   :  { %v358_v60 = vld [vmem:[#allocation2 + $0x600] sm:$0xff]  ;;  %v7920_v0 = vcombine.high %v230_v57, %v234_v58  ;;  %3166 = vmatprep.subr.bf16.mxu1 %v8056_v55  ;;  %v7919_v6 = vcombine.low %v230_v57, %v234_v58  ;;  %v179_v55 = vld [vmem:[#allocation2 + $0x68] sm:$0xff]  ;;  %v7873_v58 = vcombine.low %v183_v45, %v187_v47 }
  0xba   :  { %v362_v61 = vld [vmem:[#allocation2 + $0x620] sm:$0xff]  ;;  %3167 = vmatpush2.bf16.msra.mxu1 %v8055_v63  ;;  %v167_v63 = vld [vmem:[#allocation2 + $0x8] sm:$0xff] }
  0xbb   :  { %v8048_v1 = vcombine.high %v358_v60, %v362_v61  ;;  %v478_v2 = vld [vmem:[#allocation2 + $0x9c0] sm:$0xff]  ;;  %3125 = vmatprep.subr.bf16.mxu0 %v7920_v0  ;;  %v8047_v7 = vcombine.low %v358_v60, %v362_v61  ;;  %v7866_v0 = vcombine.high %v175_v53, %v179_v55 }
  0xbc   :  { %v482_v3 = vld [vmem:[#allocation2 + $0x9e0] sm:$0xff]  ;;  %3126 = vmatpush2.bf16.msra.mxu0 %v7919_v6 }
  0xbd   :  { %v8168_v8 = vcombine.high %v478_v2, %v482_v3  ;;  %3168 = vmatprep.subr.bf16.mxu1 %v8048_v1  ;;  %v470_v10 = vld [vmem:[#allocation2 + $0x980] sm:$0xff]  ;;  %v8167_v16 = vcombine.low %v478_v2, %v482_v3  ;;  %v171_v1 = vld [vmem:[#allocation2 + $0x28] sm:$0xff]  ;;  %v7865_v3 = vcombine.low %v175_v53, %v179_v55 }
  0xbe   :  { %v474_v11 = vld [vmem:[#allocation2 + $0x9a0] sm:$0xff]  ;;  %3169 = vmatpush2.bf16.msra.mxu1 %v8047_v7  ;;  %v287_v7 = vld [vmem:[#allocation2 + $0x3c8] sm:$0xff] }
  0xbf   :  { %v10173_v12 = vld [vmem:[%s11535_s0] ss:$24 sps:$4 sm:$0xff]   ;;  %3181 = vmatprep.subr.bf16.mxu0 %v8168_v8  ;;  %v8160_v18 = vcombine.high %v470_v10, %v474_v11  ;;  %3224 = vmatprep.subr.bf16.mxu1 %v7914_v9  ;;  %v8159_v25 = vcombine.low %v470_v10, %v474_v11  ;;  %v7858_v8 = vcombine.high %v167_v63, %v171_v1  ;;  %v291_v9 = vld [vmem:[#allocation2 + $0x3e8] sm:$0xff] }
  0xc0   :  { %v8804_v15 = vld [vmem:[%s11535_s0 + $0x8] ss:$24 sps:$4 sm:$0xff]   ;;  %3128 = vmatmul.mubr.bf16.vlgmr.msra.gmra.mxu0 %v10173_v12  ;;  %v7857_v11 = vcombine.low %v167_v63, %v171_v1 }
  0xc1   :  { %v462_v20 = vld [vmem:[#allocation2 + $0x940] sm:$0xff]  ;;  %3171 = vmatmul.mubr.bf16.vlgmr.msra.gmra.mxu1 %v8804_v15  ;;  %3182 = vmatpush1.bf16.msra.mxu0 %v8167_v16  ;;  %v279_v16 = vld [vmem:[#allocation2 + $0x388] sm:$0xff] }
  0xc2   :  { %v466_v21 = vld [vmem:[#allocation2 + $0x960] sm:$0xff]  ;;  %3225 = vmatpush1.bf16.msra.mxu1 %v7913_v17  ;;  %3183 = vmatprep.subr.bf16.mxu0 %v8160_v18  ;;  %v7978_v17 = vcombine.high %v287_v7, %v291_v9  ;;  %v283_v18 = vld [vmem:[#allocation2 + $0x3a8] sm:$0xff] }
  0xc3   :  { %v8152_v27 = vcombine.high %v462_v20, %v466_v21  ;;  %v454_v28 = vld [vmem:[#allocation2 + $0x900] sm:$0xff]  ;;  %3226 = vmatprep.subr.bf16.mxu1 %v7906_v19  ;;  %3213 = vmatprep.mubr.bf16.mxu0 %v10181_v22  ;;  %v8151_v33 = vcombine.low %v462_v20, %v466_v21  ;;  %v7977_v20 = vcombine.low %v287_v7, %v291_v9  ;;  %v355_v9 = vld [vmem:[#allocation2 + $0x5e8] sm:$0xff] }
  0xc4   :  { %v458_v29 = vld [vmem:[#allocation2 + $0x920] sm:$0xff]  ;;  %3256 = vmatprep.mubr.bf16.mxu1 %v10161_v56 }
  0xc5   :  { %3184 = vmatpush1.bf16.msra.mxu0 %v8159_v25  ;;  %v8144_v35 = vcombine.high %v454_v28, %v458_v29  ;;  %v446_v36 = vld [vmem:[#allocation2 + $0x8c0] sm:$0xff]  ;;  %v8143_v41 = vcombine.low %v454_v28, %v458_v29  ;;  %v271_v25 = vld [vmem:[#allocation2 + $0x348] sm:$0xff]  ;;  %v7969_v29 = vcombine.low %v279_v16, %v283_v18 }
  0xc6   :  { %3227 = vmatpush1.bf16.msra.mxu1 %v7905_v26  ;;  %3185 = vmatprep.subr.bf16.mxu0 %v8152_v27  ;;  %v450_v37 = vld [vmem:[#allocation2 + $0x8e0] sm:$0xff]  ;;  %v7970_v26 = vcombine.high %v279_v16, %v283_v18  ;;  %v275_v27 = vld [vmem:[#allocation2 + $0x368] sm:$0xff] }
  0xc7   :  { %3228 = vmatprep.subr.bf16.mxu1 %v7898_v30  ;;  %v8136_v43 = vcombine.high %v446_v36, %v450_v37  ;;  %v438_v44 = vld [vmem:[#allocation2 + $0x880] sm:$0xff]  ;;  %v8135_v48 = vcombine.low %v446_v36, %v450_v37  ;;  %v7961_v37 = vcombine.low %v271_v25, %v275_v27  ;;  %v10189_v16 = vld [vmem:[%s11535_s0 + $0x10] ss:$24 sps:$4 sm:$0xff]  }
  0xc8   :  { %v442_v56 = vld [vmem:[#allocation2 + $0x8a0] sm:$0xff]  ;;  %v343_v18 = vld [vmem:[#allocation2 + $0x588] sm:$0xff] }
  0xc9   :  { %3186 = vmatpush1.bf16.msra.mxu0 %v8151_v33  ;;  %v8128_v50 = vcombine.high %v438_v44, %v442_v56  ;;  %v430_v51 = vld [vmem:[#allocation2 + $0x840] sm:$0xff]  ;;  %v8127_v57 = vcombine.low %v438_v44, %v442_v56  ;;  %v263_v33 = vld [vmem:[#allocation2 + $0x308] sm:$0xff] }
  0xca   :  { %3229 = vmatpush1.bf16.msra.mxu1 %v7897_v34  ;;  %3187 = vmatprep.subr.bf16.mxu0 %v8144_v35  ;;  %v434_v52 = vld [vmem:[#allocation2 + $0x860] sm:$0xff]  ;;  %v7962_v34 = vcombine.high %v271_v25, %v275_v27  ;;  %v267_v35 = vld [vmem:[#allocation2 + $0x328] sm:$0xff] }
  0xcb   :  { %3230 = vmatprep.subr.bf16.mxu1 %v7890_v39  ;;  %v8120_v60 = vcombine.high %v430_v51, %v434_v52  ;;  %v422_v61 = vld [vmem:[#allocation2 + $0x800] sm:$0xff]  ;;  %v8119_v2 = vcombine.low %v430_v51, %v434_v52  ;;  %v7953_v56 = vcombine.low %v263_v33, %v267_v35  ;;  %v335_v27 = vld [vmem:[#allocation2 + $0x548] sm:$0xff] }
  0xcc   :  { %v426_v62 = vld [vmem:[#allocation2 + $0x820] sm:$0xff] }
  0xcd   :  { %3188 = vmatpush1.bf16.msra.mxu0 %v8143_v41  ;;  %v8112_v4 = vcombine.high %v422_v61, %v426_v62  ;;  %v542_v5 = vld [vmem:[#allocation2 + $0xbc0] sm:$0xff]  ;;  %v8111_v10 = vcombine.low %v422_v61, %v426_v62  ;;  %v255_v41 = vld [vmem:[#allocation2 + $0x2c8] sm:$0xff] }
  0xce   :  { %3231 = vmatpush1.bf16.msra.mxu1 %v7889_v42  ;;  %3189 = vmatprep.subr.bf16.mxu0 %v8136_v43  ;;  %v546_v6 = vld [vmem:[#allocation2 + $0xbe0] sm:$0xff]  ;;  %v7954_v42 = vcombine.high %v263_v33, %v267_v35  ;;  %v259_v43 = vld [vmem:[#allocation2 + $0x2e8] sm:$0xff] }
  0xcf   :  { %3232 = vmatprep.subr.bf16.mxu1 %v7882_v46  ;;  %v8232_v13 = vcombine.high %v542_v5, %v546_v6  ;;  %v534_v14 = vld [vmem:[#allocation2 + $0xb80] sm:$0xff]  ;;  %v8231_v19 = vcombine.low %v542_v5, %v546_v6  ;;  %v7945_v52 = vcombine.low %v255_v41, %v259_v43  ;;  %v327_v35 = vld [vmem:[#allocation2 + $0x508] sm:$0xff] }
  0xd0   :  { %v538_v15 = vld [vmem:[#allocation2 + $0xba0] sm:$0xff] }
  0xd1   :  { %3190 = vmatpush1.bf16.msra.mxu0 %v8135_v48  ;;  %v8224_v21 = vcombine.high %v534_v14, %v538_v15  ;;  %v526_v23 = vld [vmem:[#allocation2 + $0xb40] sm:$0xff]  ;;  %v8223_v28 = vcombine.low %v534_v14, %v538_v15  ;;  %v247_v48 = vld [vmem:[#allocation2 + $0x288] sm:$0xff] }
  0xd2   :  { %3233 = vmatpush1.bf16.msra.mxu1 %v7881_v49  ;;  %3191 = vmatprep.subr.bf16.mxu0 %v8128_v50  ;;  %v530_v24 = vld [vmem:[#allocation2 + $0xb60] sm:$0xff]  ;;  %v7946_v49 = vcombine.high %v255_v41, %v259_v43  ;;  %v251_v50 = vld [vmem:[#allocation2 + $0x2a8] sm:$0xff] }
  0xd3   :  { %3234 = vmatprep.subr.bf16.mxu1 %v7874_v54  ;;  %v8216_v30 = vcombine.high %v526_v23, %v530_v24  ;;  %v518_v31 = vld [vmem:[#allocation2 + $0xb00] sm:$0xff]  ;;  %v8215_v36 = vcombine.low %v526_v23, %v530_v24  ;;  %v7937_v62 = vcombine.low %v247_v48, %v251_v50  ;;  %v475_v23 = vld [vmem:[#allocation2 + $0x9a8] sm:$0xff] }
  0xd4   :  { %v522_v32 = vld [vmem:[#allocation2 + $0xb20] sm:$0xff]  ;;  %v323_v43 = vld [vmem:[#allocation2 + $0x4e8] sm:$0xff] }
  0xd5   :  { %3192 = vmatpush1.bf16.msra.mxu0 %v8127_v57  ;;  %v8208_v38 = vcombine.high %v518_v31, %v522_v32  ;;  %v510_v39 = vld [vmem:[#allocation2 + $0xac0] sm:$0xff]  ;;  %v8207_v44 = vcombine.low %v518_v31, %v522_v32  ;;  %v239_v57 = vld [vmem:[#allocation2 + $0x248] sm:$0xff] }
  0xd6   :  { %3235 = vmatpush1.bf16.msra.mxu1 %v7873_v58  ;;  %3193 = vmatprep.subr.bf16.mxu0 %v8120_v60  ;;  %v514_v40 = vld [vmem:[#allocation2 + $0xae0] sm:$0xff]  ;;  %v7938_v58 = vcombine.high %v247_v48, %v251_v50  ;;  %v243_v60 = vld [vmem:[#allocation2 + $0x268] sm:$0xff] }
  0xd7   :  { %3236 = vmatprep.subr.bf16.mxu1 %v7866_v0  ;;  %v8200_v45 = vcombine.high %v510_v39, %v514_v40  ;;  %v502_v46 = vld [vmem:[#allocation2 + $0xa80] sm:$0xff]  ;;  %v8199_v51 = vcombine.low %v510_v39, %v514_v40  ;;  %v7929_v6 = vcombine.low %v239_v57, %v243_v60  ;;  %v467_v31 = vld [vmem:[#allocation2 + $0x968] sm:$0xff] }
  0xd8   :  { %v506_v47 = vld [vmem:[#allocation2 + $0xaa0] sm:$0xff]  ;;  %v459_v39 = vld [vmem:[#allocation2 + $0x928] sm:$0xff] }
  0xd9   :  { %3194 = vmatpush1.bf16.msra.mxu0 %v8119_v2  ;;  %v8192_v53 = vcombine.high %v502_v46, %v506_v47  ;;  %v494_v54 = vld [vmem:[#allocation2 + $0xa40] sm:$0xff]  ;;  %v8191_v61 = vcombine.low %v502_v46, %v506_v47  ;;  %v231_v2 = vld [vmem:[#allocation2 + $0x208] sm:$0xff] }
  0xda   :  { %3237 = vmatpush1.bf16.msra.mxu1 %v7865_v3  ;;  %3195 = vmatprep.subr.bf16.mxu0 %v8112_v4  ;;  %v498_v55 = vld [vmem:[#allocation2 + $0xa60] sm:$0xff]  ;;  %v7930_v3 = vcombine.high %v239_v57, %v243_v60  ;;  %v235_v4 = vld [vmem:[#allocation2 + $0x228] sm:$0xff] }
  0xdb   :  { %3238 = vmatprep.subr.bf16.mxu1 %v7858_v8  ;;  %v8184_v63 = vcombine.high %v494_v54, %v498_v55  ;;  %v486_v0 = vld [vmem:[#allocation2 + $0xa00] sm:$0xff]  ;;  %v8183_v5 = vcombine.low %v494_v54, %v498_v55  ;;  %v351_v8 = vld [vmem:[#allocation2 + $0x5c8] sm:$0xff]  ;;  %v7921_v15 = vcombine.low %v231_v2, %v235_v4 }
  0xdc   :  { %v490_v1 = vld [vmem:[#allocation2 + $0xa20] sm:$0xff]  ;;  %v8041_v24 = vcombine.low %v351_v8, %v355_v9  ;;  %v311_v48 = vld [vmem:[#allocation2 + $0x488] sm:$0xff] }
  0xdd   :  { %3196 = vmatpush1.bf16.msra.mxu0 %v8111_v10  ;;  %v8176_v7 = vcombine.high %v486_v0, %v490_v1  ;;  %v479_v10 = vld [vmem:[#allocation2 + $0x9c8] sm:$0xff]  ;;  %v8175_v14 = vcombine.low %v486_v0, %v490_v1 }
  0xde   :  { %3239 = vmatpush1.bf16.msra.mxu1 %v7857_v11  ;;  %3197 = vmatprep.subr.bf16.mxu0 %v8232_v13  ;;  %v7922_v11 = vcombine.high %v231_v2, %v235_v4  ;;  %v483_v13 = vld [vmem:[#allocation2 + $0x9e8] sm:$0xff] }
  0xdf   :  { %3240 = vmatprep.subr.bf16.mxu1 %v7978_v17  ;;  %v8042_v17 = vcombine.high %v351_v8, %v355_v9  ;;  %v8169_v25 = vcombine.low %v479_v10, %v483_v13  ;;  %v303_v55 = vld [vmem:[#allocation2 + $0x448] sm:$0xff] }
  0xe0   :  { %v307_v57 = vld [vmem:[#allocation2 + $0x468] sm:$0xff] }
  0xe1   :  { %3198 = vmatpush2.bf16.msra.mxu0 %v8231_v19  ;;  %v347_v19 = vld [vmem:[#allocation2 + $0x5a8] sm:$0xff]  ;;  %v7994_v0 = vcombine.high %v303_v55, %v307_v57 }
  0xe2   :  { %3241 = vmatpush2.bf16.msra.mxu1 %v7977_v20  ;;  %3199 = vmatprep.subr.bf16.mxu0 %v8224_v21  ;;  %v471_v20 = vld [vmem:[#allocation2 + $0x988] sm:$0xff]  ;;  %v8170_v21 = vcombine.high %v479_v10, %v483_v13  ;;  %v8033_v32 = vcombine.low %v343_v18, %v347_v19 }
  0xe3   :  { %3242 = vmatprep.subr.bf16.mxu1 %v7970_v26  ;;  %v8034_v26 = vcombine.high %v343_v18, %v347_v19  ;;  %v8161_v33 = vcombine.low %v471_v20, %v475_v23  ;;  %v295_v1 = vld [vmem:[#allocation2 + $0x408] sm:$0xff] }
  0xe4   :  { %v299_v2 = vld [vmem:[#allocation2 + $0x428] sm:$0xff] }
  0xe5   :  { %3200 = vmatpush2.bf16.msra.mxu0 %v8223_v28  ;;  %v339_v28 = vld [vmem:[#allocation2 + $0x568] sm:$0xff]  ;;  %v7986_v8 = vcombine.high %v295_v1, %v299_v2 }
  0xe6   :  { %3243 = vmatpush2.bf16.msra.mxu1 %v7969_v29  ;;  %3201 = vmatprep.subr.bf16.mxu0 %v8216_v30  ;;  %v8162_v29 = vcombine.high %v471_v20, %v475_v23  ;;  %v463_v30 = vld [vmem:[#allocation2 + $0x948] sm:$0xff]  ;;  %v8025_v40 = vcombine.low %v335_v27, %v339_v28 }
  0xe7   :  { %3244 = vmatprep.subr.bf16.mxu1 %v7962_v34  ;;  %v8026_v34 = vcombine.high %v335_v27, %v339_v28  ;;  %v415_v9 = vld [vmem:[#allocation2 + $0x7c8] sm:$0xff] }
  0xe8   :  { %v419_v10 = vld [vmem:[#allocation2 + $0x7e8] sm:$0xff] }
  0xe9   :  { %3202 = vmatpush2.bf16.msra.mxu0 %v8215_v36  ;;  %v331_v36 = vld [vmem:[#allocation2 + $0x528] sm:$0xff]  ;;  %v8106_v18 = vcombine.high %v415_v9, %v419_v10 }
  0xea   :  { %3245 = vmatpush2.bf16.msra.mxu1 %v7961_v37  ;;  %3203 = vmatprep.subr.bf16.mxu0 %v8208_v38  ;;  %v455_v37 = vld [vmem:[#allocation2 + $0x908] sm:$0xff]  ;;  %v8154_v38 = vcombine.high %v463_v30, %v467_v31  ;;  %v8018_v41 = vcombine.high %v327_v35, %v331_v36  ;;  %v8017_v46 = vcombine.low %v327_v35, %v331_v36 }
  0xeb   :  { %3246 = vmatprep.subr.bf16.mxu1 %v7954_v42  ;;  %v319_v42 = vld [vmem:[#allocation2 + $0x4c8] sm:$0xff]  ;;  %v8145_v47 = vcombine.low %v455_v37, %v459_v39 }
  0xec   :  { %v407_v19 = vld [vmem:[#allocation2 + $0x788] sm:$0xff] }
  0xed   :  { %3204 = vmatpush2.bf16.msra.mxu0 %v8207_v44  ;;  %v447_v44 = vld [vmem:[#allocation2 + $0x8c8] sm:$0xff] }
  0xee   :  { %3247 = vmatpush2.bf16.msra.mxu1 %v7953_v56  ;;  %3205 = vmatprep.subr.bf16.mxu0 %v8200_v45  ;;  %v8146_v56 = vcombine.high %v455_v37, %v459_v39  ;;  %v451_v45 = vld [vmem:[#allocation2 + $0x8e8] sm:$0xff] }
  0xef   :  { %3248 = vmatprep.subr.bf16.mxu1 %v7946_v49  ;;  %v439_v49 = vld [vmem:[#allocation2 + $0x888] sm:$0xff]  ;;  %v8138_v50 = vcombine.high %v447_v44, %v451_v45 }
  0xf0   :  { %v411_v20 = vld [vmem:[#allocation2 + $0x7a8] sm:$0xff] }
  0xf1   :  { %3206 = vmatpush2.bf16.msra.mxu0 %v8199_v51  ;;  %v443_v51 = vld [vmem:[#allocation2 + $0x8a8] sm:$0xff]  ;;  %v8098_v27 = vcombine.high %v407_v19, %v411_v20 }
  0xf2   :  { %3249 = vmatpush2.bf16.msra.mxu1 %v7945_v52  ;;  %3207 = vmatprep.subr.bf16.mxu0 %v8192_v53  ;;  %v8009_v52 = vcombine.low %v319_v42, %v323_v43  ;;  %v8137_v53 = vcombine.low %v447_v44, %v451_v45  ;;  %v8130_v60 = vcombine.high %v439_v49, %v443_v51  ;;  %v399_v28 = vld [vmem:[#allocation2 + $0x748] sm:$0xff] }
  0xf3   :  { %3250 = vmatprep.subr.bf16.mxu1 %v7938_v58  ;;  %v431_v58 = vld [vmem:[#allocation2 + $0x848] sm:$0xff] }
  0xf4   :  { %v391_v36 = vld [vmem:[#allocation2 + $0x708] sm:$0xff] }
  0xf5   :  { %3208 = vmatpush2.bf16.msra.mxu0 %v8191_v61  ;;  %v435_v61 = vld [vmem:[#allocation2 + $0x868] sm:$0xff] }
  0xf6   :  { %3251 = vmatpush2.bf16.msra.mxu1 %v7937_v62  ;;  %3209 = vmatprep.subr.bf16.mxu0 %v8184_v63  ;;  %v8129_v63 = vcombine.low %v439_v49, %v443_v51  ;;  %v8122_v4 = vcombine.high %v431_v58, %v435_v61  ;;  %v395_v37 = vld [vmem:[#allocation2 + $0x728] sm:$0xff] }
  0xf7   :  { %3252 = vmatprep.subr.bf16.mxu1 %v7930_v3  ;;  %v423_v3 = vld [vmem:[#allocation2 + $0x808] sm:$0xff] }
  0xf8   :  { %v387_v44 = vld [vmem:[#allocation2 + $0x6e8] sm:$0xff] }
  0xf9   :  { %3210 = vmatpush2.bf16.msra.mxu0 %v8183_v5  ;;  %v427_v5 = vld [vmem:[#allocation2 + $0x828] sm:$0xff] }
  0xfa   :  { %3253 = vmatpush2.bf16.msra.mxu1 %v7929_v6  ;;  %3211 = vmatprep.subr.bf16.mxu0 %v8176_v7  ;;  %v7993_v6 = vcombine.low %v303_v55, %v307_v57  ;;  %v8121_v7 = vcombine.low %v431_v58, %v435_v61  ;;  %v8114_v13 = vcombine.high %v423_v3, %v427_v5  ;;  %v379_v49 = vld [vmem:[#allocation2 + $0x6a8] sm:$0xff] }
  0xfb   :  { %3254 = vmatprep.subr.bf16.mxu1 %v7922_v11  ;;  %v543_v11 = vld [vmem:[#allocation2 + $0xbc8] sm:$0xff] }
  0xfc   :  { %v367_v57 = vld [vmem:[#allocation2 + $0x648] sm:$0xff] }
  0xfd   :  { %3212 = vmatpush2.bf16.msra.mxu0 %v8175_v14  ;;  %v547_v14 = vld [vmem:[#allocation2 + $0xbe8] sm:$0xff] }
  0xfe   :  { %3255 = vmatpush2.bf16.msra.mxu1 %v7921_v15  ;;  %3267 = vmatprep.subr.bf16.mxu0 %v8042_v17  ;;  %v7985_v15 = vcombine.low %v295_v1, %v299_v2  ;;  %v8113_v17 = vcombine.low %v423_v3, %v427_v5  ;;  %v8234_v23 = vcombine.high %v543_v11, %v547_v14  ;;  %v371_v58 = vld [vmem:[#allocation2 + $0x668] sm:$0xff] }
  0xff   :  { %3310 = vmatprep.subr.bf16.mxu1 %v8170_v21  ;;  %v535_v21 = vld [vmem:[#allocation2 + $0xb88] sm:$0xff]  ;;  %v8058_v1 = vcombine.high %v367_v57, %v371_v58 }
 0x100   :  { %3214 = vmatmul.mubr.bf16.vlgmr.msra.gmra.mxu0 %v10189_v16  ;;  %v359_v2 = vld [vmem:[#allocation2 + $0x608] sm:$0xff] }
 0x101   :  { %3257 = vmatmul.mubr.bf16.vlgmr.msra.gmra.mxu1 %v10173_v12  ;;  %3268 = vmatpush1.bf16.msra.mxu0 %v8041_v24  ;;  %v8153_v12 = vcombine.low %v463_v30, %v467_v31  ;;  %v539_v24 = vld [vmem:[#allocation2 + $0xba8] sm:$0xff] }
 0x102   :  { %3311 = vmatpush1.bf16.msra.mxu1 %v8169_v25  ;;  %3269 = vmatprep.subr.bf16.mxu0 %v8034_v26  ;;  %v8105_v25 = vcombine.low %v415_v9, %v419_v10  ;;  %v8233_v26 = vcombine.low %v543_v11, %v547_v14  ;;  %v527_v30 = vld [vmem:[#allocation2 + $0xb48] sm:$0xff]  ;;  %v8226_v31 = vcombine.high %v535_v21, %v539_v24  ;;  %v224_v10 = vld [vmem:[#allocation2 + $0x1d0] sm:$0xff] }
 0x103   :  { %3312 = vmatprep.subr.bf16.mxu1 %v8162_v29  ;;  %3299 = vmatprep.mubr.bf16.mxu0 %v10166_v59  ;;  %v8010_v59 = vcombine.high %v319_v42, %v323_v43  ;;  %v403_v29 = vld [vmem:[#allocation2 + $0x768] sm:$0xff]  ;;  %v8082_v42 = vcombine.high %v391_v36, %v395_v37  ;;  %v228_v11 = vld [vmem:[#allocation2 + $0x1f0] sm:$0xff] }
 0x104   :  { %3342 = vmatprep.mubr.bf16.mxu1 %v10181_v22  ;;  %v315_v22 = vld [vmem:[#allocation2 + $0x4a8] sm:$0xff]  ;;  %v8090_v35 = vcombine.high %v399_v28, %v403_v29 }
 0x105   :  { %3270 = vmatpush1.bf16.msra.mxu0 %v8033_v32  ;;  %v8002_v54 = vcombine.high %v311_v48, %v315_v22  ;;  %v8001_v62 = vcombine.low %v311_v48, %v315_v22  ;;  %v531_v32 = vld [vmem:[#allocation2 + $0xb68] sm:$0xff] }
 0x106   :  { %3313 = vmatpush1.bf16.msra.mxu1 %v8161_v33  ;;  %3271 = vmatprep.subr.bf16.mxu0 %v8026_v34  ;;  %v8097_v33 = vcombine.low %v407_v19, %v411_v20  ;;  %v8225_v34 = vcombine.low %v535_v21, %v539_v24  ;;  %v8218_v39 = vcombine.high %v527_v30, %v531_v32  ;;  %v383_v43 = vld [vmem:[#allocation2 + $0x6c8] sm:$0xff]  ;;  %v216_v20 = vld [vmem:[#allocation2 + $0x190] sm:$0xff] }
 0x107   :  { %3314 = vmatprep.subr.bf16.mxu1 %v8154_v38  ;;  %v519_v38 = vld [vmem:[#allocation2 + $0xb08] sm:$0xff]  ;;  %v8074_v48 = vcombine.high %v383_v43, %v387_v44  ;;  %v7916_v19 = vcombine.high %v224_v10, %v228_v11  ;;  %v220_v21 = vld [vmem:[#allocation2 + $0x1b0] sm:$0xff] }
 0x108   :  { %v375_v22 = vld [vmem:[#allocation2 + $0x688] sm:$0xff] }
 0x109   :  { %3272 = vmatpush1.bf16.msra.mxu0 %v8025_v40  ;;  %v523_v40 = vld [vmem:[#allocation2 + $0xb28] sm:$0xff]  ;;  %v8066_v55 = vcombine.high %v375_v22, %v379_v49 }
 0x10a   :  { %3315 = vmatpush1.bf16.msra.mxu1 %v8153_v12  ;;  %3273 = vmatprep.subr.bf16.mxu0 %v8018_v41  ;;  %v8089_v12 = vcombine.low %v399_v28, %v403_v29  ;;  %v8217_v41 = vcombine.low %v527_v30, %v531_v32  ;;  %v8210_v45 = vcombine.high %v519_v38, %v523_v40  ;;  %v363_v3 = vld [vmem:[#allocation2 + $0x628] sm:$0xff]  ;;  %v208_v29 = vld [vmem:[#allocation2 + $0x150] sm:$0xff] }
 0x10b   :  { %3316 = vmatprep.subr.bf16.mxu1 %v8146_v56  ;;  %v511_v56 = vld [vmem:[#allocation2 + $0xac8] sm:$0xff]  ;;  %v8050_v9 = vcombine.high %v359_v2, %v363_v3  ;;  %v7908_v28 = vcombine.high %v216_v20, %v220_v21  ;;  %v212_v30 = vld [vmem:[#allocation2 + $0x170] sm:$0xff] }
 0x10d   :  { %3274 = vmatpush1.bf16.msra.mxu0 %v8017_v46  ;;  %v515_v46 = vld [vmem:[#allocation2 + $0xae8] sm:$0xff] }
 0x10e   :  { %3317 = vmatpush1.bf16.msra.mxu1 %v8145_v47  ;;  %3275 = vmatprep.subr.bf16.mxu0 %v8010_v59  ;;  %v8081_v47 = vcombine.low %v391_v36, %v395_v37  ;;  %v8209_v59 = vcombine.low %v519_v38, %v523_v40  ;;  %v8202_v51 = vcombine.high %v511_v56, %v515_v46  ;;  %v200_v38 = vld [vmem:[#allocation2 + $0x110] sm:$0xff] }
 0x10f   :  { %3318 = vmatprep.subr.bf16.mxu1 %v8138_v50  ;;  %v503_v50 = vld [vmem:[#allocation2 + $0xa88] sm:$0xff]  ;;  %v7900_v37 = vcombine.high %v208_v29, %v212_v30  ;;  %v328_v40 = vld [vmem:[#allocation2 + $0x510] sm:$0xff] }
 0x111   :  { %3276 = vmatpush1.bf16.msra.mxu0 %v8009_v52  ;;  %v507_v52 = vld [vmem:[#allocation2 + $0xaa8] sm:$0xff] }
 0x112   :  { %3319 = vmatpush1.bf16.msra.mxu1 %v8137_v53  ;;  %3277 = vmatprep.subr.bf16.mxu0 %v8002_v54  ;;  %v8073_v53 = vcombine.low %v383_v43, %v387_v44  ;;  %v8201_v54 = vcombine.low %v511_v56, %v515_v46  ;;  %v8194_v61 = vcombine.high %v503_v50, %v507_v52  ;;  %v196_v46 = vld [vmem:[#allocation2 + $0xf0] sm:$0xff] }
 0x113   :  { %3320 = vmatprep.subr.bf16.mxu1 %v8130_v60  ;;  %v495_v60 = vld [vmem:[#allocation2 + $0xa48] sm:$0xff]  ;;  %v7899_v43 = vcombine.low %v208_v29, %v212_v30 }
 0x115   :  { %3278 = vmatpush1.bf16.msra.mxu0 %v8001_v62  ;;  %v499_v62 = vld [vmem:[#allocation2 + $0xa68] sm:$0xff] }
 0x116   :  { %3321 = vmatpush1.bf16.msra.mxu1 %v8129_v63  ;;  %3279 = vmatprep.subr.bf16.mxu0 %v7994_v0  ;;  %v8065_v63 = vcombine.low %v375_v22, %v379_v49  ;;  %v8193_v0 = vcombine.low %v503_v50, %v507_v52  ;;  %v8186_v5 = vcombine.high %v495_v60, %v499_v62  ;;  %v188_v52 = vld [vmem:[#allocation2 + $0xb0] sm:$0xff] }
 0x117   :  { %3322 = vmatprep.subr.bf16.mxu1 %v8122_v4  ;;  %v487_v4 = vld [vmem:[#allocation2 + $0xa08] sm:$0xff] }
 0x119   :  { %3280 = vmatpush1.bf16.msra.mxu0 %v7993_v6  ;;  %v491_v6 = vld [vmem:[#allocation2 + $0xa28] sm:$0xff] }
 0x11a   :  { %3323 = vmatpush1.bf16.msra.mxu1 %v8121_v7  ;;  %3281 = vmatprep.subr.bf16.mxu0 %v7986_v8  ;;  %v8057_v7 = vcombine.low %v367_v57, %v371_v58  ;;  %v8185_v8 = vcombine.low %v495_v60, %v499_v62  ;;  %v8178_v14 = vcombine.high %v487_v4, %v491_v6  ;;  %v180_v62 = vld [vmem:[#allocation2 + $0x70] sm:$0xff] }
 0x11b   :  { %3324 = vmatprep.subr.bf16.mxu1 %v8114_v13  ;;  %v352_v13 = vld [vmem:[#allocation2 + $0x5d0] sm:$0xff] }
 0x11d   :  { %3282 = vmatpush1.bf16.msra.mxu0 %v7985_v15  ;;  %v356_v15 = vld [vmem:[#allocation2 + $0x5f0] sm:$0xff] }
 0x11e   :  { %3325 = vmatpush1.bf16.msra.mxu1 %v8113_v17  ;;  %3283 = vmatprep.subr.bf16.mxu0 %v8106_v18  ;;  %v8049_v17 = vcombine.low %v359_v2, %v363_v3  ;;  %v8177_v18 = vcombine.low %v487_v4, %v491_v6  ;;  %v8044_v24 = vcombine.high %v352_v13, %v356_v15  ;;  %v172_v6 = vld [vmem:[#allocation2 + $0x30] sm:$0xff] }
 0x11f   :  { %3326 = vmatprep.subr.bf16.mxu1 %v8234_v23  ;;  %v344_v23 = vld [vmem:[#allocation2 + $0x590] sm:$0xff] }
 0x121   :  { %3284 = vmatpush2.bf16.msra.mxu0 %v8105_v25  ;;  %v348_v25 = vld [vmem:[#allocation2 + $0x5b0] sm:$0xff] }
 0x122   :  { %3327 = vmatpush2.bf16.msra.mxu1 %v8233_v26  ;;  %3285 = vmatprep.subr.bf16.mxu0 %v8098_v27  ;;  %v7915_v26 = vcombine.low %v224_v10, %v228_v11  ;;  %v8043_v27 = vcombine.low %v352_v13, %v356_v15  ;;  %v8036_v32 = vcombine.high %v344_v23, %v348_v25  ;;  %v292_v15 = vld [vmem:[#allocation2 + $0x3f0] sm:$0xff] }
 0x123   :  { %3328 = vmatprep.subr.bf16.mxu1 %v8226_v31  ;;  %v336_v31 = vld [vmem:[#allocation2 + $0x550] sm:$0xff]  ;;  %v8035_v36 = vcombine.low %v344_v23, %v348_v25 }
 0x124   :  { %v284_v25 = vld [vmem:[#allocation2 + $0x3b0] sm:$0xff] }
 0x125   :  { %3286 = vmatpush2.bf16.msra.mxu0 %v8097_v33  ;;  %v340_v33 = vld [vmem:[#allocation2 + $0x570] sm:$0xff] }
 0x126   :  { %3329 = vmatpush2.bf16.msra.mxu1 %v8225_v34  ;;  %3287 = vmatprep.subr.bf16.mxu0 %v8090_v35  ;;  %v10198_v34 = vld [vmem:[%s11535_s0 + $0x8] ss:$24 sps:$4 sm:$0xff]   ;;  %v7907_v35 = vcombine.low %v216_v20, %v220_v21  ;;  %v8027_v44 = vcombine.low %v336_v31, %v340_v33 }
 0x127   :  { %3330 = vmatprep.subr.bf16.mxu1 %v8218_v39  ;;  %v204_v39 = vld [vmem:[#allocation2 + $0x130] sm:$0xff] }
 0x128   :  { %v7892_v56 = vcombine.high %v200_v38, %v204_v39  ;;  %v7891_v22 = vcombine.low %v200_v38, %v204_v39 }
 0x129   :  { %3288 = vmatpush2.bf16.msra.mxu0 %v8089_v12  ;;  %v8028_v12 = vcombine.high %v336_v31, %v340_v33  ;;  %v276_v33 = vld [vmem:[#allocation2 + $0x370] sm:$0xff] }
 0x12a   :  { %3331 = vmatpush2.bf16.msra.mxu1 %v8217_v41  ;;  %3289 = vmatprep.subr.bf16.mxu0 %v8082_v42  ;;  %v332_v41 = vld [vmem:[#allocation2 + $0x530] sm:$0xff]  ;;  %v10205_v42 = vld [vmem:[%s11535_s0 + $0x4] ss:$24 sps:$4 sm:$0xff]  }
 0x12b   :  { %3332 = vmatprep.subr.bf16.mxu1 %v8210_v45  ;;  %v192_v45 = vld [vmem:[#allocation2 + $0xd0] sm:$0xff]  ;;  %v8019_v49 = vcombine.low %v328_v40, %v332_v41 }
 0x12c   :  { %v7884_v50 = vcombine.high %v192_v45, %v196_v46  ;;  %v7883_v57 = vcombine.low %v192_v45, %v196_v46 }
 0x12d   :  { %3290 = vmatpush2.bf16.msra.mxu0 %v8081_v47  ;;  %v320_v47 = vld [vmem:[#allocation2 + $0x4d0] sm:$0xff] }
 0x12e   :  { %3333 = vmatpush2.bf16.msra.mxu1 %v8209_v59  ;;  %3291 = vmatprep.subr.bf16.mxu0 %v8074_v48  ;;  %v8020_v59 = vcombine.high %v328_v40, %v332_v41  ;;  %v324_v48 = vld [vmem:[#allocation2 + $0x4f0] sm:$0xff] }
 0x12f   :  { %3334 = vmatprep.subr.bf16.mxu1 %v8202_v51  ;;  %v184_v51 = vld [vmem:[#allocation2 + $0x90] sm:$0xff]  ;;  %v8011_v58 = vcombine.low %v320_v47, %v324_v48 }
 0x130   :  { %v7876_v60 = vcombine.high %v184_v51, %v188_v52  ;;  %v7875_v2 = vcombine.low %v184_v51, %v188_v52  ;;  %v268_v41 = vld [vmem:[#allocation2 + $0x330] sm:$0xff] }
 0x131   :  { %3292 = vmatpush2.bf16.msra.mxu0 %v8073_v53  ;;  %v312_v53 = vld [vmem:[#allocation2 + $0x490] sm:$0xff] }
 0x132   :  { %3335 = vmatpush2.bf16.msra.mxu1 %v8201_v54  ;;  %3293 = vmatprep.subr.bf16.mxu0 %v8066_v55  ;;  %v8012_v54 = vcombine.high %v320_v47, %v324_v48  ;;  %v316_v55 = vld [vmem:[#allocation2 + $0x4b0] sm:$0xff] }
 0x133   :  { %3336 = vmatprep.subr.bf16.mxu1 %v8194_v61  ;;  %v176_v61 = vld [vmem:[#allocation2 + $0x50] sm:$0xff]  ;;  %v8003_v3 = vcombine.low %v312_v53, %v316_v55 }
 0x134   :  { %v7868_v4 = vcombine.high %v176_v61, %v180_v62  ;;  %v7867_v10 = vcombine.low %v176_v61, %v180_v62  ;;  %v256_v47 = vld [vmem:[#allocation2 + $0x2d0] sm:$0xff] }
 0x135   :  { %3294 = vmatpush2.bf16.msra.mxu0 %v8065_v63  ;;  %v304_v63 = vld [vmem:[#allocation2 + $0x450] sm:$0xff] }
 0x136   :  { %3337 = vmatpush2.bf16.msra.mxu1 %v8193_v0  ;;  %3295 = vmatprep.subr.bf16.mxu0 %v8058_v1  ;;  %v8004_v0 = vcombine.high %v312_v53, %v316_v55  ;;  %v308_v1 = vld [vmem:[#allocation2 + $0x470] sm:$0xff] }
 0x137   :  { %3338 = vmatprep.subr.bf16.mxu1 %v8186_v5  ;;  %v168_v5 = vld [vmem:[#allocation2 + $0x10] sm:$0xff]  ;;  %v7995_v11 = vcombine.low %v304_v63, %v308_v1 }
 0x138   :  { %v7860_v13 = vcombine.high %v168_v5, %v172_v6  ;;  %v7859_v20 = vcombine.low %v168_v5, %v172_v6  ;;  %v384_v48 = vld [vmem:[#allocation2 + $0x6d0] sm:$0xff]  ;;  %v1105_v5 = vlaneseq }
 0x139   :  { %3296 = vmatpush2.bf16.msra.mxu0 %v8057_v7  ;;  %v296_v7 = vld [vmem:[#allocation2 + $0x410] sm:$0xff] }
 0x13a   :  { %3339 = vmatpush2.bf16.msra.mxu1 %v8185_v8  ;;  %3297 = vmatprep.subr.bf16.mxu0 %v8050_v9  ;;  %v7996_v8 = vcombine.high %v304_v63, %v308_v1  ;;  %v300_v9 = vld [vmem:[#allocation2 + $0x430] sm:$0xff] }
 0x13b   :  { %3340 = vmatprep.subr.bf16.mxu1 %v8178_v14  ;;  %v288_v14 = vld [vmem:[#allocation2 + $0x3d0] sm:$0xff]  ;;  %v7987_v21 = vcombine.low %v296_v7, %v300_v9 }
 0x13c   :  { %v7980_v23 = vcombine.high %v288_v14, %v292_v15  ;;  %v7979_v29 = vcombine.low %v288_v14, %v292_v15  ;;  %v248_v53 = vld [vmem:[#allocation2 + $0x290] sm:$0xff]  ;;  %v10211_v15 = vshrl.u32 %v1105_v5, 7  ;;  %v197_v5 = vld [vmem:[#allocation2 + $0xf8] sm:$0xff] }
 0x13d   :  { %3298 = vmatpush2.bf16.msra.mxu0 %v8049_v17  ;;  %v416_v17 = vld [vmem:[#allocation2 + $0x7d0] sm:$0xff] }
 0x13e   :  { %3341 = vmatpush2.bf16.msra.mxu1 %v8177_v18  ;;  %3353 = vmatprep.subr.bf16.mxu0 %v7916_v19  ;;  %v7988_v18 = vcombine.high %v296_v7, %v300_v9  ;;  %v420_v19 = vld [vmem:[#allocation2 + $0x7f0] sm:$0xff] }
 0x13f   :  { %3396 = vmatprep.subr.bf16.mxu1 %v8044_v24  ;;  %v280_v24 = vld [vmem:[#allocation2 + $0x390] sm:$0xff]  ;;  %v8107_v30 = vcombine.low %v416_v17, %v420_v19 }
 0x140   :  { %3300 = vmatmul.mubr.bf16.vlgmr.msra.gmra.mxu0 %v10198_v34  ;;  %v7972_v31 = vcombine.high %v280_v24, %v284_v25  ;;  %v7971_v38 = vcombine.low %v280_v24, %v284_v25  ;;  %v376_v55 = vld [vmem:[#allocation2 + $0x690] sm:$0xff]  ;;  %v229_v24 = vld [vmem:[#allocation2 + $0x1f8] sm:$0xff]  ;;  %v550_v25 = vld [vmem:[#allocation4] sm:$0xff] }
 0x141   :  { %3343 = vmatmul.mubr.bf16.vlgmr.msra.gmra.mxu1 %v10189_v16  ;;  %3354 = vmatpush1.bf16.msra.mxu0 %v7915_v26  ;;  %v9626_v16 = vld [vmem:[%s11535_s0 + $0xc] ss:$24 sps:$4 sm:$0xff]   ;;  %v408_v26 = vld [vmem:[#allocation2 + $0x790] sm:$0xff] }
 0x142   :  { %3397 = vmatpush1.bf16.msra.mxu1 %v8043_v27  ;;  %3355 = vmatprep.subr.bf16.mxu0 %v7908_v28  ;;  %v8108_v27 = vcombine.high %v416_v17, %v420_v19  ;;  %v412_v28 = vld [vmem:[#allocation2 + $0x7b0] sm:$0xff] }
 0x143   :  { %3398 = vmatprep.subr.bf16.mxu1 %v8036_v32  ;;  %3385 = vmatprep.mubr.bf16.mxu0 %v10205_v42  ;;  %v272_v32 = vld [vmem:[#allocation2 + $0x350] sm:$0xff]  ;;  %v8099_v39 = vcombine.low %v408_v26, %v412_v28 }
 0x144   :  { %3428 = vmatprep.mubr.bf16.mxu1 %v9626_v16  ;;  %v7964_v40 = vcombine.high %v272_v32, %v276_v33  ;;  %v392_v16 = vld [vmem:[#allocation2 + $0x710] sm:$0xff] }
 0x145   :  { %3356 = vmatpush1.bf16.msra.mxu0 %v7907_v35  ;;  %v400_v35 = vld [vmem:[#allocation2 + $0x750] sm:$0xff] }
 0x146   :  { %3399 = vmatpush1.bf16.msra.mxu1 %v8035_v36  ;;  %3357 = vmatprep.subr.bf16.mxu0 %v7900_v37  ;;  %v8100_v36 = vcombine.high %v408_v26, %v412_v28  ;;  %v404_v37 = vld [vmem:[#allocation2 + $0x770] sm:$0xff] }
 0x147   :  { %3400 = vmatprep.subr.bf16.mxu1 %v8028_v12  ;;  %v264_v12 = vld [vmem:[#allocation2 + $0x310] sm:$0xff]  ;;  %v8091_v45 = vcombine.low %v400_v35, %v404_v37 }
 0x148   :  { %v7956_v46 = vcombine.high %v264_v12, %v268_v41  ;;  %v240_v63 = vld [vmem:[#allocation2 + $0x250] sm:$0xff] }
 0x149   :  { %3358 = vmatpush1.bf16.msra.mxu0 %v7899_v43  ;;  %v8092_v43 = vcombine.high %v400_v35, %v404_v37  ;;  %v368_v1 = vld [vmem:[#allocation2 + $0x650] sm:$0xff]  ;;  %v221_v35 = vld [vmem:[#allocation2 + $0x1b8] sm:$0xff] }
 0x14a   :  { %3401 = vmatpush1.bf16.msra.mxu1 %v8027_v44  ;;  %3359 = vmatprep.subr.bf16.mxu0 %v7892_v56  ;;  %v396_v44 = vld [vmem:[#allocation2 + $0x730] sm:$0xff]  ;;  %v7963_v56 = vcombine.low %v272_v32, %v276_v33  ;;  %v217_v32 = vld [vmem:[#allocation2 + $0x198] sm:$0xff] }
 0x14b   :  { %3402 = vmatprep.subr.bf16.mxu1 %v8020_v59  ;;  %v260_v59 = vld [vmem:[#allocation2 + $0x2f0] sm:$0xff]  ;;  %v8083_v51 = vcombine.low %v392_v16, %v396_v44 }
 0x14c   :  { %v7948_v52 = vcombine.high %v256_v47, %v260_v59  ;;  %v236_v9 = vld [vmem:[#allocation2 + $0x230] sm:$0xff] }
 0x14d   :  { %3360 = vmatpush1.bf16.msra.mxu0 %v7891_v22  ;;  %v8084_v22 = vcombine.high %v392_v16, %v396_v44  ;;  %v480_v19 = vld [vmem:[#allocation2 + $0x9d0] sm:$0xff]  ;;  %v209_v44 = vld [vmem:[#allocation2 + $0x158] sm:$0xff] }
 0x14e   :  { %3403 = vmatpush1.bf16.msra.mxu1 %v8019_v49  ;;  %3361 = vmatprep.subr.bf16.mxu0 %v7884_v50  ;;  %v388_v49 = vld [vmem:[#allocation2 + $0x6f0] sm:$0xff]  ;;  %v7955_v50 = vcombine.low %v264_v12, %v268_v41 }
 0x14f   :  { %3404 = vmatprep.subr.bf16.mxu1 %v8012_v54  ;;  %v252_v54 = vld [vmem:[#allocation2 + $0x2b0] sm:$0xff]  ;;  %v8075_v61 = vcombine.low %v384_v48, %v388_v49 }
 0x150   :  { %v7940_v62 = vcombine.high %v248_v53, %v252_v54  ;;  %v464_v12 = vld [vmem:[#allocation2 + $0x950] sm:$0xff] }
 0x151   :  { %3362 = vmatpush1.bf16.msra.mxu0 %v7883_v57  ;;  %v8076_v57 = vcombine.high %v384_v48, %v388_v49  ;;  %v468_v41 = vld [vmem:[#allocation2 + $0x970] sm:$0xff]  ;;  %v7909_v48 = vcombine.low %v217_v32, %v221_v35 }
 0x152   :  { %3405 = vmatpush1.bf16.msra.mxu1 %v8011_v58  ;;  %3363 = vmatprep.subr.bf16.mxu0 %v7876_v60  ;;  %v380_v58 = vld [vmem:[#allocation2 + $0x6b0] sm:$0xff]  ;;  %v7947_v60 = vcombine.low %v256_v47, %v260_v59 }
 0x153   :  { %3406 = vmatprep.subr.bf16.mxu1 %v8004_v0  ;;  %v244_v0 = vld [vmem:[#allocation2 + $0x270] sm:$0xff]  ;;  %v8067_v6 = vcombine.low %v376_v55, %v380_v58 }
 0x154   :  { %v7932_v7 = vcombine.high %v240_v63, %v244_v0  ;;  %v7931_v14 = vcombine.low %v240_v63, %v244_v0 }
 0x155   :  { %3364 = vmatpush1.bf16.msra.mxu0 %v7875_v2  ;;  %v8068_v2 = vcombine.high %v376_v55, %v380_v58  ;;  %v201_v55 = vld [vmem:[#allocation2 + $0x118] sm:$0xff] }
 0x156   :  { %3407 = vmatpush1.bf16.msra.mxu1 %v8003_v3  ;;  %3365 = vmatprep.subr.bf16.mxu0 %v7868_v4  ;;  %v372_v3 = vld [vmem:[#allocation2 + $0x670] sm:$0xff]  ;;  %v7939_v4 = vcombine.low %v248_v53, %v252_v54 }
 0x157   :  { %3408 = vmatprep.subr.bf16.mxu1 %v7996_v8  ;;  %v232_v8 = vld [vmem:[#allocation2 + $0x210] sm:$0xff]  ;;  %v8059_v17 = vcombine.low %v368_v1, %v372_v3 }
 0x158   :  { %v7923_v26 = vcombine.low %v232_v8, %v236_v9  ;;  %v460_v53 = vld [vmem:[#allocation2 + $0x930] sm:$0xff] }
 0x159   :  { %3366 = vmatpush1.bf16.msra.mxu0 %v7867_v10  ;;  %v360_v10 = vld [vmem:[#allocation2 + $0x610] sm:$0xff] }
 0x15a   :  { %3409 = vmatpush1.bf16.msra.mxu1 %v7995_v11  ;;  %3367 = vmatprep.subr.bf16.mxu0 %v7860_v13  ;;  %v8060_v11 = vcombine.high %v368_v1, %v372_v3  ;;  %v364_v13 = vld [vmem:[#allocation2 + $0x630] sm:$0xff] }
 0x15b   :  { %3410 = vmatprep.subr.bf16.mxu1 %v7988_v18  ;;  %v7924_v18 = vcombine.high %v232_v8, %v236_v9  ;;  %v8051_v28 = vcombine.low %v360_v10, %v364_v13  ;;  %v452_v3 = vld [vmem:[#allocation2 + $0x8f0] sm:$0xff] }
 0x15c   :  { %v440_v9 = vld [vmem:[#allocation2 + $0x890] sm:$0xff] }
 0x15d   :  { %3368 = vmatpush1.bf16.msra.mxu0 %v7859_v20  ;;  %v484_v20 = vld [vmem:[#allocation2 + $0x9f0] sm:$0xff] }
 0x15e   :  { %3411 = vmatpush1.bf16.msra.mxu1 %v7987_v21  ;;  %3369 = vmatprep.subr.bf16.mxu0 %v7980_v23  ;;  %v225_v21 = vld [vmem:[#allocation2 + $0x1d8] sm:$0xff]  ;;  %v8052_v23 = vcombine.high %v360_v10, %v364_v13  ;;  %v8171_v37 = vcombine.low %v480_v19, %v484_v20  ;;  %v444_v10 = vld [vmem:[#allocation2 + $0x8b0] sm:$0xff] }
 0x15f   :  { %3412 = vmatprep.subr.bf16.mxu1 %v8108_v27  ;;  %v10214_v27 = vsub.s32 0, %v10211_v15  ;;  %v7918_v33 = vcombine.high %v225_v21, %v229_v24  ;;  %v189_v13 = vld [vmem:[#allocation2 + $0xb8] sm:$0xff] }
 0x161   :  { %3370 = vmatpush2.bf16.msra.mxu0 %v7979_v29  ;;  %v8172_v29 = vcombine.high %v480_v19, %v484_v20  ;;  %v432_v19 = vld [vmem:[#allocation2 + $0x850] sm:$0xff] }
 0x162   :  { %3413 = vmatpush2.bf16.msra.mxu1 %v8107_v30  ;;  %3371 = vmatprep.subr.bf16.mxu0 %v7972_v31  ;;  %v472_v30 = vld [vmem:[#allocation2 + $0x990] sm:$0xff] }
 0x163   :  { %3414 = vmatprep.subr.bf16.mxu1 %v8100_v36  ;;  %v476_v31 = vld [vmem:[#allocation2 + $0x9b0] sm:$0xff]  ;;  %v1108_v36 = vrot.slane %v550_v25, %v10214_v27  ;;  %v8131_v25 = vcombine.low %v440_v9, %v444_v10 }
 0x164   :  { %v8163_v47 = vcombine.low %v472_v30, %v476_v31  ;;  %v436_v20 = vld [vmem:[#allocation2 + $0x870] sm:$0xff] }
 0x165   :  { %3372 = vmatpush2.bf16.msra.mxu0 %v7971_v38  ;;  %v7917_v38 = vcombine.low %v225_v21, %v229_v24  ;;  %v177_v21 = vld [vmem:[#allocation2 + $0x58] sm:$0xff] }
 0x166   :  { %3415 = vmatpush2.bf16.msra.mxu1 %v8099_v39  ;;  %3373 = vmatprep.subr.bf16.mxu0 %v7964_v40  ;;  %v8164_v39 = vcombine.high %v472_v30, %v476_v31  ;;  %v7910_v40 = vcombine.high %v217_v32, %v221_v35  ;;  %v181_v24 = vld [vmem:[#allocation2 + $0x78] sm:$0xff]  ;;  %v428_v30 = vld [vmem:[#allocation2 + $0x830] sm:$0xff]  ;;  %v8123_v35 = vcombine.low %v432_v19, %v436_v20 }
 0x167   :  { %3416 = vmatprep.subr.bf16.mxu1 %v8092_v43  ;;  %v10220_v43 = vld [vmem:[%s11535_s0] ss:$24 sps:$4 sm:$0xff]   ;;  %v7870_v32 = vcombine.high %v177_v21, %v181_v24 }
 0x168   :  { %v169_v31 = vld [vmem:[#allocation2 + $0x18] sm:$0xff] }
 0x169   :  { %3374 = vmatpush2.bf16.msra.mxu0 %v7963_v56  ;;  %v213_v56 = vld [vmem:[#allocation2 + $0x178] sm:$0xff] }
 0x16a   :  { %3417 = vmatpush2.bf16.msra.mxu1 %v8091_v45  ;;  %3375 = vmatprep.subr.bf16.mxu0 %v7956_v46 }
 0x16b   :  { %3418 = vmatprep.subr.bf16.mxu1 %v8084_v22  ;;  %v8156_v22 = vcombine.high %v464_v12, %v468_v41 }
 0x16d   :  { %3376 = vmatpush2.bf16.msra.mxu0 %v7955_v50 }
 0x16e   :  { %3419 = vmatpush2.bf16.msra.mxu1 %v8083_v51  ;;  %3377 = vmatprep.subr.bf16.mxu0 %v7948_v52  ;;  %v7902_v51 = vcombine.high %v209_v44, %v213_v56  ;;  %v456_v52 = vld [vmem:[#allocation2 + $0x910] sm:$0xff] }
 0x16f   :  { %3420 = vmatprep.subr.bf16.mxu1 %v8076_v57  ;;  %v205_v57 = vld [vmem:[#allocation2 + $0x138] sm:$0xff]  ;;  %v8148_v63 = vcombine.high %v456_v52, %v460_v53 }
 0x170   :  { %v7894_v1 = vcombine.high %v201_v55, %v205_v57 }
 0x171   :  { %3378 = vmatpush2.bf16.msra.mxu0 %v7947_v60  ;;  %v8155_v60 = vcombine.low %v464_v12, %v468_v41  ;;  %v293_v41 = vld [vmem:[#allocation2 + $0x3f8] sm:$0xff] }
 0x172   :  { %3421 = vmatpush2.bf16.msra.mxu1 %v8075_v61  ;;  %3379 = vmatprep.subr.bf16.mxu0 %v7940_v62  ;;  %v7901_v62 = vcombine.low %v209_v44, %v213_v56 }
 0x173   :  { %3422 = vmatprep.subr.bf16.mxu1 %v8068_v2  ;;  %v448_v2 = vld [vmem:[#allocation2 + $0x8d0] sm:$0xff] }
 0x175   :  { %3380 = vmatpush2.bf16.msra.mxu0 %v7939_v4  ;;  %v193_v4 = vld [vmem:[#allocation2 + $0xd8] sm:$0xff] }
 0x176   :  { %3423 = vmatpush2.bf16.msra.mxu1 %v8067_v6  ;;  %3381 = vmatprep.subr.bf16.mxu0 %v7932_v7  ;;  %v8147_v6 = vcombine.low %v456_v52, %v460_v53  ;;  %v8140_v7 = vcombine.high %v448_v2, %v452_v3  ;;  %v7886_v8 = vcombine.high %v193_v4, %v197_v5 }
 0x177   :  { %3424 = vmatprep.subr.bf16.mxu1 %v8060_v11  ;;  %v185_v11 = vld [vmem:[#allocation2 + $0x98] sm:$0xff] }
 0x179   :  { %3382 = vmatpush2.bf16.msra.mxu0 %v7931_v14  ;;  %v8139_v14 = vcombine.low %v448_v2, %v452_v3  ;;  %v524_v2 = vld [vmem:[#allocation2 + $0xb30] sm:$0xff]  ;;  %v265_v3 = vld [vmem:[#allocation2 + $0x318] sm:$0xff] }
 0x17a   :  { %3425 = vmatpush2.bf16.msra.mxu1 %v8059_v17  ;;  %3383 = vmatprep.subr.bf16.mxu0 %v7924_v18  ;;  %v7885_v17 = vcombine.low %v193_v4, %v197_v5  ;;  %v8132_v18 = vcombine.high %v440_v9, %v444_v10  ;;  %v269_v5 = vld [vmem:[#allocation2 + $0x338] sm:$0xff]  ;;  %v516_v9 = vld [vmem:[#allocation2 + $0xaf0] sm:$0xff] }
 0x17b   :  { %3426 = vmatprep.subr.bf16.mxu1 %v8052_v23  ;;  %v7878_v23 = vcombine.high %v185_v11, %v189_v13  ;;  %v257_v10 = vld [vmem:[#allocation2 + $0x2d8] sm:$0xff] }
 0x17d   :  { %3384 = vmatpush2.bf16.msra.mxu0 %v7923_v26  ;;  %v7877_v26 = vcombine.low %v185_v11, %v189_v13  ;;  %v7958_v11 = vcombine.high %v265_v3, %v269_v5  ;;  %v261_v13 = vld [vmem:[#allocation2 + $0x2f8] sm:$0xff] }
 0x17e   :  { %3427 = vmatpush2.bf16.msra.mxu1 %v8051_v28  ;;  %3439 = vmatprep.subr.bf16.mxu0 %v8172_v29  ;;  %v8124_v28 = vcombine.high %v432_v19, %v436_v20  ;;  %v424_v29 = vld [vmem:[#allocation2 + $0x810] sm:$0xff] }
 0x17f   :  { %3482 = vmatprep.subr.bf16.mxu1 %v7918_v33  ;;  %v173_v33 = vld [vmem:[#allocation2 + $0x38] sm:$0xff]  ;;  %v504_v19 = vld [vmem:[#allocation2 + $0xa90] sm:$0xff] }
 0x180   :  { %v3129_v16 = vpop.f32.mrf.mxu0  ;;  %3386 = vmatmul.mubr.bf16.vlgmr.msra.gmra.mxu0 %v10220_v43  ;;  %v7862_v12 = vcombine.high %v169_v31, %v173_v33  ;;  %v7861_v44 = vcombine.low %v169_v31, %v173_v33  ;;  %v508_v20 = vld [vmem:[#allocation2 + $0xab0] sm:$0xff]  ;;  %v241_v31 = vld [vmem:[#allocation2 + $0x258] sm:$0xff] }
 0x181   :  { %v3130_v45 = vadd.f32 %v3129_v16, %v1108_v36  ;;  %v3172_v46 = vpop.f32.mrf.mxu1  ;;  %3429 = vmatmul.mubr.bf16.vlgmr.msra.gmra.mxu1 %v10198_v34  ;;  %3440 = vmatpush1.bf16.msra.mxu0 %v8171_v37  ;;  %v10233_v34 = vld [vmem:[%s11535_s0 + $0x14] ss:$24 sps:$4 sm:$0xff]   ;;  %v8116_v37 = vcombine.high %v424_v29, %v428_v30  ;;  %v8115_v16 = vcombine.low %v424_v29, %v428_v30  ;;  %v245_v33 = vld [vmem:[#allocation2 + $0x278] sm:$0xff] }
 0x182   :  { %3483 = vmatpush1.bf16.msra.mxu1 %v7917_v38  ;;  %v10224_v59 = vpop.f32.mrf.mxu0  ;;  %3441 = vmatprep.subr.bf16.mxu0 %v8164_v39  ;;  %v544_v38 = vld [vmem:[#allocation2 + $0xbd0] sm:$0xff] }
 0x183   :  { %v10226_v49 = vadd.f32 %v3172_v46, %v3130_v45  ;;  %v10228_v50 = vpop.f32.mrf.mxu1  ;;  %3484 = vmatprep.subr.bf16.mxu1 %v7910_v40  ;;  %3471 = vmatprep.mubr.bf16.mxu0 %v10233_v34  ;;  %v548_v39 = vld [vmem:[#allocation2 + $0xbf0] sm:$0xff]  ;;  %v289_v40 = vld [vmem:[#allocation2 + $0x3d8] sm:$0xff] }
 0x184   :  { %v3133_v54 = vpop.f32.mrf.mxu0  ;;  %3514 = vmatprep.mubr.bf16.mxu1 %v10205_v42  ;;  %v7893_v42 = vcombine.low %v201_v55, %v205_v57  ;;  %v8236_v56 = vcombine.high %v544_v38, %v548_v39  ;;  %v536_v45 = vld [vmem:[#allocation2 + $0xb90] sm:$0xff]  ;;  %v7981_v52 = vcombine.low %v289_v40, %v293_v41  ;;  %v273_v57 = vld [vmem:[#allocation2 + $0x358] sm:$0xff] }
 0x185   :  { %v3134_v58 = vadd.f32 %v3133_v54, %v1108_v36  ;;  %3442 = vmatpush1.bf16.msra.mxu0 %v8163_v47  ;;  %v3176_v61 = vpop.f32.mrf.mxu1  ;;  %v7869_v36 = vcombine.low %v177_v21, %v181_v24  ;;  %v540_v46 = vld [vmem:[#allocation2 + $0xbb0] sm:$0xff]  ;;  %v281_v47 = vld [vmem:[#allocation2 + $0x398] sm:$0xff] }
 0x186   :  { %3485 = vmatpush1.bf16.msra.mxu1 %v7909_v48  ;;  %3443 = vmatprep.subr.bf16.mxu0 %v8156_v22  ;;  %v7982_v48 = vcombine.high %v289_v40, %v293_v41  ;;  %v285_v22 = vld [vmem:[#allocation2 + $0x3b8] sm:$0xff]  ;;  %v8228_v53 = vcombine.high %v536_v45, %v540_v46  ;;  %v528_v54 = vld [vmem:[#allocation2 + $0xb50] sm:$0xff] }
 0x187   :  { %v10237_v0 = vadd.f32 %v3176_v61, %v3134_v58  ;;  %3486 = vmatprep.subr.bf16.mxu1 %v7902_v51  ;;  %v8235_v51 = vcombine.low %v544_v38, %v548_v39  ;;  %v532_v55 = vld [vmem:[#allocation2 + $0xb70] sm:$0xff]  ;;  %v7974_v58 = vcombine.high %v281_v47, %v285_v22  ;;  %v8227_v61 = vcombine.low %v536_v45, %v540_v46  ;;  %v249_v21 = vld [vmem:[#allocation2 + $0x298] sm:$0xff] }
 0x188   :  { %v253_v24 = vld [vmem:[#allocation2 + $0x2b8] sm:$0xff]  ;;  %v496_v29 = vld [vmem:[#allocation2 + $0xa50] sm:$0xff] }
 0x189   :  { %3444 = vmatpush1.bf16.msra.mxu0 %v8155_v60  ;;  %v277_v60 = vld [vmem:[#allocation2 + $0x378] sm:$0xff]  ;;  %v500_v30 = vld [vmem:[#allocation2 + $0xa70] sm:$0xff] }
 0x18a   :  { %3487 = vmatpush1.bf16.msra.mxu1 %v7901_v62  ;;  %3445 = vmatprep.subr.bf16.mxu0 %v8148_v63  ;;  %v7973_v62 = vcombine.low %v281_v47, %v285_v22  ;;  %v8220_v63 = vcombine.high %v528_v54, %v532_v55  ;;  %v7966_v4 = vcombine.high %v273_v57, %v277_v60  ;;  %v488_v38 = vld [vmem:[#allocation2 + $0xa10] sm:$0xff]  ;;  %v233_v40 = vld [vmem:[#allocation2 + $0x218] sm:$0xff] }
 0x18b   :  { %3488 = vmatprep.subr.bf16.mxu1 %v7894_v1  ;;  %v520_v1 = vld [vmem:[#allocation2 + $0xb10] sm:$0xff]  ;;  %v237_v41 = vld [vmem:[#allocation2 + $0x238] sm:$0xff] }
 0x18c   :  { %v492_v39 = vld [vmem:[#allocation2 + $0xa30] sm:$0xff]  ;;  %v353_v45 = vld [vmem:[#allocation2 + $0x5d8] sm:$0xff] }
 0x18d   :  { %3446 = vmatpush1.bf16.msra.mxu0 %v8147_v6  ;;  %v8219_v6 = vcombine.low %v528_v54, %v532_v55  ;;  %v357_v46 = vld [vmem:[#allocation2 + $0x5f8] sm:$0xff] }
 0x18e   :  { %3489 = vmatpush1.bf16.msra.mxu1 %v7893_v42  ;;  %3447 = vmatprep.subr.bf16.mxu0 %v8140_v7  ;;  %v7965_v42 = vcombine.low %v273_v57, %v277_v60  ;;  %v8212_v7 = vcombine.high %v520_v1, %v524_v2  ;;  %v481_v47 = vld [vmem:[#allocation2 + $0x9d8] sm:$0xff] }
 0x18f   :  { %3490 = vmatprep.subr.bf16.mxu1 %v7886_v8  ;;  %v512_v8 = vld [vmem:[#allocation2 + $0xad0] sm:$0xff]  ;;  %v485_v22 = vld [vmem:[#allocation2 + $0x9f8] sm:$0xff] }
 0x190   :  { %v345_v54 = vld [vmem:[#allocation2 + $0x598] sm:$0xff] }
 0x191   :  { %3448 = vmatpush1.bf16.msra.mxu0 %v8139_v14  ;;  %v8211_v14 = vcombine.low %v520_v1, %v524_v2  ;;  %v349_v55 = vld [vmem:[#allocation2 + $0x5b8] sm:$0xff]  ;;  %v10239_v1 = vpop.f32.mrf.mxu0  ;;  %v8173_v2 = vcombine.low %v481_v47, %v485_v22 }
 0x192   :  { %3491 = vmatpush1.bf16.msra.mxu1 %v7885_v17  ;;  %3449 = vmatprep.subr.bf16.mxu0 %v8132_v18  ;;  %v7957_v17 = vcombine.low %v265_v3, %v269_v5  ;;  %v8204_v18 = vcombine.high %v512_v8, %v516_v9  ;;  %v473_v57 = vld [vmem:[#allocation2 + $0x998] sm:$0xff]  ;;  %v8038_v3 = vcombine.high %v345_v54, %v349_v55 }
 0x193   :  { %3492 = vmatprep.subr.bf16.mxu1 %v7878_v23  ;;  %v7950_v23 = vcombine.high %v257_v10, %v261_v13  ;;  %v477_v60 = vld [vmem:[#allocation2 + $0x9b8] sm:$0xff] }
 0x194   :  { %v469_v5 = vld [vmem:[#allocation2 + $0x978] sm:$0xff] }
 0x195   :  { %3450 = vmatpush1.bf16.msra.mxu0 %v8131_v25  ;;  %v8203_v25 = vcombine.low %v512_v8, %v516_v9  ;;  %v8037_v9 = vcombine.low %v345_v54, %v349_v55  ;;  %v425_v54 = vld [vmem:[#allocation2 + $0x818] sm:$0xff] }
 0x196   :  { %3493 = vmatpush1.bf16.msra.mxu1 %v7877_v26  ;;  %3451 = vmatprep.subr.bf16.mxu0 %v8124_v28  ;;  %v7949_v26 = vcombine.low %v257_v10, %v261_v13  ;;  %v8196_v28 = vcombine.high %v504_v19, %v508_v20  ;;  %v329_v10 = vld [vmem:[#allocation2 + $0x518] sm:$0xff] }
 0x197   :  { %3494 = vmatprep.subr.bf16.mxu1 %v7870_v32  ;;  %v7942_v32 = vcombine.high %v249_v21, %v253_v24  ;;  %v429_v55 = vld [vmem:[#allocation2 + $0x838] sm:$0xff] }
 0x199   :  { %3452 = vmatpush1.bf16.msra.mxu0 %v8123_v35  ;;  %v8195_v35 = vcombine.low %v504_v19, %v508_v20  ;;  %v461_v19 = vld [vmem:[#allocation2 + $0x938] sm:$0xff] }
 0x19a   :  { %3495 = vmatpush1.bf16.msra.mxu1 %v7869_v36  ;;  %3453 = vmatprep.subr.bf16.mxu0 %v8116_v37  ;;  %v7941_v36 = vcombine.low %v249_v21, %v253_v24  ;;  %v8188_v37 = vcombine.high %v496_v29, %v500_v30  ;;  %v321_v24 = vld [vmem:[#allocation2 + $0x4d8] sm:$0xff] }
 0x19b   :  { %3496 = vmatprep.subr.bf16.mxu1 %v7862_v12  ;;  %v7934_v12 = vcombine.high %v241_v31, %v245_v33 }
 0x19d   :  { %3454 = vmatpush1.bf16.msra.mxu0 %v8115_v16  ;;  %v8187_v16 = vcombine.low %v496_v29, %v500_v30  ;;  %v449_v29 = vld [vmem:[#allocation2 + $0x8d8] sm:$0xff] }
 0x19e   :  { %3497 = vmatpush1.bf16.msra.mxu1 %v7861_v44  ;;  %3455 = vmatprep.subr.bf16.mxu0 %v8236_v56  ;;  %v7933_v44 = vcombine.low %v241_v31, %v245_v33  ;;  %v8180_v56 = vcombine.high %v488_v38, %v492_v39  ;;  %v453_v30 = vld [vmem:[#allocation2 + $0x8f8] sm:$0xff] }
 0x19f   :  { %3498 = vmatprep.subr.bf16.mxu1 %v7982_v48  ;;  %v7926_v48 = vcombine.high %v233_v40, %v237_v41 }
 0x1a1   :  { %3456 = vmatpush2.bf16.msra.mxu0 %v8235_v51  ;;  %v8179_v51 = vcombine.low %v488_v38, %v492_v39  ;;  %v441_v38 = vld [vmem:[#allocation2 + $0x898] sm:$0xff] }
 0x1a2   :  { %3499 = vmatpush2.bf16.msra.mxu1 %v7981_v52  ;;  %3457 = vmatprep.subr.bf16.mxu0 %v8228_v53  ;;  %v7925_v52 = vcombine.low %v233_v40, %v237_v41  ;;  %v8046_v53 = vcombine.high %v353_v45, %v357_v46  ;;  %v445_v39 = vld [vmem:[#allocation2 + $0x8b8] sm:$0xff]  ;;  %v8141_v41 = vcombine.low %v449_v29, %v453_v30 }
 0x1a3   :  { %3500 = vmatprep.subr.bf16.mxu1 %v7974_v58  ;;  %v8174_v58 = vcombine.high %v481_v47, %v485_v22 }
 0x1a5   :  { %3458 = vmatpush2.bf16.msra.mxu0 %v8227_v61  ;;  %v8045_v61 = vcombine.low %v353_v45, %v357_v46  ;;  %v433_v45 = vld [vmem:[#allocation2 + $0x858] sm:$0xff] }
 0x1a6   :  { %3501 = vmatpush2.bf16.msra.mxu1 %v7973_v62  ;;  %3459 = vmatprep.subr.bf16.mxu0 %v8220_v63  ;;  %v337_v62 = vld [vmem:[#allocation2 + $0x558] sm:$0xff] }
 0x1a7   :  { %3502 = vmatprep.subr.bf16.mxu1 %v7966_v4  ;;  %v341_v63 = vld [vmem:[#allocation2 + $0x578] sm:$0xff] }
 0x1a8   :  { %v465_v4 = vld [vmem:[#allocation2 + $0x958] sm:$0xff] }
 0x1a9   :  { %3460 = vmatpush2.bf16.msra.mxu0 %v8219_v6  ;;  %v8166_v6 = vcombine.high %v473_v57, %v477_v60  ;;  %v8158_v20 = vcombine.high %v465_v4, %v469_v5  ;;  %v437_v46 = vld [vmem:[#allocation2 + $0x878] sm:$0xff] }
 0x1aa   :  { %3503 = vmatpush2.bf16.msra.mxu1 %v7965_v42  ;;  %3461 = vmatprep.subr.bf16.mxu0 %v8212_v7  ;;  %v10244_v7 = vld [vmem:[%s11535_s0 + $0x10] ss:$24 sps:$4 sm:$0xff]  }
 0x1ab   :  { %3504 = vmatprep.subr.bf16.mxu1 %v7958_v11  ;;  %v333_v11 = vld [vmem:[#allocation2 + $0x538] sm:$0xff] }
 0x1ac   :  { %v8021_v33 = vcombine.low %v329_v10, %v333_v11 }
 0x1ad   :  { %3462 = vmatpush2.bf16.msra.mxu0 %v8211_v14  ;;  %v8165_v14 = vcombine.low %v473_v57, %v477_v60 }
 0x1ae   :  { %3505 = vmatpush2.bf16.msra.mxu1 %v7957_v17  ;;  %3463 = vmatprep.subr.bf16.mxu0 %v8204_v18  ;;  %v8030_v17 = vcombine.high %v337_v62, %v341_v63  ;;  %v457_v18 = vld [vmem:[#allocation2 + $0x918] sm:$0xff] }
 0x1af   :  { %3506 = vmatprep.subr.bf16.mxu1 %v7950_v23  ;;  %v8029_v23 = vcombine.low %v337_v62, %v341_v63  ;;  %v417_v62 = vld [vmem:[#allocation2 + $0x7d8] sm:$0xff] }
 0x1b0   :  { %v421_v63 = vld [vmem:[#allocation2 + $0x7f8] sm:$0xff] }
 0x1b1   :  { %3464 = vmatpush2.bf16.msra.mxu0 %v8203_v25  ;;  %v325_v25 = vld [vmem:[#allocation2 + $0x4f8] sm:$0xff] }
 0x1b2   :  { %3507 = vmatpush2.bf16.msra.mxu1 %v7949_v26  ;;  %3465 = vmatprep.subr.bf16.mxu0 %v8196_v28  ;;  %v8157_v26 = vcombine.low %v465_v4, %v469_v5  ;;  %v8022_v28 = vcombine.high %v329_v10, %v333_v11  ;;  %v8013_v40 = vcombine.low %v321_v24, %v325_v25  ;;  %v537_v10 = vld [vmem:[#allocation2 + $0xb98] sm:$0xff] }
 0x1b3   :  { %3508 = vmatprep.subr.bf16.mxu1 %v7942_v32  ;;  %v8150_v32 = vcombine.high %v457_v18, %v461_v19  ;;  %v8117_v5 = vcombine.low %v425_v54, %v429_v55  ;;  %v541_v11 = vld [vmem:[#allocation2 + $0xbb8] sm:$0xff] }
 0x1b5   :  { %3466 = vmatpush2.bf16.msra.mxu0 %v8195_v35  ;;  %v313_v35 = vld [vmem:[#allocation2 + $0x498] sm:$0xff] }
 0x1b6   :  { %3509 = vmatpush2.bf16.msra.mxu1 %v7941_v36  ;;  %3467 = vmatprep.subr.bf16.mxu0 %v8188_v37  ;;  %v317_v36 = vld [vmem:[#allocation2 + $0x4b8] sm:$0xff]  ;;  %v8142_v37 = vcombine.high %v449_v29, %v453_v30 }
 0x1b7   :  { %3510 = vmatprep.subr.bf16.mxu1 %v7934_v12  ;;  %v305_v12 = vld [vmem:[#allocation2 + $0x458] sm:$0xff]  ;;  %v8005_v47 = vcombine.low %v313_v35, %v317_v36 }
 0x1b8   :  { %v397_v29 = vld [vmem:[#allocation2 + $0x738] sm:$0xff] }
 0x1b9   :  { %3468 = vmatpush2.bf16.msra.mxu0 %v8187_v16  ;;  %v8006_v16 = vcombine.high %v313_v35, %v317_v36  ;;  %v521_v30 = vld [vmem:[#allocation2 + $0xb18] sm:$0xff] }
 0x1ba   :  { %3511 = vmatpush2.bf16.msra.mxu1 %v7933_v44  ;;  %3469 = vmatprep.subr.bf16.mxu0 %v8180_v56  ;;  %v8134_v44 = vcombine.high %v441_v38, %v445_v39  ;;  %v309_v56 = vld [vmem:[#allocation2 + $0x478] sm:$0xff] }
 0x1bb   :  { %3512 = vmatprep.subr.bf16.mxu1 %v7926_v48  ;;  %v8133_v48 = vcombine.low %v441_v38, %v445_v39  ;;  %v7998_v22 = vcombine.high %v305_v12, %v309_v56  ;;  %v7997_v57 = vcombine.low %v305_v12, %v309_v56  ;;  %v385_v36 = vld [vmem:[#allocation2 + $0x6d8] sm:$0xff] }
 0x1bc   :  { %v513_v38 = vld [vmem:[#allocation2 + $0xad8] sm:$0xff] }
 0x1bd   :  { %3470 = vmatpush2.bf16.msra.mxu0 %v8179_v51  ;;  %v8126_v51 = vcombine.high %v433_v45, %v437_v46  ;;  %v517_v39 = vld [vmem:[#allocation2 + $0xaf8] sm:$0xff] }
 0x1be   :  { %3513 = vmatpush2.bf16.msra.mxu1 %v7925_v52  ;;  %3525 = vmatprep.subr.bf16.mxu0 %v8046_v53  ;;  %v297_v52 = vld [vmem:[#allocation2 + $0x418] sm:$0xff] }
 0x1bf   :  { %3568 = vmatprep.subr.bf16.mxu1 %v8174_v58  ;;  %v301_v53 = vld [vmem:[#allocation2 + $0x438] sm:$0xff]  ;;  %v8125_v58 = vcombine.low %v433_v45, %v437_v46 }
 0x1c0   :  { %v3215_v42 = vpop.f32.mrf.mxu0  ;;  %3472 = vmatmul.mubr.bf16.vlgmr.msra.gmra.mxu0 %v10244_v7  ;;  %v7990_v60 = vcombine.high %v297_v52, %v301_v53  ;;  %v7989_v4 = vcombine.low %v297_v52, %v301_v53  ;;  %v381_v56 = vld [vmem:[#allocation2 + $0x6b8] sm:$0xff] }
 0x1c1   :  { %v3216_v8 = vadd.f32 %v3215_v42, %v10226_v49  ;;  %3515 = vmatmul.mubr.bf16.vlgmr.msra.gmra.mxu1 %v10220_v43  ;;  %3526 = vmatpush1.bf16.msra.mxu0 %v8045_v61  ;;  %v9630_v49 = vld [vmem:[%s11535_s0 + $0xc] ss:$24 sps:$4 sm:$0xff]   ;;  %v8118_v61 = vcombine.high %v425_v54, %v429_v55  ;;  %v505_v45 = vld [vmem:[#allocation2 + $0xa98] sm:$0xff]  ;;  %v10259_v54 = vsub.s32 1, %v10211_v15 }
 0x1c2   :  { %3569 = vmatpush1.bf16.msra.mxu1 %v8173_v2  ;;  %v10249_v13 = vpop.f32.mrf.mxu0  ;;  %3527 = vmatprep.subr.bf16.mxu0 %v8038_v3  ;;  %v545_v2 = vld [vmem:[#allocation2 + $0xbd8] sm:$0xff] }
 0x1c3   :  { %3570 = vmatprep.subr.bf16.mxu1 %v8166_v6  ;;  %3557 = vmatprep.mubr.bf16.mxu0 %v9630_v49  ;;  %v549_v3 = vld [vmem:[#allocation2 + $0xbf8] sm:$0xff]  ;;  %v8110_v6 = vcombine.high %v417_v62, %v421_v63 }
 0x1c4   :  { %v3219_v43 = vpop.f32.mrf.mxu0  ;;  %3600 = vmatprep.mubr.bf16.mxu1 %v10233_v34  ;;  %v8149_v34 = vcombine.low %v457_v18, %v461_v19  ;;  %v8238_v42 = vcombine.high %v545_v2, %v549_v3  ;;  %v8230_v19 = vcombine.high %v537_v10, %v541_v11  ;;  %v405_v49 = vld [vmem:[#allocation2 + $0x778] sm:$0xff] }
 0x1c5   :  { %v3220_v21 = vadd.f32 %v3219_v43, %v10237_v0  ;;  %3528 = vmatpush1.bf16.msra.mxu0 %v8037_v9  ;;  %v8014_v0 = vcombine.high %v321_v24, %v325_v25  ;;  %v413_v9 = vld [vmem:[#allocation2 + $0x7b8] sm:$0xff]  ;;  %v8229_v24 = vcombine.low %v537_v10, %v541_v11 }
 0x1c6   :  { %3571 = vmatpush1.bf16.msra.mxu1 %v8165_v14  ;;  %3529 = vmatprep.subr.bf16.mxu0 %v8030_v17  ;;  %v8109_v14 = vcombine.low %v417_v62, %v421_v63  ;;  %v8237_v17 = vcombine.low %v545_v2, %v549_v3  ;;  %v529_v43 = vld [vmem:[#allocation2 + $0xb58] sm:$0xff] }
 0x1c7   :  { %v10256_v31 = vpack.c.bf16 %v3220_v21, %v3216_v8  ;;  %3572 = vmatprep.subr.bf16.mxu1 %v8158_v20  ;;  %v409_v8 = vld [vmem:[#allocation2 + $0x798] sm:$0xff] }
 0x1c8   :  { %v8102_v18 = vcombine.high %v409_v8, %v413_v9  ;;  %v401_v20 = vld [vmem:[#allocation2 + $0x758] sm:$0xff] }
 0x1c9   :  { %3530 = vmatpush1.bf16.msra.mxu0 %v8029_v23  ;;  %v533_v21 = vld [vmem:[#allocation2 + $0xb78] sm:$0xff]  ;;  %v8101_v23 = vcombine.low %v409_v8, %v413_v9  ;;  %v8094_v25 = vcombine.high %v401_v20, %v405_v49 }
 0x1ca   :  { %3573 = vmatpush1.bf16.msra.mxu1 %v8157_v26  ;;  %3531 = vmatprep.subr.bf16.mxu0 %v8022_v28  ;;  %v8222_v26 = vcombine.high %v529_v43, %v533_v21  ;;  %v393_v28 = vld [vmem:[#allocation2 + $0x718] sm:$0xff] }
 0x1cb   :  { %3574 = vmatprep.subr.bf16.mxu1 %v8150_v32  ;;  %v525_v32 = vld [vmem:[#allocation2 + $0xb38] sm:$0xff] }
 0x1cc   :  { %v8214_v35 = vcombine.high %v521_v30, %v525_v32  ;;  %v8213_v12 = vcombine.low %v521_v30, %v525_v32  ;;  %v509_v46 = vld [vmem:[#allocation2 + $0xab8] sm:$0xff] }
 0x1cd   :  { %3532 = vmatpush1.bf16.msra.mxu0 %v8021_v33  ;;  %v8093_v33 = vcombine.low %v401_v20, %v405_v49  ;;  %v369_v52 = vld [vmem:[#allocation2 + $0x658] sm:$0xff]  ;;  %v3221_v20 = vpop.f32.mrf.mxu0 }
 0x1ce   :  { %3575 = vmatpush1.bf16.msra.mxu1 %v8149_v34  ;;  %3533 = vmatprep.subr.bf16.mxu0 %v8014_v0  ;;  %v8221_v34 = vcombine.low %v529_v43, %v533_v21  ;;  %v8086_v0 = vcombine.high %v393_v28, %v397_v29  ;;  %v373_v53 = vld [vmem:[#allocation2 + $0x678] sm:$0xff] }
 0x1cf   :  { %3576 = vmatprep.subr.bf16.mxu1 %v8142_v37  ;;  %v389_v37 = vld [vmem:[#allocation2 + $0x6f8] sm:$0xff]  ;;  %v8062_v62 = vcombine.high %v369_v52, %v373_v53  ;;  %v8061_v9 = vcombine.low %v369_v52, %v373_v53 }
 0x1d0   :  { %v497_v55 = vld [vmem:[#allocation2 + $0xa58] sm:$0xff] }
 0x1d1   :  { %3534 = vmatpush1.bf16.msra.mxu0 %v8013_v40  ;;  %v8085_v40 = vcombine.low %v393_v28, %v397_v29  ;;  %v361_v3 = vld [vmem:[#allocation2 + $0x618] sm:$0xff] }
 0x1d2   :  { %3577 = vmatpush1.bf16.msra.mxu1 %v8141_v41  ;;  %3535 = vmatprep.subr.bf16.mxu0 %v8006_v16  ;;  %v8078_v41 = vcombine.high %v385_v36, %v389_v37  ;;  %v8206_v16 = vcombine.high %v513_v38, %v517_v39  ;;  %v493_v8 = vld [vmem:[#allocation2 + $0xa38] sm:$0xff] }
 0x1d3   :  { %3578 = vmatprep.subr.bf16.mxu1 %v8134_v44  ;;  %v377_v44 = vld [vmem:[#allocation2 + $0x698] sm:$0xff] }
 0x1d4   :  { %v8811_v30 = vld [vmem:[#allocation6 + $0x2e0] ss:$16 sps:$4 sm:$0xff]   ;;  %v8831_v52 = vld [vmem:[#allocation6 + $0x284] ss:$16 sps:$4 sm:$0xff]  }
 0x1d5   :  { %3536 = vmatpush1.bf16.msra.mxu0 %v8005_v47  ;;  %v8077_v47 = vcombine.low %v385_v36, %v389_v37  ;;  %v8814_v37 = vld [vmem:[#allocation6 + $0xc0] ss:$16 sps:$4 sm:$0xff]  }
 0x1d6   :  { %3579 = vmatpush1.bf16.msra.mxu1 %v8133_v48  ;;  %3537 = vmatprep.subr.bf16.mxu0 %v7998_v22  ;;  %v8205_v48 = vcombine.low %v513_v38, %v517_v39  ;;  %v8070_v22 = vcombine.high %v377_v44, %v381_v56  ;;  %v8817_v39 = vld [vmem:[#allocation6 + $0x2c0] ss:$16 sps:$4 sm:$0xff]  }
 0x1d7   :  { %3580 = vmatprep.subr.bf16.mxu1 %v8126_v51  ;;  %v8198_v51 = vcombine.high %v505_v45, %v509_v46 }
 0x1d9   :  { %3538 = vmatpush1.bf16.msra.mxu0 %v7997_v57  ;;  %v501_v57 = vld [vmem:[#allocation2 + $0xa78] sm:$0xff] }
 0x1da   :  { %3581 = vmatpush1.bf16.msra.mxu1 %v8125_v58  ;;  %3539 = vmatprep.subr.bf16.mxu0 %v7990_v60  ;;  %v3178_v58 = vpop.f32.mrf.mxu1  ;;  %v8069_v60 = vcombine.low %v377_v44, %v381_v56  ;;  %v8190_v2 = vcombine.high %v497_v55, %v501_v57  ;;  %v8189_v11 = vcombine.low %v497_v55, %v501_v57 }
 0x1db   :  { %3582 = vmatprep.subr.bf16.mxu1 %v8118_v61  ;;  %v8197_v61 = vcombine.low %v505_v45, %v509_v46 }
 0x1dc   :  { %v10261_v63 = vpop.f32.mrf.mxu1 }
 0x1dd   :  { %3540 = vmatpush1.bf16.msra.mxu0 %v7989_v4  ;;  %v365_v4 = vld [vmem:[#allocation2 + $0x638] sm:$0xff] }
 0x1de   :  { %3583 = vmatpush1.bf16.msra.mxu1 %v8117_v5  ;;  %3541 = vmatprep.subr.bf16.mxu0 %v8110_v6  ;;  %v10263_v5 = vld [vmem:[#allocation4] sm:$0xff]  ;;  %v8053_v49 = vcombine.low %v361_v3, %v365_v4 }
 0x1df   :  { %3584 = vmatprep.subr.bf16.mxu1 %v8238_v42  ;;  %v1112_v6 = vrot.slane %v10263_v5, %v10259_v54  ;;  %v489_v42 = vld [vmem:[#allocation2 + $0xa18] sm:$0xff] }
 0x1e0   :  { %v8181_v21 = vcombine.low %v489_v42, %v493_v8 }
 0x1e1   :  { %3542 = vmatpush2.bf16.msra.mxu0 %v8109_v14  ;;  %v3136_v10 = vadd.f32 %v10239_v1, %v1112_v6  ;;  %v8054_v14 = vcombine.high %v361_v3, %v365_v4  ;;  %v8832_v3 = vld [vmem:[#allocation6 + $0x60] ss:$16 sps:$4 sm:$0xff]  }
 0x1e2   :  { %3585 = vmatpush2.bf16.msra.mxu1 %v8237_v17  ;;  %3543 = vmatprep.subr.bf16.mxu0 %v8102_v18  ;;  %v3260_v17 = vpop.f32.mrf.mxu1  ;;  %v8182_v18 = vcombine.high %v489_v42, %v493_v8  ;;  %v8835_v4 = vld [vmem:[#allocation6 + $0x260] ss:$16 sps:$4 sm:$0xff]   ;;  %v8843_v42 = vld [vmem:[#allocation6 + $0x244] ss:$16 sps:$4 sm:$0xff]  }
 0x1e3   :  { %3586 = vmatprep.subr.bf16.mxu1 %v8230_v19  ;;  %v3132_v19 = vadd.f32 %v10224_v59, %v1112_v6  ;;  %v3179_v43 = vadd.f32 %v3178_v58, %v3136_v10  ;;  %v8808_v59 = vld [vmem:[#allocation6 + $0xe0] ss:$16 sps:$4 sm:$0xff]   ;;  %v8840_v6 = vld [vmem:[#allocation6 + $0x44] ss:$16 sps:$4 sm:$0xff]  }
 0x1e4   :  { %v10272_v1 = vpop.f32.mrf.mxu1  ;;  %v8826_v58 = vld [vmem:[#allocation6 + $0x80] ss:$16 sps:$4 sm:$0xff]   ;;  %v8846_v10 = vld [vmem:[#allocation6 + $0x24] ss:$16 sps:$4 sm:$0xff]  }
 0x1e5   :  { %3544 = vmatpush2.bf16.msra.mxu0 %v8101_v23  ;;  %v8810_v23 = vld [vmem:[#allocation6 + $0xe4] ss:$16 sps:$4 sm:$0xff]   ;;  %v3222_v28 = vadd.f32 %v3221_v20, %v3179_v43  ;;  %v8838_v8 = vld [vmem:[#allocation6 + $0x40] ss:$16 sps:$4 sm:$0xff]  }
 0x1e6   :  { %3587 = vmatpush2.bf16.msra.mxu1 %v8229_v24  ;;  %3545 = vmatprep.subr.bf16.mxu0 %v8094_v25  ;;  %v10270_v24 = vsub.s32 3, %v10211_v15  ;;  %v8813_v25 = vld [vmem:[#allocation6 + $0x2e4] ss:$16 sps:$4 sm:$0xff]   ;;  %v8850_v20 = vld [vmem:[#allocation6] ss:$16 sps:$4 sm:$0xff]  }
 0x1e7   :  { %3588 = vmatprep.subr.bf16.mxu1 %v8222_v26  ;;  %v3175_v26 = vadd.f32 %v10228_v50, %v3132_v19  ;;  %v9632_v50 = vld [vmem:[%s11535_s0 + $0x8] ss:$24 sps:$4 sm:$0xff]   ;;  %v8855_v19 = vld [vmem:[#allocation6 + $0x204] ss:$16 sps:$4 sm:$0xff]  }
 0x1e8   :  { %v1120_v32 = vrot.slane %v10263_v5, %v10270_v24  ;;  %v8858_v43 = vld [vmem:[#allocation6 + $0x1e4] ss:$16 sps:$4 sm:$0xff]  }
 0x1e9   :  { %3546 = vmatpush2.bf16.msra.mxu0 %v8093_v33  ;;  %v3218_v29 = vadd.f32 %v10249_v13, %v3175_v26  ;;  %v3264_v33 = vpop.f32.mrf.mxu1  ;;  %v8864_v26 = vld [vmem:[#allocation6 + $0x1c4] ss:$16 sps:$4 sm:$0xff]  }
 0x1ea   :  { %3589 = vmatpush2.bf16.msra.mxu1 %v8221_v34  ;;  %3547 = vmatprep.subr.bf16.mxu0 %v8086_v0  ;;  %v8816_v34 = vld [vmem:[#allocation6 + $0xc4] ss:$16 sps:$4 sm:$0xff]   ;;  %v3265_v56 = vadd.f32 %v3264_v33, %v1120_v32  ;;  %v8868_v33 = vld [vmem:[#allocation6 + $0x1a0] ss:$16 sps:$4 sm:$0xff]  }
 0x1eb   :  { %3590 = vmatprep.subr.bf16.mxu1 %v8214_v35  ;;  %v8819_v0 = vld [vmem:[#allocation6 + $0x2c4] ss:$16 sps:$4 sm:$0xff]   ;;  %v10278_v35 = vpack.c.bf16 %v3222_v28, %v3218_v29  ;;  %v8865_v29 = vld [vmem:[#allocation6 + $0x3c0] ss:$16 sps:$4 sm:$0xff]  }
 0x1ec   :  { %v8867_v28 = vld [vmem:[#allocation6 + $0x3c4] ss:$16 sps:$4 sm:$0xff]  }
 0x1ed   :  { %3548 = vmatpush2.bf16.msra.mxu0 %v8085_v40  ;;  %v8822_v40 = vld [vmem:[#allocation6 + $0xa4] ss:$16 sps:$4 sm:$0xff]  }
 0x1ee   :  { %3591 = vmatpush2.bf16.msra.mxu1 %v8213_v12  ;;  %3549 = vmatprep.subr.bf16.mxu0 %v8078_v41  ;;  %v3261_v12 = vadd.f32 %v3260_v17, %v1120_v32  ;;  %v8847_v17 = vld [vmem:[#allocation6 + $0x220] ss:$16 sps:$4 sm:$0xff]   ;;  %v8873_v32 = vld [vmem:[#allocation6 + $0x3a4] ss:$16 sps:$4 sm:$0xff]  }
 0x1ef   :  { %3592 = vmatprep.subr.bf16.mxu1 %v8206_v16  ;;  %v8825_v16 = vld [vmem:[#allocation6 + $0x2a4] ss:$16 sps:$4 sm:$0xff]  }
 0x1f1   :  { %3550 = vmatpush2.bf16.msra.mxu0 %v8077_v47 }
 0x1f2   :  { %3593 = vmatpush2.bf16.msra.mxu1 %v8205_v48  ;;  %3551 = vmatprep.subr.bf16.mxu0 %v8070_v22  ;;  %v8823_v48 = vld [vmem:[#allocation6 + $0x2a0] ss:$16 sps:$4 sm:$0xff]   ;;  %v8828_v22 = vld [vmem:[#allocation6 + $0x84] ss:$16 sps:$4 sm:$0xff]  }
 0x1f3   :  { %3594 = vmatprep.subr.bf16.mxu1 %v8198_v51 }
 0x1f5   :  { %3552 = vmatpush2.bf16.msra.mxu0 %v8069_v60  ;;  %v8829_v60 = vld [vmem:[#allocation6 + $0x280] ss:$16 sps:$4 sm:$0xff]  }
 0x1f6   :  { %3595 = vmatpush2.bf16.msra.mxu1 %v8197_v61  ;;  %3553 = vmatprep.subr.bf16.mxu0 %v8062_v62  ;;  %v8834_v61 = vld [vmem:[#allocation6 + $0x64] ss:$16 sps:$4 sm:$0xff]  }
 0x1f7   :  { %3596 = vmatprep.subr.bf16.mxu1 %v8190_v2  ;;  %v8837_v2 = vld [vmem:[#allocation6 + $0x264] ss:$16 sps:$4 sm:$0xff]  }
 0x1f9   :  { %3554 = vmatpush2.bf16.msra.mxu0 %v8061_v9  ;;  %v8841_v9 = vld [vmem:[#allocation6 + $0x240] ss:$16 sps:$4 sm:$0xff]  }
 0x1fa   :  { %3597 = vmatpush2.bf16.msra.mxu1 %v8189_v11  ;;  %3555 = vmatprep.subr.bf16.mxu0 %v8054_v14  ;;  %v8849_v11 = vld [vmem:[#allocation6 + $0x224] ss:$16 sps:$4 sm:$0xff]   ;;  %v8844_v14 = vld [vmem:[#allocation6 + $0x20] ss:$16 sps:$4 sm:$0xff]  }
 0x1fb   :  { %3598 = vmatprep.subr.bf16.mxu1 %v8182_v18  ;;  %v8852_v18 = vld [vmem:[#allocation6 + $0x4] ss:$16 sps:$4 sm:$0xff]  }
 0x1fd   :  { %3556 = vmatpush2.bf16.msra.mxu0 %v8053_v49  ;;  %v8853_v49 = vld [vmem:[#allocation6 + $0x200] ss:$16 sps:$4 sm:$0xff]  }
 0x1fe   :  { %3599 = vmatpush2.bf16.msra.mxu1 %v8181_v21  ;;  %4920 = vmatprep.subr.bf16.mxu0 %v8810_v23  ;;  %v8861_v21 = vld [vmem:[#allocation6 + $0x3e4] ss:$16 sps:$4 sm:$0xff]   ;;  %v8856_v23 = vld [vmem:[#allocation6 + $0x1e0] ss:$16 sps:$4 sm:$0xff]  }
 0x1ff   :  { %4963 = vmatprep.subr.bf16.mxu1 %v8813_v25  ;;  %v8859_v25 = vld [vmem:[#allocation6 + $0x3e0] ss:$16 sps:$4 sm:$0xff]  }
 0x200   :  { %v10280_v36 = vpop.f32.mrf.mxu0  ;;  %3558 = vmatmul.mubr.bf16.vlgmr.msra.gmra.mxu0 %v9632_v50  ;;  %v8879_v50 = vld [vmem:[#allocation6 + $0x384] ss:$16 sps:$4 sm:$0xff]  }
 0x201   :  { %v10285_v13 = vpop.f32.mrf.mxu1  ;;  %3601 = vmatmul.mubr.bf16.vlgmr.msra.gmra.mxu1 %v10244_v7  ;;  %4921 = vmatpush1.bf16.msra.mxu0 %v8808_v59  ;;  %v8820_v7 = vld [vmem:[#allocation6 + $0xa0] ss:$16 sps:$4 sm:$0xff]  }
 0x202   :  { %4952 = vmatprep.mubr.bf16.mxu0 %v10278_v35  ;;  %4964 = vmatpush1.bf16.msra.mxu1 %v8811_v30  ;;  %v3303_v38 = vpop.f32.mrf.mxu0  ;;  %v8862_v59 = vld [vmem:[#allocation6 + $0x1c0] ss:$16 sps:$4 sm:$0xff]   ;;  %v8870_v30 = vld [vmem:[#allocation6 + $0x1a4] ss:$16 sps:$4 sm:$0xff]  }
 0x203   :  { %v3346_v41 = vpop.f32.mrf.mxu1  ;;  %4922 = vmatprep.subr.bf16.mxu0 %v8816_v34  ;;  %4965 = vmatprep.subr.bf16.mxu1 %v8819_v0  ;;  %v3304_v45 = vadd.f32 %v3303_v38, %v3261_v12  ;;  %v8871_v34 = vld [vmem:[#allocation6 + $0x3a0] ss:$16 sps:$4 sm:$0xff]   ;;  %v8876_v0 = vld [vmem:[#allocation6 + $0x184] ss:$16 sps:$4 sm:$0xff]   ;;  %v10297_v12 = vsub.s32 2, %v10211_v15 }
 0x204   :  { %v10289_v44 = vpop.f32.mrf.mxu0  ;;  %v8877_v38 = vld [vmem:[#allocation6 + $0x380] ss:$16 sps:$4 sm:$0xff]  }
 0x205   :  { %v10291_v46 = vpop.f32.mrf.mxu1  ;;  %4923 = vmatpush1.bf16.msra.mxu0 %v8814_v37  ;;  %v3347_v55 = vadd.f32 %v3346_v41, %v3304_v45  ;;  %v8874_v37 = vld [vmem:[#allocation6 + $0x180] ss:$16 sps:$4 sm:$0xff]   ;;  %v8891_v45 = vld [vmem:[#allocation6 + $0x344] ss:$16 sps:$4 sm:$0xff]  }
 0x206   :  { %4966 = vmatpush1.bf16.msra.mxu1 %v8817_v39  ;;  %v3307_v47 = vpop.f32.mrf.mxu0  ;;  %4924 = vmatprep.subr.bf16.mxu0 %v8822_v40  ;;  %v8882_v39 = vld [vmem:[#allocation6 + $0x164] ss:$16 sps:$4 sm:$0xff]   ;;  %v8880_v41 = vld [vmem:[#allocation6 + $0x160] ss:$16 sps:$4 sm:$0xff]  }
 0x207   :  { %v3308_v51 = vadd.f32 %v3307_v47, %v3265_v56  ;;  %4967 = vmatprep.subr.bf16.mxu1 %v8825_v16  ;;  %v3350_v53 = vpop.f32.mrf.mxu1  ;;  %v8885_v40 = vld [vmem:[#allocation6 + $0x364] ss:$16 sps:$4 sm:$0xff]   ;;  %v8883_v16 = vld [vmem:[#allocation6 + $0x360] ss:$16 sps:$4 sm:$0xff]  }
 0x208   :  { %v8888_v56 = vld [vmem:[#allocation6 + $0x144] ss:$16 sps:$4 sm:$0xff]   ;;  %v8886_v47 = vld [vmem:[#allocation6 + $0x140] ss:$16 sps:$4 sm:$0xff]  }
 0x209   :  { %v3351_v57 = vadd.f32 %v3350_v53, %v3308_v51  ;;  %4925 = vmatpush1.bf16.msra.mxu0 %v8820_v7  ;;  %v1116_v7 = vrot.slane %v10263_v5, %v10297_v12  ;;  %v8897_v51 = vld [vmem:[#allocation6 + $0x324] ss:$16 sps:$4 sm:$0xff]   ;;  %v8892_v53 = vld [vmem:[#allocation6 + $0x120] ss:$16 sps:$4 sm:$0xff]  }
 0x20a   :  { %4968 = vmatpush1.bf16.msra.mxu1 %v8823_v48  ;;  %4926 = vmatprep.subr.bf16.mxu0 %v8828_v22  ;;  %v8889_v48 = vld [vmem:[#allocation6 + $0x340] ss:$16 sps:$4 sm:$0xff]   ;;  %v8894_v22 = vld [vmem:[#allocation6 + $0x124] ss:$16 sps:$4 sm:$0xff]  }
 0x20b   :  { %v10293_v62 = vpack.c.bf16 %v3351_v57, %v3347_v55  ;;  %4969 = vmatprep.subr.bf16.mxu1 %v8831_v52  ;;  %v3263_v52 = vadd.f32 %v10272_v1, %v1116_v7  ;;  %v8895_v55 = vld [vmem:[#allocation6 + $0x320] ss:$16 sps:$4 sm:$0xff]   ;;  %v8900_v57 = vld [vmem:[#allocation6 + $0x104] ss:$16 sps:$4 sm:$0xff]  }
 0x20c   :  { %v8906_v1 = vld [vmem:[#allocation6 + $0x4e4] ss:$16 sps:$4 sm:$0xff]  }
 0x20d   :  { %4927 = vmatpush1.bf16.msra.mxu0 %v8826_v58  ;;  %4995 = vmatprep.mubr.bf16.mxu1 %v10293_v62  ;;  %v3259_v58 = vadd.f32 %v10261_v63, %v1116_v7  ;;  %v8904_v63 = vld [vmem:[#allocation6 + $0x4e0] ss:$16 sps:$4 sm:$0xff]   ;;  %v9011_v7 = vld [vmem:[#allocation6 + $0x7c4] ss:$16 sps:$4 sm:$0xff]  }
 0x20e   :  { %4970 = vmatpush1.bf16.msra.mxu1 %v8829_v60  ;;  %4928 = vmatprep.subr.bf16.mxu0 %v8834_v61  ;;  %v3306_v60 = vadd.f32 %v10289_v44, %v3263_v52  ;;  %v8903_v61 = vld [vmem:[#allocation6 + $0x304] ss:$16 sps:$4 sm:$0xff]   ;;  %v8934_v52 = vld [vmem:[#allocation6 + $0x5a0] ss:$16 sps:$4 sm:$0xff]  }
 0x20f   :  { %4971 = vmatprep.subr.bf16.mxu1 %v8837_v2  ;;  %v3302_v2 = vadd.f32 %v10280_v36, %v3259_v58  ;;  %v8909_v44 = vld [vmem:[#allocation6 + $0x4c4] ss:$16 sps:$4 sm:$0xff]   ;;  %v8937_v58 = vld [vmem:[#allocation6 + $0x580] ss:$16 sps:$4 sm:$0xff]  }
 0x210   :  { %v8963_v36 = vld [vmem:[#allocation6 + $0x6c4] ss:$16 sps:$4 sm:$0xff]  }
 0x211   :  { %4929 = vmatpush1.bf16.msra.mxu0 %v8832_v3  ;;  %v8898_v3 = vld [vmem:[#allocation6 + $0x100] ss:$16 sps:$4 sm:$0xff]  }
 0x212   :  { %4972 = vmatpush1.bf16.msra.mxu1 %v8835_v4  ;;  %4930 = vmatprep.subr.bf16.mxu0 %v8840_v6  ;;  %v8901_v4 = vld [vmem:[#allocation6 + $0x300] ss:$16 sps:$4 sm:$0xff]   ;;  %v3349_v6 = vadd.f32 %v10291_v46, %v3306_v60  ;;  %v8942_v60 = vld [vmem:[#allocation6 + $0x564] ss:$16 sps:$4 sm:$0xff]  }
 0x213   :  { %4973 = vmatprep.subr.bf16.mxu1 %v8843_v42  ;;  %v8957_v42 = vld [vmem:[#allocation6 + $0x6e4] ss:$16 sps:$4 sm:$0xff]   ;;  %v8907_v46 = vld [vmem:[#allocation6 + $0x4c0] ss:$16 sps:$4 sm:$0xff]  }
 0x215   :  { %4931 = vmatpush1.bf16.msra.mxu0 %v8838_v8  ;;  %v3345_v8 = vadd.f32 %v10285_v13, %v3302_v2  ;;  %v8961_v13 = vld [vmem:[#allocation6 + $0x6c0] ss:$16 sps:$4 sm:$0xff]   ;;  %v9029_v2 = vld [vmem:[#allocation6 + $0x764] ss:$16 sps:$4 sm:$0xff]  }
 0x216   :  { %4974 = vmatpush1.bf16.msra.mxu1 %v8841_v9  ;;  %4932 = vmatprep.subr.bf16.mxu0 %v8846_v10  ;;  %v8955_v9 = vld [vmem:[#allocation6 + $0x6e0] ss:$16 sps:$4 sm:$0xff]  }
 0x217   :  { %4975 = vmatprep.subr.bf16.mxu1 %v8849_v11  ;;  %v10307_v10 = vpack.c.bf16 %v3349_v6, %v3345_v8  ;;  %v8912_v11 = vld [vmem:[#allocation6 + $0x4a4] ss:$16 sps:$4 sm:$0xff]  }
 0x218   :  { %v9035_v6 = vld [vmem:[#allocation6 + $0x744] ss:$16 sps:$4 sm:$0xff]  }
 0x219   :  { %4933 = vmatpush1.bf16.msra.mxu0 %v8844_v14  ;;  %v8969_v14 = vld [vmem:[#allocation6 + $0x6a4] ss:$16 sps:$4 sm:$0xff]  }
 0x21a   :  { %4976 = vmatpush1.bf16.msra.mxu1 %v8847_v17  ;;  %4934 = vmatprep.subr.bf16.mxu0 %v8852_v18  ;;  %v8910_v17 = vld [vmem:[#allocation6 + $0x4a0] ss:$16 sps:$4 sm:$0xff]   ;;  %v8915_v18 = vld [vmem:[#allocation6 + $0x484] ss:$16 sps:$4 sm:$0xff]  }
 0x21b   :  { %4977 = vmatprep.subr.bf16.mxu1 %v8855_v19  ;;  %v8967_v19 = vld [vmem:[#allocation6 + $0x6a0] ss:$16 sps:$4 sm:$0xff]  }
 0x21d   :  { %4935 = vmatpush1.bf16.msra.mxu0 %v8850_v20  ;;  %v8975_v20 = vld [vmem:[#allocation6 + $0x684] ss:$16 sps:$4 sm:$0xff]  }
 0x21e   :  { %4978 = vmatpush1.bf16.msra.mxu1 %v8853_v49  ;;  %4936 = vmatprep.subr.bf16.mxu0 %v8858_v43  ;;  %v8913_v49 = vld [vmem:[#allocation6 + $0x480] ss:$16 sps:$4 sm:$0xff]   ;;  %v8918_v43 = vld [vmem:[#allocation6 + $0x464] ss:$16 sps:$4 sm:$0xff]  }
 0x21f   :  { %4979 = vmatprep.subr.bf16.mxu1 %v8861_v21  ;;  %v8973_v21 = vld [vmem:[#allocation6 + $0x680] ss:$16 sps:$4 sm:$0xff]  }
 0x221   :  { %4937 = vmatpush2.bf16.msra.mxu0 %v8856_v23  ;;  %v8981_v23 = vld [vmem:[#allocation6 + $0x664] ss:$16 sps:$4 sm:$0xff]  }
 0x222   :  { %4980 = vmatpush2.bf16.msra.mxu1 %v8859_v25  ;;  %4938 = vmatprep.subr.bf16.mxu0 %v8864_v26  ;;  %v8916_v25 = vld [vmem:[#allocation6 + $0x460] ss:$16 sps:$4 sm:$0xff]   ;;  %v8921_v26 = vld [vmem:[#allocation6 + $0x444] ss:$16 sps:$4 sm:$0xff]  }
 0x223   :  { %4981 = vmatprep.subr.bf16.mxu1 %v8867_v28  ;;  %v8979_v28 = vld [vmem:[#allocation6 + $0x660] ss:$16 sps:$4 sm:$0xff]  }
 0x225   :  { %4939 = vmatpush2.bf16.msra.mxu0 %v8862_v59  ;;  %v8987_v59 = vld [vmem:[#allocation6 + $0x644] ss:$16 sps:$4 sm:$0xff]  }
 0x226   :  { %4982 = vmatpush2.bf16.msra.mxu1 %v8865_v29  ;;  %4940 = vmatprep.subr.bf16.mxu0 %v8870_v30  ;;  %v8919_v29 = vld [vmem:[#allocation6 + $0x440] ss:$16 sps:$4 sm:$0xff]   ;;  %v8924_v30 = vld [vmem:[#allocation6 + $0x424] ss:$16 sps:$4 sm:$0xff]  }
 0x227   :  { %4983 = vmatprep.subr.bf16.mxu1 %v8873_v32  ;;  %v8985_v32 = vld [vmem:[#allocation6 + $0x640] ss:$16 sps:$4 sm:$0xff]  }
 0x229   :  { %4941 = vmatpush2.bf16.msra.mxu0 %v8868_v33  ;;  %v8993_v33 = vld [vmem:[#allocation6 + $0x624] ss:$16 sps:$4 sm:$0xff]  }
 0x22a   :  { %4984 = vmatpush2.bf16.msra.mxu1 %v8871_v34  ;;  %4942 = vmatprep.subr.bf16.mxu0 %v8876_v0  ;;  %v8922_v34 = vld [vmem:[#allocation6 + $0x420] ss:$16 sps:$4 sm:$0xff]   ;;  %v8927_v0 = vld [vmem:[#allocation6 + $0x404] ss:$16 sps:$4 sm:$0xff]  }
 0x22b   :  { %4985 = vmatprep.subr.bf16.mxu1 %v8879_v50  ;;  %v8991_v50 = vld [vmem:[#allocation6 + $0x620] ss:$16 sps:$4 sm:$0xff]  }
 0x22d   :  { %4943 = vmatpush2.bf16.msra.mxu0 %v8874_v37  ;;  %v8999_v37 = vld [vmem:[#allocation6 + $0x604] ss:$16 sps:$4 sm:$0xff]  }
 0x22e   :  { %4986 = vmatpush2.bf16.msra.mxu1 %v8877_v38  ;;  %4944 = vmatprep.subr.bf16.mxu0 %v8882_v39  ;;  %v8925_v38 = vld [vmem:[#allocation6 + $0x400] ss:$16 sps:$4 sm:$0xff]   ;;  %v8930_v39 = vld [vmem:[#allocation6 + $0x5e4] ss:$16 sps:$4 sm:$0xff]  }
 0x22f   :  { %4987 = vmatprep.subr.bf16.mxu1 %v8885_v40  ;;  %v8997_v40 = vld [vmem:[#allocation6 + $0x600] ss:$16 sps:$4 sm:$0xff]  }
 0x231   :  { %4945 = vmatpush2.bf16.msra.mxu0 %v8880_v41  ;;  %v9005_v41 = vld [vmem:[#allocation6 + $0x7e4] ss:$16 sps:$4 sm:$0xff]  }
 0x232   :  { %4988 = vmatpush2.bf16.msra.mxu1 %v8883_v16  ;;  %4946 = vmatprep.subr.bf16.mxu0 %v8888_v56  ;;  %v8928_v16 = vld [vmem:[#allocation6 + $0x5e0] ss:$16 sps:$4 sm:$0xff]   ;;  %v8933_v56 = vld [vmem:[#allocation6 + $0x5c4] ss:$16 sps:$4 sm:$0xff]  }
 0x233   :  { %4989 = vmatprep.subr.bf16.mxu1 %v8891_v45  ;;  %v9003_v45 = vld [vmem:[#allocation6 + $0x7e0] ss:$16 sps:$4 sm:$0xff]  }
 0x235   :  { %4947 = vmatpush2.bf16.msra.mxu0 %v8886_v47  ;;  %v8931_v47 = vld [vmem:[#allocation6 + $0x5c0] ss:$16 sps:$4 sm:$0xff]  }
 0x236   :  { %4990 = vmatpush2.bf16.msra.mxu1 %v8889_v48  ;;  %4948 = vmatprep.subr.bf16.mxu0 %v8894_v22  ;;  %v8936_v48 = vld [vmem:[#allocation6 + $0x5a4] ss:$16 sps:$4 sm:$0xff]   ;;  %v9009_v22 = vld [vmem:[#allocation6 + $0x7c0] ss:$16 sps:$4 sm:$0xff]  }
 0x237   :  { %4991 = vmatprep.subr.bf16.mxu1 %v8897_v51  ;;  %v9017_v51 = vld [vmem:[#allocation6 + $0x7a4] ss:$16 sps:$4 sm:$0xff]  }
 0x239   :  { %4949 = vmatpush2.bf16.msra.mxu0 %v8892_v53  ;;  %v8939_v53 = vld [vmem:[#allocation6 + $0x584] ss:$16 sps:$4 sm:$0xff]  }
 0x23a   :  { %4992 = vmatpush2.bf16.msra.mxu1 %v8895_v55  ;;  %4950 = vmatprep.subr.bf16.mxu0 %v8900_v57  ;;  %v9015_v55 = vld [vmem:[#allocation6 + $0x7a0] ss:$16 sps:$4 sm:$0xff]   ;;  %v9023_v57 = vld [vmem:[#allocation6 + $0x784] ss:$16 sps:$4 sm:$0xff]  }
 0x23b   :  { %4993 = vmatprep.subr.bf16.mxu1 %v8903_v61  ;;  %v9021_v61 = vld [vmem:[#allocation6 + $0x780] ss:$16 sps:$4 sm:$0xff]  }
 0x23d   :  { %4951 = vmatpush2.bf16.msra.mxu0 %v8898_v3  ;;  %v8940_v3 = vld [vmem:[#allocation6 + $0x560] ss:$16 sps:$4 sm:$0xff]  }
 0x23e   :  { %4994 = vmatpush2.bf16.msra.mxu1 %v8901_v4  ;;  %5006 = vmatprep.subr.bf16.mxu0 %v8906_v1  ;;  %v8945_v4 = vld [vmem:[#allocation6 + $0x544] ss:$16 sps:$4 sm:$0xff]   ;;  %v9027_v1 = vld [vmem:[#allocation6 + $0x760] ss:$16 sps:$4 sm:$0xff]  }
 0x23f   :  { %5049 = vmatprep.subr.bf16.mxu1 %v8957_v42  ;;  %v8943_v42 = vld [vmem:[#allocation6 + $0x540] ss:$16 sps:$4 sm:$0xff]  }
 0x240   :  { %4953 = vmatmul.mubr.bf16.vlgmr.msra.gmra.mxu0 %v10256_v31  ;;  %v3387_v8 = vpop.f32.mrf.mxu0 }
 0x241   :  { %4996 = vmatmul.mubr.bf16.vlgmr.msra.gmra.mxu1 %v10307_v10  ;;  %5007 = vmatpush1.bf16.msra.mxu0 %v8904_v63  ;;  %v8948_v63 = vld [vmem:[#allocation6 + $0x524] ss:$16 sps:$4 sm:$0xff]  }
 0x242   :  { %5008 = vmatprep.subr.bf16.mxu0 %v8909_v44  ;;  %5050 = vmatpush1.bf16.msra.mxu1 %v8955_v9  ;;  %v9033_v44 = vld [vmem:[#allocation6 + $0x740] ss:$16 sps:$4 sm:$0xff]   ;;  %v9041_v9 = vld [vmem:[#allocation6 + $0x724] ss:$16 sps:$4 sm:$0xff]  }
 0x243   :  { %5051 = vmatprep.subr.bf16.mxu1 %v8963_v36  ;;  %v8946_v36 = vld [vmem:[#allocation6 + $0x520] ss:$16 sps:$4 sm:$0xff]  }
 0x245   :  { %5009 = vmatpush1.bf16.msra.mxu0 %v8907_v46  ;;  %v3389_v46 = vpop.f32.mrf.mxu0 }
 0x246   :  { %5010 = vmatprep.subr.bf16.mxu0 %v8912_v11  ;;  %5052 = vmatpush1.bf16.msra.mxu1 %v8961_v13  ;;  %v8951_v11 = vld [vmem:[#allocation6 + $0x504] ss:$16 sps:$4 sm:$0xff]   ;;  %v9039_v13 = vld [vmem:[#allocation6 + $0x720] ss:$16 sps:$4 sm:$0xff]  }
 0x247   :  { %5053 = vmatprep.subr.bf16.mxu1 %v8969_v14  ;;  %v9047_v14 = vld [vmem:[#allocation6 + $0x704] ss:$16 sps:$4 sm:$0xff]  }
 0x249   :  { %5011 = vmatpush1.bf16.msra.mxu0 %v8910_v17  ;;  %v3430_v17 = vpop.f32.mrf.mxu1 }
 0x24a   :  { %5012 = vmatprep.subr.bf16.mxu0 %v8915_v18  ;;  %5054 = vmatpush1.bf16.msra.mxu1 %v8967_v19  ;;  %v1127_v18 = vsub.s32 5, %v10211_v15  ;;  %v8949_v19 = vld [vmem:[#allocation6 + $0x500] ss:$16 sps:$4 sm:$0xff]  }
 0x24b   :  { %5055 = vmatprep.subr.bf16.mxu1 %v8975_v20  ;;  %v1123_v20 = vsub.s32 4, %v10211_v15 }
 0x24d   :  { %5013 = vmatpush1.bf16.msra.mxu0 %v8913_v49  ;;  %v3391_v49 = vpop.f32.mrf.mxu0 }
 0x24e   :  { %5014 = vmatprep.subr.bf16.mxu0 %v8918_v43  ;;  %5056 = vmatpush1.bf16.msra.mxu1 %v8973_v21  ;;  %v8954_v43 = vld [vmem:[#allocation6 + $0xec] ss:$16 sps:$4 sm:$0xff]   ;;  %v9045_v21 = vld [vmem:[#allocation6 + $0x700] ss:$16 sps:$4 sm:$0xff]  }
 0x24f   :  { %5057 = vmatprep.subr.bf16.mxu1 %v8981_v23  ;;  %v9053_v23 = vld [vmem:[#allocation6 + $0x2ec] ss:$16 sps:$4 sm:$0xff]  }
 0x251   :  { %5015 = vmatpush1.bf16.msra.mxu0 %v8916_v25  ;;  %v3432_v25 = vpop.f32.mrf.mxu1 }
 0x252   :  { %5016 = vmatprep.subr.bf16.mxu0 %v8921_v26  ;;  %5058 = vmatpush1.bf16.msra.mxu1 %v8979_v28  ;;  %v1128_v26 = vrot.slane %v10263_v5, %v1127_v18  ;;  %v1124_v28 = vrot.slane %v10263_v5, %v1123_v20  ;;  %v9026_v18 = vld [vmem:[#allocation6 + $0x16c] ss:$16 sps:$4 sm:$0xff]   ;;  %v9024_v20 = vld [vmem:[#allocation6 + $0x168] ss:$16 sps:$4 sm:$0xff]  }
 0x253   :  { %5059 = vmatprep.subr.bf16.mxu1 %v8987_v59  ;;  %v3393_v59 = vpop.f32.mrf.mxu0 }
 0x255   :  { %5017 = vmatpush1.bf16.msra.mxu0 %v8919_v29  ;;  %v3392_v29 = vadd.f32 %v3391_v49, %v1124_v28  ;;  %v9032_v49 = vld [vmem:[#allocation6 + $0x14c] ss:$16 sps:$4 sm:$0xff]  }
 0x256   :  { %5018 = vmatprep.subr.bf16.mxu0 %v8924_v30  ;;  %5060 = vmatpush1.bf16.msra.mxu1 %v8985_v32  ;;  %v3434_v30 = vpop.f32.mrf.mxu1 }
 0x257   :  { %5061 = vmatprep.subr.bf16.mxu1 %v8993_v33  ;;  %v3390_v33 = vadd.f32 %v3389_v46, %v1128_v26  ;;  %v9014_v46 = vld [vmem:[#allocation6 + $0x1ac] ss:$16 sps:$4 sm:$0xff]  }
 0x259   :  { %5019 = vmatpush1.bf16.msra.mxu0 %v8922_v34  ;;  %v3394_v34 = vadd.f32 %v3393_v59, %v1128_v26  ;;  %v9038_v26 = vld [vmem:[#allocation6 + $0x12c] ss:$16 sps:$4 sm:$0xff]  }
 0x25a   :  { %5020 = vmatprep.subr.bf16.mxu0 %v8927_v0  ;;  %5062 = vmatpush1.bf16.msra.mxu1 %v8991_v50  ;;  %v3388_v0 = vadd.f32 %v3387_v8, %v1124_v28  ;;  %v8994_v8 = vld [vmem:[#allocation6 + $0x8] ss:$16 sps:$4 sm:$0xff]  }
 0x25b   :  { %5063 = vmatprep.subr.bf16.mxu1 %v8999_v37  ;;  %v3435_v37 = vadd.f32 %v3434_v30, %v3392_v29 }
 0x25d   :  { %5021 = vmatpush1.bf16.msra.mxu0 %v8925_v38  ;;  %v3436_v38 = vpop.f32.mrf.mxu1 }
 0x25e   :  { %5022 = vmatprep.subr.bf16.mxu0 %v8930_v39  ;;  %5064 = vmatpush1.bf16.msra.mxu1 %v8997_v40  ;;  %v3433_v40 = vadd.f32 %v3432_v25, %v3390_v33  ;;  %v9030_v25 = vld [vmem:[#allocation6 + $0x148] ss:$16 sps:$4 sm:$0xff]  }
 0x25f   :  { %5065 = vmatprep.subr.bf16.mxu1 %v9005_v41  ;;  %v3437_v41 = vadd.f32 %v3436_v38, %v3394_v34  ;;  %v9036_v33 = vld [vmem:[#allocation6 + $0x128] ss:$16 sps:$4 sm:$0xff]  }
 0x261   :  { %5023 = vmatpush2.bf16.msra.mxu0 %v8928_v16  ;;  %v3431_v16 = vadd.f32 %v3430_v17, %v3388_v0  ;;  %v9018_v17 = vld [vmem:[#allocation6 + $0x188] ss:$16 sps:$4 sm:$0xff]   ;;  %v9044_v0 = vld [vmem:[#allocation6 + $0x10c] ss:$16 sps:$4 sm:$0xff]  }
 0x262   :  { %5024 = vmatprep.subr.bf16.mxu0 %v8933_v56  ;;  %5066 = vmatpush2.bf16.msra.mxu1 %v9003_v45 }
 0x263   :  { %5067 = vmatprep.subr.bf16.mxu1 %v9011_v7 }
 0x265   :  { %5025 = vmatpush2.bf16.msra.mxu0 %v8931_v47 }
 0x266   :  { %5026 = vmatprep.subr.bf16.mxu0 %v8936_v48  ;;  %5068 = vmatpush2.bf16.msra.mxu1 %v9009_v22 }
 0x267   :  { %5069 = vmatprep.subr.bf16.mxu1 %v9017_v51  ;;  %v8952_v51 = vld [vmem:[#allocation6 + $0xe8] ss:$16 sps:$4 sm:$0xff]  }
 0x269   :  { %5027 = vmatpush2.bf16.msra.mxu0 %v8934_v52 }
 0x26a   :  { %5028 = vmatprep.subr.bf16.mxu0 %v8939_v53  ;;  %5070 = vmatpush2.bf16.msra.mxu1 %v9015_v55  ;;  %v8960_v53 = vld [vmem:[#allocation6 + $0xcc] ss:$16 sps:$4 sm:$0xff]   ;;  %v8958_v55 = vld [vmem:[#allocation6 + $0xc8] ss:$16 sps:$4 sm:$0xff]  }
 0x26b   :  { %5071 = vmatprep.subr.bf16.mxu1 %v9023_v57  ;;  %v8966_v57 = vld [vmem:[#allocation6 + $0xac] ss:$16 sps:$4 sm:$0xff]  }
 0x26d   :  { %5029 = vmatpush2.bf16.msra.mxu0 %v8937_v58  ;;  %v8964_v58 = vld [vmem:[#allocation6 + $0xa8] ss:$16 sps:$4 sm:$0xff]  }
 0x26e   :  { %5030 = vmatprep.subr.bf16.mxu0 %v8942_v60  ;;  %5072 = vmatpush2.bf16.msra.mxu1 %v9021_v61  ;;  %v8972_v60 = vld [vmem:[#allocation6 + $0x8c] ss:$16 sps:$4 sm:$0xff]   ;;  %v8970_v61 = vld [vmem:[#allocation6 + $0x88] ss:$16 sps:$4 sm:$0xff]  }
 0x26f   :  { %5073 = vmatprep.subr.bf16.mxu1 %v9029_v2  ;;  %v8978_v2 = vld [vmem:[#allocation6 + $0x6c] ss:$16 sps:$4 sm:$0xff]  }
 0x271   :  { %5031 = vmatpush2.bf16.msra.mxu0 %v8940_v3  ;;  %v8976_v3 = vld [vmem:[#allocation6 + $0x68] ss:$16 sps:$4 sm:$0xff]  }
 0x272   :  { %5032 = vmatprep.subr.bf16.mxu0 %v8945_v4  ;;  %5074 = vmatpush2.bf16.msra.mxu1 %v9027_v1  ;;  %v8984_v4 = vld [vmem:[#allocation6 + $0x4c] ss:$16 sps:$4 sm:$0xff]   ;;  %v8982_v1 = vld [vmem:[#allocation6 + $0x48] ss:$16 sps:$4 sm:$0xff]  }
 0x273   :  { %5075 = vmatprep.subr.bf16.mxu1 %v9035_v6  ;;  %v8990_v6 = vld [vmem:[#allocation6 + $0x2c] ss:$16 sps:$4 sm:$0xff]  }
 0x275   :  { %5033 = vmatpush2.bf16.msra.mxu0 %v8943_v42  ;;  %v8996_v42 = vld [vmem:[#allocation6 + $0xc] ss:$16 sps:$4 sm:$0xff]  }
 0x276   :  { %5034 = vmatprep.subr.bf16.mxu0 %v8948_v63  ;;  %5076 = vmatpush2.bf16.msra.mxu1 %v9033_v44  ;;  %v9002_v63 = vld [vmem:[#allocation6 + $0x1ec] ss:$16 sps:$4 sm:$0xff]   ;;  %v9000_v44 = vld [vmem:[#allocation6 + $0x1e8] ss:$16 sps:$4 sm:$0xff]  }
 0x277   :  { %5077 = vmatprep.subr.bf16.mxu1 %v9041_v9  ;;  %v9008_v9 = vld [vmem:[#allocation6 + $0x1cc] ss:$16 sps:$4 sm:$0xff]  }
 0x279   :  { %5035 = vmatpush2.bf16.msra.mxu0 %v8946_v36  ;;  %v9006_v36 = vld [vmem:[#allocation6 + $0x1c8] ss:$16 sps:$4 sm:$0xff]  }
 0x27a   :  { %5036 = vmatprep.subr.bf16.mxu0 %v8951_v11  ;;  %5078 = vmatpush2.bf16.msra.mxu1 %v9039_v13  ;;  %v9012_v11 = vld [vmem:[#allocation6 + $0x1a8] ss:$16 sps:$4 sm:$0xff]   ;;  %v9020_v13 = vld [vmem:[#allocation6 + $0x18c] ss:$16 sps:$4 sm:$0xff]  }
 0x27b   :  { %5079 = vmatprep.subr.bf16.mxu1 %v9047_v14 }
 0x27d   :  { %5037 = vmatpush2.bf16.msra.mxu0 %v8949_v19 }
 0x27e   :  { %5092 = vmatprep.subr.bf16.mxu0 %v8954_v43  ;;  %5080 = vmatpush2.bf16.msra.mxu1 %v9045_v21  ;;  %v1131_v43 = vsub.s32 6, %v10211_v15  ;;  %v1135_v21 = vsub.s32 7, %v10211_v15 }
 0x27f   :  { %5135 = vmatprep.subr.bf16.mxu1 %v9053_v23 }
 0x280   :  { %v3473_v32 = vpop.f32.mrf.mxu0  ;;  %v1132_v28 = vrot.slane %v10263_v5, %v1131_v43  ;;  %v1136_v59 = vrot.slane %v10263_v5, %v1135_v21  ;;  %v9089_v43 = vld [vmem:[#allocation6 + $0x22c] ss:$16 sps:$4 sm:$0xff]  }
 0x281   :  { %v3474_v48 = vadd.f32 %v3473_v32, %v3431_v16  ;;  %v3516_v14 = vpop.f32.mrf.mxu1  ;;  %v9092_v21 = vld [vmem:[#allocation6 + $0x40c] ss:$16 sps:$4 sm:$0xff]  }
 0x282   :  { %v3475_v50 = vpop.f32.mrf.mxu0 }
 0x283   :  { %v3476_v7 = vadd.f32 %v3475_v50, %v3433_v40  ;;  %v3518_v19 = vpop.f32.mrf.mxu1 }
 0x284   :  { %v3477_v39 = vpop.f32.mrf.mxu0  ;;  %v3519_v50 = vadd.f32 %v3518_v19, %v1136_v59  ;;  %v9086_v19 = vld [vmem:[#allocation6 + $0x42c] ss:$16 sps:$4 sm:$0xff]  }
 0x285   :  { %v3478_v56 = vadd.f32 %v3477_v39, %v3435_v37  ;;  %v3520_v23 = vpop.f32.mrf.mxu1  ;;  %v3517_v39 = vadd.f32 %v3516_v14, %v1132_v28  ;;  %v9075_v14 = vld [vmem:[#allocation6 + $0x268] ss:$16 sps:$4 sm:$0xff]  }
 0x286   :  { %v3479_v45 = vpop.f32.mrf.mxu0  ;;  %v3521_v37 = vadd.f32 %v3520_v23, %v1132_v28  ;;  %v9087_v23 = vld [vmem:[#allocation6 + $0x228] ss:$16 sps:$4 sm:$0xff]   ;;  %v9098_v28 = vld [vmem:[#allocation6 + $0x5ec] ss:$16 sps:$4 sm:$0xff]  }
 0x287   :  { %v3480_v47 = vadd.f32 %v3479_v45, %v3437_v41  ;;  %v10317_v52 = vpack.c.bf16 %v3478_v56, %v3474_v48  ;;  %v3522_v29 = vpop.f32.mrf.mxu1  ;;  %v9042_v45 = vld [vmem:[#allocation6 + $0x108] ss:$16 sps:$4 sm:$0xff]  }
 0x288   :  { %v3523_v40 = vadd.f32 %v3522_v29, %v1136_v59  ;;  %v9093_v59 = vld [vmem:[#allocation6 + $0x208] ss:$16 sps:$4 sm:$0xff]  }
 0x289   :  { %v10315_v22 = vpack.c.bf16 %v3480_v47, %v3476_v7  ;;  %v9050_v7 = vld [vmem:[#allocation6 + $0x4ec] ss:$16 sps:$4 sm:$0xff]   ;;  %v9096_v29 = vld [vmem:[#allocation6 + $0x5e8] ss:$16 sps:$4 sm:$0xff]  }
 0x28b   :  { %5038 = vmatprep.mubr.bf16.mxu0 %v10315_v22 }
 0x28c   :  { %5039 = vmatmul.mubr.bf16.vlgmr.msra.gmra.mxu0 %v10317_v52 }
 0x28d   :  { %5093 = vmatpush1.bf16.msra.mxu0 %v8952_v51  ;;  %5124 = vmatprep.mubr.bf16.mxu0 %v10278_v35  ;;  %v8988_v35 = vld [vmem:[#allocation6 + $0x28] ss:$16 sps:$4 sm:$0xff]  }
 0x28e   :  { %5094 = vmatprep.subr.bf16.mxu0 %v8960_v53 }
 0x291   :  { %5095 = vmatpush1.bf16.msra.mxu0 %v8958_v55 }
 0x292   :  { %5096 = vmatprep.subr.bf16.mxu0 %v8966_v57 }
 0x295   :  { %5097 = vmatpush1.bf16.msra.mxu0 %v8964_v58  ;;  %v9048_v58 = vld [vmem:[#allocation6 + $0x4e8] ss:$16 sps:$4 sm:$0xff]  }
 0x296   :  { %5098 = vmatprep.subr.bf16.mxu0 %v8972_v60  ;;  %v9056_v60 = vld [vmem:[#allocation6 + $0x4cc] ss:$16 sps:$4 sm:$0xff]  }
 0x299   :  { %5099 = vmatpush1.bf16.msra.mxu0 %v8970_v61 }
 0x29a   :  { %5100 = vmatprep.subr.bf16.mxu0 %v8978_v2 }
 0x29d   :  { %5101 = vmatpush1.bf16.msra.mxu0 %v8976_v3  ;;  %v9051_v3 = vld [vmem:[#allocation6 + $0x2e8] ss:$16 sps:$4 sm:$0xff]  }
 0x29e   :  { %5102 = vmatprep.subr.bf16.mxu0 %v8984_v4 }
 0x2a1   :  { %5103 = vmatpush1.bf16.msra.mxu0 %v8982_v1  ;;  %v9054_v1 = vld [vmem:[#allocation6 + $0x4c8] ss:$16 sps:$4 sm:$0xff]  }
 0x2a2   :  { %5104 = vmatprep.subr.bf16.mxu0 %v8990_v6  ;;  %v9059_v6 = vld [vmem:[#allocation6 + $0x2cc] ss:$16 sps:$4 sm:$0xff]  }
 0x2a5   :  { %5105 = vmatpush1.bf16.msra.mxu0 %v8988_v35  ;;  %v9062_v35 = vld [vmem:[#allocation6 + $0x4ac] ss:$16 sps:$4 sm:$0xff]  }
 0x2a6   :  { %5106 = vmatprep.subr.bf16.mxu0 %v8996_v42  ;;  %v9057_v42 = vld [vmem:[#allocation6 + $0x2c8] ss:$16 sps:$4 sm:$0xff]  }
 0x2a9   :  { %5107 = vmatpush1.bf16.msra.mxu0 %v8994_v8  ;;  %v9065_v8 = vld [vmem:[#allocation6 + $0x2ac] ss:$16 sps:$4 sm:$0xff]  }
 0x2aa   :  { %5108 = vmatprep.subr.bf16.mxu0 %v9002_v63  ;;  %v9068_v63 = vld [vmem:[#allocation6 + $0x48c] ss:$16 sps:$4 sm:$0xff]  }
 0x2ad   :  { %5109 = vmatpush2.bf16.msra.mxu0 %v9000_v44  ;;  %v9066_v44 = vld [vmem:[#allocation6 + $0x488] ss:$16 sps:$4 sm:$0xff]  }
 0x2ae   :  { %5110 = vmatprep.subr.bf16.mxu0 %v9008_v9  ;;  %v9071_v9 = vld [vmem:[#allocation6 + $0x28c] ss:$16 sps:$4 sm:$0xff]  }
 0x2b1   :  { %5111 = vmatpush2.bf16.msra.mxu0 %v9006_v36  ;;  %v9074_v36 = vld [vmem:[#allocation6 + $0x46c] ss:$16 sps:$4 sm:$0xff]  }
 0x2b2   :  { %5112 = vmatprep.subr.bf16.mxu0 %v9014_v46  ;;  %v9069_v46 = vld [vmem:[#allocation6 + $0x288] ss:$16 sps:$4 sm:$0xff]  }
 0x2b5   :  { %5113 = vmatpush2.bf16.msra.mxu0 %v9012_v11  ;;  %v9077_v11 = vld [vmem:[#allocation6 + $0x26c] ss:$16 sps:$4 sm:$0xff]  }
 0x2b6   :  { %5114 = vmatprep.subr.bf16.mxu0 %v9020_v13  ;;  %v9080_v13 = vld [vmem:[#allocation6 + $0x44c] ss:$16 sps:$4 sm:$0xff]  }
 0x2b9   :  { %5115 = vmatpush2.bf16.msra.mxu0 %v9018_v17  ;;  %v9078_v17 = vld [vmem:[#allocation6 + $0x448] ss:$16 sps:$4 sm:$0xff]  }
 0x2ba   :  { %5116 = vmatprep.subr.bf16.mxu0 %v9026_v18  ;;  %v9083_v18 = vld [vmem:[#allocation6 + $0x24c] ss:$16 sps:$4 sm:$0xff]  }
 0x2bd   :  { %5117 = vmatpush2.bf16.msra.mxu0 %v9024_v20  ;;  %v9081_v20 = vld [vmem:[#allocation6 + $0x248] ss:$16 sps:$4 sm:$0xff]  }
 0x2be   :  { %5118 = vmatprep.subr.bf16.mxu0 %v9032_v49  ;;  %v9084_v49 = vld [vmem:[#allocation6 + $0x428] ss:$16 sps:$4 sm:$0xff]  }
 0x2c0   :  { %v3559_v30 = vpop.f32.mrf.mxu0 }
 0x2c1   :  { %v3602_v32 = vpop.f32.mrf.mxu1  ;;  %5119 = vmatpush2.bf16.msra.mxu0 %v9030_v25  ;;  %v3560_v47 = vadd.f32 %v3559_v30, %v3517_v39  ;;  %v9090_v25 = vld [vmem:[#allocation6 + $0x408] ss:$16 sps:$4 sm:$0xff]   ;;  %v9101_v30 = vld [vmem:[#allocation6 + $0x3ec] ss:$16 sps:$4 sm:$0xff]  }
 0x2c2   :  { %v3561_v34 = vpop.f32.mrf.mxu0  ;;  %5120 = vmatprep.subr.bf16.mxu0 %v9038_v26  ;;  %v9095_v26 = vld [vmem:[#allocation6 + $0x20c] ss:$16 sps:$4 sm:$0xff]  }
 0x2c3   :  { %v3604_v15 = vpop.f32.mrf.mxu1  ;;  %v3562_v41 = vadd.f32 %v3561_v34, %v3519_v50  ;;  %v3603_v61 = vadd.f32 %v3602_v32, %v3560_v47  ;;  %v9104_v32 = vld [vmem:[#allocation6 + $0x5cc] ss:$16 sps:$4 sm:$0xff]   ;;  %v9102_v34 = vld [vmem:[#allocation6 + $0x5c8] ss:$16 sps:$4 sm:$0xff]  }
 0x2c4   :  { %v3563_v38 = vpop.f32.mrf.mxu0  ;;  %v9110_v50 = vld [vmem:[#allocation6 + $0x5ac] ss:$16 sps:$4 sm:$0xff]  }
 0x2c5   :  { %v3564_v16 = vadd.f32 %v3563_v38, %v3521_v37  ;;  %v3606_v56 = vpop.f32.mrf.mxu1  ;;  %5121 = vmatpush2.bf16.msra.mxu0 %v9036_v33  ;;  %v3605_v53 = vadd.f32 %v3604_v15, %v3562_v41  ;;  %v9099_v33 = vld [vmem:[#allocation6 + $0x3e8] ss:$16 sps:$4 sm:$0xff]   ;;  %v9113_v38 = vld [vmem:[#allocation6 + $0x3ac] ss:$16 sps:$4 sm:$0xff]  }
 0x2c6   :  { %v3565_v5 = vpop.f32.mrf.mxu0  ;;  %5122 = vmatprep.subr.bf16.mxu0 %v9044_v0  ;;  %v9107_v0 = vld [vmem:[#allocation6 + $0x3cc] ss:$16 sps:$4 sm:$0xff]   ;;  %v9105_v37 = vld [vmem:[#allocation6 + $0x3c8] ss:$16 sps:$4 sm:$0xff]  }
 0x2c7   :  { %v3566_v48 = vadd.f32 %v3565_v5, %v3523_v40  ;;  %v3608_v51 = vpop.f32.mrf.mxu1  ;;  %v3607_v55 = vadd.f32 %v3606_v56, %v3564_v16  ;;  %v9108_v15 = vld [vmem:[#allocation6 + $0x5a8] ss:$16 sps:$4 sm:$0xff]   ;;  %v9116_v39 = vld [vmem:[#allocation6 + $0x58c] ss:$16 sps:$4 sm:$0xff]  }
 0x2c8   :  { %v9111_v40 = vld [vmem:[#allocation6 + $0x3a8] ss:$16 sps:$4 sm:$0xff]   ;;  %v9119_v16 = vld [vmem:[#allocation6 + $0x38c] ss:$16 sps:$4 sm:$0xff]  }
 0x2c9   :  { %v3609_v57 = vadd.f32 %v3608_v51, %v3566_v48  ;;  %5123 = vmatpush2.bf16.msra.mxu0 %v9042_v45  ;;  %v10329_v4 = vpack.c.bf16 %v3607_v55, %v3603_v61  ;;  %v9114_v41 = vld [vmem:[#allocation6 + $0x588] ss:$16 sps:$4 sm:$0xff]   ;;  %v9122_v56 = vld [vmem:[#allocation6 + $0x56c] ss:$16 sps:$4 sm:$0xff]  }
 0x2ca   :  { %5178 = vmatprep.subr.bf16.mxu0 %v9050_v7  ;;  %v9117_v45 = vld [vmem:[#allocation6 + $0x388] ss:$16 sps:$4 sm:$0xff]   ;;  %v9125_v7 = vld [vmem:[#allocation6 + $0x36c] ss:$16 sps:$4 sm:$0xff]  }
 0x2cb   :  { %v10326_v2 = vpack.c.bf16 %v3609_v57, %v3605_v53  ;;  %v9120_v5 = vld [vmem:[#allocation6 + $0x568] ss:$16 sps:$4 sm:$0xff]   ;;  %v9128_v47 = vld [vmem:[#allocation6 + $0x54c] ss:$16 sps:$4 sm:$0xff]  }
 0x2cc   :  { %5125 = vmatmul.mubr.bf16.vlgmr.msra.gmra.mxu0 %v10256_v31  ;;  %v9060_v31 = vld [vmem:[#allocation6 + $0x4a8] ss:$16 sps:$4 sm:$0xff]   ;;  %v9131_v53 = vld [vmem:[#allocation6 + $0x34c] ss:$16 sps:$4 sm:$0xff]  }
 0x2cd   :  { %5179 = vmatpush1.bf16.msra.mxu0 %v9048_v58  ;;  %5210 = vmatprep.mubr.bf16.mxu0 %v10315_v22  ;;  %v9063_v22 = vld [vmem:[#allocation6 + $0x2a8] ss:$16 sps:$4 sm:$0xff]   ;;  %v9134_v55 = vld [vmem:[#allocation6 + $0x52c] ss:$16 sps:$4 sm:$0xff]  }
 0x2ce   :  { %5081 = vmatprep.mubr.bf16.mxu1 %v10326_v2  ;;  %5180 = vmatprep.subr.bf16.mxu0 %v9056_v60  ;;  %v9123_v48 = vld [vmem:[#allocation6 + $0x368] ss:$16 sps:$4 sm:$0xff]   ;;  %v9137_v60 = vld [vmem:[#allocation6 + $0x32c] ss:$16 sps:$4 sm:$0xff]  }
 0x2cf   :  { %5082 = vmatmul.mubr.bf16.vlgmr.msra.gmra.mxu1 %v10329_v4  ;;  %v9126_v51 = vld [vmem:[#allocation6 + $0x548] ss:$16 sps:$4 sm:$0xff]   ;;  %v9140_v61 = vld [vmem:[#allocation6 + $0x50c] ss:$16 sps:$4 sm:$0xff]  }
 0x2d0   :  { %5136 = vmatpush1.bf16.msra.mxu1 %v9051_v3  ;;  %5167 = vmatprep.mubr.bf16.mxu1 %v10293_v62  ;;  %v9072_v62 = vld [vmem:[#allocation6 + $0x468] ss:$16 sps:$4 sm:$0xff]  }
 0x2d1   :  { %5181 = vmatpush1.bf16.msra.mxu0 %v9054_v1  ;;  %5137 = vmatprep.subr.bf16.mxu1 %v9059_v6  ;;  %v9129_v57 = vld [vmem:[#allocation6 + $0x348] ss:$16 sps:$4 sm:$0xff]   ;;  %v9143_v6 = vld [vmem:[#allocation6 + $0x30c] ss:$16 sps:$4 sm:$0xff]  }
 0x2d2   :  { %5182 = vmatprep.subr.bf16.mxu0 %v9062_v35  ;;  %v9132_v58 = vld [vmem:[#allocation6 + $0x528] ss:$16 sps:$4 sm:$0xff]  }
 0x2d3   :  { %v9135_v3 = vld [vmem:[#allocation6 + $0x328] ss:$16 sps:$4 sm:$0xff]  }
 0x2d4   :  { %5138 = vmatpush1.bf16.msra.mxu1 %v9057_v42  ;;  %v9138_v1 = vld [vmem:[#allocation6 + $0x508] ss:$16 sps:$4 sm:$0xff]  }
 0x2d5   :  { %5183 = vmatpush1.bf16.msra.mxu0 %v9060_v31  ;;  %5139 = vmatprep.subr.bf16.mxu1 %v9065_v8  ;;  %v9194_v35 = vld [vmem:[#allocation10 + $0xe4] ss:$16 sps:$4 sm:$0xff]   ;;  %v9146_v31 = vld [vmem:[#allocation6 + $0x6ec] ss:$16 sps:$4 sm:$0xff]   ;;  %v9192_v8 = vld [vmem:[#allocation10 + $0xe0] ss:$16 sps:$4 sm:$0xff]  }
 0x2d6   :  { %5184 = vmatprep.subr.bf16.mxu0 %v9068_v63  ;;  %v9141_v42 = vld [vmem:[#allocation6 + $0x308] ss:$16 sps:$4 sm:$0xff]  }
 0x2d7   :  { %v9197_v63 = vld [vmem:[#allocation10 + $0xc4] ss:$16 sps:$4 sm:$0xff]  }
 0x2d8   :  { %5140 = vmatpush1.bf16.msra.mxu1 %v9063_v22  ;;  %v9144_v22 = vld [vmem:[#allocation6 + $0x6e8] ss:$16 sps:$4 sm:$0xff]  }
 0x2d9   :  { %5185 = vmatpush1.bf16.msra.mxu0 %v9066_v44  ;;  %5141 = vmatprep.subr.bf16.mxu1 %v9071_v9  ;;  %v9149_v44 = vld [vmem:[#allocation6 + $0x6cc] ss:$16 sps:$4 sm:$0xff]   ;;  %v9195_v9 = vld [vmem:[#allocation10 + $0xc0] ss:$16 sps:$4 sm:$0xff]  }
 0x2da   :  { %5186 = vmatprep.subr.bf16.mxu0 %v9074_v36  ;;  %v9200_v36 = vld [vmem:[#allocation10 + $0xa4] ss:$16 sps:$4 sm:$0xff]  }
 0x2dc   :  { %5142 = vmatpush1.bf16.msra.mxu1 %v9069_v46  ;;  %v9147_v46 = vld [vmem:[#allocation6 + $0x6c8] ss:$16 sps:$4 sm:$0xff]  }
 0x2dd   :  { %5187 = vmatpush1.bf16.msra.mxu0 %v9072_v62  ;;  %5143 = vmatprep.subr.bf16.mxu1 %v9077_v11  ;;  %v9152_v62 = vld [vmem:[#allocation6 + $0x6ac] ss:$16 sps:$4 sm:$0xff]   ;;  %v9198_v11 = vld [vmem:[#allocation10 + $0xa0] ss:$16 sps:$4 sm:$0xff]  }
 0x2de   :  { %5188 = vmatprep.subr.bf16.mxu0 %v9080_v13  ;;  %v9203_v13 = vld [vmem:[#allocation10 + $0x84] ss:$16 sps:$4 sm:$0xff]  }
 0x2e0   :  { %5144 = vmatpush1.bf16.msra.mxu1 %v9075_v14  ;;  %v9155_v14 = vld [vmem:[#allocation6 + $0x68c] ss:$16 sps:$4 sm:$0xff]  }
 0x2e1   :  { %5189 = vmatpush1.bf16.msra.mxu0 %v9078_v17  ;;  %5145 = vmatprep.subr.bf16.mxu1 %v9083_v18  ;;  %v9201_v17 = vld [vmem:[#allocation10 + $0x80] ss:$16 sps:$4 sm:$0xff]   ;;  %v9206_v18 = vld [vmem:[#allocation10 + $0x64] ss:$16 sps:$4 sm:$0xff]  }
 0x2e2   :  { %5190 = vmatprep.subr.bf16.mxu0 %v9086_v19  ;;  %v9158_v19 = vld [vmem:[#allocation6 + $0x66c] ss:$16 sps:$4 sm:$0xff]  }
 0x2e4   :  { %5146 = vmatpush1.bf16.msra.mxu1 %v9081_v20  ;;  %v9209_v20 = vld [vmem:[#allocation10 + $0x44] ss:$16 sps:$4 sm:$0xff]  }
 0x2e5   :  { %5191 = vmatpush1.bf16.msra.mxu0 %v9084_v49  ;;  %5147 = vmatprep.subr.bf16.mxu1 %v9089_v43  ;;  %v9156_v49 = vld [vmem:[#allocation6 + $0x668] ss:$16 sps:$4 sm:$0xff]   ;;  %v9161_v43 = vld [vmem:[#allocation6 + $0x64c] ss:$16 sps:$4 sm:$0xff]  }
 0x2e6   :  { %5192 = vmatprep.subr.bf16.mxu0 %v9092_v21  ;;  %v9207_v21 = vld [vmem:[#allocation10 + $0x40] ss:$16 sps:$4 sm:$0xff]  }
 0x2e8   :  { %5148 = vmatpush1.bf16.msra.mxu1 %v9087_v23  ;;  %v9212_v23 = vld [vmem:[#allocation10 + $0x24] ss:$16 sps:$4 sm:$0xff]  }
 0x2e9   :  { %5193 = vmatpush1.bf16.msra.mxu0 %v9090_v25  ;;  %5149 = vmatprep.subr.bf16.mxu1 %v9095_v26  ;;  %v9159_v25 = vld [vmem:[#allocation6 + $0x648] ss:$16 sps:$4 sm:$0xff]   ;;  %v9164_v26 = vld [vmem:[#allocation6 + $0x62c] ss:$16 sps:$4 sm:$0xff]  }
 0x2ea   :  { %5194 = vmatprep.subr.bf16.mxu0 %v9098_v28  ;;  %v9210_v28 = vld [vmem:[#allocation10 + $0x20] ss:$16 sps:$4 sm:$0xff]  }
 0x2ec   :  { %5150 = vmatpush1.bf16.msra.mxu1 %v9093_v59  ;;  %v9215_v59 = vld [vmem:[#allocation10 + $0x4] ss:$16 sps:$4 sm:$0xff]  }
 0x2ed   :  { %5195 = vmatpush2.bf16.msra.mxu0 %v9096_v29  ;;  %5151 = vmatprep.subr.bf16.mxu1 %v9101_v30  ;;  %v9162_v29 = vld [vmem:[#allocation6 + $0x628] ss:$16 sps:$4 sm:$0xff]   ;;  %v9167_v30 = vld [vmem:[#allocation6 + $0x60c] ss:$16 sps:$4 sm:$0xff]  }
 0x2ee   :  { %5196 = vmatprep.subr.bf16.mxu0 %v9104_v32  ;;  %v9213_v32 = vld [vmem:[#allocation10] ss:$16 sps:$4 sm:$0xff]  }
 0x2f0   :  { %5152 = vmatpush2.bf16.msra.mxu1 %v9099_v33  ;;  %v9218_v33 = vld [vmem:[#allocation10 + $0x1e4] ss:$16 sps:$4 sm:$0xff]  }
 0x2f1   :  { %5197 = vmatpush2.bf16.msra.mxu0 %v9102_v34  ;;  %5153 = vmatprep.subr.bf16.mxu1 %v9107_v0  ;;  %v9165_v34 = vld [vmem:[#allocation6 + $0x608] ss:$16 sps:$4 sm:$0xff]   ;;  %v9170_v0 = vld [vmem:[#allocation6 + $0x7ec] ss:$16 sps:$4 sm:$0xff]  }
 0x2f2   :  { %5198 = vmatprep.subr.bf16.mxu0 %v9110_v50  ;;  %v9216_v50 = vld [vmem:[#allocation10 + $0x1e0] ss:$16 sps:$4 sm:$0xff]  }
 0x2f4   :  { %5154 = vmatpush2.bf16.msra.mxu1 %v9105_v37  ;;  %v9221_v37 = vld [vmem:[#allocation10 + $0x1c4] ss:$16 sps:$4 sm:$0xff]  }
 0x2f5   :  { %5199 = vmatpush2.bf16.msra.mxu0 %v9108_v15  ;;  %5155 = vmatprep.subr.bf16.mxu1 %v9113_v38  ;;  %v9168_v15 = vld [vmem:[#allocation6 + $0x7e8] ss:$16 sps:$4 sm:$0xff]   ;;  %v9173_v38 = vld [vmem:[#allocation6 + $0x7cc] ss:$16 sps:$4 sm:$0xff]  }
 0x2f6   :  { %5200 = vmatprep.subr.bf16.mxu0 %v9116_v39  ;;  %v9219_v39 = vld [vmem:[#allocation10 + $0x1c0] ss:$16 sps:$4 sm:$0xff]  }
 0x2f8   :  { %5156 = vmatpush2.bf16.msra.mxu1 %v9111_v40  ;;  %v9224_v40 = vld [vmem:[#allocation10 + $0x1a4] ss:$16 sps:$4 sm:$0xff]  }
 0x2f9   :  { %5201 = vmatpush2.bf16.msra.mxu0 %v9114_v41  ;;  %5157 = vmatprep.subr.bf16.mxu1 %v9119_v16  ;;  %v9171_v41 = vld [vmem:[#allocation6 + $0x7c8] ss:$16 sps:$4 sm:$0xff]   ;;  %v9176_v16 = vld [vmem:[#allocation6 + $0x7ac] ss:$16 sps:$4 sm:$0xff]  }
 0x2fa   :  { %5202 = vmatprep.subr.bf16.mxu0 %v9122_v56  ;;  %v9222_v56 = vld [vmem:[#allocation10 + $0x1a0] ss:$16 sps:$4 sm:$0xff]  }
 0x2fc   :  { %5158 = vmatpush2.bf16.msra.mxu1 %v9117_v45  ;;  %v9227_v45 = vld [vmem:[#allocation10 + $0x184] ss:$16 sps:$4 sm:$0xff]  }
 0x2fd   :  { %5203 = vmatpush2.bf16.msra.mxu0 %v9120_v5  ;;  %5159 = vmatprep.subr.bf16.mxu1 %v9125_v7  ;;  %v9174_v5 = vld [vmem:[#allocation6 + $0x7a8] ss:$16 sps:$4 sm:$0xff]   ;;  %v9179_v7 = vld [vmem:[#allocation6 + $0x78c] ss:$16 sps:$4 sm:$0xff]  }
 0x2fe   :  { %5204 = vmatprep.subr.bf16.mxu0 %v9128_v47  ;;  %v9225_v47 = vld [vmem:[#allocation10 + $0x180] ss:$16 sps:$4 sm:$0xff]  }
 0x300   :  { %5160 = vmatpush2.bf16.msra.mxu1 %v9123_v48  ;;  %v9230_v48 = vld [vmem:[#allocation10 + $0x164] ss:$16 sps:$4 sm:$0xff]  }
 0x301   :  { %5205 = vmatpush2.bf16.msra.mxu0 %v9126_v51  ;;  %5161 = vmatprep.subr.bf16.mxu1 %v9131_v53  ;;  %v9177_v51 = vld [vmem:[#allocation6 + $0x788] ss:$16 sps:$4 sm:$0xff]   ;;  %v9182_v53 = vld [vmem:[#allocation6 + $0x76c] ss:$16 sps:$4 sm:$0xff]  }
 0x302   :  { %5206 = vmatprep.subr.bf16.mxu0 %v9134_v55  ;;  %v9228_v55 = vld [vmem:[#allocation10 + $0x160] ss:$16 sps:$4 sm:$0xff]  }
 0x304   :  { %5162 = vmatpush2.bf16.msra.mxu1 %v9129_v57  ;;  %v9233_v57 = vld [vmem:[#allocation10 + $0x144] ss:$16 sps:$4 sm:$0xff]  }
 0x305   :  { %5207 = vmatpush2.bf16.msra.mxu0 %v9132_v58  ;;  %5163 = vmatprep.subr.bf16.mxu1 %v9137_v60  ;;  %v9180_v58 = vld [vmem:[#allocation6 + $0x768] ss:$16 sps:$4 sm:$0xff]   ;;  %v9185_v60 = vld [vmem:[#allocation6 + $0x74c] ss:$16 sps:$4 sm:$0xff]  }
 0x306   :  { %5208 = vmatprep.subr.bf16.mxu0 %v9140_v61  ;;  %v9231_v61 = vld [vmem:[#allocation10 + $0x140] ss:$16 sps:$4 sm:$0xff]  }
 0x308   :  { %5164 = vmatpush2.bf16.msra.mxu1 %v9135_v3  ;;  %v9236_v3 = vld [vmem:[#allocation10 + $0x124] ss:$16 sps:$4 sm:$0xff]  }
 0x309   :  { %5209 = vmatpush2.bf16.msra.mxu0 %v9138_v1  ;;  %5165 = vmatprep.subr.bf16.mxu1 %v9143_v6  ;;  %v9183_v1 = vld [vmem:[#allocation6 + $0x748] ss:$16 sps:$4 sm:$0xff]   ;;  %v9188_v6 = vld [vmem:[#allocation6 + $0x72c] ss:$16 sps:$4 sm:$0xff]  }
 0x30a   :  { %5937 = vmatprep.subr.bf16.mxu0 %v9194_v35  ;;  %v9234_v35 = vld [vmem:[#allocation10 + $0x120] ss:$16 sps:$4 sm:$0xff]  }
 0x30c   :  { %5166 = vmatpush2.bf16.msra.mxu1 %v9141_v42  ;;  %5211 = vmatmul.mubr.bf16.vlgmr.msra.gmra.mxu0 %v10317_v52  ;;  %v9150_v52 = vld [vmem:[#allocation6 + $0x6a8] ss:$16 sps:$4 sm:$0xff]  }
 0x30d   :  { %5221 = vmatprep.subr.bf16.mxu1 %v9146_v31  ;;  %5938 = vmatpush1.bf16.msra.mxu0 %v9192_v8  ;;  %v9239_v42 = vld [vmem:[#allocation10 + $0x104] ss:$16 sps:$4 sm:$0xff]   ;;  %v9191_v8 = vld [vmem:[#allocation6 + $0x70c] ss:$16 sps:$4 sm:$0xff]  }
 0x30e   :  { %5939 = vmatprep.subr.bf16.mxu0 %v9197_v63  ;;  %v9186_v31 = vld [vmem:[#allocation6 + $0x728] ss:$16 sps:$4 sm:$0xff]   ;;  %v9237_v63 = vld [vmem:[#allocation10 + $0x100] ss:$16 sps:$4 sm:$0xff]  }
 0x30f   :  { %5168 = vmatmul.mubr.bf16.vlgmr.msra.gmra.mxu1 %v10307_v10  ;;  %v9153_v10 = vld [vmem:[#allocation6 + $0x688] ss:$16 sps:$4 sm:$0xff]  }
 0x310   :  { %5222 = vmatpush1.bf16.msra.mxu1 %v9144_v22  ;;  %5253 = vmatprep.mubr.bf16.mxu1 %v10326_v2  ;;  %v9204_v2 = vld [vmem:[#allocation10 + $0x60] ss:$16 sps:$4 sm:$0xff]   ;;  %v9242_v22 = vld [vmem:[#allocation10 + $0xec] ss:$16 sps:$4 sm:$0xff]  }
 0x311   :  { %5223 = vmatprep.subr.bf16.mxu1 %v9149_v44  ;;  %5940 = vmatpush1.bf16.msra.mxu0 %v9195_v9  ;;  %v9189_v44 = vld [vmem:[#allocation6 + $0x708] ss:$16 sps:$4 sm:$0xff]   ;;  %v9288_v9 = vld [vmem:[#allocation10 + $0x2e0] ss:$16 sps:$4 sm:$0xff]  }
 0x312   :  { %5941 = vmatprep.subr.bf16.mxu0 %v9200_v36  ;;  %v9290_v36 = vld [vmem:[#allocation10 + $0x2e4] ss:$16 sps:$4 sm:$0xff]  }
 0x314   :  { %5224 = vmatpush1.bf16.msra.mxu1 %v9147_v46  ;;  %v9291_v46 = vld [vmem:[#allocation10 + $0x2c0] ss:$16 sps:$4 sm:$0xff]  }
 0x315   :  { %5225 = vmatprep.subr.bf16.mxu1 %v9152_v62  ;;  %5942 = vmatpush1.bf16.msra.mxu0 %v9198_v11  ;;  %v9293_v62 = vld [vmem:[#allocation10 + $0x2c4] ss:$16 sps:$4 sm:$0xff]  }
 0x316   :  { %5943 = vmatprep.subr.bf16.mxu0 %v9203_v13  ;;  %v9296_v11 = vld [vmem:[#allocation10 + $0x2a4] ss:$16 sps:$4 sm:$0xff]   ;;  %v9294_v13 = vld [vmem:[#allocation10 + $0x2a0] ss:$16 sps:$4 sm:$0xff]  }
 0x318   :  { %5226 = vmatpush1.bf16.msra.mxu1 %v9150_v52  ;;  %v9299_v52 = vld [vmem:[#allocation10 + $0x284] ss:$16 sps:$4 sm:$0xff]  }
 0x319   :  { %5227 = vmatprep.subr.bf16.mxu1 %v9155_v14  ;;  %5944 = vmatpush1.bf16.msra.mxu0 %v9201_v17  ;;  %v9297_v14 = vld [vmem:[#allocation10 + $0x280] ss:$16 sps:$4 sm:$0xff]   ;;  %v9302_v17 = vld [vmem:[#allocation10 + $0x264] ss:$16 sps:$4 sm:$0xff]  }
 0x31a   :  { %5945 = vmatprep.subr.bf16.mxu0 %v9206_v18  ;;  %v9300_v18 = vld [vmem:[#allocation10 + $0x260] ss:$16 sps:$4 sm:$0xff]  }
 0x31c   :  { %5228 = vmatpush1.bf16.msra.mxu1 %v9153_v10  ;;  %v9303_v10 = vld [vmem:[#allocation10 + $0x240] ss:$16 sps:$4 sm:$0xff]  }
 0x31d   :  { %5229 = vmatprep.subr.bf16.mxu1 %v9158_v19  ;;  %5946 = vmatpush1.bf16.msra.mxu0 %v9204_v2  ;;  %v9308_v19 = vld [vmem:[#allocation10 + $0x224] ss:$16 sps:$4 sm:$0xff]   ;;  %v9306_v2 = vld [vmem:[#allocation10 + $0x220] ss:$16 sps:$4 sm:$0xff]  }
 0x31e   :  { %5947 = vmatprep.subr.bf16.mxu0 %v9209_v20  ;;  %v9311_v20 = vld [vmem:[#allocation10 + $0x204] ss:$16 sps:$4 sm:$0xff]  }
 0x320   :  { %5230 = vmatpush1.bf16.msra.mxu1 %v9156_v49  ;;  %v9309_v49 = vld [vmem:[#allocation10 + $0x200] ss:$16 sps:$4 sm:$0xff]  }
 0x321   :  { %5231 = vmatprep.subr.bf16.mxu1 %v9161_v43  ;;  %5948 = vmatpush1.bf16.msra.mxu0 %v9207_v21  ;;  %v9314_v43 = vld [vmem:[#allocation10 + $0x3e4] ss:$16 sps:$4 sm:$0xff]   ;;  %v4954_v21 = vpop.f32.mrf.mxu0 }
 0x322   :  { %5949 = vmatprep.subr.bf16.mxu0 %v9212_v23  ;;  %v9312_v23 = vld [vmem:[#allocation10 + $0x3e0] ss:$16 sps:$4 sm:$0xff]  }
 0x324   :  { %5232 = vmatpush1.bf16.msra.mxu1 %v9159_v25  ;;  %v9317_v25 = vld [vmem:[#allocation10 + $0x3c4] ss:$16 sps:$4 sm:$0xff]  }
 0x325   :  { %5233 = vmatprep.subr.bf16.mxu1 %v9164_v26  ;;  %5950 = vmatpush1.bf16.msra.mxu0 %v9210_v28  ;;  %v4956_v26 = vpop.f32.mrf.mxu0  ;;  %v9315_v28 = vld [vmem:[#allocation10 + $0x3c0] ss:$16 sps:$4 sm:$0xff]  }
 0x326   :  { %5951 = vmatprep.subr.bf16.mxu0 %v9215_v59  ;;  %v9320_v59 = vld [vmem:[#allocation10 + $0x3a4] ss:$16 sps:$4 sm:$0xff]  }
 0x328   :  { %5234 = vmatpush1.bf16.msra.mxu1 %v9162_v29  ;;  %v4958_v29 = vpop.f32.mrf.mxu0 }
 0x329   :  { %5235 = vmatprep.subr.bf16.mxu1 %v9167_v30  ;;  %5952 = vmatpush1.bf16.msra.mxu0 %v9213_v32  ;;  %v4997_v30 = vpop.f32.mrf.mxu1  ;;  %v9318_v32 = vld [vmem:[#allocation10 + $0x3a0] ss:$16 sps:$4 sm:$0xff]  }
 0x32a   :  { %5953 = vmatprep.subr.bf16.mxu0 %v9218_v33  ;;  %v9323_v33 = vld [vmem:[#allocation10 + $0x384] ss:$16 sps:$4 sm:$0xff]  }
 0x32c   :  { %5236 = vmatpush1.bf16.msra.mxu1 %v9165_v34  ;;  %v4960_v34 = vpop.f32.mrf.mxu0 }
 0x32d   :  { %5237 = vmatprep.subr.bf16.mxu1 %v9170_v0  ;;  %5954 = vmatpush2.bf16.msra.mxu0 %v9216_v50  ;;  %v4999_v0 = vpop.f32.mrf.mxu1 }
 0x32e   :  { %5955 = vmatprep.subr.bf16.mxu0 %v9221_v37  ;;  %v9321_v37 = vld [vmem:[#allocation10 + $0x380] ss:$16 sps:$4 sm:$0xff]  }
 0x330   :  { %5238 = vmatpush2.bf16.msra.mxu1 %v9168_v15  ;;  %v10339_v15 = vld [vmem:[#allocation7] sm:$0xf] }
 0x331   :  { %5239 = vmatprep.subr.bf16.mxu1 %v9173_v38  ;;  %5956 = vmatpush2.bf16.msra.mxu0 %v9219_v39  ;;  %v9326_v38 = vld [vmem:[#allocation10 + $0x364] ss:$16 sps:$4 sm:$0xff]   ;;  %v3627_v39 = vrot.slane %v10339_v15, %v10259_v54 }
 0x332   :  { %5957 = vmatprep.subr.bf16.mxu0 %v9224_v40  ;;  %v3623_v40 = vrot.slane %v10339_v15, %v10214_v27 }
 0x334   :  { %5240 = vmatpush2.bf16.msra.mxu1 %v9171_v41  ;;  %v5001_v41 = vpop.f32.mrf.mxu1 }
 0x335   :  { %5241 = vmatprep.subr.bf16.mxu1 %v9176_v16  ;;  %5958 = vmatpush2.bf16.msra.mxu0 %v9222_v56  ;;  %v9324_v56 = vld [vmem:[#allocation10 + $0x360] ss:$16 sps:$4 sm:$0xff]  }
 0x336   :  { %5959 = vmatprep.subr.bf16.mxu0 %v9227_v45  ;;  %v4957_v45 = vadd.f32 %v4956_v26, %v3627_v39  ;;  %v9249_v26 = vld [vmem:[#allocation10 + $0x88] ss:$16 sps:$4 sm:$0xff]  }
 0x338   :  { %5242 = vmatpush2.bf16.msra.mxu1 %v9174_v5  ;;  %v4959_v5 = vadd.f32 %v4958_v29, %v3623_v40  ;;  %v9257_v29 = vld [vmem:[#allocation10 + $0x4c] ss:$16 sps:$4 sm:$0xff]  }
 0x339   :  { %5243 = vmatprep.subr.bf16.mxu1 %v9179_v7  ;;  %5960 = vmatpush2.bf16.msra.mxu0 %v9225_v47  ;;  %v4955_v7 = vadd.f32 %v4954_v21, %v3623_v40  ;;  %v5003_v47 = vpop.f32.mrf.mxu1  ;;  %v9248_v21 = vld [vmem:[#allocation10 + $0xac] ss:$16 sps:$4 sm:$0xff]  }
 0x33a   :  { %5961 = vmatprep.subr.bf16.mxu0 %v9230_v48  ;;  %v9272_v40 = vld [vmem:[#allocation10 + $0x1ac] ss:$16 sps:$4 sm:$0xff]  }
 0x33c   :  { %5244 = vmatpush2.bf16.msra.mxu1 %v9177_v51  ;;  %v4961_v51 = vadd.f32 %v4960_v34, %v3627_v39  ;;  %v9263_v34 = vld [vmem:[#allocation10 + $0xc] ss:$16 sps:$4 sm:$0xff]   ;;  %v9267_v39 = vld [vmem:[#allocation10 + $0x1c8] ss:$16 sps:$4 sm:$0xff]  }
 0x33d   :  { %5245 = vmatprep.subr.bf16.mxu1 %v9182_v53  ;;  %5962 = vmatpush2.bf16.msra.mxu0 %v9228_v55  ;;  %v9329_v53 = vld [vmem:[#allocation10 + $0x344] ss:$16 sps:$4 sm:$0xff]  }
 0x33e   :  { %5963 = vmatprep.subr.bf16.mxu0 %v9233_v57  ;;  %v9327_v57 = vld [vmem:[#allocation10 + $0x340] ss:$16 sps:$4 sm:$0xff]  }
 0x340   :  { %5246 = vmatpush2.bf16.msra.mxu1 %v9180_v58  ;;  %v5000_v58 = vadd.f32 %v4999_v0, %v4957_v45  ;;  %v9261_v0 = vld [vmem:[#allocation10 + $0x8] ss:$16 sps:$4 sm:$0xff]   ;;  %v9278_v45 = vld [vmem:[#allocation10 + $0x16c] ss:$16 sps:$4 sm:$0xff]  }
 0x341   :  { %5247 = vmatprep.subr.bf16.mxu1 %v9185_v60  ;;  %5964 = vmatpush2.bf16.msra.mxu0 %v9231_v61  ;;  %v5002_v60 = vadd.f32 %v5001_v41, %v4959_v5  ;;  %v4998_v61 = vadd.f32 %v4997_v30, %v4955_v7  ;;  %v9255_v30 = vld [vmem:[#allocation10 + $0x48] ss:$16 sps:$4 sm:$0xff]   ;;  %v9281_v7 = vld [vmem:[#allocation10 + $0x14c] ss:$16 sps:$4 sm:$0xff]  }
 0x342   :  { %5965 = vmatprep.subr.bf16.mxu0 %v9236_v3  ;;  %v9270_v41 = vld [vmem:[#allocation10 + $0x1a8] ss:$16 sps:$4 sm:$0xff]  }
 0x343   :  { %v9276_v5 = vld [vmem:[#allocation10 + $0x168] ss:$16 sps:$4 sm:$0xff]  }
 0x344   :  { %5248 = vmatpush2.bf16.msra.mxu1 %v9183_v1 }
 0x345   :  { %5249 = vmatprep.subr.bf16.mxu1 %v9188_v6  ;;  %5966 = vmatpush2.bf16.msra.mxu0 %v9234_v35  ;;  %v5004_v6 = vadd.f32 %v5003_v47, %v4961_v51  ;;  %v9279_v47 = vld [vmem:[#allocation10 + $0x148] ss:$16 sps:$4 sm:$0xff]  }
 0x346   :  { %5967 = vmatprep.subr.bf16.mxu0 %v9239_v42  ;;  %v9282_v51 = vld [vmem:[#allocation10 + $0x128] ss:$16 sps:$4 sm:$0xff]  }
 0x348   :  { %5250 = vmatpush2.bf16.msra.mxu1 %v9186_v31  ;;  %v9332_v31 = vld [vmem:[#allocation10 + $0x324] ss:$16 sps:$4 sm:$0xff]  }
 0x349   :  { %5251 = vmatprep.subr.bf16.mxu1 %v9191_v8  ;;  %5968 = vmatpush2.bf16.msra.mxu0 %v9237_v63 }
 0x34a   :  { %6023 = vmatprep.subr.bf16.mxu0 %v9242_v22  ;;  %v9330_v22 = vld [vmem:[#allocation10 + $0x320] ss:$16 sps:$4 sm:$0xff]  }
 0x34c   :  { %5252 = vmatpush2.bf16.msra.mxu1 %v9189_v44  ;;  %v5040_v50 = vpop.f32.mrf.mxu0 }
 0x34d   :  { %5980 = vmatprep.subr.bf16.mxu1 %v9290_v36  ;;  %v5041_v8 = vadd.f32 %v5040_v50, %v4998_v61  ;;  %v9266_v50 = vld [vmem:[#allocation10 + $0x1ec] ss:$16 sps:$4 sm:$0xff]  }
 0x34e   :  { %v5042_v16 = vpop.f32.mrf.mxu0 }
 0x34f   :  { %5254 = vmatmul.mubr.bf16.vlgmr.msra.gmra.mxu1 %v10329_v4  ;;  %v9305_v4 = vld [vmem:[#allocation10 + $0x244] ss:$16 sps:$4 sm:$0xff]   ;;  %v5043_v35 = vadd.f32 %v5042_v16, %v5000_v58  ;;  %v9275_v16 = vld [vmem:[#allocation10 + $0x18c] ss:$16 sps:$4 sm:$0xff]  }
 0x350   :  { %5981 = vmatpush1.bf16.msra.mxu1 %v9288_v9  ;;  %v5044_v48 = vpop.f32.mrf.mxu0 }
 0x351   :  { %5982 = vmatprep.subr.bf16.mxu1 %v9293_v62  ;;  %v5045_v42 = vadd.f32 %v5044_v48, %v5002_v60  ;;  %v9284_v48 = vld [vmem:[#allocation10 + $0x12c] ss:$16 sps:$4 sm:$0xff]  }
 0x352   :  { %v5046_v3 = vpop.f32.mrf.mxu0 }
 0x353   :  { %v5047_v44 = vadd.f32 %v5046_v3, %v5004_v6 }
 0x354   :  { %5983 = vmatpush1.bf16.msra.mxu1 %v9291_v46 }
 0x355   :  { %5984 = vmatprep.subr.bf16.mxu1 %v9296_v11 }
 0x358   :  { %5985 = vmatpush1.bf16.msra.mxu1 %v9294_v13  ;;  %v9335_v13 = vld [vmem:[#allocation10 + $0x304] ss:$16 sps:$4 sm:$0xff]  }
 0x359   :  { %5986 = vmatprep.subr.bf16.mxu1 %v9299_v52 }
 0x35c   :  { %5987 = vmatpush1.bf16.msra.mxu1 %v9297_v14  ;;  %v9333_v14 = vld [vmem:[#allocation10 + $0x300] ss:$16 sps:$4 sm:$0xff]  }
 0x35d   :  { %5988 = vmatprep.subr.bf16.mxu1 %v9302_v17 }
 0x360   :  { %5989 = vmatpush1.bf16.msra.mxu1 %v9300_v18 }
 0x361   :  { %5990 = vmatprep.subr.bf16.mxu1 %v9305_v4 }
 0x364   :  { %5991 = vmatpush1.bf16.msra.mxu1 %v9303_v10 }
 0x365   :  { %5992 = vmatprep.subr.bf16.mxu1 %v9308_v19  ;;  %v9240_v19 = vld [vmem:[#allocation10 + $0xe8] ss:$16 sps:$4 sm:$0xff]  }
 0x368   :  { %5993 = vmatpush1.bf16.msra.mxu1 %v9306_v2  ;;  %v9338_v2 = vld [vmem:[#allocation10 + $0x2ec] ss:$16 sps:$4 sm:$0xff]  }
 0x369   :  { %5994 = vmatprep.subr.bf16.mxu1 %v9311_v20 }
 0x36c   :  { %5995 = vmatpush1.bf16.msra.mxu1 %v9309_v49  ;;  %v9245_v49 = vld [vmem:[#allocation10 + $0xcc] ss:$16 sps:$4 sm:$0xff]  }
 0x36d   :  { %5996 = vmatprep.subr.bf16.mxu1 %v9314_v43  ;;  %v9243_v43 = vld [vmem:[#allocation10 + $0xc8] ss:$16 sps:$4 sm:$0xff]  }
 0x370   :  { %5997 = vmatpush2.bf16.msra.mxu1 %v9312_v23  ;;  %v9246_v23 = vld [vmem:[#allocation10 + $0xa8] ss:$16 sps:$4 sm:$0xff]  }
 0x371   :  { %5998 = vmatprep.subr.bf16.mxu1 %v9317_v25  ;;  %v9251_v25 = vld [vmem:[#allocation10 + $0x8c] ss:$16 sps:$4 sm:$0xff]  }
 0x374   :  { %5999 = vmatpush2.bf16.msra.mxu1 %v9315_v28  ;;  %v9254_v28 = vld [vmem:[#allocation10 + $0x6c] ss:$16 sps:$4 sm:$0xff]  }
 0x375   :  { %6000 = vmatprep.subr.bf16.mxu1 %v9320_v59  ;;  %v9252_v59 = vld [vmem:[#allocation10 + $0x68] ss:$16 sps:$4 sm:$0xff]  }
 0x378   :  { %6001 = vmatpush2.bf16.msra.mxu1 %v9318_v32  ;;  %v9260_v32 = vld [vmem:[#allocation10 + $0x2c] ss:$16 sps:$4 sm:$0xff]  }
 0x379   :  { %6002 = vmatprep.subr.bf16.mxu1 %v9323_v33  ;;  %v9258_v33 = vld [vmem:[#allocation10 + $0x28] ss:$16 sps:$4 sm:$0xff]  }
 0x37c   :  { %6003 = vmatpush2.bf16.msra.mxu1 %v9321_v37  ;;  %v9264_v37 = vld [vmem:[#allocation10 + $0x1e8] ss:$16 sps:$4 sm:$0xff]  }
 0x37d   :  { %6004 = vmatprep.subr.bf16.mxu1 %v9326_v38  ;;  %v9269_v38 = vld [vmem:[#allocation10 + $0x1cc] ss:$16 sps:$4 sm:$0xff]  }
 0x380   :  { %6005 = vmatpush2.bf16.msra.mxu1 %v9324_v56  ;;  %v9273_v56 = vld [vmem:[#allocation10 + $0x188] ss:$16 sps:$4 sm:$0xff]  }
 0x381   :  { %6006 = vmatprep.subr.bf16.mxu1 %v9329_v53  ;;  %v9287_v53 = vld [vmem:[#allocation10 + $0x10c] ss:$16 sps:$4 sm:$0xff]  }
 0x384   :  { %6007 = vmatpush2.bf16.msra.mxu1 %v9327_v57 }
 0x385   :  { %6008 = vmatprep.subr.bf16.mxu1 %v9332_v31 }
 0x388   :  { %6009 = vmatpush2.bf16.msra.mxu1 %v9330_v22 }
 0x389   :  { %6010 = vmatprep.subr.bf16.mxu1 %v9335_v13 }
 0x38c   :  { %6011 = vmatpush2.bf16.msra.mxu1 %v9333_v14  ;;  %v5126_v57 = vpop.f32.mrf.mxu0 }
 0x38d   :  { %6066 = vmatprep.subr.bf16.mxu1 %v9338_v2 }
 0x38e   :  { %v5128_v58 = vpop.f32.mrf.mxu0 }
 0x38f   :  { %v5083_v55 = vpop.f32.mrf.mxu1 }
 0x390   :  { %v10349_v46 = vadd.f32 %v5083_v55, %v5041_v8  ;;  %v9285_v55 = vld [vmem:[#allocation10 + $0x108] ss:$16 sps:$4 sm:$0xff]   ;;  %v5130_v60 = vpop.f32.mrf.mxu0 }
 0x391   :  { %v5085_v1 = vpop.f32.mrf.mxu1 }
 0x392   :  { %v10345_v9 = vadd.f32 %v5085_v1, %v5043_v35  ;;  %v5264_v4 = vmax.f32 %v10349_v46, 0.0  ;;  %v5132_v3 = vpop.f32.mrf.mxu0  ;;  %v3635_v35 = vrot.slane %v10339_v15, %v10270_v24 }
 0x393   :  { %v5087_v63 = vpop.f32.mrf.mxu1 }
 0x394   :  { %11757 = vst [vmem:[#allocation24_spill] sm:$0xff] %v10345_v9  ;;  %v10347_v36 = vadd.f32 %v5087_v63, %v5045_v42  ;;  %v5265_v17 = vmax.f32 %v10345_v9, 0.0  ;;  %v3631_v42 = vrot.slane %v10339_v15, %v10297_v12  ;;  %v5129_v63 = vadd.f32 %v5128_v58, %v3635_v35  ;;  %v10409_v58 = vld [vmem:[#allocation10 + $0x248] ss:$16 sps:$4 sm:$0xff]  }
 0x395   :  { %v5089_v62 = vpop.f32.mrf.mxu1  ;;  %v5133_v13 = vadd.f32 %v5132_v3, %v3635_v35  ;;  %v9398_v3 = vld [vmem:[#allocation13 + $0x34] ss:$8 sps:$4 sm:$0xff]   ;;  %v9396_v35 = vld [vmem:[#allocation13 + $0x30] ss:$8 sps:$4 sm:$0xff]  }
 0x396   :  { %11758 = vst [vmem:[#allocation25_spill] sm:$0xff] %v10347_v36  ;;  %v10351_v11 = vadd.f32 %v5089_v62, %v5047_v44  ;;  %v5268_v52 = vmax.f32 %v10347_v36, 0.0  ;;  %v5131_v22 = vadd.f32 %v5130_v60, %v3631_v42  ;;  %v5127_v44 = vadd.f32 %v5126_v57, %v3631_v42  ;;  %v9395_v57 = vld [vmem:[#allocation13 + $0x44] ss:$8 sps:$4 sm:$0xff]   ;;  %v10412_v60 = vld [vmem:[#allocation10 + $0x22c] ss:$16 sps:$4 sm:$0xff]  }
 0x397   :  { %v9401_v42 = vld [vmem:[#allocation13 + $0x24] ss:$8 sps:$4 sm:$0xff]  }
 0x398   :  { %v5269_v18 = vmax.f32 %v10351_v11, 0.0  ;;  %v10357_v20 = vpack.c.bf16 %v5268_v52, %v5264_v4 }
 0x39a   :  { %v5273_v10 = vpack.c.bf16 %v5269_v18, %v5265_v17 }
 0x39c   :  { %5969 = vmatprep.mubr.bf16.mxu0 %v5273_v10 }
 0x39d   :  { %5970 = vmatmul.mubr.bf16.vlgmr.msra.gmra.mxu0 %v10357_v20 }
 0x39e   :  { %6024 = vmatpush1.bf16.msra.mxu0 %v9240_v19  ;;  %6055 = vmatprep.mubr.bf16.mxu0 %v5273_v10 }
 0x39f   :  { %6025 = vmatprep.subr.bf16.mxu0 %v9245_v49 }
 0x3a2   :  { %6026 = vmatpush1.bf16.msra.mxu0 %v9243_v43 }
 0x3a3   :  { %6027 = vmatprep.subr.bf16.mxu0 %v9248_v21 }
 0x3a6   :  { %6028 = vmatpush1.bf16.msra.mxu0 %v9246_v23 }
 0x3a7   :  { %6029 = vmatprep.subr.bf16.mxu0 %v9251_v25 }
 0x3aa   :  { %6030 = vmatpush1.bf16.msra.mxu0 %v9249_v26 }
 0x3ab   :  { %6031 = vmatprep.subr.bf16.mxu0 %v9254_v28 }
 0x3ae   :  { %6032 = vmatpush1.bf16.msra.mxu0 %v9252_v59 }
 0x3af   :  { %6033 = vmatprep.subr.bf16.mxu0 %v9257_v29 }
 0x3b2   :  { %6034 = vmatpush1.bf16.msra.mxu0 %v9255_v30 }
 0x3b3   :  { %6035 = vmatprep.subr.bf16.mxu0 %v9260_v32 }
 0x3b6   :  { %6036 = vmatpush1.bf16.msra.mxu0 %v9258_v33 }
 0x3b7   :  { %6037 = vmatprep.subr.bf16.mxu0 %v9263_v34 }
 0x3ba   :  { %6038 = vmatpush1.bf16.msra.mxu0 %v9261_v0  ;;  %v10377_v0 = vld [vmem:[#allocation10 + $0x2e8] ss:$16 sps:$4 sm:$0xff]  }
 0x3bb   :  { %6039 = vmatprep.subr.bf16.mxu0 %v9266_v50 }
 0x3be   :  { %6040 = vmatpush2.bf16.msra.mxu0 %v9264_v37  ;;  %v10381_v37 = vld [vmem:[#allocation10 + $0x2cc] ss:$16 sps:$4 sm:$0xff]  }
 0x3bf   :  { %6041 = vmatprep.subr.bf16.mxu0 %v9269_v38  ;;  %v10385_v38 = vld [vmem:[#allocation10 + $0x2c8] ss:$16 sps:$4 sm:$0xff]  }
 0x3c2   :  { %6042 = vmatpush2.bf16.msra.mxu0 %v9267_v39  ;;  %v10388_v39 = vld [vmem:[#allocation10 + $0x2ac] ss:$16 sps:$4 sm:$0xff]  }
 0x3c3   :  { %6043 = vmatprep.subr.bf16.mxu0 %v9272_v40  ;;  %v10391_v40 = vld [vmem:[#allocation10 + $0x2a8] ss:$16 sps:$4 sm:$0xff]  }
 0x3c6   :  { %6044 = vmatpush2.bf16.msra.mxu0 %v9270_v41  ;;  %v10394_v41 = vld [vmem:[#allocation10 + $0x28c] ss:$16 sps:$4 sm:$0xff]  }
 0x3c7   :  { %6045 = vmatprep.subr.bf16.mxu0 %v9275_v16  ;;  %v9384_v16 = vld [vmem:[#allocation13 + $0x70] ss:$8 sps:$4 sm:$0xff]  }
 0x3ca   :  { %6046 = vmatpush2.bf16.msra.mxu0 %v9273_v56  ;;  %v9386_v56 = vld [vmem:[#allocation13 + $0x74] ss:$8 sps:$4 sm:$0xff]  }
 0x3cb   :  { %6047 = vmatprep.subr.bf16.mxu0 %v9278_v45  ;;  %v9389_v45 = vld [vmem:[#allocation13 + $0x64] ss:$8 sps:$4 sm:$0xff]  }
 0x3cc   :  { %v5212_v6 = vpop.f32.mrf.mxu0 }
 0x3ce   :  { %6048 = vmatpush2.bf16.msra.mxu0 %v9276_v5  ;;  %v5214_v8 = vpop.f32.mrf.mxu0  ;;  %v10397_v5 = vld [vmem:[#allocation10 + $0x288] ss:$16 sps:$4 sm:$0xff]  }
 0x3cf   :  { %6049 = vmatprep.subr.bf16.mxu0 %v9281_v7  ;;  %v5169_v61 = vpop.f32.mrf.mxu1  ;;  %v10400_v7 = vld [vmem:[#allocation10 + $0x26c] ss:$16 sps:$4 sm:$0xff]  }
 0x3d0   :  { %v5170_v17 = vadd.f32 %v5169_v61, %v5127_v44  ;;  %v5216_v18 = vpop.f32.mrf.mxu0  ;;  %v9393_v61 = vld [vmem:[#allocation13 + $0x40] ss:$8 sps:$4 sm:$0xff]   ;;  %v10427_v44 = vld [vmem:[#allocation10 + $0x3e8] ss:$16 sps:$4 sm:$0xff]  }
 0x3d1   :  { %v5171_v1 = vpop.f32.mrf.mxu1 }
 0x3d2   :  { %6050 = vmatpush2.bf16.msra.mxu0 %v9279_v47  ;;  %v5172_v52 = vadd.f32 %v5171_v1, %v5129_v63  ;;  %v5218_v49 = vpop.f32.mrf.mxu0  ;;  %v5213_v43 = vadd.f32 %v5212_v6, %v5170_v17  ;;  %v9387_v47 = vld [vmem:[#allocation13 + $0x60] ss:$8 sps:$4 sm:$0xff]   ;;  %v10415_v1 = vld [vmem:[#allocation10 + $0x228] ss:$16 sps:$4 sm:$0xff]  }
 0x3d3   :  { %6051 = vmatprep.subr.bf16.mxu0 %v9284_v48  ;;  %v5173_v31 = vpop.f32.mrf.mxu1  ;;  %v9392_v48 = vld [vmem:[#allocation13 + $0x54] ss:$8 sps:$4 sm:$0xff]   ;;  %v10418_v6 = vld [vmem:[#allocation10 + $0x20c] ss:$16 sps:$4 sm:$0xff]  }
 0x3d4   :  { %v5174_v14 = vadd.f32 %v5173_v31, %v5131_v22  ;;  %v5215_v2 = vadd.f32 %v5214_v8, %v5172_v52  ;;  %v10421_v31 = vld [vmem:[#allocation10 + $0x208] ss:$16 sps:$4 sm:$0xff]   ;;  %v10424_v8 = vld [vmem:[#allocation10 + $0x3ec] ss:$16 sps:$4 sm:$0xff]  }
 0x3d5   :  { %v5175_v62 = vpop.f32.mrf.mxu1  ;;  %v9399_v63 = vld [vmem:[#allocation13 + $0x20] ss:$8 sps:$4 sm:$0xff]   ;;  %v9404_v22 = vld [vmem:[#allocation13 + $0x14] ss:$8 sps:$4 sm:$0xff]   ;;  %v9407_v52 = vld [vmem:[#allocation13 + $0x4] ss:$8 sps:$4 sm:$0xff]  }
 0x3d6   :  { %6052 = vmatpush2.bf16.msra.mxu0 %v9282_v51  ;;  %v5176_v10 = vadd.f32 %v5175_v62, %v5133_v13  ;;  %v10403_v51 = vld [vmem:[#allocation10 + $0x268] ss:$16 sps:$4 sm:$0xff]   ;;  %v10430_v62 = vld [vmem:[#allocation10 + $0x3cc] ss:$16 sps:$4 sm:$0xff]  }
 0x3d7   :  { %6053 = vmatprep.subr.bf16.mxu0 %v9287_v53  ;;  %v10406_v53 = vld [vmem:[#allocation10 + $0x24c] ss:$16 sps:$4 sm:$0xff]  }
 0x3d8   :  { %v5219_v25 = vadd.f32 %v5218_v49, %v5176_v10  ;;  %v9402_v13 = vld [vmem:[#allocation13 + $0x10] ss:$8 sps:$4 sm:$0xff]   ;;  %v10439_v10 = vld [vmem:[#allocation10 + $0x3a8] ss:$16 sps:$4 sm:$0xff]  }
 0x3d9   :  { %v10436_v17 = vld [vmem:[#allocation10 + $0x3ac] ss:$16 sps:$4 sm:$0xff]   ;;  %v10445_v49 = vld [vmem:[#allocation10 + $0x388] ss:$16 sps:$4 sm:$0xff]  }
 0x3da   :  { %6054 = vmatpush2.bf16.msra.mxu0 %v9285_v55  ;;  %v9390_v55 = vld [vmem:[#allocation13 + $0x50] ss:$8 sps:$4 sm:$0xff]  }
 0x3db   :  { %6452 = vmatprep.subr.bf16.mxu0 %v9386_v56  ;;  %v10464_v56 = vld [vmem:[#allocation13 + $0xb4] ss:$8 sps:$4 sm:$0xff]  }
 0x3dc   :  { %11764 = vst [vmem:[#allocation31_spill] sm:$0xff] %v10464_v56 }
 0x3dd   :  { %6056 = vmatmul.mubr.bf16.vlgmr.msra.gmra.mxu0 %v10357_v20  ;;  %v5217_v20 = vadd.f32 %v5216_v18, %v5174_v14  ;;  %v10433_v14 = vld [vmem:[#allocation10 + $0x3c8] ss:$16 sps:$4 sm:$0xff]   ;;  %v9405_v18 = vld [vmem:[#allocation13] ss:$8 sps:$4 sm:$0xff]  }
 0x3de   :  { %6453 = vmatpush1.bf16.msra.mxu0 %v9384_v16  ;;  %v10462_v16 = vld [vmem:[#allocation13 + $0xc0] ss:$8 sps:$4 sm:$0xff]  }
 0x3df   :  { %6454 = vmatprep.subr.bf16.mxu0 %v9389_v45  ;;  %11763 = vst [vmem:[#allocation30_spill] sm:$0xff] %v10462_v16  ;;  %v10467_v45 = vld [vmem:[#allocation10 + $0x328] ss:$16 sps:$4 sm:$0xff]  }
 0x3e0   :  { %11765 = vst [vmem:[#allocation32_spill] sm:$0xff] %v10467_v45 }
 0x3e2   :  { %6455 = vmatpush1.bf16.msra.mxu0 %v9387_v47  ;;  %v10470_v47 = vld [vmem:[#allocation10 + $0x30c] ss:$16 sps:$4 sm:$0xff]  }
 0x3e3   :  { %6456 = vmatprep.subr.bf16.mxu0 %v9392_v48  ;;  %11766 = vst [vmem:[#allocation33_spill] sm:$0xff] %v10470_v47  ;;  %v10473_v48 = vld [vmem:[#allocation13 + $0xb0] ss:$8 sps:$4 sm:$0xff]  }
 0x3e4   :  { %11767 = vst [vmem:[#allocation34_spill] sm:$0xff] %v10473_v48 }
 0x3e6   :  { %6457 = vmatpush1.bf16.msra.mxu0 %v9390_v55  ;;  %v10477_v55 = vld [vmem:[#allocation10 + $0x308] ss:$16 sps:$4 sm:$0xff]  }
 0x3e7   :  { %6458 = vmatprep.subr.bf16.mxu0 %v9395_v57  ;;  %11768 = vst [vmem:[#allocation35_spill] sm:$0xff] %v10477_v55  ;;  %v10483_v57 = vld [vmem:[#allocation13 + $0xa4] ss:$8 sps:$4 sm:$0xff]  }
 0x3e8   :  { %11769 = vst [vmem:[#allocation36_spill] sm:$0xff] %v10483_v57 }
 0x3ea   :  { %6459 = vmatpush1.bf16.msra.mxu0 %v9393_v61  ;;  %v10485_v61 = vld [vmem:[#allocation13 + $0xa0] ss:$8 sps:$4 sm:$0xff]  }
 0x3eb   :  { %6460 = vmatprep.subr.bf16.mxu0 %v9398_v3  ;;  %11770 = vst [vmem:[#allocation37_spill] sm:$0xff] %v10485_v61  ;;  %v10489_v3 = vld [vmem:[#allocation13 + $0x94] ss:$8 sps:$4 sm:$0xff]  }
 0x3ec   :  { %11771 = vst [vmem:[#allocation38_spill] sm:$0xff] %v10489_v3 }
 0x3ee   :  { %6461 = vmatpush1.bf16.msra.mxu0 %v9396_v35  ;;  %v10491_v35 = vld [vmem:[#allocation13 + $0x90] ss:$8 sps:$4 sm:$0xff]  }
 0x3ef   :  { %6462 = vmatprep.subr.bf16.mxu0 %v9401_v42  ;;  %11772 = vst [vmem:[#allocation39_spill] sm:$0xff] %v10491_v35  ;;  %v10495_v42 = vld [vmem:[#allocation13 + $0x84] ss:$8 sps:$4 sm:$0xff]  }
 0x3f0   :  { %11773 = vst [vmem:[#allocation40_spill] sm:$0xff] %v10495_v42 }
 0x3f2   :  { %6463 = vmatpush1.bf16.msra.mxu0 %v9399_v63  ;;  %v10497_v63 = vld [vmem:[#allocation13 + $0x80] ss:$8 sps:$4 sm:$0xff]  }
 0x3f3   :  { %6464 = vmatprep.subr.bf16.mxu0 %v9404_v22  ;;  %11774 = vst [vmem:[#allocation41_spill] sm:$0xff] %v10497_v63  ;;  %v10503_v22 = vld [vmem:[#allocation13 + $0x170] ss:$8 sps:$4 sm:$0xff]  }
 0x3f4   :  { %11776 = vst [vmem:[#allocation43_spill] sm:$0xff] %v10503_v22 }
 0x3f6   :  { %6465 = vmatpush1.bf16.msra.mxu0 %v9402_v13  ;;  %v10506_v13 = vld [vmem:[#allocation13 + $0x164] ss:$8 sps:$4 sm:$0xff]  }
 0x3f7   :  { %6466 = vmatprep.subr.bf16.mxu0 %v9407_v52  ;;  %11777 = vst [vmem:[#allocation44_spill] sm:$0xff] %v10506_v13  ;;  %v10509_v52 = vld [vmem:[#allocation13 + $0x160] ss:$8 sps:$4 sm:$0xff]  }
 0x3f8   :  { %11778 = vst [vmem:[#allocation45_spill] sm:$0xff] %v10509_v52 }
 0x3fa   :  { %6467 = vmatpush1.bf16.msra.mxu0 %v9405_v18  ;;  %v10512_v18 = vld [vmem:[#allocation13 + $0x154] ss:$8 sps:$4 sm:$0xff]  }
 0x3fb   :  { %11779 = vst [vmem:[#allocation46_spill] sm:$0xff] %v10512_v18 }
 0x40f   :  { %v5255_v4 = vpop.f32.mrf.mxu1 }
 0x410   :  { %v10369_v26 = vadd.f32 %v5255_v4, %v5213_v43  ;;  %v9410_v4 = vld [vmem:[#allocation13 + $0xf4] ss:$8 sps:$4 sm:$0xff]   ;;  %v10448_v43 = vld [vmem:[#allocation10 + $0x36c] ss:$16 sps:$4 sm:$0xff]  }
 0x411   :  { %v5257_v19 = vpop.f32.mrf.mxu1  ;;  %6468 = vmatprep.subr.bf16.mxu0 %v9410_v4  ;;  %v10515_v4 = vld [vmem:[#allocation13 + $0x150] ss:$8 sps:$4 sm:$0xff]  }
 0x412   :  { %v10365_v15 = vadd.f32 %v5257_v19, %v5215_v2  ;;  %v5266_v33 = vmax.f32 %v10369_v26, 0.0  ;;  %v10442_v19 = vld [vmem:[#allocation10 + $0x38c] ss:$16 sps:$4 sm:$0xff]   ;;  %11780 = vst [vmem:[#allocation47_spill] sm:$0xff] %v10515_v4 }
 0x413   :  { %v5259_v21 = vpop.f32.mrf.mxu1  ;;  %v9408_v2 = vld [vmem:[#allocation13 + $0xf0] ss:$8 sps:$4 sm:$0xff]  }
 0x414   :  { %11759 = vst [vmem:[#allocation26_spill] sm:$0xff] %v10365_v15  ;;  %v10367_v23 = vadd.f32 %v5259_v21, %v5217_v20  ;;  %v5267_v30 = vmax.f32 %v10365_v15, 0.0  ;;  %v9413_v20 = vld [vmem:[#allocation13 + $0xe4] ss:$8 sps:$4 sm:$0xff]   ;;  %6469 = vmatpush2.bf16.msra.mxu0 %v9408_v2  ;;  %v9411_v21 = vld [vmem:[#allocation13 + $0xe0] ss:$8 sps:$4 sm:$0xff]  }
 0x415   :  { %v5261_v28 = vpop.f32.mrf.mxu1  ;;  %6470 = vmatprep.subr.bf16.mxu0 %v9413_v20  ;;  %v10518_v2 = vld [vmem:[#allocation13 + $0x144] ss:$8 sps:$4 sm:$0xff]   ;;  %v10521_v20 = vld [vmem:[#allocation13 + $0x140] ss:$8 sps:$4 sm:$0xff]  }
 0x416   :  { %11760 = vst [vmem:[#allocation27_spill] sm:$0xff] %v10367_v23  ;;  %v10371_v59 = vadd.f32 %v5261_v28, %v5219_v25  ;;  %v5270_v29 = vmax.f32 %v10367_v23, 0.0  ;;  %v9416_v25 = vld [vmem:[#allocation13 + $0xd4] ss:$8 sps:$4 sm:$0xff]   ;;  %11781 = vst [vmem:[#allocation48_spill] sm:$0xff] %v10518_v2 }
 0x417   :  { %v10451_v28 = vld [vmem:[#allocation10 + $0x368] ss:$16 sps:$4 sm:$0xff]   ;;  %11782 = vst [vmem:[#allocation49_spill] sm:$0xff] %v10521_v20 }
 0x418   :  { %v5271_v32 = vmax.f32 %v10371_v59, 0.0  ;;  %v10379_v50 = vpack.c.bf16 %v5270_v29, %v5266_v33  ;;  %v10454_v29 = vld [vmem:[#allocation10 + $0x34c] ss:$16 sps:$4 sm:$0xff]   ;;  %6471 = vmatpush2.bf16.msra.mxu0 %v9411_v21  ;;  %v10457_v33 = vld [vmem:[#allocation10 + $0x348] ss:$16 sps:$4 sm:$0xff]  }
 0x419   :  { %6472 = vmatprep.subr.bf16.mxu0 %v9416_v25  ;;  %11761 = vst [vmem:[#allocation28_spill] sm:$0xff] %v10457_v33  ;;  %v10524_v21 = vld [vmem:[#allocation13 + $0x134] ss:$8 sps:$4 sm:$0xff]   ;;  %v10527_v25 = vld [vmem:[#allocation13 + $0x130] ss:$8 sps:$4 sm:$0xff]  }
 0x41a   :  { %v5275_v34 = vpack.c.bf16 %v5271_v32, %v5267_v30  ;;  %v9414_v30 = vld [vmem:[#allocation13 + $0xd0] ss:$8 sps:$4 sm:$0xff]   ;;  %v9419_v32 = vld [vmem:[#allocation13 + $0xc4] ss:$8 sps:$4 sm:$0xff]   ;;  %11783 = vst [vmem:[#allocation50_spill] sm:$0xff] %v10524_v21  ;;  %11784 = vst [vmem:[#allocation51_spill] sm:$0xff] %v10527_v25 }
 0x41c   :  { %6012 = vmatprep.mubr.bf16.mxu1 %v5275_v34  ;;  %6473 = vmatpush2.bf16.msra.mxu0 %v9414_v30  ;;  %v10530_v30 = vld [vmem:[#allocation13 + $0x124] ss:$8 sps:$4 sm:$0xff]  }
 0x41d   :  { %6013 = vmatmul.mubr.bf16.vlgmr.msra.gmra.mxu1 %v10379_v50  ;;  %6474 = vmatprep.subr.bf16.mxu0 %v9419_v32  ;;  %11785 = vst [vmem:[#allocation52_spill] sm:$0xff] %v10530_v30  ;;  %v10533_v32 = vld [vmem:[#allocation13 + $0x120] ss:$8 sps:$4 sm:$0xff]  }
 0x41e   :  { %6067 = vmatpush1.bf16.msra.mxu1 %v10377_v0  ;;  %6098 = vmatprep.mubr.bf16.mxu1 %v5275_v34  ;;  %v10460_v34 = vld [vmem:[#allocation10 + $0x32c] ss:$16 sps:$4 sm:$0xff]   ;;  %11786 = vst [vmem:[#allocation53_spill] sm:$0xff] %v10533_v32 }
 0x41f   :  { %6068 = vmatprep.subr.bf16.mxu1 %v10381_v37  ;;  %11762 = vst [vmem:[#allocation29_spill] sm:$0xff] %v10460_v34 }
 0x420   :  { %6475 = vmatpush2.bf16.msra.mxu0 %v10462_v16  ;;  %v10560_v16 = vld [vmem:[#allocation13 + $0x1d4] ss:$8 sps:$4 sm:$0xff]  }
 0x421   :  { %6476 = vmatprep.subr.bf16.mxu0 %v10464_v56  ;;  %v10557_v56 = vld [vmem:[#allocation13 + $0x1e0] ss:$8 sps:$4 sm:$0xff]   ;;  %11795 = vst [vmem:[#allocation62_spill] sm:$0xff] %v10560_v16 }
 0x422   :  { %6069 = vmatpush1.bf16.msra.mxu1 %v10385_v38  ;;  %11794 = vst [vmem:[#allocation61_spill] sm:$0xff] %v10557_v56 }
 0x423   :  { %6070 = vmatprep.subr.bf16.mxu1 %v10388_v39 }
 0x424   :  { %6477 = vmatpush2.bf16.msra.mxu0 %v10473_v48  ;;  %v10554_v48 = vld [vmem:[#allocation13 + $0x1e4] ss:$8 sps:$4 sm:$0xff]  }
 0x425   :  { %6478 = vmatprep.subr.bf16.mxu0 %v10483_v57  ;;  %v10551_v57 = vld [vmem:[#allocation13 + $0x1f0] ss:$8 sps:$4 sm:$0xff]   ;;  %11793 = vst [vmem:[#allocation60_spill] sm:$0xff] %v10554_v48 }
 0x426   :  { %6071 = vmatpush1.bf16.msra.mxu1 %v10391_v40  ;;  %11792 = vst [vmem:[#allocation59_spill] sm:$0xff] %v10551_v57 }
 0x427   :  { %6072 = vmatprep.subr.bf16.mxu1 %v10394_v41 }
 0x428   :  { %6479 = vmatpush2.bf16.msra.mxu0 %v10485_v61  ;;  %v10548_v61 = vld [vmem:[#allocation13 + $0x1f4] ss:$8 sps:$4 sm:$0xff]  }
 0x429   :  { %6480 = vmatprep.subr.bf16.mxu0 %v10489_v3  ;;  %v10545_v3 = vld [vmem:[#allocation13 + $0x100] ss:$8 sps:$4 sm:$0xff]   ;;  %11791 = vst [vmem:[#allocation58_spill] sm:$0xff] %v10548_v61 }
 0x42a   :  { %6073 = vmatpush1.bf16.msra.mxu1 %v10397_v5  ;;  %11790 = vst [vmem:[#allocation57_spill] sm:$0xff] %v10545_v3 }
 0x42b   :  { %6074 = vmatprep.subr.bf16.mxu1 %v10400_v7 }
 0x42c   :  { %6481 = vmatpush2.bf16.msra.mxu0 %v10491_v35  ;;  %v10542_v35 = vld [vmem:[#allocation13 + $0x104] ss:$8 sps:$4 sm:$0xff]  }
 0x42d   :  { %6482 = vmatprep.subr.bf16.mxu0 %v10495_v42  ;;  %v10539_v42 = vld [vmem:[#allocation13 + $0x110] ss:$8 sps:$4 sm:$0xff]   ;;  %11789 = vst [vmem:[#allocation56_spill] sm:$0xff] %v10542_v35 }
 0x42e   :  { %6075 = vmatpush1.bf16.msra.mxu1 %v10403_v51  ;;  %11788 = vst [vmem:[#allocation55_spill] sm:$0xff] %v10539_v42 }
 0x42f   :  { %6076 = vmatprep.subr.bf16.mxu1 %v10406_v53 }
 0x430   :  { %6483 = vmatpush2.bf16.msra.mxu0 %v10497_v63  ;;  %v10536_v63 = vld [vmem:[#allocation13 + $0x114] ss:$8 sps:$4 sm:$0xff]  }
 0x431   :  { %11787 = vst [vmem:[#allocation54_spill] sm:$0xff] %v10536_v63 }
 0x432   :  { %6077 = vmatpush1.bf16.msra.mxu1 %v10409_v58 }
 0x433   :  { %6078 = vmatprep.subr.bf16.mxu1 %v10412_v60 }
 0x436   :  { %6079 = vmatpush1.bf16.msra.mxu1 %v10415_v1 }
 0x437   :  { %6080 = vmatprep.subr.bf16.mxu1 %v10418_v6 }
 0x43a   :  { %6081 = vmatpush1.bf16.msra.mxu1 %v10421_v31 }
 0x43b   :  { %6082 = vmatprep.subr.bf16.mxu1 %v10424_v8 }
 0x43e   :  { %6083 = vmatpush2.bf16.msra.mxu1 %v10427_v44 }
 0x43f   :  { %6084 = vmatprep.subr.bf16.mxu1 %v10430_v62 }
 0x442   :  { %6085 = vmatpush2.bf16.msra.mxu1 %v10433_v14 }
 0x443   :  { %6086 = vmatprep.subr.bf16.mxu1 %v10436_v17 }
 0x446   :  { %6087 = vmatpush2.bf16.msra.mxu1 %v10439_v10 }
 0x447   :  { %6088 = vmatprep.subr.bf16.mxu1 %v10442_v19 }
 0x44a   :  { %6089 = vmatpush2.bf16.msra.mxu1 %v10445_v49 }
 0x44b   :  { %6090 = vmatprep.subr.bf16.mxu1 %v10448_v43 }
 0x44e   :  { %6091 = vmatpush2.bf16.msra.mxu1 %v10451_v28 }
 0x44f   :  { %6092 = vmatprep.subr.bf16.mxu1 %v10454_v29 }
 0x452   :  { %6093 = vmatpush2.bf16.msra.mxu1 %v10457_v33 }
 0x453   :  { %6094 = vmatprep.subr.bf16.mxu1 %v10460_v34 }
 0x456   :  { %6095 = vmatpush2.bf16.msra.mxu1 %v10467_v45 }
 0x457   :  { %6096 = vmatprep.subr.bf16.mxu1 %v10470_v47 }
 0x45a   :  { %6097 = vmatpush2.bf16.msra.mxu1 %v10477_v55 }
 0x45d   :  { %6099 = vmatmul.mubr.bf16.vlgmr.msra.gmra.mxu1 %v10379_v50  ;;  %v10501_v50 = vld [vmem:[#allocation13 + $0x174] ss:$8 sps:$4 sm:$0xff]  }
 0x45e   :  { %11775 = vst [vmem:[#allocation42_spill] sm:$0xff] %v10501_v50  ;;  %6495 = vmatprep.subr.bf16.mxu1 %v10501_v50 }
 0x45f   :  { %6496 = vmatpush1.bf16.msra.mxu1 %v10503_v22 }
 0x460   :  { %6497 = vmatprep.subr.bf16.mxu1 %v10506_v13 }
 0x463   :  { %6498 = vmatpush1.bf16.msra.mxu1 %v10509_v52 }
 0x464   :  { %6499 = vmatprep.subr.bf16.mxu1 %v10512_v18 }
 0x467   :  { %6500 = vmatpush1.bf16.msra.mxu1 %v10515_v4 }
 0x468   :  { %6501 = vmatprep.subr.bf16.mxu1 %v10518_v2 }
 0x46b   :  { %6502 = vmatpush1.bf16.msra.mxu1 %v10521_v20 }
 0x46c   :  { %6503 = vmatprep.subr.bf16.mxu1 %v10524_v21 }
 0x46f   :  { %6504 = vmatpush1.bf16.msra.mxu1 %v10527_v25 }
 0x470   :  { %6505 = vmatprep.subr.bf16.mxu1 %v10530_v30 }
 0x473   :  { %6506 = vmatpush1.bf16.msra.mxu1 %v10533_v32 }
 0x474   :  { %6507 = vmatprep.subr.bf16.mxu1 %v10536_v63 }
 0x477   :  { %6508 = vmatpush1.bf16.msra.mxu1 %v10539_v42  ;;  %v1000_v42 = vld [vmem:[#allocation12] sm:$0xf] }
 0x478   :  { %6509 = vmatprep.subr.bf16.mxu1 %v10542_v35  ;;  %v10563_v35 = vld [vmem:[#allocation13 + $0x1d0] ss:$8 sps:$4 sm:$0xff]   ;;  %v10598_v63 = vrot.slane %v1000_v42, %v10259_v54  ;;  %v10601_v32 = vrot.slane %v1000_v42, %v10214_v27 }
 0x479   :  { %11796 = vst [vmem:[#allocation63_spill] sm:$0xff] %v10563_v35 }
 0x47b   :  { %6510 = vmatpush1.bf16.msra.mxu1 %v10545_v3  ;;  %v10566_v3 = vld [vmem:[#allocation13 + $0x1c4] ss:$8 sps:$4 sm:$0xff]  }
 0x47c   :  { %6511 = vmatprep.subr.bf16.mxu1 %v10548_v61  ;;  %11797 = vst [vmem:[#allocation64_spill] sm:$0xff] %v10566_v3  ;;  %v10569_v61 = vld [vmem:[#allocation13 + $0x1c0] ss:$8 sps:$4 sm:$0xff]  }
 0x47d   :  { %11798 = vst [vmem:[#allocation65_spill] sm:$0xff] %v10569_v61 }
 0x47f   :  { %6512 = vmatpush2.bf16.msra.mxu1 %v10551_v57  ;;  %v10572_v57 = vld [vmem:[#allocation13 + $0x1b4] ss:$8 sps:$4 sm:$0xff]  }
 0x480   :  { %6513 = vmatprep.subr.bf16.mxu1 %v10554_v48  ;;  %11799 = vst [vmem:[#allocation66_spill] sm:$0xff] %v10572_v57  ;;  %v10575_v48 = vld [vmem:[#allocation13 + $0x1b0] ss:$8 sps:$4 sm:$0xff]  }
 0x481   :  { %11800 = vst [vmem:[#allocation67_spill] sm:$0xff] %v10575_v48 }
 0x483   :  { %6514 = vmatpush2.bf16.msra.mxu1 %v10557_v56  ;;  %v10579_v56 = vld [vmem:[#allocation13 + $0x1a4] ss:$8 sps:$4 sm:$0xff]  }
 0x484   :  { %6515 = vmatprep.subr.bf16.mxu1 %v10560_v16  ;;  %11801 = vst [vmem:[#allocation68_spill] sm:$0xff] %v10579_v56  ;;  %v10581_v16 = vld [vmem:[#allocation13 + $0x1a0] ss:$8 sps:$4 sm:$0xff]  }
 0x485   :  { %11802 = vst [vmem:[#allocation69_spill] sm:$0xff] %v10581_v16 }
 0x487   :  { %6516 = vmatpush2.bf16.msra.mxu1 %v10563_v35  ;;  %v10585_v35 = vld [vmem:[#allocation13 + $0x194] ss:$8 sps:$4 sm:$0xff]  }
 0x488   :  { %6517 = vmatprep.subr.bf16.mxu1 %v10566_v3  ;;  %11803 = vst [vmem:[#allocation70_spill] sm:$0xff] %v10585_v35  ;;  %v10587_v3 = vld [vmem:[#allocation13 + $0x190] ss:$8 sps:$4 sm:$0xff]  }
 0x489   :  { %11804 = vst [vmem:[#allocation71_spill] sm:$0xff] %v10587_v3 }
 0x48b   :  { %6518 = vmatpush2.bf16.msra.mxu1 %v10569_v61  ;;  %v10591_v61 = vld [vmem:[#allocation13 + $0x184] ss:$8 sps:$4 sm:$0xff]  }
 0x48c   :  { %6519 = vmatprep.subr.bf16.mxu1 %v10572_v57  ;;  %11805 = vst [vmem:[#allocation72_spill] sm:$0xff] %v10591_v61  ;;  %v10593_v57 = vld [vmem:[#allocation13 + $0x180] ss:$8 sps:$4 sm:$0xff]  }
 0x48d   :  { %11806 = vst [vmem:[#allocation73_spill] sm:$0xff] %v10593_v57 }
 0x48f   :  { %6520 = vmatpush2.bf16.msra.mxu1 %v10575_v48  ;;  %v5971_v48 = vpop.f32.mrf.mxu0 }
 0x490   :  { %6521 = vmatprep.subr.bf16.mxu1 %v10579_v56 }
 0x491   :  { %v5973_v56 = vpop.f32.mrf.mxu0 }
 0x492   :  { %v5974_v25 = vadd.f32 %v5973_v56, %v10598_v63 }
 0x493   :  { %6522 = vmatpush2.bf16.msra.mxu1 %v10581_v16  ;;  %v5975_v16 = vpop.f32.mrf.mxu0 }
 0x494   :  { %6523 = vmatprep.subr.bf16.mxu1 %v10585_v35  ;;  %v5976_v21 = vadd.f32 %v5975_v16, %v10601_v32 }
 0x497   :  { %6524 = vmatpush2.bf16.msra.mxu1 %v10587_v3  ;;  %v5977_v3 = vpop.f32.mrf.mxu0 }
 0x498   :  { %6525 = vmatprep.subr.bf16.mxu1 %v10591_v61  ;;  %v5972_v61 = vadd.f32 %v5971_v48, %v10601_v32  ;;  %v5978_v20 = vadd.f32 %v5977_v3, %v10598_v63  ;;  %v10608_v48 = vrot.slane %v1000_v42, %v10270_v24  ;;  %v10611_v3 = vrot.slane %v1000_v42, %v10297_v12 }
 0x49a   :  { %11807 = vst [vmem:[#allocation74_spill] sm:$0xff] %v10608_v48  ;;  %11808 = vst [vmem:[#allocation75_spill] sm:$0xff] %v10611_v3 }
 0x49b   :  { %6526 = vmatpush2.bf16.msra.mxu1 %v10593_v57 }
 0x49d   :  { %v6057_v56 = vpop.f32.mrf.mxu0 }
 0x49f   :  { %v6059_v16 = vpop.f32.mrf.mxu0 }
 0x4a1   :  { %v6061_v33 = vpop.f32.mrf.mxu0 }
 0x4dd   :  { %v6014_v35 = vpop.f32.mrf.mxu1 }
 0x4de   :  { %v6015_v18 = vadd.f32 %v6014_v35, %v5972_v61  ;;  %v6063_v61 = vpop.f32.mrf.mxu0 }
 0x4df   :  { %v6016_v30 = vpop.f32.mrf.mxu1 }
 0x4e0   :  { %v6017_v2 = vadd.f32 %v6016_v30, %v5974_v25  ;;  %v6109_v47 = vmax.f32 %v6015_v18, 0.0  ;;  %v10617_v25 = vld [vmem:[#allocation9 + $0xe0] ss:$16 sps:$4 sm:$0xff]   ;;  %v10621_v30 = vld [vmem:[#allocation9 + $0xe8] ss:$16 sps:$4 sm:$0xff]  }
 0x4e1   :  { %v6018_v57 = vpop.f32.mrf.mxu1  ;;  %11809 = vst [vmem:[#allocation76_spill] sm:$0xff] %v10621_v30 }
 0x4e2   :  { %v6019_v4 = vadd.f32 %v6018_v57, %v5976_v21  ;;  %v6110_v50 = vmax.f32 %v6017_v2, 0.0 }
 0x4e3   :  { %v6020_v52 = vpop.f32.mrf.mxu1 }
 0x4e4   :  { %v6021_v13 = vadd.f32 %v6020_v52, %v5978_v20  ;;  %v6113_v22 = vmax.f32 %v6019_v4, 0.0  ;;  %v6060_v52 = vadd.f32 %v6059_v16, %v10608_v48  ;;  %v10625_v16 = vld [vmem:[#allocation9 + $0xc4] ss:$16 sps:$4 sm:$0xff]  }
 0x4e6   :  { %v6114_v55 = vmax.f32 %v6021_v13, 0.0  ;;  %v6117_v34 = vpack.c.bf16 %v6113_v22, %v6109_v47  ;;  %v6062_v13 = vadd.f32 %v6061_v33, %v10611_v3  ;;  %v6058_v47 = vadd.f32 %v6057_v56, %v10611_v3  ;;  %v10619_v33 = vld [vmem:[#allocation9 + $0xe4] ss:$16 sps:$4 sm:$0xff]   ;;  %v10623_v56 = vld [vmem:[#allocation9 + $0xec] ss:$16 sps:$4 sm:$0xff]  }
 0x4e7   :  { %6860 = vmatprep.subr.bf16.mxu0 %v10619_v33  ;;  %6903 = vmatprep.subr.bf16.mxu1 %v10623_v56  ;;  %v10725_v3 = vld [vmem:[#allocation9 + $0x1cc] ss:$16 sps:$4 sm:$0xff]  }
 0x4e8   :  { %v6118_v45 = vpack.c.bf16 %v6114_v55, %v6110_v50  ;;  %11837 = vst [vmem:[#allocation104_spill] sm:$0xff] %v10725_v3 }
 0x4ea   :  { %6484 = vmatprep.mubr.bf16.mxu0 %v6118_v45 }
 0x4eb   :  { %6485 = vmatmul.mubr.bf16.vlgmr.msra.gmra.mxu0 %v6117_v34  ;;  %v6064_v34 = vadd.f32 %v6063_v61, %v10608_v48  ;;  %v10632_v61 = vld [vmem:[#allocation9 + $0xc0] ss:$16 sps:$4 sm:$0xff]   ;;  %v10732_v48 = vld [vmem:[#allocation9 + $0x1c8] ss:$16 sps:$4 sm:$0xff]  }
 0x4ec   :  { %6861 = vmatpush1.bf16.msra.mxu0 %v10617_v25  ;;  %11839 = vst [vmem:[#allocation106_spill] sm:$0xff] %v10732_v48 }
 0x4ed   :  { %6862 = vmatprep.subr.bf16.mxu0 %v10625_v16 }
 0x4f0   :  { %6863 = vmatpush1.bf16.msra.mxu0 %v10632_v61 }
 0x51d   :  { %v6100_v57 = vpop.f32.mrf.mxu1 }
 0x51e   :  { %v6101_v22 = vadd.f32 %v6100_v57, %v6058_v47  ;;  %v10628_v57 = vld [vmem:[#allocation9 + $0xcc] ss:$16 sps:$4 sm:$0xff]   ;;  %v10644_v47 = vld [vmem:[#allocation9 + $0xa0] ss:$16 sps:$4 sm:$0xff]  }
 0x51f   :  { %v6102_v35 = vpop.f32.mrf.mxu1  ;;  %11810 = vst [vmem:[#allocation77_spill] sm:$0xff] %v10628_v57 }
 0x520   :  { %v6103_v55 = vadd.f32 %v6102_v35, %v6060_v52  ;;  %v6111_v2 = vmax.f32 %v6101_v22, 0.0  ;;  %v10636_v35 = vld [vmem:[#allocation9 + $0xc8] ss:$16 sps:$4 sm:$0xff]   ;;  %v10638_v52 = vld [vmem:[#allocation9 + $0xa4] ss:$16 sps:$4 sm:$0xff]  }
 0x521   :  { %v6104_v45 = vpop.f32.mrf.mxu1  ;;  %11811 = vst [vmem:[#allocation78_spill] sm:$0xff] %v10636_v35  ;;  %6864 = vmatprep.subr.bf16.mxu0 %v10638_v52  ;;  %v10660_v22 = vld [vmem:[#allocation9 + $0x88] ss:$16 sps:$4 sm:$0xff]  }
 0x522   :  { %v6105_v50 = vadd.f32 %v6104_v45, %v6062_v13  ;;  %v6112_v12 = vmax.f32 %v6103_v55, 0.0  ;;  %v10641_v13 = vld [vmem:[#allocation9 + $0xac] ss:$16 sps:$4 sm:$0xff]   ;;  %v10648_v45 = vld [vmem:[#allocation9 + $0xa8] ss:$16 sps:$4 sm:$0xff]   ;;  %6865 = vmatpush1.bf16.msra.mxu0 %v10644_v47  ;;  %11815 = vst [vmem:[#allocation82_spill] sm:$0xff] %v10660_v22 }
 0x523   :  { %v6106_v24 = vpop.f32.mrf.mxu1  ;;  %11812 = vst [vmem:[#allocation79_spill] sm:$0xff] %v10641_v13  ;;  %11813 = vst [vmem:[#allocation80_spill] sm:$0xff] %v10648_v45  ;;  %v10653_v55 = vld [vmem:[#allocation9 + $0x8c] ss:$16 sps:$4 sm:$0xff]  }
 0x524   :  { %v6107_v18 = vadd.f32 %v6106_v24, %v6064_v34  ;;  %v6115_v4 = vmax.f32 %v6105_v50, 0.0  ;;  %v10650_v34 = vld [vmem:[#allocation9 + $0x84] ss:$16 sps:$4 sm:$0xff]   ;;  %11814 = vst [vmem:[#allocation81_spill] sm:$0xff] %v10653_v55  ;;  %v10656_v50 = vld [vmem:[#allocation9 + $0x80] ss:$16 sps:$4 sm:$0xff]  }
 0x525   :  { %6866 = vmatprep.subr.bf16.mxu0 %v10650_v34  ;;  %v10662_v24 = vld [vmem:[#allocation9 + $0x64] ss:$16 sps:$4 sm:$0xff]  }
 0x526   :  { %v6116_v42 = vmax.f32 %v6107_v18, 0.0  ;;  %v6119_v21 = vpack.c.bf16 %v6115_v4, %v6111_v2  ;;  %11816 = vst [vmem:[#allocation83_spill] sm:$0xff] %v10662_v24  ;;  %v10665_v18 = vld [vmem:[#allocation9 + $0x6c] ss:$16 sps:$4 sm:$0xff]   ;;  %6867 = vmatpush1.bf16.msra.mxu0 %v10656_v50  ;;  %v10668_v4 = vld [vmem:[#allocation9 + $0x60] ss:$16 sps:$4 sm:$0xff]  }
 0x527   :  { %11817 = vst [vmem:[#allocation84_spill] sm:$0xff] %v10665_v18  ;;  %11818 = vst [vmem:[#allocation85_spill] sm:$0xff] %v10668_v4  ;;  %6868 = vmatprep.subr.bf16.mxu0 %v10662_v24  ;;  %v10677_v2 = vld [vmem:[#allocation9 + $0x4c] ss:$16 sps:$4 sm:$0xff]  }
 0x528   :  { %v6120_v20 = vpack.c.bf16 %v6116_v42, %v6112_v12  ;;  %v10672_v12 = vld [vmem:[#allocation9 + $0x68] ss:$16 sps:$4 sm:$0xff]   ;;  %v10674_v42 = vld [vmem:[#allocation9 + $0x44] ss:$16 sps:$4 sm:$0xff]   ;;  %11821 = vst [vmem:[#allocation88_spill] sm:$0xff] %v10677_v2 }
 0x529   :  { %11819 = vst [vmem:[#allocation86_spill] sm:$0xff] %v10672_v12  ;;  %11820 = vst [vmem:[#allocation87_spill] sm:$0xff] %v10674_v42 }
 0x52a   :  { %6527 = vmatprep.mubr.bf16.mxu1 %v6120_v20  ;;  %6869 = vmatpush1.bf16.msra.mxu0 %v10668_v4  ;;  %v10680_v20 = vld [vmem:[#allocation9 + $0x40] ss:$16 sps:$4 sm:$0xff]  }
 0x52b   :  { %6528 = vmatmul.mubr.bf16.vlgmr.msra.gmra.mxu1 %v6119_v21  ;;  %11822 = vst [vmem:[#allocation89_spill] sm:$0xff] %v10680_v20  ;;  %6870 = vmatprep.subr.bf16.mxu0 %v10674_v42  ;;  %v10684_v21 = vld [vmem:[#allocation9 + $0x48] ss:$16 sps:$4 sm:$0xff]  }
 0x52c   :  { %6904 = vmatpush1.bf16.msra.mxu1 %v10621_v30  ;;  %11823 = vst [vmem:[#allocation90_spill] sm:$0xff] %v10684_v21  ;;  %v10720_v30 = vld [vmem:[#allocation9 + $0x1e8] ss:$16 sps:$4 sm:$0xff]  }
 0x52d   :  { %6905 = vmatprep.subr.bf16.mxu1 %v10628_v57  ;;  %v10713_v57 = vld [vmem:[#allocation9 + $0x1ec] ss:$16 sps:$4 sm:$0xff]   ;;  %11835 = vst [vmem:[#allocation102_spill] sm:$0xff] %v10720_v30 }
 0x52e   :  { %6871 = vmatpush1.bf16.msra.mxu0 %v10680_v20  ;;  %11833 = vst [vmem:[#allocation100_spill] sm:$0xff] %v10713_v57 }
 0x530   :  { %6906 = vmatpush1.bf16.msra.mxu1 %v10636_v35  ;;  %v10708_v35 = vld [vmem:[#allocation9 + $0x8] ss:$16 sps:$4 sm:$0xff]  }
 0x531   :  { %6907 = vmatprep.subr.bf16.mxu1 %v10641_v13  ;;  %v10701_v13 = vld [vmem:[#allocation9 + $0xc] ss:$16 sps:$4 sm:$0xff]   ;;  %11831 = vst [vmem:[#allocation98_spill] sm:$0xff] %v10708_v35 }
 0x532   :  { %11829 = vst [vmem:[#allocation96_spill] sm:$0xff] %v10701_v13 }
 0x534   :  { %6908 = vmatpush1.bf16.msra.mxu1 %v10648_v45  ;;  %v10696_v45 = vld [vmem:[#allocation9 + $0x28] ss:$16 sps:$4 sm:$0xff]  }
 0x535   :  { %6909 = vmatprep.subr.bf16.mxu1 %v10653_v55  ;;  %v10689_v55 = vld [vmem:[#allocation9 + $0x2c] ss:$16 sps:$4 sm:$0xff]   ;;  %11827 = vst [vmem:[#allocation94_spill] sm:$0xff] %v10696_v45 }
 0x536   :  { %11825 = vst [vmem:[#allocation92_spill] sm:$0xff] %v10689_v55 }
 0x538   :  { %6910 = vmatpush1.bf16.msra.mxu1 %v10660_v22  ;;  %v10686_v22 = vld [vmem:[#allocation9 + $0x24] ss:$16 sps:$4 sm:$0xff]  }
 0x539   :  { %6911 = vmatprep.subr.bf16.mxu1 %v10665_v18  ;;  %11824 = vst [vmem:[#allocation91_spill] sm:$0xff] %v10686_v22  ;;  %v10692_v18 = vld [vmem:[#allocation9 + $0x20] ss:$16 sps:$4 sm:$0xff]   ;;  %6872 = vmatprep.subr.bf16.mxu0 %v10686_v22 }
 0x53a   :  { %11826 = vst [vmem:[#allocation93_spill] sm:$0xff] %v10692_v18  ;;  %6873 = vmatpush1.bf16.msra.mxu0 %v10692_v18 }
 0x53c   :  { %6912 = vmatpush1.bf16.msra.mxu1 %v10672_v12  ;;  %v10698_v12 = vld [vmem:[#allocation9 + $0x4] ss:$16 sps:$4 sm:$0xff]  }
 0x53d   :  { %6913 = vmatprep.subr.bf16.mxu1 %v10677_v2  ;;  %11828 = vst [vmem:[#allocation95_spill] sm:$0xff] %v10698_v12  ;;  %v10704_v2 = vld [vmem:[#allocation9] ss:$16 sps:$4 sm:$0xff]   ;;  %6874 = vmatprep.subr.bf16.mxu0 %v10698_v12 }
 0x53e   :  { %11830 = vst [vmem:[#allocation97_spill] sm:$0xff] %v10704_v2  ;;  %6875 = vmatpush1.bf16.msra.mxu0 %v10704_v2  ;;  %v1065_v2 = vld [vmem:[#allocation15] sm:$0x3] }
 0x540   :  { %6914 = vmatpush1.bf16.msra.mxu1 %v10684_v21  ;;  %v10710_v21 = vld [vmem:[#allocation9 + $0x1e4] ss:$16 sps:$4 sm:$0xff]  }
 0x541   :  { %6915 = vmatprep.subr.bf16.mxu1 %v10689_v55  ;;  %11832 = vst [vmem:[#allocation99_spill] sm:$0xff] %v10710_v21  ;;  %v10716_v55 = vld [vmem:[#allocation9 + $0x1e0] ss:$16 sps:$4 sm:$0xff]   ;;  %6876 = vmatprep.subr.bf16.mxu0 %v10710_v21  ;;  %v10737_v21 = vld [vmem:[#allocation9 + $0x1ac] ss:$16 sps:$4 sm:$0xff]  }
 0x542   :  { %11834 = vst [vmem:[#allocation101_spill] sm:$0xff] %v10716_v55  ;;  %6877 = vmatpush2.bf16.msra.mxu0 %v10716_v55  ;;  %11841 = vst [vmem:[#allocation108_spill] sm:$0xff] %v10737_v21  ;;  %v10744_v55 = vld [vmem:[#allocation9 + $0x1a8] ss:$16 sps:$4 sm:$0xff]  }
 0x543   :  { %11843 = vst [vmem:[#allocation110_spill] sm:$0xff] %v10744_v55 }
 0x544   :  { %6916 = vmatpush1.bf16.msra.mxu1 %v10696_v45  ;;  %v10722_v45 = vld [vmem:[#allocation9 + $0x1c4] ss:$16 sps:$4 sm:$0xff]  }
 0x545   :  { %6917 = vmatprep.subr.bf16.mxu1 %v10701_v13  ;;  %11836 = vst [vmem:[#allocation103_spill] sm:$0xff] %v10722_v45  ;;  %v10728_v13 = vld [vmem:[#allocation9 + $0x1c0] ss:$16 sps:$4 sm:$0xff]   ;;  %6878 = vmatprep.subr.bf16.mxu0 %v10722_v45  ;;  %v10749_v45 = vld [vmem:[#allocation9 + $0x18c] ss:$16 sps:$4 sm:$0xff]  }
 0x546   :  { %11838 = vst [vmem:[#allocation105_spill] sm:$0xff] %v10728_v13  ;;  %6879 = vmatpush2.bf16.msra.mxu0 %v10728_v13  ;;  %11845 = vst [vmem:[#allocation112_spill] sm:$0xff] %v10749_v45  ;;  %v10756_v13 = vld [vmem:[#allocation9 + $0x188] ss:$16 sps:$4 sm:$0xff]  }
 0x547   :  { %11847 = vst [vmem:[#allocation114_spill] sm:$0xff] %v10756_v13 }
 0x548   :  { %6918 = vmatpush1.bf16.msra.mxu1 %v10708_v35  ;;  %v10734_v35 = vld [vmem:[#allocation9 + $0x1a4] ss:$16 sps:$4 sm:$0xff]  }
 0x549   :  { %6919 = vmatprep.subr.bf16.mxu1 %v10713_v57  ;;  %11840 = vst [vmem:[#allocation107_spill] sm:$0xff] %v10734_v35  ;;  %v10740_v57 = vld [vmem:[#allocation9 + $0x1a0] ss:$16 sps:$4 sm:$0xff]   ;;  %6880 = vmatprep.subr.bf16.mxu0 %v10734_v35  ;;  %v10761_v35 = vld [vmem:[#allocation9 + $0x16c] ss:$16 sps:$4 sm:$0xff]  }
 0x54a   :  { %11842 = vst [vmem:[#allocation109_spill] sm:$0xff] %v10740_v57  ;;  %6881 = vmatpush2.bf16.msra.mxu0 %v10740_v57  ;;  %11849 = vst [vmem:[#allocation116_spill] sm:$0xff] %v10761_v35  ;;  %v10768_v57 = vld [vmem:[#allocation9 + $0x168] ss:$16 sps:$4 sm:$0xff]  }
 0x54b   :  { %11851 = vst [vmem:[#allocation118_spill] sm:$0xff] %v10768_v57 }
 0x54c   :  { %6920 = vmatpush2.bf16.msra.mxu1 %v10720_v30  ;;  %v10746_v30 = vld [vmem:[#allocation9 + $0x184] ss:$16 sps:$4 sm:$0xff]  }
 0x54d   :  { %6921 = vmatprep.subr.bf16.mxu1 %v10725_v3  ;;  %11844 = vst [vmem:[#allocation111_spill] sm:$0xff] %v10746_v30  ;;  %v10752_v3 = vld [vmem:[#allocation9 + $0x180] ss:$16 sps:$4 sm:$0xff]   ;;  %6882 = vmatprep.subr.bf16.mxu0 %v10746_v30 }
 0x54e   :  { %11846 = vst [vmem:[#allocation113_spill] sm:$0xff] %v10752_v3  ;;  %6883 = vmatpush2.bf16.msra.mxu0 %v10752_v3  ;;  %v10777_v30 = vld [vmem:[#allocation9 + $0x140] ss:$16 sps:$4 sm:$0xff]   ;;  %v10779_v3 = vld [vmem:[#allocation9 + $0x148] ss:$16 sps:$4 sm:$0xff]  }
 0x54f   :  { %11854 = vst [vmem:[#allocation121_spill] sm:$0xff] %v10777_v30  ;;  %11855 = vst [vmem:[#allocation122_spill] sm:$0xff] %v10779_v3 }
 0x550   :  { %6922 = vmatpush2.bf16.msra.mxu1 %v10732_v48  ;;  %v10758_v48 = vld [vmem:[#allocation9 + $0x164] ss:$16 sps:$4 sm:$0xff]  }
 0x551   :  { %6923 = vmatprep.subr.bf16.mxu1 %v10737_v21  ;;  %11848 = vst [vmem:[#allocation115_spill] sm:$0xff] %v10758_v48  ;;  %v10764_v21 = vld [vmem:[#allocation9 + $0x160] ss:$16 sps:$4 sm:$0xff]   ;;  %6884 = vmatprep.subr.bf16.mxu0 %v10758_v48 }
 0x552   :  { %11850 = vst [vmem:[#allocation117_spill] sm:$0xff] %v10764_v21  ;;  %6885 = vmatpush2.bf16.msra.mxu0 %v10764_v21  ;;  %v10791_v21 = vld [vmem:[#allocation9 + $0x128] ss:$16 sps:$4 sm:$0xff]  }
 0x553   :  { %11859 = vst [vmem:[#allocation126_spill] sm:$0xff] %v10791_v21 }
 0x554   :  { %6924 = vmatpush2.bf16.msra.mxu1 %v10744_v55  ;;  %v10773_v55 = vld [vmem:[#allocation9 + $0x144] ss:$16 sps:$4 sm:$0xff]  }
 0x555   :  { %6925 = vmatprep.subr.bf16.mxu1 %v10749_v45  ;;  %11852 = vst [vmem:[#allocation119_spill] sm:$0xff] %v10773_v55  ;;  %v10775_v45 = vld [vmem:[#allocation9 + $0x14c] ss:$16 sps:$4 sm:$0xff]   ;;  %6886 = vmatprep.subr.bf16.mxu0 %v10773_v55  ;;  %v10803_v55 = vld [vmem:[#allocation9 + $0x108] ss:$16 sps:$4 sm:$0xff]  }
 0x556   :  { %11853 = vst [vmem:[#allocation120_spill] sm:$0xff] %v10775_v45  ;;  %6887 = vmatpush2.bf16.msra.mxu0 %v10777_v30  ;;  %v10799_v30 = vld [vmem:[#allocation9 + $0x10c] ss:$16 sps:$4 sm:$0xff]   ;;  %11863 = vst [vmem:[#allocation130_spill] sm:$0xff] %v10803_v55 }
 0x557   :  { %11861 = vst [vmem:[#allocation128_spill] sm:$0xff] %v10799_v30 }
 0x558   :  { %6926 = vmatpush2.bf16.msra.mxu1 %v10756_v13  ;;  %v10787_v13 = vld [vmem:[#allocation9 + $0x12c] ss:$16 sps:$4 sm:$0xff]  }
 0x559   :  { %6927 = vmatprep.subr.bf16.mxu1 %v10761_v35  ;;  %v10785_v35 = vld [vmem:[#allocation9 + $0x124] ss:$16 sps:$4 sm:$0xff]   ;;  %11857 = vst [vmem:[#allocation124_spill] sm:$0xff] %v10787_v13 }
 0x55a   :  { %11856 = vst [vmem:[#allocation123_spill] sm:$0xff] %v10785_v35  ;;  %6888 = vmatprep.subr.bf16.mxu0 %v10785_v35 }
 0x55c   :  { %6928 = vmatpush2.bf16.msra.mxu1 %v10768_v57  ;;  %v10789_v57 = vld [vmem:[#allocation9 + $0x120] ss:$16 sps:$4 sm:$0xff]  }
 0x55d   :  { %6929 = vmatprep.subr.bf16.mxu1 %v10775_v45  ;;  %11858 = vst [vmem:[#allocation125_spill] sm:$0xff] %v10789_v57  ;;  %6889 = vmatpush2.bf16.msra.mxu0 %v10789_v57  ;;  %v10797_v45 = vld [vmem:[#allocation9 + $0x104] ss:$16 sps:$4 sm:$0xff]  }
 0x55e   :  { %11860 = vst [vmem:[#allocation127_spill] sm:$0xff] %v10797_v45  ;;  %6890 = vmatprep.subr.bf16.mxu0 %v10797_v45  ;;  %v10816_v45 = vrot.slane %v1065_v2, %v10259_v54 }
 0x560   :  { %6930 = vmatpush2.bf16.msra.mxu1 %v10779_v3  ;;  %v10801_v3 = vld [vmem:[#allocation9 + $0x100] ss:$16 sps:$4 sm:$0xff]   ;;  %11866 = vst [vmem:[#allocation133_spill] sm:$0xff] %v10816_v45 }
 0x561   :  { %6931 = vmatprep.subr.bf16.mxu1 %v10787_v13  ;;  %11862 = vst [vmem:[#allocation129_spill] sm:$0xff] %v10801_v3  ;;  %6891 = vmatpush2.bf16.msra.mxu0 %v10801_v3  ;;  %v10809_v13 = vld [vmem:[#allocation10 + $0xe4] ss:$16 sps:$4 sm:$0xff]  }
 0x562   :  { %11864 = vst [vmem:[#allocation131_spill] sm:$0xff] %v10809_v13  ;;  %6966 = vmatprep.subr.bf16.mxu0 %v10809_v13 }
 0x564   :  { %6932 = vmatpush2.bf16.msra.mxu1 %v10791_v21  ;;  %v10812_v21 = vld [vmem:[#allocation10 + $0x2e4] ss:$16 sps:$4 sm:$0xff]  }
 0x565   :  { %6933 = vmatprep.subr.bf16.mxu1 %v10799_v30  ;;  %11865 = vst [vmem:[#allocation132_spill] sm:$0xff] %v10812_v21  ;;  %v10819_v30 = vrot.slane %v1065_v2, %v10214_v27 }
 0x567   :  { %11867 = vst [vmem:[#allocation134_spill] sm:$0xff] %v10819_v30 }
 0x568   :  { %6934 = vmatpush2.bf16.msra.mxu1 %v10803_v55 }
 0x569   :  { %7009 = vmatprep.subr.bf16.mxu1 %v10812_v21 }
 0x5ab   :  { %v6486_v57 = vpop.f32.mrf.mxu0 }
 0x5ac   :  { %v6487_v20 = vadd.f32 %v6486_v57, %v10819_v30  ;;  %v10837_v57 = vld [vmem:[#allocation10 + $0xe0] ss:$16 sps:$4 sm:$0xff]  }
 0x5ad   :  { %v6488_v35 = vpop.f32.mrf.mxu0  ;;  %11872 = vst [vmem:[#allocation139_spill] sm:$0xff] %v10837_v57 }
 0x5ae   :  { %v6489_v22 = vadd.f32 %v6488_v35, %v10816_v45  ;;  %v10843_v35 = vld [vmem:[#allocation10 + $0xc4] ss:$16 sps:$4 sm:$0xff]  }
 0x5af   :  { %v6490_v48 = vpop.f32.mrf.mxu0  ;;  %11874 = vst [vmem:[#allocation141_spill] sm:$0xff] %v10843_v35 }
 0x5b0   :  { %v6491_v18 = vadd.f32 %v6490_v48, %v10819_v30 }
 0x5b1   :  { %v6492_v55 = vpop.f32.mrf.mxu0 }
 0x5b2   :  { %v6493_v21 = vadd.f32 %v6492_v55, %v10816_v45  ;;  %v10849_v55 = vld [vmem:[#allocation10 + $0xc0] ss:$16 sps:$4 sm:$0xff]  }
 0x5b3   :  { %11876 = vst [vmem:[#allocation143_spill] sm:$0xff] %v10849_v55 }
 0x5eb   :  { %v6529_v12 = vpop.f32.mrf.mxu1 }
 0x5ec   :  { %v10831_v27 = vadd.f32 %v6529_v12, %v6487_v20  ;;  %v10861_v12 = vld [vmem:[#allocation10 + $0xa0] ss:$16 sps:$4 sm:$0xff]  }
 0x5ed   :  { %v6531_v3 = vpop.f32.mrf.mxu1  ;;  %11880 = vst [vmem:[#allocation147_spill] sm:$0xff] %v10861_v12  ;;  %v10864_v20 = vld [vmem:[#allocation10 + $0x2a0] ss:$16 sps:$4 sm:$0xff]  }
 0x5ee   :  { %v10827_v24 = vadd.f32 %v6531_v3, %v6489_v22  ;;  %11871 = vst [vmem:[#allocation138_spill] sm:$0xff] %v10831_v27  ;;  %v10840_v3 = vld [vmem:[#allocation10 + $0x2e0] ss:$16 sps:$4 sm:$0xff]   ;;  %11881 = vst [vmem:[#allocation148_spill] sm:$0xff] %v10864_v20 }
 0x5ef   :  { %v6533_v13 = vpop.f32.mrf.mxu1  ;;  %11873 = vst [vmem:[#allocation140_spill] sm:$0xff] %v10840_v3  ;;  %v10852_v22 = vld [vmem:[#allocation10 + $0x2c0] ss:$16 sps:$4 sm:$0xff]  }
 0x5f0   :  { %v10825_v42 = vadd.f32 %v6533_v13, %v6491_v18  ;;  %11869 = vst [vmem:[#allocation136_spill] sm:$0xff] %v10827_v24  ;;  %v10846_v13 = vld [vmem:[#allocation10 + $0x2c4] ss:$16 sps:$4 sm:$0xff]   ;;  %11877 = vst [vmem:[#allocation144_spill] sm:$0xff] %v10852_v22 }
 0x5f1   :  { %v6535_v4 = vpop.f32.mrf.mxu1  ;;  %11875 = vst [vmem:[#allocation142_spill] sm:$0xff] %v10846_v13  ;;  %v10855_v18 = vld [vmem:[#allocation10 + $0xa4] ss:$16 sps:$4 sm:$0xff]  }
 0x5f2   :  { %11868 = vst [vmem:[#allocation135_spill] sm:$0xff] %v10825_v42  ;;  %v10829_v54 = vadd.f32 %v6535_v4, %v6493_v21  ;;  %v6538_v48 = vpack.c.bf16 %v10825_v42, %v10831_v27  ;;  %11878 = vst [vmem:[#allocation145_spill] sm:$0xff] %v10855_v18  ;;  %v10858_v4 = vld [vmem:[#allocation10 + $0x2a4] ss:$16 sps:$4 sm:$0xff]  }
 0x5f3   :  { %11879 = vst [vmem:[#allocation146_spill] sm:$0xff] %v10858_v4  ;;  %v10867_v21 = vld [vmem:[#allocation10 + $0x84] ss:$16 sps:$4 sm:$0xff]  }
 0x5f4   :  { %11870 = vst [vmem:[#allocation137_spill] sm:$0xff] %v10829_v54  ;;  %v6539_v2 = vpack.c.bf16 %v10829_v54, %v10827_v24  ;;  %11882 = vst [vmem:[#allocation149_spill] sm:$0xff] %v10867_v21 }
 0x5f6   :  { %6892 = vmatprep.mubr.bf16.mxu0 %v6539_v2  ;;  %6935 = vmatprep.mubr.bf16.mxu1 %v6539_v2  ;;  %v10870_v2 = vld [vmem:[#allocation10 + $0x284] ss:$16 sps:$4 sm:$0xff]  }
 0x5f7   :  { %6893 = vmatmul.mubr.bf16.vlgmr.msra.gmra.mxu0 %v6538_v48  ;;  %6936 = vmatmul.mubr.bf16.vlgmr.msra.gmra.mxu1 %v6538_v48  ;;  %11883 = vst [vmem:[#allocation150_spill] sm:$0xff] %v10870_v2  ;;  %v10873_v48 = vld [vmem:[#allocation10 + $0x80] ss:$16 sps:$4 sm:$0xff]  }
 0x5f8   :  { %6967 = vmatpush1.bf16.msra.mxu0 %v10837_v57  ;;  %7010 = vmatpush1.bf16.msra.mxu1 %v10840_v3  ;;  %11884 = vst [vmem:[#allocation151_spill] sm:$0xff] %v10873_v48 }
 0x5f9   :  { %6968 = vmatprep.subr.bf16.mxu0 %v10843_v35  ;;  %7011 = vmatprep.subr.bf16.mxu1 %v10846_v13 }
 0x5fc   :  { %6969 = vmatpush1.bf16.msra.mxu0 %v10849_v55  ;;  %7012 = vmatpush1.bf16.msra.mxu1 %v10852_v22 }
 0x5fd   :  { %6970 = vmatprep.subr.bf16.mxu0 %v10855_v18  ;;  %7013 = vmatprep.subr.bf16.mxu1 %v10858_v4  ;;  %v10876_v4 = vld [vmem:[#allocation10 + $0x280] ss:$16 sps:$4 sm:$0xff]  }
 0x5fe   :  { %11885 = vst [vmem:[#allocation152_spill] sm:$0xff] %v10876_v4 }
 0x600   :  { %6971 = vmatpush1.bf16.msra.mxu0 %v10861_v12  ;;  %7014 = vmatpush1.bf16.msra.mxu1 %v10864_v20  ;;  %v10879_v12 = vld [vmem:[#allocation10 + $0x64] ss:$16 sps:$4 sm:$0xff]  }
 0x601   :  { %6972 = vmatprep.subr.bf16.mxu0 %v10867_v21  ;;  %7015 = vmatprep.subr.bf16.mxu1 %v10870_v2  ;;  %11886 = vst [vmem:[#allocation153_spill] sm:$0xff] %v10879_v12  ;;  %v10882_v20 = vld [vmem:[#allocation10 + $0x264] ss:$16 sps:$4 sm:$0xff]   ;;  %v10885_v21 = vld [vmem:[#allocation10 + $0x60] ss:$16 sps:$4 sm:$0xff]  }
 0x602   :  { %11887 = vst [vmem:[#allocation154_spill] sm:$0xff] %v10882_v20  ;;  %11888 = vst [vmem:[#allocation155_spill] sm:$0xff] %v10885_v21  ;;  %v10888_v2 = vld [vmem:[#allocation10 + $0x260] ss:$16 sps:$4 sm:$0xff]  }
 0x603   :  { %11889 = vst [vmem:[#allocation156_spill] sm:$0xff] %v10888_v2 }
 0x604   :  { %6973 = vmatpush1.bf16.msra.mxu0 %v10873_v48  ;;  %7016 = vmatpush1.bf16.msra.mxu1 %v10876_v4  ;;  %v10891_v48 = vld [vmem:[#allocation10 + $0x44] ss:$16 sps:$4 sm:$0xff]  }
 0x605   :  { %6974 = vmatprep.subr.bf16.mxu0 %v10879_v12  ;;  %7017 = vmatprep.subr.bf16.mxu1 %v10882_v20  ;;  %11890 = vst [vmem:[#allocation157_spill] sm:$0xff] %v10891_v48  ;;  %v10894_v4 = vld [vmem:[#allocation10 + $0x244] ss:$16 sps:$4 sm:$0xff]   ;;  %v10897_v12 = vld [vmem:[#allocation10 + $0x40] ss:$16 sps:$4 sm:$0xff]  }
 0x606   :  { %11891 = vst [vmem:[#allocation158_spill] sm:$0xff] %v10894_v4  ;;  %11892 = vst [vmem:[#allocation159_spill] sm:$0xff] %v10897_v12  ;;  %v10900_v20 = vld [vmem:[#allocation10 + $0x240] ss:$16 sps:$4 sm:$0xff]  }
 0x607   :  { %11893 = vst [vmem:[#allocation160_spill] sm:$0xff] %v10900_v20 }
 0x608   :  { %6975 = vmatpush1.bf16.msra.mxu0 %v10885_v21  ;;  %7018 = vmatpush1.bf16.msra.mxu1 %v10888_v2  ;;  %v10903_v21 = vld [vmem:[#allocation10 + $0x24] ss:$16 sps:$4 sm:$0xff]  }
 0x609   :  { %6976 = vmatprep.subr.bf16.mxu0 %v10891_v48  ;;  %7019 = vmatprep.subr.bf16.mxu1 %v10894_v4  ;;  %11894 = vst [vmem:[#allocation161_spill] sm:$0xff] %v10903_v21  ;;  %v10906_v2 = vld [vmem:[#allocation10 + $0x224] ss:$16 sps:$4 sm:$0xff]   ;;  %v10909_v48 = vld [vmem:[#allocation10 + $0x20] ss:$16 sps:$4 sm:$0xff]  }
 0x60a   :  { %11895 = vst [vmem:[#allocation162_spill] sm:$0xff] %v10906_v2  ;;  %11896 = vst [vmem:[#allocation163_spill] sm:$0xff] %v10909_v48  ;;  %v10912_v4 = vld [vmem:[#allocation10 + $0x220] ss:$16 sps:$4 sm:$0xff]  }
 0x60b   :  { %11897 = vst [vmem:[#allocation164_spill] sm:$0xff] %v10912_v4 }
 0x60c   :  { %6977 = vmatpush1.bf16.msra.mxu0 %v10897_v12  ;;  %7020 = vmatpush1.bf16.msra.mxu1 %v10900_v20  ;;  %v10915_v12 = vld [vmem:[#allocation10 + $0x4] ss:$16 sps:$4 sm:$0xff]  }
 0x60d   :  { %6978 = vmatprep.subr.bf16.mxu0 %v10903_v21  ;;  %7021 = vmatprep.subr.bf16.mxu1 %v10906_v2  ;;  %11898 = vst [vmem:[#allocation165_spill] sm:$0xff] %v10915_v12  ;;  %v10918_v20 = vld [vmem:[#allocation10 + $0x204] ss:$16 sps:$4 sm:$0xff]   ;;  %v10921_v21 = vld [vmem:[#allocation10] ss:$16 sps:$4 sm:$0xff]  }
 0x60e   :  { %11899 = vst [vmem:[#allocation166_spill] sm:$0xff] %v10918_v20  ;;  %11900 = vst [vmem:[#allocation167_spill] sm:$0xff] %v10921_v21  ;;  %v10924_v2 = vld [vmem:[#allocation10 + $0x200] ss:$16 sps:$4 sm:$0xff]  }
 0x60f   :  { %11901 = vst [vmem:[#allocation168_spill] sm:$0xff] %v10924_v2 }
 0x610   :  { %6979 = vmatpush1.bf16.msra.mxu0 %v10909_v48  ;;  %7022 = vmatpush1.bf16.msra.mxu1 %v10912_v4  ;;  %v10927_v48 = vld [vmem:[#allocation10 + $0x1e4] ss:$16 sps:$4 sm:$0xff]  }
 0x611   :  { %6980 = vmatprep.subr.bf16.mxu0 %v10915_v12  ;;  %7023 = vmatprep.subr.bf16.mxu1 %v10918_v20  ;;  %11902 = vst [vmem:[#allocation169_spill] sm:$0xff] %v10927_v48  ;;  %v10930_v4 = vld [vmem:[#allocation10 + $0x3e4] ss:$16 sps:$4 sm:$0xff]   ;;  %v10933_v12 = vld [vmem:[#allocation10 + $0x1e0] ss:$16 sps:$4 sm:$0xff]  }
 0x612   :  { %11903 = vst [vmem:[#allocation170_spill] sm:$0xff] %v10930_v4  ;;  %11904 = vst [vmem:[#allocation171_spill] sm:$0xff] %v10933_v12  ;;  %v10936_v20 = vld [vmem:[#allocation10 + $0x3e0] ss:$16 sps:$4 sm:$0xff]  }
 0x613   :  { %11905 = vst [vmem:[#allocation172_spill] sm:$0xff] %v10936_v20 }
 0x614   :  { %6981 = vmatpush1.bf16.msra.mxu0 %v10921_v21  ;;  %7024 = vmatpush1.bf16.msra.mxu1 %v10924_v2  ;;  %v10939_v21 = vld [vmem:[#allocation10 + $0x1c4] ss:$16 sps:$4 sm:$0xff]  }
 0x615   :  { %6982 = vmatprep.subr.bf16.mxu0 %v10927_v48  ;;  %7025 = vmatprep.subr.bf16.mxu1 %v10930_v4  ;;  %11906 = vst [vmem:[#allocation173_spill] sm:$0xff] %v10939_v21  ;;  %v10942_v2 = vld [vmem:[#allocation10 + $0x3c4] ss:$16 sps:$4 sm:$0xff]   ;;  %v10945_v48 = vld [vmem:[#allocation10 + $0x1c0] ss:$16 sps:$4 sm:$0xff]  }
 0x616   :  { %11907 = vst [vmem:[#allocation174_spill] sm:$0xff] %v10942_v2  ;;  %11908 = vst [vmem:[#allocation175_spill] sm:$0xff] %v10945_v48  ;;  %v10948_v4 = vld [vmem:[#allocation10 + $0x3c0] ss:$16 sps:$4 sm:$0xff]  }
 0x617   :  { %11909 = vst [vmem:[#allocation176_spill] sm:$0xff] %v10948_v4 }
 0x618   :  { %6983 = vmatpush2.bf16.msra.mxu0 %v10933_v12  ;;  %7026 = vmatpush2.bf16.msra.mxu1 %v10936_v20  ;;  %v10951_v12 = vld [vmem:[#allocation10 + $0x1a4] ss:$16 sps:$4 sm:$0xff]  }
 0x619   :  { %6984 = vmatprep.subr.bf16.mxu0 %v10939_v21  ;;  %7027 = vmatprep.subr.bf16.mxu1 %v10942_v2  ;;  %11910 = vst [vmem:[#allocation177_spill] sm:$0xff] %v10951_v12  ;;  %v10954_v20 = vld [vmem:[#allocation10 + $0x3a4] ss:$16 sps:$4 sm:$0xff]   ;;  %v10957_v21 = vld [vmem:[#allocation10 + $0x1a0] ss:$16 sps:$4 sm:$0xff]  }
 0x61a   :  { %11911 = vst [vmem:[#allocation178_spill] sm:$0xff] %v10954_v20  ;;  %11912 = vst [vmem:[#allocation179_spill] sm:$0xff] %v10957_v21  ;;  %v10960_v2 = vld [vmem:[#allocation10 + $0x3a0] ss:$16 sps:$4 sm:$0xff]  }
 0x61b   :  { %11913 = vst [vmem:[#allocation180_spill] sm:$0xff] %v10960_v2 }
 0x61c   :  { %6985 = vmatpush2.bf16.msra.mxu0 %v10945_v48  ;;  %7028 = vmatpush2.bf16.msra.mxu1 %v10948_v4  ;;  %v10963_v48 = vld [vmem:[#allocation10 + $0x184] ss:$16 sps:$4 sm:$0xff]  }
 0x61d   :  { %6986 = vmatprep.subr.bf16.mxu0 %v10951_v12  ;;  %7029 = vmatprep.subr.bf16.mxu1 %v10954_v20  ;;  %11914 = vst [vmem:[#allocation181_spill] sm:$0xff] %v10963_v48  ;;  %v10966_v4 = vld [vmem:[#allocation10 + $0x384] ss:$16 sps:$4 sm:$0xff]   ;;  %v10969_v12 = vld [vmem:[#allocation10 + $0x180] ss:$16 sps:$4 sm:$0xff]  }
 0x61e   :  { %11915 = vst [vmem:[#allocation182_spill] sm:$0xff] %v10966_v4  ;;  %11916 = vst [vmem:[#allocation183_spill] sm:$0xff] %v10969_v12  ;;  %v10972_v20 = vld [vmem:[#allocation10 + $0x380] ss:$16 sps:$4 sm:$0xff]  }
 0x61f   :  { %11917 = vst [vmem:[#allocation184_spill] sm:$0xff] %v10972_v20 }
 0x620   :  { %6987 = vmatpush2.bf16.msra.mxu0 %v10957_v21  ;;  %7030 = vmatpush2.bf16.msra.mxu1 %v10960_v2  ;;  %v10975_v21 = vld [vmem:[#allocation10 + $0x164] ss:$16 sps:$4 sm:$0xff]  }
 0x621   :  { %6988 = vmatprep.subr.bf16.mxu0 %v10963_v48  ;;  %7031 = vmatprep.subr.bf16.mxu1 %v10966_v4  ;;  %11918 = vst [vmem:[#allocation185_spill] sm:$0xff] %v10975_v21  ;;  %v10978_v2 = vld [vmem:[#allocation10 + $0x364] ss:$16 sps:$4 sm:$0xff]   ;;  %v10981_v48 = vld [vmem:[#allocation10 + $0x160] ss:$16 sps:$4 sm:$0xff]  }
 0x622   :  { %11919 = vst [vmem:[#allocation186_spill] sm:$0xff] %v10978_v2  ;;  %11920 = vst [vmem:[#allocation187_spill] sm:$0xff] %v10981_v48  ;;  %v10984_v4 = vld [vmem:[#allocation10 + $0x360] ss:$16 sps:$4 sm:$0xff]  }
 0x623   :  { %11921 = vst [vmem:[#allocation188_spill] sm:$0xff] %v10984_v4 }
 0x624   :  { %6989 = vmatpush2.bf16.msra.mxu0 %v10969_v12  ;;  %7032 = vmatpush2.bf16.msra.mxu1 %v10972_v20  ;;  %v10987_v12 = vld [vmem:[#allocation10 + $0x144] ss:$16 sps:$4 sm:$0xff]  }
 0x625   :  { %6990 = vmatprep.subr.bf16.mxu0 %v10975_v21  ;;  %7033 = vmatprep.subr.bf16.mxu1 %v10978_v2  ;;  %11922 = vst [vmem:[#allocation189_spill] sm:$0xff] %v10987_v12  ;;  %v10990_v20 = vld [vmem:[#allocation10 + $0x344] ss:$16 sps:$4 sm:$0xff]   ;;  %v10993_v21 = vld [vmem:[#allocation10 + $0x140] ss:$16 sps:$4 sm:$0xff]  }
 0x626   :  { %11923 = vst [vmem:[#allocation190_spill] sm:$0xff] %v10990_v20  ;;  %11924 = vst [vmem:[#allocation191_spill] sm:$0xff] %v10993_v21  ;;  %v10996_v2 = vld [vmem:[#allocation10 + $0x340] ss:$16 sps:$4 sm:$0xff]  }
 0x627   :  { %11925 = vst [vmem:[#allocation192_spill] sm:$0xff] %v10996_v2 }
 0x628   :  { %6991 = vmatpush2.bf16.msra.mxu0 %v10981_v48  ;;  %7034 = vmatpush2.bf16.msra.mxu1 %v10984_v4  ;;  %v10999_v48 = vld [vmem:[#allocation10 + $0x124] ss:$16 sps:$4 sm:$0xff]  }
 0x629   :  { %6992 = vmatprep.subr.bf16.mxu0 %v10987_v12  ;;  %7035 = vmatprep.subr.bf16.mxu1 %v10990_v20  ;;  %11926 = vst [vmem:[#allocation193_spill] sm:$0xff] %v10999_v48  ;;  %v11002_v4 = vld [vmem:[#allocation10 + $0x324] ss:$16 sps:$4 sm:$0xff]   ;;  %v11005_v12 = vld [vmem:[#allocation10 + $0x120] ss:$16 sps:$4 sm:$0xff]  }
 0x62a   :  { %11927 = vst [vmem:[#allocation194_spill] sm:$0xff] %v11002_v4  ;;  %11928 = vst [vmem:[#allocation195_spill] sm:$0xff] %v11005_v12  ;;  %v11008_v20 = vld [vmem:[#allocation10 + $0x320] ss:$16 sps:$4 sm:$0xff]  }
 0x62b   :  { %11929 = vst [vmem:[#allocation196_spill] sm:$0xff] %v11008_v20 }
 0x62c   :  { %6993 = vmatpush2.bf16.msra.mxu0 %v10993_v21  ;;  %7036 = vmatpush2.bf16.msra.mxu1 %v10996_v2  ;;  %v11011_v21 = vld [vmem:[#allocation10 + $0x104] ss:$16 sps:$4 sm:$0xff]  }
 0x62d   :  { %6994 = vmatprep.subr.bf16.mxu0 %v10999_v48  ;;  %7037 = vmatprep.subr.bf16.mxu1 %v11002_v4  ;;  %11930 = vst [vmem:[#allocation197_spill] sm:$0xff] %v11011_v21  ;;  %v11014_v2 = vld [vmem:[#allocation10 + $0x304] ss:$16 sps:$4 sm:$0xff]   ;;  %v11017_v48 = vld [vmem:[#allocation10 + $0x100] ss:$16 sps:$4 sm:$0xff]  }
 0x62e   :  { %11931 = vst [vmem:[#allocation198_spill] sm:$0xff] %v11014_v2  ;;  %11932 = vst [vmem:[#allocation199_spill] sm:$0xff] %v11017_v48  ;;  %v11020_v4 = vld [vmem:[#allocation10 + $0x300] ss:$16 sps:$4 sm:$0xff]  }
 0x62f   :  { %11933 = vst [vmem:[#allocation200_spill] sm:$0xff] %v11020_v4 }
 0x630   :  { %6995 = vmatpush2.bf16.msra.mxu0 %v11005_v12  ;;  %7038 = vmatpush2.bf16.msra.mxu1 %v11008_v20  ;;  %v11023_v12 = vld [vmem:[#allocation10 + $0xec] ss:$16 sps:$4 sm:$0xff]  }
 0x631   :  { %6996 = vmatprep.subr.bf16.mxu0 %v11011_v21  ;;  %7039 = vmatprep.subr.bf16.mxu1 %v11014_v2  ;;  %11934 = vst [vmem:[#allocation201_spill] sm:$0xff] %v11023_v12  ;;  %v11026_v20 = vld [vmem:[#allocation10 + $0x2ec] ss:$16 sps:$4 sm:$0xff]  }
 0x632   :  { %11935 = vst [vmem:[#allocation202_spill] sm:$0xff] %v11026_v20 }
 0x634   :  { %6997 = vmatpush2.bf16.msra.mxu0 %v11017_v48  ;;  %7040 = vmatpush2.bf16.msra.mxu1 %v11020_v4 }
 0x635   :  { %7052 = vmatprep.subr.bf16.mxu0 %v11023_v12  ;;  %7095 = vmatprep.subr.bf16.mxu1 %v11026_v20 }
 0x6b7   :  { %v6894_v21 = vpop.f32.mrf.mxu0  ;;  %v6937_v18 = vpop.f32.mrf.mxu1 }
 0x6b8   :  { %v6946_v12 = vadd.f32 %v6894_v21, %v10349_v46  ;;  %v6948_v57 = vadd.f32 %v6937_v18, %v10369_v26  ;;  %v11173_v18 = vld [vmem:[#allocation13 + $0x70] ss:$8 sps:$4 sm:$0xff]  }
 0x6b9   :  { %v6896_v22 = vpop.f32.mrf.mxu0  ;;  %v6939_v2 = vpop.f32.mrf.mxu1 }
 0x6ba   :  { %v6947_v48 = vadd.f32 %v6896_v22, %v10345_v9  ;;  %v6949_v35 = vadd.f32 %v6939_v2, %v10365_v15  ;;  %v6954_v15 = vmax.f32 %v6946_v12, 0.0  ;;  %v11177_v12 = vld [vmem:[#allocation13 + $0x64] ss:$8 sps:$4 sm:$0xff]  }
 0x6bb   :  { %v6898_v55 = vpop.f32.mrf.mxu0  ;;  %v6941_v13 = vpop.f32.mrf.mxu1 }
 0x6bc   :  { %v6950_v4 = vadd.f32 %v6898_v55, %v10347_v36  ;;  %v6952_v3 = vadd.f32 %v6941_v13, %v10367_v23  ;;  %v6955_v45 = vmax.f32 %v6947_v48, 0.0  ;;  %v6957_v22 = vmax.f32 %v6949_v35, 0.0  ;;  %v11943_v35 = vld [vmem:[#allocation42_spill] sm:$0xff]  ;;  %v11181_v48 = vld [vmem:[#allocation13 + $0x60] ss:$8 sps:$4 sm:$0xff]  }
 0x6bd   :  { %v6900_v27 = vpop.f32.mrf.mxu0  ;;  %v6943_v20 = vpop.f32.mrf.mxu1  ;;  %v6956_v55 = vmax.f32 %v6948_v57, 0.0  ;;  %v11941_v57 = vld [vmem:[#allocation35_spill] sm:$0xff] }
 0x6be   :  { %v6951_v54 = vadd.f32 %v6900_v27, %v10351_v11  ;;  %v6953_v24 = vadd.f32 %v6943_v20, %v10371_v59  ;;  %v6958_v42 = vmax.f32 %v6950_v4, 0.0  ;;  %v6960_v30 = vmax.f32 %v6952_v3, 0.0  ;;  %v11043_v27 = vld [vmem:[#allocation10 + $0xe8] ss:$16 sps:$4 sm:$0xff]   ;;  %v11945_v4 = vld [vmem:[#allocation43_spill] sm:$0xff]  ;;  %11948 = vst [vmem:[#allocation35_spill] sm:$0xff] %v11181_v48 }
 0x6bf   :  { %v11167_v3 = vld [vmem:[#allocation13 + $0x74] ss:$8 sps:$4 sm:$0xff]   ;;  %v11947_v20 = vld [vmem:[#allocation44_spill] sm:$0xff] }
 0x6c0   :  { %v6959_v9 = vmax.f32 %v6951_v54, 0.0  ;;  %v6961_v2 = vmax.f32 %v6953_v24, 0.0  ;;  %v11037_v23 = vpack.c.bf16 %v6958_v42, %v6954_v15  ;;  %v11039_v21 = vpack.c.bf16 %v6960_v30, %v6956_v55  ;;  %v11051_v15 = vld [vmem:[#allocation10 + $0xc8] ss:$16 sps:$4 sm:$0xff]   ;;  %v11055_v30 = vld [vmem:[#allocation10 + $0xac] ss:$16 sps:$4 sm:$0xff]  }
 0x6c1   :  { %v11155_v24 = vld [vmem:[#allocation10 + $0x128] ss:$16 sps:$4 sm:$0xff]   ;;  %v11159_v42 = vld [vmem:[#allocation10 + $0x10c] ss:$16 sps:$4 sm:$0xff]  }
 0x6c2   :  { %v6963_v36 = vpack.c.bf16 %v6959_v9, %v6955_v45  ;;  %v6965_v13 = vpack.c.bf16 %v6961_v2, %v6957_v22  ;;  %v11047_v9 = vld [vmem:[#allocation10 + $0xcc] ss:$16 sps:$4 sm:$0xff]   ;;  %v11163_v54 = vld [vmem:[#allocation10 + $0x108] ss:$16 sps:$4 sm:$0xff]  }
 0x6c3   :  { %v11151_v45 = vld [vmem:[#allocation10 + $0x12c] ss:$16 sps:$4 sm:$0xff]  }
 0x6c4   :  { %6998 = vmatprep.mubr.bf16.mxu0 %v6963_v36  ;;  %7041 = vmatprep.mubr.bf16.mxu1 %v6965_v13  ;;  %v11949_v22 = vld [vmem:[#allocation45_spill] sm:$0xff]  ;;  %v11951_v2 = vld [vmem:[#allocation46_spill] sm:$0xff] }
 0x6c5   :  { %6999 = vmatmul.mubr.bf16.vlgmr.msra.gmra.mxu0 %v11037_v23  ;;  %7042 = vmatmul.mubr.bf16.vlgmr.msra.gmra.mxu1 %v11039_v21  ;;  %v11189_v55 = vld [vmem:[#allocation13 + $0x50] ss:$8 sps:$4 sm:$0xff]  }
 0x6c6   :  { %7053 = vmatpush1.bf16.msra.mxu0 %v11043_v27  ;;  %7096 = vmatpush1.bf16.msra.mxu1 %v10377_v0  ;;  %v11063_v0 = vld [vmem:[#allocation10 + $0x8c] ss:$16 sps:$4 sm:$0xff]   ;;  %11952 = vst [vmem:[#allocation43_spill] sm:$0xff] %v11189_v55 }
 0x6c7   :  { %7084 = vmatprep.mubr.bf16.mxu0 %v6963_v36  ;;  %7127 = vmatprep.mubr.bf16.mxu1 %v6965_v13  ;;  %v11059_v36 = vld [vmem:[#allocation10 + $0xa8] ss:$16 sps:$4 sm:$0xff]   ;;  %v11953_v13 = vld [vmem:[#allocation47_spill] sm:$0xff] }
 0x6c8   :  { %7054 = vmatprep.subr.bf16.mxu0 %v11047_v9  ;;  %7097 = vmatprep.subr.bf16.mxu1 %v10381_v37  ;;  %v11067_v37 = vld [vmem:[#allocation10 + $0x88] ss:$16 sps:$4 sm:$0xff]  }
 0x6ca   :  { %7055 = vmatpush1.bf16.msra.mxu0 %v11051_v15  ;;  %7098 = vmatpush1.bf16.msra.mxu1 %v10385_v38  ;;  %v11071_v38 = vld [vmem:[#allocation10 + $0x6c] ss:$16 sps:$4 sm:$0xff]  }
 0x6cb   :  { %7056 = vmatprep.subr.bf16.mxu0 %v11055_v30  ;;  %7099 = vmatprep.subr.bf16.mxu1 %v10388_v39  ;;  %v11075_v39 = vld [vmem:[#allocation10 + $0x68] ss:$16 sps:$4 sm:$0xff]  }
 0x6ce   :  { %7057 = vmatpush1.bf16.msra.mxu0 %v11059_v36  ;;  %7100 = vmatpush1.bf16.msra.mxu1 %v10391_v40  ;;  %v11079_v40 = vld [vmem:[#allocation10 + $0x4c] ss:$16 sps:$4 sm:$0xff]  }
 0x6cf   :  { %7058 = vmatprep.subr.bf16.mxu0 %v11063_v0  ;;  %7101 = vmatprep.subr.bf16.mxu1 %v10394_v41  ;;  %v11083_v41 = vld [vmem:[#allocation10 + $0x48] ss:$16 sps:$4 sm:$0xff]  }
 0x6d2   :  { %7059 = vmatpush1.bf16.msra.mxu0 %v11067_v37  ;;  %7102 = vmatpush1.bf16.msra.mxu1 %v10397_v5  ;;  %v11087_v5 = vld [vmem:[#allocation10 + $0x2c] ss:$16 sps:$4 sm:$0xff]  }
 0x6d3   :  { %7060 = vmatprep.subr.bf16.mxu0 %v11071_v38  ;;  %7103 = vmatprep.subr.bf16.mxu1 %v10400_v7  ;;  %v11091_v7 = vld [vmem:[#allocation10 + $0x28] ss:$16 sps:$4 sm:$0xff]  }
 0x6d6   :  { %7061 = vmatpush1.bf16.msra.mxu0 %v11075_v39  ;;  %7104 = vmatpush1.bf16.msra.mxu1 %v10403_v51  ;;  %v11095_v51 = vld [vmem:[#allocation10 + $0xc] ss:$16 sps:$4 sm:$0xff]  }
 0x6d7   :  { %7062 = vmatprep.subr.bf16.mxu0 %v11079_v40  ;;  %7105 = vmatprep.subr.bf16.mxu1 %v10406_v53  ;;  %v11099_v53 = vld [vmem:[#allocation10 + $0x8] ss:$16 sps:$4 sm:$0xff]  }
 0x6da   :  { %7063 = vmatpush1.bf16.msra.mxu0 %v11083_v41  ;;  %7106 = vmatpush1.bf16.msra.mxu1 %v10409_v58  ;;  %v11103_v58 = vld [vmem:[#allocation10 + $0x1ec] ss:$16 sps:$4 sm:$0xff]  }
 0x6db   :  { %7064 = vmatprep.subr.bf16.mxu0 %v11087_v5  ;;  %7107 = vmatprep.subr.bf16.mxu1 %v10412_v60  ;;  %v11107_v60 = vld [vmem:[#allocation10 + $0x1e8] ss:$16 sps:$4 sm:$0xff]  }
 0x6de   :  { %7065 = vmatpush1.bf16.msra.mxu0 %v11091_v7  ;;  %7108 = vmatpush1.bf16.msra.mxu1 %v10415_v1  ;;  %v11111_v1 = vld [vmem:[#allocation10 + $0x1cc] ss:$16 sps:$4 sm:$0xff]  }
 0x6df   :  { %7066 = vmatprep.subr.bf16.mxu0 %v11095_v51  ;;  %7109 = vmatprep.subr.bf16.mxu1 %v10418_v6  ;;  %v11115_v6 = vld [vmem:[#allocation10 + $0x1c8] ss:$16 sps:$4 sm:$0xff]  }
 0x6e2   :  { %7067 = vmatpush1.bf16.msra.mxu0 %v11099_v53  ;;  %7110 = vmatpush1.bf16.msra.mxu1 %v10421_v31  ;;  %v11119_v31 = vld [vmem:[#allocation10 + $0x1ac] ss:$16 sps:$4 sm:$0xff]  }
 0x6e3   :  { %7068 = vmatprep.subr.bf16.mxu0 %v11103_v58  ;;  %7111 = vmatprep.subr.bf16.mxu1 %v10424_v8  ;;  %v11123_v8 = vld [vmem:[#allocation10 + $0x1a8] ss:$16 sps:$4 sm:$0xff]  }
 0x6e6   :  { %7069 = vmatpush2.bf16.msra.mxu0 %v11107_v60  ;;  %7112 = vmatpush2.bf16.msra.mxu1 %v10427_v44  ;;  %v11127_v44 = vld [vmem:[#allocation10 + $0x18c] ss:$16 sps:$4 sm:$0xff]  }
 0x6e7   :  { %7070 = vmatprep.subr.bf16.mxu0 %v11111_v1  ;;  %7113 = vmatprep.subr.bf16.mxu1 %v10430_v62  ;;  %v11131_v62 = vld [vmem:[#allocation10 + $0x188] ss:$16 sps:$4 sm:$0xff]  }
 0x6ea   :  { %7071 = vmatpush2.bf16.msra.mxu0 %v11115_v6  ;;  %7114 = vmatpush2.bf16.msra.mxu1 %v10433_v14  ;;  %v11135_v14 = vld [vmem:[#allocation10 + $0x16c] ss:$16 sps:$4 sm:$0xff]  }
 0x6eb   :  { %7072 = vmatprep.subr.bf16.mxu0 %v11119_v31  ;;  %7115 = vmatprep.subr.bf16.mxu1 %v10436_v17  ;;  %v11139_v17 = vld [vmem:[#allocation10 + $0x168] ss:$16 sps:$4 sm:$0xff]  }
 0x6ee   :  { %7073 = vmatpush2.bf16.msra.mxu0 %v11123_v8  ;;  %7116 = vmatpush2.bf16.msra.mxu1 %v10439_v10  ;;  %v11143_v10 = vld [vmem:[#allocation10 + $0x14c] ss:$16 sps:$4 sm:$0xff]  }
 0x6ef   :  { %7074 = vmatprep.subr.bf16.mxu0 %v11127_v44  ;;  %7117 = vmatprep.subr.bf16.mxu1 %v10442_v19  ;;  %v11147_v19 = vld [vmem:[#allocation10 + $0x148] ss:$16 sps:$4 sm:$0xff]  }
 0x6f2   :  { %7075 = vmatpush2.bf16.msra.mxu0 %v11131_v62  ;;  %7118 = vmatpush2.bf16.msra.mxu1 %v10445_v49  ;;  %v11936_v49 = vld [vmem:[#allocation28_spill] sm:$0xff] }
 0x6f3   :  { %7076 = vmatprep.subr.bf16.mxu0 %v11135_v14  ;;  %7119 = vmatprep.subr.bf16.mxu1 %v10448_v43  ;;  %v11937_v43 = vld [vmem:[#allocation29_spill] sm:$0xff]  ;;  %11940 = vst [vmem:[#allocation28_spill] sm:$0xff] %v11163_v54 }
 0x6f4   :  { %11942 = vst [vmem:[#allocation29_spill] sm:$0xff] %v11167_v3 }
 0x6f6   :  { %7077 = vmatpush2.bf16.msra.mxu0 %v11139_v17  ;;  %7120 = vmatpush2.bf16.msra.mxu1 %v10451_v28  ;;  %v11938_v28 = vld [vmem:[#allocation32_spill] sm:$0xff] }
 0x6f7   :  { %7078 = vmatprep.subr.bf16.mxu0 %v11143_v10  ;;  %7121 = vmatprep.subr.bf16.mxu1 %v10454_v29  ;;  %v11939_v29 = vld [vmem:[#allocation33_spill] sm:$0xff]  ;;  %11944 = vst [vmem:[#allocation32_spill] sm:$0xff] %v11173_v18 }
 0x6f8   :  { %11946 = vst [vmem:[#allocation33_spill] sm:$0xff] %v11177_v12 }
 0x6fa   :  { %7079 = vmatpush2.bf16.msra.mxu0 %v11147_v19  ;;  %7122 = vmatpush2.bf16.msra.mxu1 %v11936_v49  ;;  %v11955_v49 = vld [vmem:[#allocation48_spill] sm:$0xff] }
 0x6fb   :  { %7080 = vmatprep.subr.bf16.mxu0 %v11151_v45  ;;  %7123 = vmatprep.subr.bf16.mxu1 %v11937_v43  ;;  %v11197_v43 = vld [vmem:[#allocation13 + $0x40] ss:$8 sps:$4 sm:$0xff]  }
 0x6fc   :  { %11956 = vst [vmem:[#allocation45_spill] sm:$0xff] %v11197_v43 }
 0x6fe   :  { %7081 = vmatpush2.bf16.msra.mxu0 %v11155_v24  ;;  %7124 = vmatpush2.bf16.msra.mxu1 %v11938_v28  ;;  %v11957_v28 = vld [vmem:[#allocation49_spill] sm:$0xff] }
 0x6ff   :  { %7082 = vmatprep.subr.bf16.mxu0 %v11159_v42  ;;  %7125 = vmatprep.subr.bf16.mxu1 %v11939_v29  ;;  %v11201_v29 = vld [vmem:[#allocation13 + $0x34] ss:$8 sps:$4 sm:$0xff]  }
 0x700   :  { %11958 = vst [vmem:[#allocation46_spill] sm:$0xff] %v11201_v29 }
 0x702   :  { %7083 = vmatpush2.bf16.msra.mxu0 %v11163_v54  ;;  %7126 = vmatpush2.bf16.msra.mxu1 %v11941_v57  ;;  %v11959_v57 = vld [vmem:[#allocation50_spill] sm:$0xff] }
 0x703   :  { %7150 = vmatprep.subr.bf16.mxu0 %v11167_v3  ;;  %7193 = vmatprep.subr.bf16.mxu1 %v11943_v35  ;;  %v11205_v35 = vld [vmem:[#allocation13 + $0x30] ss:$8 sps:$4 sm:$0xff]  }
 0x704   :  { %11960 = vst [vmem:[#allocation47_spill] sm:$0xff] %v11205_v35 }
 0x705   :  { %7085 = vmatmul.mubr.bf16.vlgmr.msra.gmra.mxu0 %v11037_v23  ;;  %7128 = vmatmul.mubr.bf16.vlgmr.msra.gmra.mxu1 %v11039_v21  ;;  %v11185_v23 = vld [vmem:[#allocation13 + $0x54] ss:$8 sps:$4 sm:$0xff]   ;;  %v11193_v21 = vld [vmem:[#allocation13 + $0x44] ss:$8 sps:$4 sm:$0xff]  }
 0x706   :  { %7151 = vmatpush1.bf16.msra.mxu0 %v11173_v18  ;;  %7194 = vmatpush1.bf16.msra.mxu1 %v11945_v4  ;;  %11950 = vst [vmem:[#allocation42_spill] sm:$0xff] %v11185_v23  ;;  %11954 = vst [vmem:[#allocation44_spill] sm:$0xff] %v11193_v21  ;;  %v11961_v4 = vld [vmem:[#allocation51_spill] sm:$0xff] }
 0x707   :  { %7152 = vmatprep.subr.bf16.mxu0 %v11177_v12  ;;  %7195 = vmatprep.subr.bf16.mxu1 %v11947_v20  ;;  %v11209_v20 = vld [vmem:[#allocation13 + $0x24] ss:$8 sps:$4 sm:$0xff]  }
 0x708   :  { %11962 = vst [vmem:[#allocation48_spill] sm:$0xff] %v11209_v20 }
 0x70a   :  { %7153 = vmatpush1.bf16.msra.mxu0 %v11181_v48  ;;  %7196 = vmatpush1.bf16.msra.mxu1 %v11949_v22  ;;  %v11963_v22 = vld [vmem:[#allocation52_spill] sm:$0xff] }
 0x70b   :  { %7154 = vmatprep.subr.bf16.mxu0 %v11185_v23  ;;  %7197 = vmatprep.subr.bf16.mxu1 %v11951_v2  ;;  %v11213_v2 = vld [vmem:[#allocation13 + $0x20] ss:$8 sps:$4 sm:$0xff]  }
 0x70c   :  { %11964 = vst [vmem:[#allocation49_spill] sm:$0xff] %v11213_v2 }
 0x70e   :  { %7155 = vmatpush1.bf16.msra.mxu0 %v11189_v55  ;;  %7198 = vmatpush1.bf16.msra.mxu1 %v11953_v13  ;;  %v11965_v13 = vld [vmem:[#allocation53_spill] sm:$0xff] }
 0x70f   :  { %7156 = vmatprep.subr.bf16.mxu0 %v11193_v21  ;;  %7199 = vmatprep.subr.bf16.mxu1 %v11955_v49  ;;  %v11217_v49 = vld [vmem:[#allocation13 + $0x14] ss:$8 sps:$4 sm:$0xff]  }
 0x710   :  { %11966 = vst [vmem:[#allocation50_spill] sm:$0xff] %v11217_v49 }
 0x712   :  { %7157 = vmatpush1.bf16.msra.mxu0 %v11197_v43  ;;  %7200 = vmatpush1.bf16.msra.mxu1 %v11957_v28  ;;  %v11967_v28 = vld [vmem:[#allocation54_spill] sm:$0xff]  ;;  %v11996_v43 = vld [vmem:[#allocation37_spill] sm:$0xff] }
 0x713   :  { %7158 = vmatprep.subr.bf16.mxu0 %v11201_v29  ;;  %7201 = vmatprep.subr.bf16.mxu1 %v11959_v57  ;;  %v11221_v57 = vld [vmem:[#allocation13 + $0x10] ss:$8 sps:$4 sm:$0xff]  }
 0x714   :  { %11968 = vst [vmem:[#allocation51_spill] sm:$0xff] %v11221_v57  ;;  %v11993_v29 = vld [vmem:[#allocation67_spill] sm:$0xff] }
 0x716   :  { %7159 = vmatpush1.bf16.msra.mxu0 %v11205_v35  ;;  %7202 = vmatpush1.bf16.msra.mxu1 %v11961_v4  ;;  %v11969_v4 = vld [vmem:[#allocation55_spill] sm:$0xff] }
 0x717   :  { %7160 = vmatprep.subr.bf16.mxu0 %v11209_v20  ;;  %7203 = vmatprep.subr.bf16.mxu1 %v11963_v22  ;;  %v11225_v20 = vld [vmem:[#allocation13 + $0x4] ss:$8 sps:$4 sm:$0xff]   ;;  %v11990_v35 = vld [vmem:[#allocation31_spill] sm:$0xff] }
 0x718   :  { %11970 = vst [vmem:[#allocation52_spill] sm:$0xff] %v11225_v20  ;;  %v11971_v22 = vld [vmem:[#allocation56_spill] sm:$0xff] }
 0x71a   :  { %7161 = vmatpush1.bf16.msra.mxu0 %v11213_v2  ;;  %7204 = vmatpush1.bf16.msra.mxu1 %v11965_v13  ;;  %v11229_v2 = vld [vmem:[#allocation13] ss:$8 sps:$4 sm:$0xff]  }
 0x71b   :  { %7162 = vmatprep.subr.bf16.mxu0 %v11217_v49  ;;  %7205 = vmatprep.subr.bf16.mxu1 %v11967_v28  ;;  %11972 = vst [vmem:[#allocation53_spill] sm:$0xff] %v11229_v2  ;;  %v11973_v13 = vld [vmem:[#allocation57_spill] sm:$0xff]  ;;  %v11233_v49 = vld [vmem:[#allocation13 + $0xf4] ss:$8 sps:$4 sm:$0xff]  }
 0x71c   :  { %11974 = vst [vmem:[#allocation54_spill] sm:$0xff] %v11233_v49  ;;  %v11975_v28 = vld [vmem:[#allocation58_spill] sm:$0xff] }
 0x71e   :  { %7163 = vmatpush1.bf16.msra.mxu0 %v11221_v57  ;;  %7206 = vmatpush1.bf16.msra.mxu1 %v11969_v4  ;;  %v11237_v57 = vld [vmem:[#allocation13 + $0xf0] ss:$8 sps:$4 sm:$0xff]  }
 0x71f   :  { %7164 = vmatprep.subr.bf16.mxu0 %v11225_v20  ;;  %7207 = vmatprep.subr.bf16.mxu1 %v11971_v22  ;;  %11976 = vst [vmem:[#allocation55_spill] sm:$0xff] %v11237_v57  ;;  %v11977_v4 = vld [vmem:[#allocation59_spill] sm:$0xff]  ;;  %v11241_v20 = vld [vmem:[#allocation13 + $0xe4] ss:$8 sps:$4 sm:$0xff]  }
 0x720   :  { %11978 = vst [vmem:[#allocation56_spill] sm:$0xff] %v11241_v20  ;;  %v11979_v22 = vld [vmem:[#allocation60_spill] sm:$0xff] }
 0x722   :  { %7165 = vmatpush1.bf16.msra.mxu0 %v11229_v2  ;;  %7208 = vmatpush1.bf16.msra.mxu1 %v11973_v13  ;;  %v11245_v2 = vld [vmem:[#allocation13 + $0xe0] ss:$8 sps:$4 sm:$0xff]  }
 0x723   :  { %7166 = vmatprep.subr.bf16.mxu0 %v11233_v49  ;;  %7209 = vmatprep.subr.bf16.mxu1 %v11975_v28  ;;  %11980 = vst [vmem:[#allocation57_spill] sm:$0xff] %v11245_v2  ;;  %v11981_v13 = vld [vmem:[#allocation61_spill] sm:$0xff]  ;;  %v11249_v49 = vld [vmem:[#allocation13 + $0xd4] ss:$8 sps:$4 sm:$0xff]  }
 0x724   :  { %11982 = vst [vmem:[#allocation58_spill] sm:$0xff] %v11249_v49  ;;  %v11983_v28 = vld [vmem:[#allocation62_spill] sm:$0xff] }
 0x726   :  { %7167 = vmatpush2.bf16.msra.mxu0 %v11237_v57  ;;  %7210 = vmatpush2.bf16.msra.mxu1 %v11977_v4  ;;  %v11253_v57 = vld [vmem:[#allocation13 + $0xd0] ss:$8 sps:$4 sm:$0xff]  }
 0x727   :  { %7168 = vmatprep.subr.bf16.mxu0 %v11241_v20  ;;  %7211 = vmatprep.subr.bf16.mxu1 %v11979_v22  ;;  %11984 = vst [vmem:[#allocation59_spill] sm:$0xff] %v11253_v57  ;;  %v11985_v4 = vld [vmem:[#allocation63_spill] sm:$0xff]  ;;  %v11257_v20 = vld [vmem:[#allocation13 + $0xc4] ss:$8 sps:$4 sm:$0xff]  }
 0x728   :  { %11986 = vst [vmem:[#allocation60_spill] sm:$0xff] %v11257_v20  ;;  %v11987_v22 = vld [vmem:[#allocation64_spill] sm:$0xff] }
 0x72a   :  { %7169 = vmatpush2.bf16.msra.mxu0 %v11245_v2  ;;  %7212 = vmatpush2.bf16.msra.mxu1 %v11981_v13  ;;  %v11988_v2 = vld [vmem:[#allocation30_spill] sm:$0xff]  ;;  %v11989_v13 = vld [vmem:[#allocation65_spill] sm:$0xff] }
 0x72b   :  { %7170 = vmatprep.subr.bf16.mxu0 %v11249_v49  ;;  %7213 = vmatprep.subr.bf16.mxu1 %v11983_v28  ;;  %v11991_v49 = vld [vmem:[#allocation66_spill] sm:$0xff] }
 0x72c   :  { %v11992_v28 = vld [vmem:[#allocation34_spill] sm:$0xff] }
 0x72e   :  { %7171 = vmatpush2.bf16.msra.mxu0 %v11253_v57  ;;  %7214 = vmatpush2.bf16.msra.mxu1 %v11985_v4  ;;  %v11994_v57 = vld [vmem:[#allocation36_spill] sm:$0xff] }
 0x72f   :  { %7172 = vmatprep.subr.bf16.mxu0 %v11257_v20  ;;  %7215 = vmatprep.subr.bf16.mxu1 %v11987_v22  ;;  %v11995_v4 = vld [vmem:[#allocation68_spill] sm:$0xff]  ;;  %v11997_v20 = vld [vmem:[#allocation69_spill] sm:$0xff]  ;;  %v11998_v22 = vld [vmem:[#allocation38_spill] sm:$0xff] }
 0x732   :  { %7173 = vmatpush2.bf16.msra.mxu0 %v11988_v2  ;;  %7216 = vmatpush2.bf16.msra.mxu1 %v11989_v13  ;;  %v11999_v2 = vld [vmem:[#allocation70_spill] sm:$0xff]  ;;  %v12000_v13 = vld [vmem:[#allocation39_spill] sm:$0xff] }
 0x733   :  { %7174 = vmatprep.subr.bf16.mxu0 %v11990_v35  ;;  %7217 = vmatprep.subr.bf16.mxu1 %v11991_v49  ;;  %v12001_v35 = vld [vmem:[#allocation71_spill] sm:$0xff]  ;;  %v12002_v49 = vld [vmem:[#allocation40_spill] sm:$0xff] }
 0x736   :  { %7175 = vmatpush2.bf16.msra.mxu0 %v11992_v28  ;;  %7218 = vmatpush2.bf16.msra.mxu1 %v11993_v29  ;;  %v12003_v28 = vld [vmem:[#allocation72_spill] sm:$0xff]  ;;  %v12004_v29 = vld [vmem:[#allocation41_spill] sm:$0xff] }
 0x737   :  { %7176 = vmatprep.subr.bf16.mxu0 %v11994_v57  ;;  %7219 = vmatprep.subr.bf16.mxu1 %v11995_v4  ;;  %v12005_v57 = vld [vmem:[#allocation73_spill] sm:$0xff] }
 0x73a   :  { %7177 = vmatpush2.bf16.msra.mxu0 %v11996_v43  ;;  %7220 = vmatpush2.bf16.msra.mxu1 %v11997_v20 }
 0x73b   :  { %7178 = vmatprep.subr.bf16.mxu0 %v11998_v22  ;;  %7221 = vmatprep.subr.bf16.mxu1 %v11999_v2 }
 0x73e   :  { %7179 = vmatpush2.bf16.msra.mxu0 %v12000_v13  ;;  %7222 = vmatpush2.bf16.msra.mxu1 %v12001_v35 }
 0x73f   :  { %7180 = vmatprep.subr.bf16.mxu0 %v12002_v49  ;;  %7223 = vmatprep.subr.bf16.mxu1 %v12003_v28 }
 0x742   :  { %7181 = vmatpush2.bf16.msra.mxu0 %v12004_v29  ;;  %7224 = vmatpush2.bf16.msra.mxu1 %v12005_v57 }
 0x743   :  { %7246 = vmatprep.subr.bf16.mxu0 %v10619_v33  ;;  %7289 = vmatprep.subr.bf16.mxu1 %v10623_v56 }
 0x785   :  { %v7000_v43 = vpop.f32.mrf.mxu0  ;;  %v7043_v20 = vpop.f32.mrf.mxu1 }
 0x786   :  { %v7001_v13 = vadd.f32 %v7000_v43, %v10601_v32  ;;  %v12021_v43 = vld [vmem:[#allocation113_spill] sm:$0xff] }
 0x787   :  { %v7002_v4 = vpop.f32.mrf.mxu0  ;;  %v7045_v22 = vpop.f32.mrf.mxu1 }
 0x788   :  { %v7003_v2 = vadd.f32 %v7002_v4, %v10598_v63  ;;  %v7044_v33 = vadd.f32 %v7043_v20, %v7001_v13  ;;  %v12022_v20 = vld [vmem:[#allocation115_spill] sm:$0xff]  ;;  %v12023_v13 = vld [vmem:[#allocation117_spill] sm:$0xff] }
 0x789   :  { %v7004_v35 = vpop.f32.mrf.mxu0  ;;  %v7047_v49 = vpop.f32.mrf.mxu1 }
 0x78a   :  { %v7005_v28 = vadd.f32 %v7004_v35, %v10601_v32  ;;  %v7046_v29 = vadd.f32 %v7045_v22, %v7003_v2  ;;  %v7138_v3 = vmax.f32 %v7044_v33, 0.0  ;;  %v12026_v33 = vld [vmem:[#allocation75_spill] sm:$0xff] }
 0x78b   :  { %v7006_v21 = vpop.f32.mrf.mxu0  ;;  %v7049_v23 = vpop.f32.mrf.mxu1 }
 0x78c   :  { %v7048_v55 = vadd.f32 %v7047_v49, %v7005_v28  ;;  %v7007_v57 = vadd.f32 %v7006_v21, %v10598_v63  ;;  %v7139_v12 = vmax.f32 %v7046_v29, 0.0  ;;  %v12020_v21 = vld [vmem:[#allocation111_spill] sm:$0xff]  ;;  %v12025_v29 = vld [vmem:[#allocation74_spill] sm:$0xff] }
 0x78d   :  { %v12024_v28 = vld [vmem:[#allocation119_spill] sm:$0xff] }
 0x78e   :  { %v7050_v56 = vadd.f32 %v7049_v23, %v7007_v57  ;;  %v7142_v48 = vmax.f32 %v7048_v55, 0.0  ;;  %v12006_v23 = vld [vmem:[#allocation83_spill] sm:$0xff]  ;;  %v12019_v55 = vld [vmem:[#allocation109_spill] sm:$0xff] }
 0x790   :  { %v7143_v18 = vmax.f32 %v7050_v56, 0.0  ;;  %v7146_v4 = vpack.c.bf16 %v7142_v48, %v7138_v3  ;;  %v12009_v3 = vld [vmem:[#allocation89_spill] sm:$0xff]  ;;  %v12018_v48 = vld [vmem:[#allocation107_spill] sm:$0xff] }
 0x792   :  { %v7147_v54 = vpack.c.bf16 %v7143_v18, %v7139_v12  ;;  %v12007_v18 = vld [vmem:[#allocation85_spill] sm:$0xff] }
 0x793   :  { %v12017_v12 = vld [vmem:[#allocation105_spill] sm:$0xff] }
 0x794   :  { %7182 = vmatprep.mubr.bf16.mxu0 %v7147_v54  ;;  %v12008_v54 = vld [vmem:[#allocation87_spill] sm:$0xff] }
 0x795   :  { %7183 = vmatmul.mubr.bf16.vlgmr.msra.gmra.mxu0 %v7146_v4 }
 0x796   :  { %7247 = vmatpush1.bf16.msra.mxu0 %v10617_v25  ;;  %v12010_v25 = vld [vmem:[#allocation91_spill] sm:$0xff] }
 0x797   :  { %7248 = vmatprep.subr.bf16.mxu0 %v10625_v16  ;;  %v12011_v16 = vld [vmem:[#allocation93_spill] sm:$0xff] }
 0x79a   :  { %7249 = vmatpush1.bf16.msra.mxu0 %v10632_v61  ;;  %v12012_v61 = vld [vmem:[#allocation95_spill] sm:$0xff] }
 0x79b   :  { %7250 = vmatprep.subr.bf16.mxu0 %v10638_v52  ;;  %v12013_v52 = vld [vmem:[#allocation97_spill] sm:$0xff] }
 0x79e   :  { %7251 = vmatpush1.bf16.msra.mxu0 %v10644_v47  ;;  %v12014_v47 = vld [vmem:[#allocation99_spill] sm:$0xff] }
 0x79f   :  { %7252 = vmatprep.subr.bf16.mxu0 %v10650_v34  ;;  %v12015_v34 = vld [vmem:[#allocation101_spill] sm:$0xff] }
 0x7a2   :  { %7253 = vmatpush1.bf16.msra.mxu0 %v10656_v50  ;;  %v12016_v50 = vld [vmem:[#allocation103_spill] sm:$0xff] }
 0x7a3   :  { %7254 = vmatprep.subr.bf16.mxu0 %v12006_v23 }
 0x7a6   :  { %7255 = vmatpush1.bf16.msra.mxu0 %v12007_v18 }
 0x7a7   :  { %7256 = vmatprep.subr.bf16.mxu0 %v12008_v54  ;;  %v12027_v54 = vld [vmem:[#allocation121_spill] sm:$0xff] }
 0x7aa   :  { %7257 = vmatpush1.bf16.msra.mxu0 %v12009_v3 }
 0x7ab   :  { %7258 = vmatprep.subr.bf16.mxu0 %v12010_v25  ;;  %v12028_v25 = vld [vmem:[#allocation123_spill] sm:$0xff] }
 0x7ae   :  { %7259 = vmatpush1.bf16.msra.mxu0 %v12011_v16 }
 0x7af   :  { %7260 = vmatprep.subr.bf16.mxu0 %v12012_v61 }
 0x7b2   :  { %7261 = vmatpush1.bf16.msra.mxu0 %v12013_v52 }
 0x7b3   :  { %7262 = vmatprep.subr.bf16.mxu0 %v12014_v47 }
 0x7b6   :  { %7263 = vmatpush2.bf16.msra.mxu0 %v12015_v34 }
 0x7b7   :  { %7264 = vmatprep.subr.bf16.mxu0 %v12016_v50 }
 0x7ba   :  { %7265 = vmatpush2.bf16.msra.mxu0 %v12017_v12  ;;  %v12029_v12 = vld [vmem:[#allocation125_spill] sm:$0xff] }
 0x7bb   :  { %7266 = vmatprep.subr.bf16.mxu0 %v12018_v48 }
 0x7be   :  { %7267 = vmatpush2.bf16.msra.mxu0 %v12019_v55  ;;  %v12030_v55 = vld [vmem:[#allocation127_spill] sm:$0xff] }
 0x7bf   :  { %7268 = vmatprep.subr.bf16.mxu0 %v12020_v21 }
 0x7c2   :  { %7269 = vmatpush2.bf16.msra.mxu0 %v12021_v43 }
 0x7c3   :  { %7270 = vmatprep.subr.bf16.mxu0 %v12022_v20 }
 0x7c5   :  { %v7086_v22 = vpop.f32.mrf.mxu0  ;;  %v7129_v2 = vpop.f32.mrf.mxu1 }
 0x7c6   :  { %7271 = vmatpush2.bf16.msra.mxu0 %v12023_v13  ;;  %v7087_v56 = vadd.f32 %v7086_v22, %v12026_v33  ;;  %v12031_v13 = vld [vmem:[#allocation129_spill] sm:$0xff] }
 0x7c7   :  { %v7088_v35 = vpop.f32.mrf.mxu0  ;;  %v7131_v49 = vpop.f32.mrf.mxu1  ;;  %7272 = vmatprep.subr.bf16.mxu0 %v12024_v28  ;;  %v12032_v28 = vld [vmem:[#allocation131_spill] sm:$0xff] }
 0x7c8   :  { %v7089_v57 = vadd.f32 %v7088_v35, %v12025_v29  ;;  %v7130_v47 = vadd.f32 %v7129_v2, %v7087_v56  ;;  %v12034_v2 = vld [vmem:[#allocation77_spill] sm:$0xff]  ;;  %v12036_v56 = vld [vmem:[#allocation79_spill] sm:$0xff] }
 0x7c9   :  { %v7090_v4 = vpop.f32.mrf.mxu0  ;;  %v7133_v23 = vpop.f32.mrf.mxu1 }
 0x7ca   :  { %v7091_v18 = vadd.f32 %v7090_v4, %v12026_v33  ;;  %7273 = vmatpush2.bf16.msra.mxu0 %v12027_v54  ;;  %v7132_v16 = vadd.f32 %v7131_v49, %v7089_v57  ;;  %v7140_v20 = vmax.f32 %v7130_v47, 0.0  ;;  %v12033_v49 = vld [vmem:[#allocation76_spill] sm:$0xff]  ;;  %v12035_v57 = vld [vmem:[#allocation78_spill] sm:$0xff] }
 0x7cb   :  { %v7092_v3 = vpop.f32.mrf.mxu0  ;;  %7274 = vmatprep.subr.bf16.mxu0 %v12028_v25  ;;  %v7135_v34 = vpop.f32.mrf.mxu1  ;;  %v12037_v4 = vld [vmem:[#allocation80_spill] sm:$0xff] }
 0x7cc   :  { %v7134_v61 = vadd.f32 %v7133_v23, %v7091_v18  ;;  %v7093_v52 = vadd.f32 %v7092_v3, %v12025_v29  ;;  %v7141_v21 = vmax.f32 %v7132_v16, 0.0  ;;  %v12038_v23 = vld [vmem:[#allocation81_spill] sm:$0xff]  ;;  %v12039_v18 = vld [vmem:[#allocation82_spill] sm:$0xff]  ;;  %v12040_v54 = vld [vmem:[#allocation84_spill] sm:$0xff] }
 0x7cd   :  { %v12041_v3 = vld [vmem:[#allocation86_spill] sm:$0xff]  ;;  %v12042_v25 = vld [vmem:[#allocation88_spill] sm:$0xff] }
 0x7ce   :  { %v7136_v50 = vadd.f32 %v7135_v34, %v7093_v52  ;;  %7275 = vmatpush2.bf16.msra.mxu0 %v12029_v12  ;;  %v7144_v48 = vmax.f32 %v7134_v61, 0.0  ;;  %v12043_v16 = vld [vmem:[#allocation90_spill] sm:$0xff]  ;;  %v12044_v61 = vld [vmem:[#allocation92_spill] sm:$0xff] }
 0x7cf   :  { %7276 = vmatprep.subr.bf16.mxu0 %v12030_v55  ;;  %v12045_v52 = vld [vmem:[#allocation94_spill] sm:$0xff]  ;;  %v12046_v47 = vld [vmem:[#allocation96_spill] sm:$0xff] }
 0x7d0   :  { %v7145_v43 = vmax.f32 %v7136_v50, 0.0  ;;  %v7148_v35 = vpack.c.bf16 %v7144_v48, %v7140_v20  ;;  %v12047_v34 = vld [vmem:[#allocation98_spill] sm:$0xff]  ;;  %v12048_v50 = vld [vmem:[#allocation100_spill] sm:$0xff] }
 0x7d1   :  { %v12049_v12 = vld [vmem:[#allocation102_spill] sm:$0xff]  ;;  %v12050_v48 = vld [vmem:[#allocation104_spill] sm:$0xff] }
 0x7d2   :  { %v7149_v22 = vpack.c.bf16 %v7145_v43, %v7141_v21  ;;  %7277 = vmatpush2.bf16.msra.mxu0 %v12031_v13  ;;  %v12051_v55 = vld [vmem:[#allocation106_spill] sm:$0xff]  ;;  %v12052_v21 = vld [vmem:[#allocation108_spill] sm:$0xff] }
 0x7d3   :  { %7352 = vmatprep.subr.bf16.mxu0 %v12032_v28  ;;  %v12053_v43 = vld [vmem:[#allocation110_spill] sm:$0xff]  ;;  %v12054_v20 = vld [vmem:[#allocation112_spill] sm:$0xff] }
 0x7d4   :  { %7225 = vmatprep.mubr.bf16.mxu1 %v7149_v22  ;;  %v12055_v22 = vld [vmem:[#allocation114_spill] sm:$0xff]  ;;  %v12056_v13 = vld [vmem:[#allocation116_spill] sm:$0xff] }
 0x7d5   :  { %7226 = vmatmul.mubr.bf16.vlgmr.msra.gmra.mxu1 %v7148_v35  ;;  %v12057_v35 = vld [vmem:[#allocation118_spill] sm:$0xff]  ;;  %v12058_v28 = vld [vmem:[#allocation120_spill] sm:$0xff] }
 0x7d6   :  { %7290 = vmatpush1.bf16.msra.mxu1 %v12033_v49  ;;  %v12059_v49 = vld [vmem:[#allocation122_spill] sm:$0xff] }
 0x7d7   :  { %7291 = vmatprep.subr.bf16.mxu1 %v12034_v2  ;;  %v12060_v2 = vld [vmem:[#allocation124_spill] sm:$0xff] }
 0x7da   :  { %7292 = vmatpush1.bf16.msra.mxu1 %v12035_v57  ;;  %v12061_v57 = vld [vmem:[#allocation126_spill] sm:$0xff] }
 0x7db   :  { %7293 = vmatprep.subr.bf16.mxu1 %v12036_v56  ;;  %v12062_v56 = vld [vmem:[#allocation128_spill] sm:$0xff] }
 0x7de   :  { %7294 = vmatpush1.bf16.msra.mxu1 %v12037_v4  ;;  %v12063_v4 = vld [vmem:[#allocation130_spill] sm:$0xff] }
 0x7df   :  { %7295 = vmatprep.subr.bf16.mxu1 %v12038_v23  ;;  %v12064_v23 = vld [vmem:[#allocation132_spill] sm:$0xff] }
 0x7e2   :  { %7296 = vmatpush1.bf16.msra.mxu1 %v12039_v18 }
 0x7e3   :  { %7297 = vmatprep.subr.bf16.mxu1 %v12040_v54 }
 0x7e6   :  { %7298 = vmatpush1.bf16.msra.mxu1 %v12041_v3 }
 0x7e7   :  { %7299 = vmatprep.subr.bf16.mxu1 %v12042_v25 }
 0x7ea   :  { %7300 = vmatpush1.bf16.msra.mxu1 %v12043_v16  ;;  %v12065_v16 = vld [vmem:[#allocation133_spill] sm:$0xff] }
 0x7eb   :  { %7301 = vmatprep.subr.bf16.mxu1 %v12044_v61 }
 0x7ee   :  { %7302 = vmatpush1.bf16.msra.mxu1 %v12045_v52  ;;  %v12066_v52 = vld [vmem:[#allocation134_spill] sm:$0xff] }
 0x7ef   :  { %7303 = vmatprep.subr.bf16.mxu1 %v12046_v47 }
 0x7f2   :  { %7304 = vmatpush1.bf16.msra.mxu1 %v12047_v34 }
 0x7f3   :  { %7305 = vmatprep.subr.bf16.mxu1 %v12048_v50 }
 0x7f6   :  { %7306 = vmatpush2.bf16.msra.mxu1 %v12049_v12 }
 0x7f7   :  { %7307 = vmatprep.subr.bf16.mxu1 %v12050_v48 }
 0x7fa   :  { %7308 = vmatpush2.bf16.msra.mxu1 %v12051_v55 }
 0x7fb   :  { %7309 = vmatprep.subr.bf16.mxu1 %v12052_v21 }
 0x7fe   :  { %7310 = vmatpush2.bf16.msra.mxu1 %v12053_v43 }
 0x7ff   :  { %7311 = vmatprep.subr.bf16.mxu1 %v12054_v20 }
 0x802   :  { %7312 = vmatpush2.bf16.msra.mxu1 %v12055_v22 }
 0x803   :  { %7313 = vmatprep.subr.bf16.mxu1 %v12056_v13 }
 0x806   :  { %7314 = vmatpush2.bf16.msra.mxu1 %v12057_v35 }
 0x807   :  { %7315 = vmatprep.subr.bf16.mxu1 %v12058_v28 }
 0x80a   :  { %7316 = vmatpush2.bf16.msra.mxu1 %v12059_v49 }
 0x80b   :  { %7317 = vmatprep.subr.bf16.mxu1 %v12060_v2 }
 0x80e   :  { %7318 = vmatpush2.bf16.msra.mxu1 %v12061_v57  ;;  %v12067_v57 = vld [vmem:[#allocation135_spill] sm:$0xff] }
 0x80f   :  { %7319 = vmatprep.subr.bf16.mxu1 %v12062_v56 }
 0x812   :  { %7320 = vmatpush2.bf16.msra.mxu1 %v12063_v4  ;;  %v12068_v4 = vld [vmem:[#allocation136_spill] sm:$0xff] }
 0x813   :  { %7395 = vmatprep.subr.bf16.mxu1 %v12064_v23 }
 0x855   :  { %v7184_v18 = vpop.f32.mrf.mxu0 }
 0x856   :  { %v7185_v47 = vadd.f32 %v7184_v18, %v12066_v52  ;;  %v12070_v18 = vld [vmem:[#allocation137_spill] sm:$0xff] }
 0x857   :  { %v7186_v54 = vpop.f32.mrf.mxu0 }
 0x858   :  { %v7187_v61 = vadd.f32 %v7186_v54, %v12065_v16 }
 0x859   :  { %v7188_v3 = vpop.f32.mrf.mxu0 }
 0x85a   :  { %v7189_v12 = vadd.f32 %v7188_v3, %v12066_v52  ;;  %v12072_v3 = vld [vmem:[#allocation138_spill] sm:$0xff] }
 0x85b   :  { %v7190_v34 = vpop.f32.mrf.mxu0 }
 0x85c   :  { %v7191_v43 = vadd.f32 %v7190_v34, %v12065_v16  ;;  %v12074_v34 = vld [vmem:[#allocation139_spill] sm:$0xff] }
 0x895   :  { %v7227_v25 = vpop.f32.mrf.mxu1 }
 0x896   :  { %v7228_v55 = vadd.f32 %v7227_v25, %v7185_v47 }
 0x897   :  { %v7229_v50 = vpop.f32.mrf.mxu1 }
 0x898   :  { %v7230_v48 = vadd.f32 %v7229_v50, %v7187_v61  ;;  %v7236_v49 = vmul.f32 0.1, %v7228_v55  ;;  %v12075_v50 = vld [vmem:[#allocation140_spill] sm:$0xff]  ;;  %v12078_v55 = vld [vmem:[#allocation143_spill] sm:$0xff] }
 0x899   :  { %v7231_v21 = vpop.f32.mrf.mxu1 }
 0x89a   :  { %v7232_v20 = vadd.f32 %v7231_v21, %v7189_v12  ;;  %v7237_v13 = vmul.f32 0.1, %v7230_v48  ;;  %v11367_v25 = vadd.f32 %v7236_v49, %v12072_v3  ;;  %v12076_v12 = vld [vmem:[#allocation141_spill] sm:$0xff]  ;;  %v12077_v48 = vld [vmem:[#allocation142_spill] sm:$0xff]  ;;  %v12079_v21 = vld [vmem:[#allocation144_spill] sm:$0xff] }
 0x89b   :  { %v7233_v22 = vpop.f32.mrf.mxu1  ;;  %v12086_v49 = vld [vmem:[#allocation151_spill] sm:$0xff]  ;;  %v12091_v3 = vld [vmem:[#allocation156_spill] sm:$0xff] }
 0x89c   :  { %v7238_v35 = vmul.f32 0.1, %v7232_v20  ;;  %v7234_v28 = vadd.f32 %v7233_v22, %v7191_v43  ;;  %v11361_v23 = vadd.f32 %v7237_v13, %v12068_v4  ;;  %12073 = vst [vmem:[#allocation63_spill] sm:$0xff] %v11367_v25  ;;  %v12080_v43 = vld [vmem:[#allocation145_spill] sm:$0xff]  ;;  %v12081_v20 = vld [vmem:[#allocation146_spill] sm:$0xff]  ;;  %v12082_v22 = vld [vmem:[#allocation147_spill] sm:$0xff] }
 0x89d   :  { %v12083_v13 = vld [vmem:[#allocation148_spill] sm:$0xff]  ;;  %v12089_v4 = vld [vmem:[#allocation154_spill] sm:$0xff] }
 0x89e   :  { %v7239_v2 = vmul.f32 0.1, %v7234_v28  ;;  %v11358_v56 = vadd.f32 %v7238_v35, %v12067_v57  ;;  %12069 = vst [vmem:[#allocation61_spill] sm:$0xff] %v11361_v23  ;;  %v12084_v35 = vld [vmem:[#allocation149_spill] sm:$0xff]  ;;  %v12085_v28 = vld [vmem:[#allocation150_spill] sm:$0xff] }
 0x89f   :  { %v12088_v57 = vld [vmem:[#allocation153_spill] sm:$0xff] }
 0x8a0   :  { %v11364_v54 = vadd.f32 %v7239_v2, %v12070_v18  ;;  %v7244_v47 = vpack.c.bf16 %v11358_v56, %v11367_v25  ;;  %v12087_v2 = vld [vmem:[#allocation152_spill] sm:$0xff]  ;;  %v12090_v18 = vld [vmem:[#allocation155_spill] sm:$0xff] }
 0x8a2   :  { %12071 = vst [vmem:[#allocation62_spill] sm:$0xff] %v11364_v54  ;;  %v7245_v61 = vpack.c.bf16 %v11364_v54, %v11361_v23 }
 0x8a4   :  { %7278 = vmatprep.mubr.bf16.mxu0 %v7245_v61  ;;  %7321 = vmatprep.mubr.bf16.mxu1 %v7245_v61  ;;  %v12092_v61 = vld [vmem:[#allocation157_spill] sm:$0xff] }
 0x8a5   :  { %7279 = vmatmul.mubr.bf16.vlgmr.msra.gmra.mxu0 %v7244_v47  ;;  %7322 = vmatmul.mubr.bf16.vlgmr.msra.gmra.mxu1 %v7244_v47  ;;  %v12093_v47 = vld [vmem:[#allocation158_spill] sm:$0xff] }
 0x8a6   :  { %7353 = vmatpush1.bf16.msra.mxu0 %v12074_v34  ;;  %7396 = vmatpush1.bf16.msra.mxu1 %v12075_v50  ;;  %v12094_v34 = vld [vmem:[#allocation159_spill] sm:$0xff]  ;;  %v12095_v50 = vld [vmem:[#allocation160_spill] sm:$0xff] }
 0x8a7   :  { %7354 = vmatprep.subr.bf16.mxu0 %v12076_v12  ;;  %7397 = vmatprep.subr.bf16.mxu1 %v12077_v48  ;;  %v12096_v12 = vld [vmem:[#allocation161_spill] sm:$0xff]  ;;  %v12097_v48 = vld [vmem:[#allocation162_spill] sm:$0xff] }
 0x8aa   :  { %7355 = vmatpush1.bf16.msra.mxu0 %v12078_v55  ;;  %7398 = vmatpush1.bf16.msra.mxu1 %v12079_v21  ;;  %v12098_v55 = vld [vmem:[#allocation163_spill] sm:$0xff]  ;;  %v12099_v21 = vld [vmem:[#allocation164_spill] sm:$0xff] }
 0x8ab   :  { %7356 = vmatprep.subr.bf16.mxu0 %v12080_v43  ;;  %7399 = vmatprep.subr.bf16.mxu1 %v12081_v20  ;;  %v12100_v43 = vld [vmem:[#allocation165_spill] sm:$0xff]  ;;  %v12101_v20 = vld [vmem:[#allocation166_spill] sm:$0xff] }
 0x8ae   :  { %7357 = vmatpush1.bf16.msra.mxu0 %v12082_v22  ;;  %7400 = vmatpush1.bf16.msra.mxu1 %v12083_v13  ;;  %v12102_v22 = vld [vmem:[#allocation167_spill] sm:$0xff]  ;;  %v12103_v13 = vld [vmem:[#allocation168_spill] sm:$0xff] }
 0x8af   :  { %7358 = vmatprep.subr.bf16.mxu0 %v12084_v35  ;;  %7401 = vmatprep.subr.bf16.mxu1 %v12085_v28  ;;  %v12104_v35 = vld [vmem:[#allocation169_spill] sm:$0xff]  ;;  %v12105_v28 = vld [vmem:[#allocation170_spill] sm:$0xff] }
 0x8b2   :  { %7359 = vmatpush1.bf16.msra.mxu0 %v12086_v49  ;;  %7402 = vmatpush1.bf16.msra.mxu1 %v12087_v2  ;;  %v12106_v49 = vld [vmem:[#allocation171_spill] sm:$0xff]  ;;  %v12107_v2 = vld [vmem:[#allocation172_spill] sm:$0xff] }
 0x8b3   :  { %7360 = vmatprep.subr.bf16.mxu0 %v12088_v57  ;;  %7403 = vmatprep.subr.bf16.mxu1 %v12089_v4  ;;  %v12108_v57 = vld [vmem:[#allocation173_spill] sm:$0xff]  ;;  %v12109_v4 = vld [vmem:[#allocation174_spill] sm:$0xff] }
 0x8b6   :  { %7361 = vmatpush1.bf16.msra.mxu0 %v12090_v18  ;;  %7404 = vmatpush1.bf16.msra.mxu1 %v12091_v3  ;;  %v12110_v18 = vld [vmem:[#allocation175_spill] sm:$0xff]  ;;  %v12111_v3 = vld [vmem:[#allocation176_spill] sm:$0xff] }
 0x8b7   :  { %7362 = vmatprep.subr.bf16.mxu0 %v12092_v61  ;;  %7405 = vmatprep.subr.bf16.mxu1 %v12093_v47  ;;  %v12112_v61 = vld [vmem:[#allocation177_spill] sm:$0xff]  ;;  %v12113_v47 = vld [vmem:[#allocation178_spill] sm:$0xff] }
 0x8ba   :  { %7363 = vmatpush1.bf16.msra.mxu0 %v12094_v34  ;;  %7406 = vmatpush1.bf16.msra.mxu1 %v12095_v50  ;;  %v12114_v34 = vld [vmem:[#allocation179_spill] sm:$0xff]  ;;  %v12115_v50 = vld [vmem:[#allocation180_spill] sm:$0xff] }
 0x8bb   :  { %7364 = vmatprep.subr.bf16.mxu0 %v12096_v12  ;;  %7407 = vmatprep.subr.bf16.mxu1 %v12097_v48  ;;  %v12116_v12 = vld [vmem:[#allocation181_spill] sm:$0xff]  ;;  %v12117_v48 = vld [vmem:[#allocation182_spill] sm:$0xff] }
 0x8be   :  { %7365 = vmatpush1.bf16.msra.mxu0 %v12098_v55  ;;  %7408 = vmatpush1.bf16.msra.mxu1 %v12099_v21  ;;  %v12118_v55 = vld [vmem:[#allocation183_spill] sm:$0xff]  ;;  %v12119_v21 = vld [vmem:[#allocation184_spill] sm:$0xff] }
 0x8bf   :  { %7366 = vmatprep.subr.bf16.mxu0 %v12100_v43  ;;  %7409 = vmatprep.subr.bf16.mxu1 %v12101_v20  ;;  %v12120_v43 = vld [vmem:[#allocation185_spill] sm:$0xff]  ;;  %v12121_v20 = vld [vmem:[#allocation186_spill] sm:$0xff] }
 0x8c2   :  { %7367 = vmatpush1.bf16.msra.mxu0 %v12102_v22  ;;  %7410 = vmatpush1.bf16.msra.mxu1 %v12103_v13  ;;  %v12122_v22 = vld [vmem:[#allocation187_spill] sm:$0xff]  ;;  %v12123_v13 = vld [vmem:[#allocation188_spill] sm:$0xff] }
 0x8c3   :  { %7368 = vmatprep.subr.bf16.mxu0 %v12104_v35  ;;  %7411 = vmatprep.subr.bf16.mxu1 %v12105_v28  ;;  %v12124_v35 = vld [vmem:[#allocation189_spill] sm:$0xff]  ;;  %v12125_v28 = vld [vmem:[#allocation190_spill] sm:$0xff] }
 0x8c6   :  { %7369 = vmatpush2.bf16.msra.mxu0 %v12106_v49  ;;  %7412 = vmatpush2.bf16.msra.mxu1 %v12107_v2  ;;  %v12126_v49 = vld [vmem:[#allocation191_spill] sm:$0xff]  ;;  %v12127_v2 = vld [vmem:[#allocation192_spill] sm:$0xff] }
 0x8c7   :  { %7370 = vmatprep.subr.bf16.mxu0 %v12108_v57  ;;  %7413 = vmatprep.subr.bf16.mxu1 %v12109_v4  ;;  %v12128_v57 = vld [vmem:[#allocation193_spill] sm:$0xff]  ;;  %v12129_v4 = vld [vmem:[#allocation194_spill] sm:$0xff] }
 0x8ca   :  { %7371 = vmatpush2.bf16.msra.mxu0 %v12110_v18  ;;  %7414 = vmatpush2.bf16.msra.mxu1 %v12111_v3  ;;  %v12130_v18 = vld [vmem:[#allocation195_spill] sm:$0xff]  ;;  %v12131_v3 = vld [vmem:[#allocation196_spill] sm:$0xff] }
 0x8cb   :  { %7372 = vmatprep.subr.bf16.mxu0 %v12112_v61  ;;  %7415 = vmatprep.subr.bf16.mxu1 %v12113_v47  ;;  %v12132_v61 = vld [vmem:[#allocation197_spill] sm:$0xff]  ;;  %v12133_v47 = vld [vmem:[#allocation198_spill] sm:$0xff] }
 0x8ce   :  { %7373 = vmatpush2.bf16.msra.mxu0 %v12114_v34  ;;  %7416 = vmatpush2.bf16.msra.mxu1 %v12115_v50  ;;  %v12134_v34 = vld [vmem:[#allocation199_spill] sm:$0xff]  ;;  %v12135_v50 = vld [vmem:[#allocation200_spill] sm:$0xff] }
 0x8cf   :  { %7374 = vmatprep.subr.bf16.mxu0 %v12116_v12  ;;  %7417 = vmatprep.subr.bf16.mxu1 %v12117_v48  ;;  %v12136_v12 = vld [vmem:[#allocation201_spill] sm:$0xff]  ;;  %v12137_v48 = vld [vmem:[#allocation202_spill] sm:$0xff] }
 0x8d2   :  { %7375 = vmatpush2.bf16.msra.mxu0 %v12118_v55  ;;  %7418 = vmatpush2.bf16.msra.mxu1 %v12119_v21 }
 0x8d3   :  { %7376 = vmatprep.subr.bf16.mxu0 %v12120_v43  ;;  %7419 = vmatprep.subr.bf16.mxu1 %v12121_v20 }
 0x8d6   :  { %7377 = vmatpush2.bf16.msra.mxu0 %v12122_v22  ;;  %7420 = vmatpush2.bf16.msra.mxu1 %v12123_v13 }
 0x8d7   :  { %7378 = vmatprep.subr.bf16.mxu0 %v12124_v35  ;;  %7421 = vmatprep.subr.bf16.mxu1 %v12125_v28  ;;  %v12138_v35 = vld [vmem:[#allocation24_spill] sm:$0xff] }
 0x8da   :  { %7379 = vmatpush2.bf16.msra.mxu0 %v12126_v49  ;;  %7422 = vmatpush2.bf16.msra.mxu1 %v12127_v2  ;;  %v12139_v49 = vld [vmem:[#allocation26_spill] sm:$0xff] }
 0x8db   :  { %7380 = vmatprep.subr.bf16.mxu0 %v12128_v57  ;;  %7423 = vmatprep.subr.bf16.mxu1 %v12129_v4  ;;  %v12140_v57 = vld [vmem:[#allocation25_spill] sm:$0xff] }
 0x8de   :  { %7381 = vmatpush2.bf16.msra.mxu0 %v12130_v18  ;;  %7424 = vmatpush2.bf16.msra.mxu1 %v12131_v3  ;;  %v12141_v18 = vld [vmem:[#allocation27_spill] sm:$0xff] }
 0x8df   :  { %7382 = vmatprep.subr.bf16.mxu0 %v12132_v61  ;;  %7425 = vmatprep.subr.bf16.mxu1 %v12133_v47 }
 0x8e2   :  { %7383 = vmatpush2.bf16.msra.mxu0 %v12134_v34  ;;  %7426 = vmatpush2.bf16.msra.mxu1 %v12135_v50 }
 0x8e3   :  { %7438 = vmatprep.subr.bf16.mxu0 %v12136_v12  ;;  %7481 = vmatprep.subr.bf16.mxu1 %v12137_v48 }
 0x965   :  { %v7280_v55 = vpop.f32.mrf.mxu0  ;;  %v7323_v21 = vpop.f32.mrf.mxu1 }
 0x966   :  { %v7332_v61 = vadd.f32 %v7280_v55, %v10349_v46  ;;  %v7334_v47 = vadd.f32 %v7323_v21, %v10369_v26  ;;  %v9754_v26 = vld [vmem:[#allocation10 + $0x2cc] ss:$16 sps:$4 sm:$0xff]  }
 0x967   :  { %v7282_v43 = vpop.f32.mrf.mxu0  ;;  %v7325_v20 = vpop.f32.mrf.mxu1  ;;  %v12143_v55 = vld [vmem:[#allocation29_spill] sm:$0xff] }
 0x968   :  { %v7333_v28 = vadd.f32 %v7282_v43, %v12138_v35  ;;  %v7335_v2 = vadd.f32 %v7325_v20, %v12139_v49  ;;  %v7340_v49 = vmax.f32 %v7332_v61, 0.0  ;;  %v12145_v21 = vld [vmem:[#allocation33_spill] sm:$0xff]  ;;  %v12148_v61 = vld [vmem:[#allocation43_spill] sm:$0xff] }
 0x969   :  { %v7284_v22 = vpop.f32.mrf.mxu0  ;;  %v7327_v13 = vpop.f32.mrf.mxu1 }
 0x96a   :  { %v7336_v4 = vadd.f32 %v7284_v22, %v12140_v57  ;;  %v7338_v3 = vadd.f32 %v7327_v13, %v12141_v18  ;;  %v7341_v23 = vmax.f32 %v7333_v28, 0.0  ;;  %v7343_v43 = vmax.f32 %v7335_v2, 0.0  ;;  %v12146_v28 = vld [vmem:[#allocation35_spill] sm:$0xff] }
 0x96b   :  { %v7286_v34 = vpop.f32.mrf.mxu0  ;;  %v7329_v50 = vpop.f32.mrf.mxu1  ;;  %v7342_v22 = vmax.f32 %v7334_v47, 0.0  ;;  %v9787_v2 = vld [vmem:[#allocation13 + $0x160] ss:$8 sps:$4 sm:$0xff]   ;;  %v9789_v47 = vld [vmem:[#allocation13 + $0x150] ss:$8 sps:$4 sm:$0xff]  }
 0x96c   :  { %v7337_v12 = vadd.f32 %v7286_v34, %v10351_v11  ;;  %v7339_v48 = vadd.f32 %v7329_v50, %v10371_v59  ;;  %v7344_v25 = vmax.f32 %v7336_v4, 0.0  ;;  %v7346_v54 = vmax.f32 %v7338_v3, 0.0  ;;  %v9753_v11 = vld [vmem:[#allocation10 + $0x2e8] ss:$16 sps:$4 sm:$0xff]  }
 0x96d   :  { %v9755_v59 = vld [vmem:[#allocation10 + $0x2c8] ss:$16 sps:$4 sm:$0xff]  }
 0x96e   :  { %v7345_v35 = vmax.f32 %v7337_v12, 0.0  ;;  %v7347_v20 = vmax.f32 %v7339_v48, 0.0  ;;  %v11445_v18 = vpack.c.bf16 %v7344_v25, %v7340_v49  ;;  %v11447_v46 = vpack.c.bf16 %v7346_v54, %v7342_v22  ;;  %v9757_v54 = vld [vmem:[#allocation10 + $0x2a8] ss:$16 sps:$4 sm:$0xff]   ;;  %v12150_v12 = vld [vmem:[#allocation45_spill] sm:$0xff] }
 0x96f   :  { %v12142_v25 = vld [vmem:[#allocation28_spill] sm:$0xff]  ;;  %v12147_v4 = vld [vmem:[#allocation42_spill] sm:$0xff] }
 0x970   :  { %v7349_v57 = vpack.c.bf16 %v7345_v35, %v7341_v23  ;;  %v7351_v13 = vpack.c.bf16 %v7347_v20, %v7343_v43  ;;  %v9756_v23 = vld [vmem:[#allocation10 + $0x2ac] ss:$16 sps:$4 sm:$0xff]   ;;  %v9788_v3 = vld [vmem:[#allocation13 + $0x154] ss:$8 sps:$4 sm:$0xff]   ;;  %v9790_v50 = vld [vmem:[#allocation13 + $0x144] ss:$8 sps:$4 sm:$0xff]  }
 0x971   :  { %v12149_v34 = vld [vmem:[#allocation44_spill] sm:$0xff]  ;;  %v12151_v43 = vld [vmem:[#allocation46_spill] sm:$0xff]  ;;  %v12152_v20 = vld [vmem:[#allocation47_spill] sm:$0xff] }
 0x972   :  { %7384 = vmatprep.mubr.bf16.mxu0 %v7349_v57  ;;  %7427 = vmatprep.mubr.bf16.mxu1 %v7351_v13  ;;  %v9791_v48 = vld [vmem:[#allocation13 + $0x140] ss:$8 sps:$4 sm:$0xff]   ;;  %v9792_v35 = vld [vmem:[#allocation13 + $0x134] ss:$8 sps:$4 sm:$0xff]   ;;  %v9793_v49 = vld [vmem:[#allocation13 + $0x130] ss:$8 sps:$4 sm:$0xff]  }
 0x973   :  { %7385 = vmatmul.mubr.bf16.vlgmr.msra.gmra.mxu0 %v11445_v18  ;;  %7428 = vmatmul.mubr.bf16.vlgmr.msra.gmra.mxu1 %v11447_v46  ;;  %v12153_v22 = vld [vmem:[#allocation48_spill] sm:$0xff] }
 0x974   :  { %7439 = vmatpush1.bf16.msra.mxu0 %v11043_v27  ;;  %7482 = vmatpush1.bf16.msra.mxu1 %v9753_v11  ;;  %v9758_v27 = vld [vmem:[#allocation10 + $0x28c] ss:$16 sps:$4 sm:$0xff]   ;;  %v9796_v11 = vld [vmem:[#allocation13 + $0x114] ss:$8 sps:$4 sm:$0xff]  }
 0x975   :  { %7470 = vmatprep.mubr.bf16.mxu0 %v7349_v57  ;;  %7513 = vmatprep.mubr.bf16.mxu1 %v7351_v13  ;;  %v9794_v57 = vld [vmem:[#allocation13 + $0x124] ss:$8 sps:$4 sm:$0xff]  }
 0x976   :  { %7440 = vmatprep.subr.bf16.mxu0 %v11047_v9  ;;  %7483 = vmatprep.subr.bf16.mxu1 %v9754_v26  ;;  %v9759_v9 = vld [vmem:[#allocation10 + $0x288] ss:$16 sps:$4 sm:$0xff]   ;;  %v12154_v13 = vld [vmem:[#allocation49_spill] sm:$0xff]  ;;  %v12156_v26 = vld [vmem:[#allocation51_spill] sm:$0xff] }
 0x978   :  { %7441 = vmatpush1.bf16.msra.mxu0 %v11051_v15  ;;  %7484 = vmatpush1.bf16.msra.mxu1 %v9755_v59  ;;  %v9760_v15 = vld [vmem:[#allocation10 + $0x26c] ss:$16 sps:$4 sm:$0xff]  }
 0x979   :  { %7442 = vmatprep.subr.bf16.mxu0 %v11055_v30  ;;  %7485 = vmatprep.subr.bf16.mxu1 %v9756_v23  ;;  %v9761_v30 = vld [vmem:[#allocation10 + $0x268] ss:$16 sps:$4 sm:$0xff]   ;;  %v9797_v59 = vld [vmem:[#allocation13 + $0x110] ss:$8 sps:$4 sm:$0xff]  }
 0x97a   :  { %v12157_v23 = vld [vmem:[#allocation52_spill] sm:$0xff] }
 0x97c   :  { %7443 = vmatpush1.bf16.msra.mxu0 %v11059_v36  ;;  %7486 = vmatpush1.bf16.msra.mxu1 %v9757_v54  ;;  %v9762_v36 = vld [vmem:[#allocation10 + $0x24c] ss:$16 sps:$4 sm:$0xff]   ;;  %v9798_v54 = vld [vmem:[#allocation13 + $0x104] ss:$8 sps:$4 sm:$0xff]  }
 0x97d   :  { %7444 = vmatprep.subr.bf16.mxu0 %v11063_v0  ;;  %7487 = vmatprep.subr.bf16.mxu1 %v9758_v27  ;;  %v9763_v0 = vld [vmem:[#allocation10 + $0x248] ss:$16 sps:$4 sm:$0xff]   ;;  %v12158_v27 = vld [vmem:[#allocation53_spill] sm:$0xff] }
 0x980   :  { %7445 = vmatpush1.bf16.msra.mxu0 %v11067_v37  ;;  %7488 = vmatpush1.bf16.msra.mxu1 %v9759_v9  ;;  %v9764_v37 = vld [vmem:[#allocation10 + $0x22c] ss:$16 sps:$4 sm:$0xff]  }
 0x981   :  { %7446 = vmatprep.subr.bf16.mxu0 %v11071_v38  ;;  %7489 = vmatprep.subr.bf16.mxu1 %v9760_v15  ;;  %v9765_v38 = vld [vmem:[#allocation10 + $0x228] ss:$16 sps:$4 sm:$0xff]   ;;  %v9799_v9 = vld [vmem:[#allocation13 + $0x100] ss:$8 sps:$4 sm:$0xff]  }
 0x982   :  { %v12159_v15 = vld [vmem:[#allocation54_spill] sm:$0xff] }
 0x984   :  { %7447 = vmatpush1.bf16.msra.mxu0 %v11075_v39  ;;  %7490 = vmatpush1.bf16.msra.mxu1 %v9761_v30  ;;  %v9766_v39 = vld [vmem:[#allocation10 + $0x20c] ss:$16 sps:$4 sm:$0xff]   ;;  %v9800_v30 = vld [vmem:[#allocation13 + $0x1f4] ss:$8 sps:$4 sm:$0xff]  }
 0x985   :  { %7448 = vmatprep.subr.bf16.mxu0 %v11079_v40  ;;  %7491 = vmatprep.subr.bf16.mxu1 %v9762_v36  ;;  %v9767_v40 = vld [vmem:[#allocation10 + $0x208] ss:$16 sps:$4 sm:$0xff]   ;;  %v12160_v36 = vld [vmem:[#allocation55_spill] sm:$0xff] }
 0x988   :  { %7449 = vmatpush1.bf16.msra.mxu0 %v11083_v41  ;;  %7492 = vmatpush1.bf16.msra.mxu1 %v9763_v0  ;;  %v9768_v41 = vld [vmem:[#allocation10 + $0x3ec] ss:$16 sps:$4 sm:$0xff]  }
 0x989   :  { %7450 = vmatprep.subr.bf16.mxu0 %v11087_v5  ;;  %7493 = vmatprep.subr.bf16.mxu1 %v9764_v37  ;;  %v9769_v5 = vld [vmem:[#allocation10 + $0x3e8] ss:$16 sps:$4 sm:$0xff]   ;;  %v9801_v0 = vld [vmem:[#allocation13 + $0x1f0] ss:$8 sps:$4 sm:$0xff]  }
 0x98a   :  { %v12161_v37 = vld [vmem:[#allocation56_spill] sm:$0xff] }
 0x98c   :  { %7451 = vmatpush1.bf16.msra.mxu0 %v11091_v7  ;;  %7494 = vmatpush1.bf16.msra.mxu1 %v9765_v38  ;;  %v9770_v7 = vld [vmem:[#allocation10 + $0x3cc] ss:$16 sps:$4 sm:$0xff]   ;;  %v9802_v38 = vld [vmem:[#allocation13 + $0x1e4] ss:$8 sps:$4 sm:$0xff]  }
 0x98d   :  { %7452 = vmatprep.subr.bf16.mxu0 %v11095_v51  ;;  %7495 = vmatprep.subr.bf16.mxu1 %v9766_v39  ;;  %v9771_v51 = vld [vmem:[#allocation10 + $0x3c8] ss:$16 sps:$4 sm:$0xff]   ;;  %v12162_v39 = vld [vmem:[#allocation57_spill] sm:$0xff] }
 0x990   :  { %7453 = vmatpush1.bf16.msra.mxu0 %v11099_v53  ;;  %7496 = vmatpush1.bf16.msra.mxu1 %v9767_v40  ;;  %v9772_v53 = vld [vmem:[#allocation10 + $0x3ac] ss:$16 sps:$4 sm:$0xff]  }
 0x991   :  { %7454 = vmatprep.subr.bf16.mxu0 %v11103_v58  ;;  %7497 = vmatprep.subr.bf16.mxu1 %v9768_v41  ;;  %v9773_v58 = vld [vmem:[#allocation10 + $0x3a8] ss:$16 sps:$4 sm:$0xff]   ;;  %v9803_v40 = vld [vmem:[#allocation13 + $0x1e0] ss:$8 sps:$4 sm:$0xff]  }
 0x992   :  { %v12163_v41 = vld [vmem:[#allocation58_spill] sm:$0xff] }
 0x994   :  { %7455 = vmatpush2.bf16.msra.mxu0 %v11107_v60  ;;  %7498 = vmatpush2.bf16.msra.mxu1 %v9769_v5  ;;  %v9774_v60 = vld [vmem:[#allocation10 + $0x38c] ss:$16 sps:$4 sm:$0xff]   ;;  %v9804_v5 = vld [vmem:[#allocation13 + $0x1d4] ss:$8 sps:$4 sm:$0xff]  }
 0x995   :  { %7456 = vmatprep.subr.bf16.mxu0 %v11111_v1  ;;  %7499 = vmatprep.subr.bf16.mxu1 %v9770_v7  ;;  %v9775_v1 = vld [vmem:[#allocation10 + $0x388] ss:$16 sps:$4 sm:$0xff]   ;;  %v12164_v7 = vld [vmem:[#allocation59_spill] sm:$0xff] }
 0x998   :  { %7457 = vmatpush2.bf16.msra.mxu0 %v11115_v6  ;;  %7500 = vmatpush2.bf16.msra.mxu1 %v9771_v51  ;;  %v9776_v6 = vld [vmem:[#allocation10 + $0x36c] ss:$16 sps:$4 sm:$0xff]  }
 0x999   :  { %7458 = vmatprep.subr.bf16.mxu0 %v11119_v31  ;;  %7501 = vmatprep.subr.bf16.mxu1 %v9772_v53  ;;  %v9777_v31 = vld [vmem:[#allocation10 + $0x368] ss:$16 sps:$4 sm:$0xff]   ;;  %v9805_v51 = vld [vmem:[#allocation13 + $0x1d0] ss:$8 sps:$4 sm:$0xff]  }
 0x99a   :  { %v12165_v53 = vld [vmem:[#allocation60_spill] sm:$0xff] }
 0x99c   :  { %7459 = vmatpush2.bf16.msra.mxu0 %v11123_v8  ;;  %7502 = vmatpush2.bf16.msra.mxu1 %v9773_v58  ;;  %v9778_v8 = vld [vmem:[#allocation10 + $0x34c] ss:$16 sps:$4 sm:$0xff]   ;;  %v9806_v58 = vld [vmem:[#allocation13 + $0x1c4] ss:$8 sps:$4 sm:$0xff]  }
 0x99d   :  { %7460 = vmatprep.subr.bf16.mxu0 %v11127_v44  ;;  %7503 = vmatprep.subr.bf16.mxu1 %v9774_v60  ;;  %v9779_v44 = vld [vmem:[#allocation10 + $0x348] ss:$16 sps:$4 sm:$0xff]   ;;  %v9807_v60 = vld [vmem:[#allocation13 + $0xc0] ss:$8 sps:$4 sm:$0xff]  }
 0x9a0   :  { %7461 = vmatpush2.bf16.msra.mxu0 %v11131_v62  ;;  %7504 = vmatpush2.bf16.msra.mxu1 %v9775_v1  ;;  %v9780_v62 = vld [vmem:[#allocation10 + $0x32c] ss:$16 sps:$4 sm:$0xff]  }
 0x9a1   :  { %7462 = vmatprep.subr.bf16.mxu0 %v11135_v14  ;;  %7505 = vmatprep.subr.bf16.mxu1 %v9776_v6  ;;  %v9781_v14 = vld [vmem:[#allocation10 + $0x328] ss:$16 sps:$4 sm:$0xff]   ;;  %v9808_v1 = vld [vmem:[#allocation13 + $0x1c0] ss:$8 sps:$4 sm:$0xff]  }
 0x9a2   :  { %v9809_v6 = vld [vmem:[#allocation13 + $0xb4] ss:$8 sps:$4 sm:$0xff]  }
 0x9a4   :  { %7463 = vmatpush2.bf16.msra.mxu0 %v11139_v17  ;;  %7506 = vmatpush2.bf16.msra.mxu1 %v9777_v31  ;;  %v9782_v17 = vld [vmem:[#allocation10 + $0x30c] ss:$16 sps:$4 sm:$0xff]   ;;  %v9810_v31 = vld [vmem:[#allocation13 + $0x1b4] ss:$8 sps:$4 sm:$0xff]  }
 0x9a5   :  { %7464 = vmatprep.subr.bf16.mxu0 %v11143_v10  ;;  %7507 = vmatprep.subr.bf16.mxu1 %v9778_v8  ;;  %v9783_v10 = vld [vmem:[#allocation10 + $0x308] ss:$16 sps:$4 sm:$0xff]   ;;  %v9811_v8 = vld [vmem:[#allocation13 + $0xb0] ss:$8 sps:$4 sm:$0xff]  }
 0x9a8   :  { %7465 = vmatpush2.bf16.msra.mxu0 %v11147_v19  ;;  %7508 = vmatpush2.bf16.msra.mxu1 %v9779_v44  ;;  %v9784_v19 = vld [vmem:[#allocation13 + $0x174] ss:$8 sps:$4 sm:$0xff]   ;;  %v9812_v44 = vld [vmem:[#allocation13 + $0x1b0] ss:$8 sps:$4 sm:$0xff]  }
 0x9a9   :  { %7466 = vmatprep.subr.bf16.mxu0 %v11151_v45  ;;  %7509 = vmatprep.subr.bf16.mxu1 %v9780_v62  ;;  %v12144_v45 = vld [vmem:[#allocation32_spill] sm:$0xff] }
 0x9aa   :  { %v9813_v62 = vld [vmem:[#allocation13 + $0xa4] ss:$8 sps:$4 sm:$0xff]  }
 0x9ac   :  { %7467 = vmatpush2.bf16.msra.mxu0 %v11155_v24  ;;  %7510 = vmatpush2.bf16.msra.mxu1 %v9781_v14  ;;  %v9785_v24 = vld [vmem:[#allocation13 + $0x170] ss:$8 sps:$4 sm:$0xff]   ;;  %v9814_v14 = vld [vmem:[#allocation13 + $0x1a4] ss:$8 sps:$4 sm:$0xff]  }
 0x9ad   :  { %7468 = vmatprep.subr.bf16.mxu0 %v11159_v42  ;;  %7511 = vmatprep.subr.bf16.mxu1 %v9782_v17  ;;  %v9786_v42 = vld [vmem:[#allocation13 + $0x164] ss:$8 sps:$4 sm:$0xff]   ;;  %v9815_v17 = vld [vmem:[#allocation13 + $0xa0] ss:$8 sps:$4 sm:$0xff]  }
 0x9b0   :  { %7469 = vmatpush2.bf16.msra.mxu0 %v12142_v25  ;;  %7512 = vmatpush2.bf16.msra.mxu1 %v9783_v10  ;;  %v9816_v25 = vld [vmem:[#allocation13 + $0x1a0] ss:$8 sps:$4 sm:$0xff]   ;;  %v9817_v10 = vld [vmem:[#allocation13 + $0x94] ss:$8 sps:$4 sm:$0xff]  }
 0x9b1   :  { %7536 = vmatprep.subr.bf16.mxu0 %v12143_v55  ;;  %7579 = vmatprep.subr.bf16.mxu1 %v9784_v19  ;;  %v9818_v55 = vld [vmem:[#allocation13 + $0x194] ss:$8 sps:$4 sm:$0xff]   ;;  %v9819_v19 = vld [vmem:[#allocation13 + $0x90] ss:$8 sps:$4 sm:$0xff]  }
 0x9b3   :  { %7471 = vmatmul.mubr.bf16.vlgmr.msra.gmra.mxu0 %v11445_v18  ;;  %7514 = vmatmul.mubr.bf16.vlgmr.msra.gmra.mxu1 %v11447_v46  ;;  %v9795_v18 = vld [vmem:[#allocation13 + $0x120] ss:$8 sps:$4 sm:$0xff]   ;;  %v12155_v46 = vld [vmem:[#allocation50_spill] sm:$0xff] }
 0x9b4   :  { %7537 = vmatpush1.bf16.msra.mxu0 %v12144_v45  ;;  %7580 = vmatpush1.bf16.msra.mxu1 %v9785_v24  ;;  %v9820_v45 = vld [vmem:[#allocation13 + $0x190] ss:$8 sps:$4 sm:$0xff]   ;;  %v9821_v24 = vld [vmem:[#allocation13 + $0x84] ss:$8 sps:$4 sm:$0xff]  }
 0x9b5   :  { %7538 = vmatprep.subr.bf16.mxu0 %v12145_v21  ;;  %7581 = vmatprep.subr.bf16.mxu1 %v9786_v42  ;;  %v9822_v21 = vld [vmem:[#allocation13 + $0x184] ss:$8 sps:$4 sm:$0xff]   ;;  %v9823_v42 = vld [vmem:[#allocation13 + $0x80] ss:$8 sps:$4 sm:$0xff]  }
 0x9b8   :  { %7539 = vmatpush1.bf16.msra.mxu0 %v12146_v28  ;;  %7582 = vmatpush1.bf16.msra.mxu1 %v9787_v2  ;;  %v9824_v28 = vld [vmem:[#allocation13 + $0x180] ss:$8 sps:$4 sm:$0xff]  }
 0x9b9   :  { %7540 = vmatprep.subr.bf16.mxu0 %v12147_v4  ;;  %7583 = vmatprep.subr.bf16.mxu1 %v9788_v3 }
 0x9bc   :  { %7541 = vmatpush1.bf16.msra.mxu0 %v12148_v61  ;;  %7584 = vmatpush1.bf16.msra.mxu1 %v9789_v47 }
 0x9bd   :  { %7542 = vmatprep.subr.bf16.mxu0 %v12149_v34  ;;  %7585 = vmatprep.subr.bf16.mxu1 %v9790_v50 }
 0x9c0   :  { %7543 = vmatpush1.bf16.msra.mxu0 %v12150_v12  ;;  %7586 = vmatpush1.bf16.msra.mxu1 %v9791_v48 }
 0x9c1   :  { %7544 = vmatprep.subr.bf16.mxu0 %v12151_v43  ;;  %7587 = vmatprep.subr.bf16.mxu1 %v9792_v35 }
 0x9c4   :  { %7545 = vmatpush1.bf16.msra.mxu0 %v12152_v20  ;;  %7588 = vmatpush1.bf16.msra.mxu1 %v9793_v49 }
 0x9c5   :  { %7546 = vmatprep.subr.bf16.mxu0 %v12153_v22  ;;  %7589 = vmatprep.subr.bf16.mxu1 %v9794_v57 }
 0x9c8   :  { %7547 = vmatpush1.bf16.msra.mxu0 %v12154_v13  ;;  %7590 = vmatpush1.bf16.msra.mxu1 %v9795_v18 }
 0x9c9   :  { %7548 = vmatprep.subr.bf16.mxu0 %v12155_v46  ;;  %7591 = vmatprep.subr.bf16.mxu1 %v9796_v11 }
 0x9cc   :  { %7549 = vmatpush1.bf16.msra.mxu0 %v12156_v26  ;;  %7592 = vmatpush1.bf16.msra.mxu1 %v9797_v59 }
 0x9cd   :  { %7550 = vmatprep.subr.bf16.mxu0 %v12157_v23  ;;  %7593 = vmatprep.subr.bf16.mxu1 %v9798_v54 }
 0x9d0   :  { %7551 = vmatpush1.bf16.msra.mxu0 %v12158_v27  ;;  %7594 = vmatpush1.bf16.msra.mxu1 %v9799_v9 }
 0x9d1   :  { %7552 = vmatprep.subr.bf16.mxu0 %v12159_v15  ;;  %7595 = vmatprep.subr.bf16.mxu1 %v9800_v30 }
 0x9d4   :  { %7553 = vmatpush2.bf16.msra.mxu0 %v12160_v36  ;;  %7596 = vmatpush2.bf16.msra.mxu1 %v9801_v0 }
 0x9d5   :  { %7554 = vmatprep.subr.bf16.mxu0 %v12161_v37  ;;  %7597 = vmatprep.subr.bf16.mxu1 %v9802_v38 }
 0x9d8   :  { %7555 = vmatpush2.bf16.msra.mxu0 %v12162_v39  ;;  %7598 = vmatpush2.bf16.msra.mxu1 %v9803_v40 }
 0x9d9   :  { %7556 = vmatprep.subr.bf16.mxu0 %v12163_v41  ;;  %7599 = vmatprep.subr.bf16.mxu1 %v9804_v5 }
 0x9dc   :  { %7557 = vmatpush2.bf16.msra.mxu0 %v12164_v7  ;;  %7600 = vmatpush2.bf16.msra.mxu1 %v9805_v51 }
 0x9dd   :  { %7558 = vmatprep.subr.bf16.mxu0 %v12165_v53  ;;  %7601 = vmatprep.subr.bf16.mxu1 %v9806_v58 }
 0x9e0   :  { %7559 = vmatpush2.bf16.msra.mxu0 %v9807_v60  ;;  %7602 = vmatpush2.bf16.msra.mxu1 %v9808_v1 }
 0x9e1   :  { %7560 = vmatprep.subr.bf16.mxu0 %v9809_v6  ;;  %7603 = vmatprep.subr.bf16.mxu1 %v9810_v31  ;;  %v9576_v31 = vld [vmem:[#allocation16 + $0x70] ss:$8 sps:$4 sm:$0xff]  }
 0x9e4   :  { %7561 = vmatpush2.bf16.msra.mxu0 %v9811_v8  ;;  %7604 = vmatpush2.bf16.msra.mxu1 %v9812_v44  ;;  %v9578_v8 = vld [vmem:[#allocation16 + $0x74] ss:$8 sps:$4 sm:$0xff]   ;;  %v9581_v44 = vld [vmem:[#allocation16 + $0x64] ss:$8 sps:$4 sm:$0xff]  }
 0x9e5   :  { %7562 = vmatprep.subr.bf16.mxu0 %v9813_v62  ;;  %7605 = vmatprep.subr.bf16.mxu1 %v9814_v14  ;;  %v9584_v62 = vld [vmem:[#allocation16 + $0x54] ss:$8 sps:$4 sm:$0xff]   ;;  %v9587_v14 = vld [vmem:[#allocation16 + $0x44] ss:$8 sps:$4 sm:$0xff]  }
 0x9e8   :  { %7563 = vmatpush2.bf16.msra.mxu0 %v9815_v17  ;;  %7606 = vmatpush2.bf16.msra.mxu1 %v9816_v25  ;;  %v9585_v17 = vld [vmem:[#allocation16 + $0x40] ss:$8 sps:$4 sm:$0xff]   ;;  %v9590_v25 = vld [vmem:[#allocation16 + $0x34] ss:$8 sps:$4 sm:$0xff]  }
 0x9e9   :  { %7564 = vmatprep.subr.bf16.mxu0 %v9817_v10  ;;  %7607 = vmatprep.subr.bf16.mxu1 %v9818_v55  ;;  %v9588_v10 = vld [vmem:[#allocation16 + $0x30] ss:$8 sps:$4 sm:$0xff]   ;;  %v9593_v55 = vld [vmem:[#allocation16 + $0x24] ss:$8 sps:$4 sm:$0xff]  }
 0x9ec   :  { %7565 = vmatpush2.bf16.msra.mxu0 %v9819_v19  ;;  %7608 = vmatpush2.bf16.msra.mxu1 %v9820_v45  ;;  %v9591_v19 = vld [vmem:[#allocation16 + $0x20] ss:$8 sps:$4 sm:$0xff]   ;;  %v9596_v45 = vld [vmem:[#allocation16 + $0x14] ss:$8 sps:$4 sm:$0xff]  }
 0x9ed   :  { %7566 = vmatprep.subr.bf16.mxu0 %v9821_v24  ;;  %7609 = vmatprep.subr.bf16.mxu1 %v9822_v21  ;;  %v9594_v24 = vld [vmem:[#allocation16 + $0x10] ss:$8 sps:$4 sm:$0xff]   ;;  %v9599_v21 = vld [vmem:[#allocation16 + $0x4] ss:$8 sps:$4 sm:$0xff]  }
 0x9f0   :  { %7567 = vmatpush2.bf16.msra.mxu0 %v9823_v42  ;;  %7610 = vmatpush2.bf16.msra.mxu1 %v9824_v28  ;;  %v9597_v42 = vld [vmem:[#allocation16] ss:$8 sps:$4 sm:$0xff]   ;;  %v9602_v28 = vld [vmem:[#allocation16 + $0xf4] ss:$8 sps:$4 sm:$0xff]  }
 0x9f1   :  { %7792 = vmatprep.subr.bf16.mxu0 %v9578_v8 }
 0xa33   :  { %v7386_v2 = vpop.f32.mrf.mxu0  ;;  %v7429_v4 = vpop.f32.mrf.mxu1 }
 0xa34   :  { %v7387_v34 = vadd.f32 %v7386_v2, %v10601_v32  ;;  %v9600_v2 = vld [vmem:[#allocation16 + $0xf0] ss:$8 sps:$4 sm:$0xff]  }
 0xa35   :  { %v7388_v3 = vpop.f32.mrf.mxu0  ;;  %v7431_v61 = vpop.f32.mrf.mxu1 }
 0xa36   :  { %v7389_v47 = vadd.f32 %v7388_v3, %v10598_v63  ;;  %v7430_v22 = vadd.f32 %v7429_v4, %v7387_v34  ;;  %v9605_v4 = vld [vmem:[#allocation16 + $0xe4] ss:$8 sps:$4 sm:$0xff]   ;;  %v9603_v3 = vld [vmem:[#allocation16 + $0xe0] ss:$8 sps:$4 sm:$0xff]  }
 0xa37   :  { %v7390_v50 = vpop.f32.mrf.mxu0  ;;  %v7433_v12 = vpop.f32.mrf.mxu1  ;;  %v9611_v34 = vld [vmem:[#allocation16 + $0xc4] ss:$8 sps:$4 sm:$0xff]  }
 0xa38   :  { %v7391_v48 = vadd.f32 %v7390_v50, %v10601_v32  ;;  %v7432_v35 = vadd.f32 %v7431_v61, %v7389_v47  ;;  %v7524_v26 = vmax.f32 %v7430_v22, 0.0  ;;  %v9608_v61 = vld [vmem:[#allocation16 + $0xd4] ss:$8 sps:$4 sm:$0xff]   ;;  %v9606_v47 = vld [vmem:[#allocation16 + $0xd0] ss:$8 sps:$4 sm:$0xff]  }
 0xa39   :  { %v7392_v43 = vpop.f32.mrf.mxu0  ;;  %v7435_v57 = vpop.f32.mrf.mxu1  ;;  %v9609_v50 = vld [vmem:[#allocation16 + $0xc0] ss:$8 sps:$4 sm:$0xff]   ;;  %v9623_v22 = vld [vmem:[#allocation16 + $0x84] ss:$8 sps:$4 sm:$0xff]  }
 0xa3a   :  { %v7434_v20 = vadd.f32 %v7433_v12, %v7391_v48  ;;  %v7393_v49 = vadd.f32 %v7392_v43, %v10598_v63  ;;  %v7525_v46 = vmax.f32 %v7432_v35, 0.0  ;;  %v9614_v12 = vld [vmem:[#allocation16 + $0xb4] ss:$8 sps:$4 sm:$0xff]   ;;  %v9612_v48 = vld [vmem:[#allocation16 + $0xb0] ss:$8 sps:$4 sm:$0xff]  }
 0xa3b   :  { %v9617_v43 = vld [vmem:[#allocation16 + $0xa4] ss:$8 sps:$4 sm:$0xff]   ;;  %v9615_v35 = vld [vmem:[#allocation16 + $0xa0] ss:$8 sps:$4 sm:$0xff]  }
 0xa3c   :  { %v7436_v13 = vadd.f32 %v7435_v57, %v7393_v49  ;;  %v7528_v18 = vmax.f32 %v7434_v20, 0.0  ;;  %v9620_v20 = vld [vmem:[#allocation16 + $0x94] ss:$8 sps:$4 sm:$0xff]   ;;  %v9618_v49 = vld [vmem:[#allocation16 + $0x90] ss:$8 sps:$4 sm:$0xff]  }
 0xa3d   :  { %v9621_v57 = vld [vmem:[#allocation16 + $0x80] ss:$8 sps:$4 sm:$0xff]  }
 0xa3e   :  { %v7529_v11 = vmax.f32 %v7436_v13, 0.0  ;;  %v7532_v23 = vpack.c.bf16 %v7528_v18, %v7524_v26 }
 0xa40   :  { %v7533_v59 = vpack.c.bf16 %v7529_v11, %v7525_v46 }
 0xa42   :  { %7568 = vmatprep.mubr.bf16.mxu0 %v7533_v59 }
 0xa43   :  { %7569 = vmatmul.mubr.bf16.vlgmr.msra.gmra.mxu0 %v7532_v23 }
 0xa44   :  { %7793 = vmatpush1.bf16.msra.mxu0 %v9576_v31 }
 0xa45   :  { %7794 = vmatprep.subr.bf16.mxu0 %v9581_v44 }
 0xa73   :  { %v7472_v54 = vpop.f32.mrf.mxu0  ;;  %v7515_v27 = vpop.f32.mrf.mxu1 }
 0xa74   :  { %v7473_v30 = vadd.f32 %v7472_v54, %v12026_v33 }
 0xa75   :  { %v7474_v9 = vpop.f32.mrf.mxu0  ;;  %v7517_v32 = vpop.f32.mrf.mxu1 }
 0xa76   :  { %v7475_v15 = vadd.f32 %v7474_v9, %v12025_v29  ;;  %v7516_v41 = vadd.f32 %v7515_v27, %v7473_v30 }
 0xa77   :  { %v7476_v63 = vpop.f32.mrf.mxu0  ;;  %v7519_v36 = vpop.f32.mrf.mxu1 }
 0xa78   :  { %v7477_v0 = vadd.f32 %v7476_v63, %v12026_v33  ;;  %v7518_v38 = vadd.f32 %v7517_v32, %v7475_v15  ;;  %v7526_v60 = vmax.f32 %v7516_v41, 0.0  ;;  %v9579_v33 = vld [vmem:[#allocation16 + $0x60] ss:$8 sps:$4 sm:$0xff]  }
 0xa79   :  { %v7478_v37 = vpop.f32.mrf.mxu0  ;;  %v7521_v5 = vpop.f32.mrf.mxu1  ;;  %7795 = vmatpush1.bf16.msra.mxu0 %v9579_v33 }
 0xa7a   :  { %v7520_v39 = vadd.f32 %v7519_v36, %v7477_v0  ;;  %v7479_v40 = vadd.f32 %v7478_v37, %v12025_v29  ;;  %v7527_v53 = vmax.f32 %v7518_v38, 0.0  ;;  %v9582_v29 = vld [vmem:[#allocation16 + $0x50] ss:$8 sps:$4 sm:$0xff]   ;;  %7796 = vmatprep.subr.bf16.mxu0 %v9584_v62 }
 0xa7c   :  { %v7522_v7 = vadd.f32 %v7521_v5, %v7479_v40  ;;  %v7530_v51 = vmax.f32 %v7520_v39, 0.0  ;;  %v12166_v5 = vld [vmem:[#allocation61_spill] sm:$0xff] }
 0xa7d   :  { %7797 = vmatpush1.bf16.msra.mxu0 %v9582_v29 }
 0xa7e   :  { %v7531_v58 = vmax.f32 %v7522_v7, 0.0  ;;  %v7534_v6 = vpack.c.bf16 %v7530_v51, %v7526_v60  ;;  %7798 = vmatprep.subr.bf16.mxu0 %v9587_v14  ;;  %v12167_v51 = vld [vmem:[#allocation62_spill] sm:$0xff] }
 0xa80   :  { %v7535_v1 = vpack.c.bf16 %v7531_v58, %v7527_v53  ;;  %v12168_v58 = vld [vmem:[#allocation63_spill] sm:$0xff] }
 0xa81   :  { %7799 = vmatpush1.bf16.msra.mxu0 %v9585_v17 }
 0xa82   :  { %7611 = vmatprep.mubr.bf16.mxu1 %v7535_v1  ;;  %7800 = vmatprep.subr.bf16.mxu0 %v9590_v25 }
 0xa83   :  { %7612 = vmatmul.mubr.bf16.vlgmr.msra.gmra.mxu1 %v7534_v6 }
 0xa85   :  { %7801 = vmatpush1.bf16.msra.mxu0 %v9588_v10 }
 0xa86   :  { %7802 = vmatprep.subr.bf16.mxu0 %v9593_v55 }
 0xa89   :  { %7803 = vmatpush1.bf16.msra.mxu0 %v9591_v19 }
 0xa8a   :  { %7804 = vmatprep.subr.bf16.mxu0 %v9596_v45 }
 0xa8d   :  { %7805 = vmatpush1.bf16.msra.mxu0 %v9594_v24 }
 0xa8e   :  { %7806 = vmatprep.subr.bf16.mxu0 %v9599_v21 }
 0xa91   :  { %7807 = vmatpush1.bf16.msra.mxu0 %v9597_v42 }
 0xa92   :  { %7808 = vmatprep.subr.bf16.mxu0 %v9602_v28 }
 0xa95   :  { %7809 = vmatpush2.bf16.msra.mxu0 %v9600_v2 }
 0xa96   :  { %7810 = vmatprep.subr.bf16.mxu0 %v9605_v4 }
 0xa99   :  { %7811 = vmatpush2.bf16.msra.mxu0 %v9603_v3 }
 0xa9a   :  { %7812 = vmatprep.subr.bf16.mxu0 %v9608_v61 }
 0xa9d   :  { %7813 = vmatpush2.bf16.msra.mxu0 %v9606_v47 }
 0xa9e   :  { %7814 = vmatprep.subr.bf16.mxu0 %v9611_v34 }
 0xaa1   :  { %7815 = vmatpush2.bf16.msra.mxu0 %v9609_v50 }
 0xaa2   :  { %7816 = vmatprep.subr.bf16.mxu0 %v9614_v12 }
 0xaa5   :  { %7817 = vmatpush2.bf16.msra.mxu0 %v9612_v48 }
 0xaa6   :  { %7818 = vmatprep.subr.bf16.mxu0 %v9617_v43 }
 0xaa9   :  { %7819 = vmatpush2.bf16.msra.mxu0 %v9615_v35 }
 0xaaa   :  { %7820 = vmatprep.subr.bf16.mxu0 %v9620_v20 }
 0xaad   :  { %7821 = vmatpush2.bf16.msra.mxu0 %v9618_v49 }
 0xaae   :  { %7822 = vmatprep.subr.bf16.mxu0 %v9623_v22 }
 0xab1   :  { %7823 = vmatpush2.bf16.msra.mxu0 %v9621_v57 }
 0xb03   :  { %v7570_v13 = vpop.f32.mrf.mxu0 }
 0xb04   :  { %v7571_v59 = vadd.f32 %v7570_v13, %v12066_v52 }
 0xb05   :  { %v7572_v18 = vpop.f32.mrf.mxu0 }
 0xb06   :  { %v7573_v26 = vadd.f32 %v7572_v18, %v12065_v16 }
 0xb07   :  { %v7574_v46 = vpop.f32.mrf.mxu0 }
 0xb08   :  { %v7575_v27 = vadd.f32 %v7574_v46, %v12066_v52 }
 0xb09   :  { %v7576_v23 = vpop.f32.mrf.mxu0 }
 0xb0a   :  { %v7577_v30 = vadd.f32 %v7576_v23, %v12065_v16 }
 0xb43   :  { %v7613_v11 = vpop.f32.mrf.mxu1 }
 0xb44   :  { %v7614_v32 = vadd.f32 %v7613_v11, %v7571_v59 }
 0xb45   :  { %v7615_v54 = vpop.f32.mrf.mxu1 }
 0xb46   :  { %v7616_v9 = vadd.f32 %v7615_v54, %v7573_v26  ;;  %v7622_v39 = vmul.f32 0.1, %v7614_v32 }
 0xb47   :  { %v7617_v15 = vpop.f32.mrf.mxu1 }
 0xb48   :  { %v7618_v63 = vadd.f32 %v7617_v15, %v7575_v27  ;;  %v7623_v0 = vmul.f32 0.1, %v7616_v9  ;;  %v7626_v52 = vadd.f32 %v7622_v39, %v12168_v58 }
 0xb49   :  { %v7619_v36 = vpop.f32.mrf.mxu1 }
 0xb4a   :  { %v7624_v37 = vmul.f32 0.1, %v7618_v63  ;;  %v7620_v38 = vadd.f32 %v7619_v36, %v7577_v30  ;;  %v7627_v7 = vadd.f32 %v7623_v0, %v12166_v5 }
 0xb4c   :  { %v7625_v40 = vmul.f32 0.1, %v7620_v38  ;;  %v7628_v41 = vadd.f32 %v7624_v37, %v11358_v56 }
 0xb4e   :  { %v7629_v53 = vadd.f32 %v7625_v40, %v12167_v51  ;;  %v7630_v1 = vpack.c.bf16 %v7628_v41, %v7626_v52 }
 0xb50   :  { %v7631_v60 = vpack.c.bf16 %v7629_v53, %v7627_v7 }
 0xb52   :  { %7824 = vmatprep.mubr.bf16.mxu0 %v7631_v60 }
 0xb53   :  { %7825 = vmatmul.mubr.bf16.vlgmr.msra.gmra.mxu0 %v7630_v1 }
 0xc13   :  { %v7826_v16 = vpop.f32.mrf.mxu0 }
 0xc14   :  { %7835 = vst [vmem:[%s11546_s11] sm:$0xff] %v7826_v16 }
 0xc15   :  { %v7828_v6 = vpop.f32.mrf.mxu0 }
 0xc16   :  { %7836 = vst [vmem:[%s11546_s11 + $0x8] sm:$0xff] %v7828_v6 }
 0xc17   :  { %v7830_v56 = vpop.f32.mrf.mxu0 }
 0xc18   :  { %7837 = vst [vmem:[%s11546_s11 + $0x10] sm:$0xff] %v7830_v56 }
 0xc19   :  { %v7832_v31 = vpop.f32.mrf.mxu0 }
 0xc1a   :  { %7838 = vst [vmem:[%s11546_s11 + $0x18] sm:$0xff] %v7832_v31 }
 0xc1b   :  { %7843 = vsyncpa [#allocation3], 1 }
 0xc1c   :  { %7844 = vsyncpa [#allocation5], 1 }
 0xc1d   :  { %7845 = vsyncpa [#allocation8], 1 }
 0xc1e   :  { %7846 = vsyncpa [#allocation11], 1 }
 0xc1f   :  { %7847 = vsyncpa [#allocation14], 1 }
 0xc20   :  { %7848 = vsyncpa [#allocation17], 1 }

</bundles_post_ra>
